<compile_context>
chip_gen: v5e
topology: v5e:2x2
jax: 0.10.0
libtpu: 0.0.40
codegen_flags: <defaults>
</compile_context>

<pallas_src>
import jax
import jax.numpy as jnp
from jax.experimental import pallas as pl
from jax.experimental.pallas import tpu as pltpu

_K = 5

# Per conv stage: (Wi, Cin, Ho, Wo, Cout, Hp, Wp, out_row_pitch)
#   input is a flat (Hi*Wi, Cin) VMEM buffer (row index = h*Wi + w),
#   conv output is stored with row pitch = round_up(Wo, 8) so dynamic stores
#   start on 8-aligned sublanes; pooled output is stored densely (pitch = Wp).
_STAGES = (
    (50, 1,  46, 46, 32, 23, 23, 48),   # conv1: (50,50,1)  -> (46,46,32) -> pool (23,23,32)
    (23, 32, 19, 19, 64,  9,  9, 24),   # conv2: (23,23,32) -> (19,19,64) -> pool (9,9,64)
    (9,  64,  5,  5, 128, 2,  2,  8),   # conv3: (9,9,64)   -> (5,5,128)  -> pool (2,2,128)
)


# ----------------------------- in-kernel helpers ----------------------------


def _conv5x5_relu(in_ref, w_ref, b_ref, out_ref, *, Wi, Cin, Ho, Wo, Cout, pitch):
    """Valid 5x5 conv + bias + ReLU, shift-and-accumulate over the 25 taps.

    in_ref : (Hi*Wi, Cin) flat activation (row = h*Wi + w), VMEM.
    w_ref  : (25*Cin, Cout) weight, rows ordered (kh, kw, cin).
    out_ref: (Ho*pitch, Cout) flat conv output (row = ho*pitch + wo), VMEM.
    """
    bias = b_ref[...]                                        # (1, Cout)

    def row(ho, carry):
        acc = jnp.zeros((Wo, Cout), jnp.float32)
        for kh in range(_K):
            base = (ho + kh) * Wi
            for kw in range(_K):
                x_s = in_ref[pl.ds(base + kw, Wo), :]                  # (Wo, Cin)
                w_s = w_ref[pl.ds((kh * _K + kw) * Cin, Cin), :]       # (Cin, Cout)
                if Cin == 1:
                    acc = acc + x_s * w_s                              # outer product (VPU)
                else:
                    acc = acc + jnp.dot(x_s, w_s,
                                        preferred_element_type=jnp.float32)
        dst = pl.multiple_of(ho * pitch, 8)                  # 8-aligned sublane store
        out_ref[pl.ds(dst, Wo), :] = jnp.maximum(acc + bias, 0.0)
        return carry

    jax.lax.fori_loop(0, Ho, row, 0)


def _maxpool2x2(in_ref, out_ref, *, Hp, Wp, pitch):
    """Floor-mode 2x2/2 max pool from flat conv scratch to flat pooled scratch."""
    for hp in range(Hp):                      # small, unrolled -> static strided loads
        r0 = (2 * hp) * pitch
        r1 = r0 + pitch
        a = in_ref[pl.ds(r0,     Wp, stride=2), :]
        b = in_ref[pl.ds(r0 + 1, Wp, stride=2), :]
        c = in_ref[pl.ds(r1,     Wp, stride=2), :]
        d = in_ref[pl.ds(r1 + 1, Wp, stride=2), :]
        out_ref[pl.ds(hp * Wp, Wp), :] = jnp.maximum(jnp.maximum(a, b),
                                                     jnp.maximum(c, d))


# --------------------------------- kernel -----------------------------------


def _fused_cnn_kernel(x_ref, w1_ref, b1_ref, w2_ref, b2_ref, w3_ref, b3_ref,
                      fw1_ref, fb1_ref, fw2_ref, fb2_ref,
                      out_ref,
                      a1_ref, p1_ref, a2_ref, p2_ref, a3_ref, p3_ref):
    conv_in  = (x_ref, p1_ref, p2_ref)
    conv_w   = (w1_ref, w2_ref, w3_ref)
    conv_b   = (b1_ref, b2_ref, b3_ref)
    conv_out = (a1_ref, a2_ref, a3_ref)
    pool_out = (p1_ref, p2_ref, p3_ref)

    for si, (Wi, Cin, Ho, Wo, Cout, Hp, Wp, pitch) in enumerate(_STAGES):
        _conv5x5_relu(conv_in[si], conv_w[si], conv_b[si], conv_out[si],
                      Wi=Wi, Cin=Cin, Ho=Ho, Wo=Wo, Cout=Cout, pitch=pitch)
        _maxpool2x2(conv_out[si], pool_out[si], Hp=Hp, Wp=Wp, pitch=pitch)

    # ---- MLP head: p3 is (4, 128) with row = h*2 + w, lane = channel ----
    h = fb1_ref[...].astype(jnp.float32)                     # (1, 512)
    for s in range(4):                                       # 512 = 4 spatial x 128 ch
        h = h + jnp.dot(p3_ref[pl.ds(s, 1), :],              # (1, 128)
                        fw1_ref[pl.ds(s * 128, 128), :],     # (128, 512)
                        preferred_element_type=jnp.float32)
    h = jnp.maximum(h, 0.0)
    logits = jnp.dot(h, fw2_ref[...],
                     preferred_element_type=jnp.float32) + fb2_ref[...]
    m = jnp.max(logits, axis=-1, keepdims=True)
    e = jnp.exp(logits - m)
    out_ref[...] = (e / jnp.sum(e, axis=-1, keepdims=True)).astype(out_ref.dtype)


# ------------------------------ host-side wrapper ----------------------------


def _compiler_params():
    cls = getattr(pltpu, "CompilerParams", None) or getattr(pltpu, "TPUCompilerParams", None)
    if cls is None:
        return None
    return cls(dimension_semantics=("parallel",),          # megacore: split batch
               vmem_limit_bytes=32 * 1024 * 1024)           # ~10 MB used, headroom


@jax.jit
def forward(x_nchw, params):
    """x_nchw: (B, 1, 50, 50) f32 -> softmax probs (B, 2)."""
    B = x_nchw.shape[0]
    x_flat = x_nchw.astype(jnp.float32).reshape(B, 50 * 50, 1)   # flat (h*50+w, cin)

    const = lambda b: (0, 0)    # weights: same block every step -> DMA'd once, VMEM-resident
    in_specs = [
        pl.BlockSpec((None, 50 * 50, 1), lambda b: (b, 0, 0)),   # per-image input
        pl.BlockSpec((25 * 1, 32), const),     # conv1 W, rows (kh,kw,cin)
        pl.BlockSpec((1, 32), const),
        pl.BlockSpec((25 * 32, 64), const),    # conv2 W
        pl.BlockSpec((1, 64), const),
        pl.BlockSpec((25 * 64, 128), const),   # conv3 W
        pl.BlockSpec((1, 128), const),
        pl.BlockSpec((512, 512), const),       # fc1 W, rows ordered (spatial, channel)
        pl.BlockSpec((1, 512), const),
        pl.BlockSpec((512, 2), const),         # fc2 W
        pl.BlockSpec((1, 2), const),
    ]
    out_specs = pl.BlockSpec((None, 1, 2), lambda b: (b, 0, 0))
    scratch_shapes = [
        pltpu.VMEM((46 * 48, 32), jnp.float32),   # conv1 out (row pitch 48)
        pltpu.VMEM((23 * 23, 32), jnp.float32),   # pool1 out
        pltpu.VMEM((19 * 24, 64), jnp.float32),   # conv2 out (row pitch 24)
        pltpu.VMEM((9 * 9, 64), jnp.float32),     # pool2 out
        pltpu.VMEM((5 * 8, 128), jnp.float32),    # conv3 out (row pitch 8)
        pltpu.VMEM((2 * 2, 128), jnp.float32),    # pool3 out = flattened features
    ]

    out = pl.pallas_call(
        _fused_cnn_kernel,
        out_shape=jax.ShapeDtypeStruct((B, 1, 2), jnp.float32),
        grid=(B,),
        in_specs=in_specs,
        out_specs=out_specs,
        scratch_shapes=scratch_shapes,
        compiler_params=_compiler_params(),
    )(x_flat, params["w1m"], params["b1"], params["w2m"], params["b2"],
      params["w3m"], params["b3"], params["fw1"], params["fb1"],
      params["fw2"], params["fb2"])
    return out.reshape(B, 2)


# -------------------------- parameters & reference ---------------------------


def init_torch_params(key):
    """Synthetic weights in the original PyTorch layouts / init scale."""
    def uni(k, shape, fan_in):
        bound = 1.0 / float(fan_in) ** 0.5
        return jax.random.uniform(k, shape, jnp.float32, -bound, bound)

    ks = jax.random.split(key, 10)
    return dict(
        conv1_w=uni(ks[0], (32, 1, 5, 5), 25),        conv1_b=uni(ks[1], (32,), 25),
        conv2_w=uni(ks[2], (64, 32, 5, 5), 32 * 25),  conv2_b=uni(ks[3], (64,), 32 * 25),
        conv3_w=uni(ks[4], (128, 64, 5, 5), 64 * 25), conv3_b=uni(ks[5], (128,), 64 * 25),
        fc1_w=uni(ks[6], (512, 512), 512),            fc1_b=uni(ks[7], (512,), 512),
        fc2_w=uni(ks[8], (2, 512), 512),              fc2_b=uni(ks[9], (2,), 512),
    )


def pack_params(tp):
    """Convert PyTorch-layout weights to the kernel's layouts."""
    def conv_mat(w):  # (Cout, Cin, kh, kw) -> (25*Cin, Cout), rows (kh, kw, cin)
        cout, cin, kh, kw = w.shape
        return jnp.transpose(w, (2, 3, 1, 0)).reshape(kh * kw * cin, cout)

    # fc1 consumes PyTorch (c, h, w)-ordered features; our kernel flattens as
    # (spatial s = h*2+w, channel c).  Permute fc1's rows accordingly.
    fw1 = tp["fc1_w"].T                         # (512_in, 512_out), row f = c*4 + s
    fw1 = fw1.reshape(128, 4, 512)              # (c, s, out)
    fw1 = jnp.transpose(fw1, (1, 0, 2)).reshape(512, 512)   # row = s*128 + c

    return dict(
        w1m=conv_mat(tp["conv1_w"]), b1=tp["conv1_b"].reshape(1, 32),
        w2m=conv_mat(tp["conv2_w"]), b2=tp["conv2_b"].reshape(1, 64),
        w3m=conv_mat(tp["conv3_w"]), b3=tp["conv3_b"].reshape(1, 128),
        fw1=fw1, fb1=tp["fc1_b"].reshape(1, 512),
        fw2=tp["fc2_w"].T, fb2=tp["fc2_b"].reshape(1, 2),
    )


def forward_reference(x_nchw, tp):
    """Pure-JAX/XLA reference of the original PyTorch module (for validation)."""
    hi = jax.lax.Precision.HIGHEST

    def conv_relu(x, w, b):
        y = jax.lax.conv_general_dilated(
            x, w, window_strides=(1, 1), padding="VALID",
            dimension_numbers=("NCHW", "OIHW", "NCHW"), precision=hi)
        return jnp.maximum(y + b[None, :, None, None], 0.0)

    def pool(x):
        return jax.lax.reduce_window(x, -jnp.inf, jax.lax.max,
                                     (1, 1, 2, 2), (1, 1, 2, 2), "VALID")

    x = pool(conv_relu(x_nchw, tp["conv1_w"], tp["conv1_b"]))
    x = pool(conv_relu(x, tp["conv2_w"], tp["conv2_b"]))
    x = pool(conv_relu(x, tp["conv3_w"], tp["conv3_b"]))
    x = x.reshape(x.shape[0], -1)                                     # (c, h, w) order
    h = jnp.maximum(jnp.dot(x, tp["fc1_w"].T, precision=hi) + tp["fc1_b"], 0.0)
    logits = jnp.dot(h, tp["fc2_w"].T, precision=hi) + tp["fc2_b"]
    return jax.nn.softmax(logits, axis=1)


# ----------------------------------- main ------------------------------------


if __name__ == "__main__":
    key = jax.random.PRNGKey(0)
    k_params, k_x = jax.random.split(key)
    torch_params = init_torch_params(k_params)
    params = pack_params(torch_params)

    # fc1 expects 512 = 128 * 2 * 2 features, which pins the input to (B, 1, 50, 50).
    x = jax.random.normal(k_x, (2, 1, 50, 50), dtype=jnp.float32)

    out = jax.block_until_ready(forward(x, params))

    assert out.shape == (2, 2), out.shape
    assert bool(jnp.all(jnp.isfinite(out)))
    assert bool(jnp.all(jnp.abs(jnp.sum(out, axis=1) - 1.0) < 1e-5))

    ref = jax.block_until_ready(forward_reference(x, torch_params))
    assert bool(jnp.allclose(out, ref, atol=5e-3)), (out, ref)

    print("KERNEL_OK")
</pallas_src>

<mosaic_0001>
module attributes {stable_mosaic.version = 11 : i64} {
  func.func @_fused_cnn_kernel(%arg0: i32, %arg1: memref<1x2500x1xf32, #tpu.memory_space<vmem>>, %arg2: memref<25x32xf32, #tpu.memory_space<vmem>>, %arg3: memref<1x32xf32, #tpu.memory_space<vmem>>, %arg4: memref<800x64xf32, #tpu.memory_space<vmem>>, %arg5: memref<1x64xf32, #tpu.memory_space<vmem>>, %arg6: memref<1600x128xf32, #tpu.memory_space<vmem>>, %arg7: memref<1x128xf32, #tpu.memory_space<vmem>>, %arg8: memref<512x512xf32, #tpu.memory_space<vmem>>, %arg9: memref<1x512xf32, #tpu.memory_space<vmem>>, %arg10: memref<512x2xf32, #tpu.memory_space<vmem>>, %arg11: memref<1x2xf32, #tpu.memory_space<vmem>>, %arg12: memref<1x1x2xf32, #tpu.memory_space<vmem>>, %arg13: memref<2208x32xf32, #tpu.memory_space<vmem>>, %arg14: memref<529x32xf32, #tpu.memory_space<vmem>>, %arg15: memref<456x64xf32, #tpu.memory_space<vmem>>, %arg16: memref<81x64xf32, #tpu.memory_space<vmem>>, %arg17: memref<40x128xf32, #tpu.memory_space<vmem>>, %arg18: memref<4x128xf32, #tpu.memory_space<vmem>>) attributes {dimension_semantics = [#tpu.dimension_semantics<parallel>], iteration_bounds = array<i64: 2>, scalar_prefetch = 0 : i64, scratch_operands = 6 : i64, tpu.core_type = #tpu.core_type<tc>, window_params = [{transform_indices = @transform_0, window_bounds = array<i64: 1, 2500, 1>}, {pipeline_mode = #tpu.pipeline_mode<synchronous>, transform_indices = @transform_1, window_bounds = array<i64: 25, 32>}, {pipeline_mode = #tpu.pipeline_mode<synchronous>, transform_indices = @transform_2, window_bounds = array<i64: 1, 32>}, {pipeline_mode = #tpu.pipeline_mode<synchronous>, transform_indices = @transform_3, window_bounds = array<i64: 800, 64>}, {pipeline_mode = #tpu.pipeline_mode<synchronous>, transform_indices = @transform_4, window_bounds = array<i64: 1, 64>}, {pipeline_mode = #tpu.pipeline_mode<synchronous>, transform_indices = @transform_5, window_bounds = array<i64: 1600, 128>}, {pipeline_mode = #tpu.pipeline_mode<synchronous>, transform_indices = @transform_6, window_bounds = array<i64: 1, 128>}, {pipeline_mode = #tpu.pipeline_mode<synchronous>, transform_indices = @transform_7, window_bounds = array<i64: 512, 512>}, {pipeline_mode = #tpu.pipeline_mode<synchronous>, transform_indices = @transform_8, window_bounds = array<i64: 1, 512>}, {pipeline_mode = #tpu.pipeline_mode<synchronous>, transform_indices = @transform_9, window_bounds = array<i64: 512, 2>}, {pipeline_mode = #tpu.pipeline_mode<synchronous>, transform_indices = @transform_10, window_bounds = array<i64: 1, 2>}, {transform_indices = @transform_11, window_bounds = array<i64: 1, 1, 2>}]} {
    %c0 = arith.constant 0 : index
    %c0_0 = arith.constant 0 : index
    %0 = vector.load %arg3[%c0, %c0_0] : memref<1x32xf32, #tpu.memory_space<vmem>>, vector<1x32xf32>
    %c0_i32 = arith.constant 0 : i32
    %c46_i32 = arith.constant 46 : i32
    %1 = arith.addi %c0_i32, %c46_i32 : i32
    %c1_i32 = arith.constant 1 : i32
    scf.for %arg19 = %c0_i32 to %1 step %c1_i32  : i32 {
      %cst_239 = arith.constant 0.000000e+00 : f32
      %313 = vector.broadcast %cst_239 : f32 to vector<46x32xf32>
      %c0_i32_240 = arith.constant 0 : i32
      %314 = arith.addi %arg19, %c0_i32_240 : i32
      %c50_i32 = arith.constant 50 : i32
      %315 = arith.muli %314, %c50_i32 : i32
      %c0_i32_241 = arith.constant 0 : i32
      %316 = arith.addi %315, %c0_i32_241 : i32
      %c0_242 = arith.constant 0 : index
      %317 = arith.index_cast %316 : i32 to index
      %c0_243 = arith.constant 0 : index
      %318 = vector.load %arg1[%c0_242, %317, %c0_243] : memref<1x2500x1xf32, #tpu.memory_space<vmem>>, vector<1x46x1xf32>
      %319 = vector.shape_cast %318 : vector<1x46x1xf32> to vector<46x1xf32>
      %c0_244 = arith.constant 0 : index
      %c0_245 = arith.constant 0 : index
      %320 = vector.load %arg2[%c0_244, %c0_245] : memref<25x32xf32, #tpu.memory_space<vmem>>, vector<1x32xf32>
      %321 = vector.broadcast %319 : vector<46x1xf32> to vector<46x32xf32>
      %322 = vector.broadcast %320 : vector<1x32xf32> to vector<46x32xf32>
      %323 = arith.mulf %321, %322 : vector<46x32xf32>
      %324 = arith.addf %313, %323 : vector<46x32xf32>
      %c1_i32_246 = arith.constant 1 : i32
      %325 = arith.addi %315, %c1_i32_246 : i32
      %c0_247 = arith.constant 0 : index
      %326 = arith.index_cast %325 : i32 to index
      %c0_248 = arith.constant 0 : index
      %327 = vector.load %arg1[%c0_247, %326, %c0_248] : memref<1x2500x1xf32, #tpu.memory_space<vmem>>, vector<1x46x1xf32>
      %328 = vector.shape_cast %327 : vector<1x46x1xf32> to vector<46x1xf32>
      %c1_249 = arith.constant 1 : index
      %c0_250 = arith.constant 0 : index
      %329 = vector.load %arg2[%c1_249, %c0_250] : memref<25x32xf32, #tpu.memory_space<vmem>>, vector<1x32xf32>
      %330 = vector.broadcast %328 : vector<46x1xf32> to vector<46x32xf32>
      %331 = vector.broadcast %329 : vector<1x32xf32> to vector<46x32xf32>
      %332 = arith.mulf %330, %331 : vector<46x32xf32>
      %333 = arith.addf %324, %332 : vector<46x32xf32>
      %c2_i32 = arith.constant 2 : i32
      %334 = arith.addi %315, %c2_i32 : i32
      %c0_251 = arith.constant 0 : index
      %335 = arith.index_cast %334 : i32 to index
      %c0_252 = arith.constant 0 : index
      %336 = vector.load %arg1[%c0_251, %335, %c0_252] : memref<1x2500x1xf32, #tpu.memory_space<vmem>>, vector<1x46x1xf32>
      %337 = vector.shape_cast %336 : vector<1x46x1xf32> to vector<46x1xf32>
      %c2_253 = arith.constant 2 : index
      %c0_254 = arith.constant 0 : index
      %338 = vector.load %arg2[%c2_253, %c0_254] : memref<25x32xf32, #tpu.memory_space<vmem>>, vector<1x32xf32>
      %339 = vector.broadcast %337 : vector<46x1xf32> to vector<46x32xf32>
      %340 = vector.broadcast %338 : vector<1x32xf32> to vector<46x32xf32>
      %341 = arith.mulf %339, %340 : vector<46x32xf32>
      %342 = arith.addf %333, %341 : vector<46x32xf32>
      %c3_i32 = arith.constant 3 : i32
      %343 = arith.addi %315, %c3_i32 : i32
      %c0_255 = arith.constant 0 : index
      %344 = arith.index_cast %343 : i32 to index
      %c0_256 = arith.constant 0 : index
      %345 = vector.load %arg1[%c0_255, %344, %c0_256] : memref<1x2500x1xf32, #tpu.memory_space<vmem>>, vector<1x46x1xf32>
      %346 = vector.shape_cast %345 : vector<1x46x1xf32> to vector<46x1xf32>
      %c3_257 = arith.constant 3 : index
      %c0_258 = arith.constant 0 : index
      %347 = vector.load %arg2[%c3_257, %c0_258] : memref<25x32xf32, #tpu.memory_space<vmem>>, vector<1x32xf32>
      %348 = vector.broadcast %346 : vector<46x1xf32> to vector<46x32xf32>
      %349 = vector.broadcast %347 : vector<1x32xf32> to vector<46x32xf32>
      %350 = arith.mulf %348, %349 : vector<46x32xf32>
      %351 = arith.addf %342, %350 : vector<46x32xf32>
      %c4_i32 = arith.constant 4 : i32
      %352 = arith.addi %315, %c4_i32 : i32
      %c0_259 = arith.constant 0 : index
      %353 = arith.index_cast %352 : i32 to index
      %c0_260 = arith.constant 0 : index
      %354 = vector.load %arg1[%c0_259, %353, %c0_260] : memref<1x2500x1xf32, #tpu.memory_space<vmem>>, vector<1x46x1xf32>
      %355 = vector.shape_cast %354 : vector<1x46x1xf32> to vector<46x1xf32>
      %c4 = arith.constant 4 : index
      %c0_261 = arith.constant 0 : index
      %356 = vector.load %arg2[%c4, %c0_261] : memref<25x32xf32, #tpu.memory_space<vmem>>, vector<1x32xf32>
      %357 = vector.broadcast %355 : vector<46x1xf32> to vector<46x32xf32>
      %358 = vector.broadcast %356 : vector<1x32xf32> to vector<46x32xf32>
      %359 = arith.mulf %357, %358 : vector<46x32xf32>
      %360 = arith.addf %351, %359 : vector<46x32xf32>
      %c1_i32_262 = arith.constant 1 : i32
      %361 = arith.addi %arg19, %c1_i32_262 : i32
      %c50_i32_263 = arith.constant 50 : i32
      %362 = arith.muli %361, %c50_i32_263 : i32
      %c0_i32_264 = arith.constant 0 : i32
      %363 = arith.addi %362, %c0_i32_264 : i32
      %c0_265 = arith.constant 0 : index
      %364 = arith.index_cast %363 : i32 to index
      %c0_266 = arith.constant 0 : index
      %365 = vector.load %arg1[%c0_265, %364, %c0_266] : memref<1x2500x1xf32, #tpu.memory_space<vmem>>, vector<1x46x1xf32>
      %366 = vector.shape_cast %365 : vector<1x46x1xf32> to vector<46x1xf32>
      %c5 = arith.constant 5 : index
      %c0_267 = arith.constant 0 : index
      %367 = vector.load %arg2[%c5, %c0_267] : memref<25x32xf32, #tpu.memory_space<vmem>>, vector<1x32xf32>
      %368 = vector.broadcast %366 : vector<46x1xf32> to vector<46x32xf32>
      %369 = vector.broadcast %367 : vector<1x32xf32> to vector<46x32xf32>
      %370 = arith.mulf %368, %369 : vector<46x32xf32>
      %371 = arith.addf %360, %370 : vector<46x32xf32>
      %c1_i32_268 = arith.constant 1 : i32
      %372 = arith.addi %362, %c1_i32_268 : i32
      %c0_269 = arith.constant 0 : index
      %373 = arith.index_cast %372 : i32 to index
      %c0_270 = arith.constant 0 : index
      %374 = vector.load %arg1[%c0_269, %373, %c0_270] : memref<1x2500x1xf32, #tpu.memory_space<vmem>>, vector<1x46x1xf32>
      %375 = vector.shape_cast %374 : vector<1x46x1xf32> to vector<46x1xf32>
      %c6 = arith.constant 6 : index
      %c0_271 = arith.constant 0 : index
      %376 = vector.load %arg2[%c6, %c0_271] : memref<25x32xf32, #tpu.memory_space<vmem>>, vector<1x32xf32>
      %377 = vector.broadcast %375 : vector<46x1xf32> to vector<46x32xf32>
      %378 = vector.broadcast %376 : vector<1x32xf32> to vector<46x32xf32>
      %379 = arith.mulf %377, %378 : vector<46x32xf32>
      %380 = arith.addf %371, %379 : vector<46x32xf32>
      %c2_i32_272 = arith.constant 2 : i32
      %381 = arith.addi %362, %c2_i32_272 : i32
      %c0_273 = arith.constant 0 : index
      %382 = arith.index_cast %381 : i32 to index
      %c0_274 = arith.constant 0 : index
      %383 = vector.load %arg1[%c0_273, %382, %c0_274] : memref<1x2500x1xf32, #tpu.memory_space<vmem>>, vector<1x46x1xf32>
      %384 = vector.shape_cast %383 : vector<1x46x1xf32> to vector<46x1xf32>
      %c7 = arith.constant 7 : index
      %c0_275 = arith.constant 0 : index
      %385 = vector.load %arg2[%c7, %c0_275] : memref<25x32xf32, #tpu.memory_space<vmem>>, vector<1x32xf32>
      %386 = vector.broadcast %384 : vector<46x1xf32> to vector<46x32xf32>
      %387 = vector.broadcast %385 : vector<1x32xf32> to vector<46x32xf32>
      %388 = arith.mulf %386, %387 : vector<46x32xf32>
      %389 = arith.addf %380, %388 : vector<46x32xf32>
      %c3_i32_276 = arith.constant 3 : i32
      %390 = arith.addi %362, %c3_i32_276 : i32
      %c0_277 = arith.constant 0 : index
      %391 = arith.index_cast %390 : i32 to index
      %c0_278 = arith.constant 0 : index
      %392 = vector.load %arg1[%c0_277, %391, %c0_278] : memref<1x2500x1xf32, #tpu.memory_space<vmem>>, vector<1x46x1xf32>
      %393 = vector.shape_cast %392 : vector<1x46x1xf32> to vector<46x1xf32>
      %c8_279 = arith.constant 8 : index
      %c0_280 = arith.constant 0 : index
      %394 = vector.load %arg2[%c8_279, %c0_280] : memref<25x32xf32, #tpu.memory_space<vmem>>, vector<1x32xf32>
      %395 = vector.broadcast %393 : vector<46x1xf32> to vector<46x32xf32>
      %396 = vector.broadcast %394 : vector<1x32xf32> to vector<46x32xf32>
      %397 = arith.mulf %395, %396 : vector<46x32xf32>
      %398 = arith.addf %389, %397 : vector<46x32xf32>
      %c4_i32_281 = arith.constant 4 : i32
      %399 = arith.addi %362, %c4_i32_281 : i32
      %c0_282 = arith.constant 0 : index
      %400 = arith.index_cast %399 : i32 to index
      %c0_283 = arith.constant 0 : index
      %401 = vector.load %arg1[%c0_282, %400, %c0_283] : memref<1x2500x1xf32, #tpu.memory_space<vmem>>, vector<1x46x1xf32>
      %402 = vector.shape_cast %401 : vector<1x46x1xf32> to vector<46x1xf32>
      %c9_284 = arith.constant 9 : index
      %c0_285 = arith.constant 0 : index
      %403 = vector.load %arg2[%c9_284, %c0_285] : memref<25x32xf32, #tpu.memory_space<vmem>>, vector<1x32xf32>
      %404 = vector.broadcast %402 : vector<46x1xf32> to vector<46x32xf32>
      %405 = vector.broadcast %403 : vector<1x32xf32> to vector<46x32xf32>
      %406 = arith.mulf %404, %405 : vector<46x32xf32>
      %407 = arith.addf %398, %406 : vector<46x32xf32>
      %c2_i32_286 = arith.constant 2 : i32
      %408 = arith.addi %arg19, %c2_i32_286 : i32
      %c50_i32_287 = arith.constant 50 : i32
      %409 = arith.muli %408, %c50_i32_287 : i32
      %c0_i32_288 = arith.constant 0 : i32
      %410 = arith.addi %409, %c0_i32_288 : i32
      %c0_289 = arith.constant 0 : index
      %411 = arith.index_cast %410 : i32 to index
      %c0_290 = arith.constant 0 : index
      %412 = vector.load %arg1[%c0_289, %411, %c0_290] : memref<1x2500x1xf32, #tpu.memory_space<vmem>>, vector<1x46x1xf32>
      %413 = vector.shape_cast %412 : vector<1x46x1xf32> to vector<46x1xf32>
      %c10 = arith.constant 10 : index
      %c0_291 = arith.constant 0 : index
      %414 = vector.load %arg2[%c10, %c0_291] : memref<25x32xf32, #tpu.memory_space<vmem>>, vector<1x32xf32>
      %415 = vector.broadcast %413 : vector<46x1xf32> to vector<46x32xf32>
      %416 = vector.broadcast %414 : vector<1x32xf32> to vector<46x32xf32>
      %417 = arith.mulf %415, %416 : vector<46x32xf32>
      %418 = arith.addf %407, %417 : vector<46x32xf32>
      %c1_i32_292 = arith.constant 1 : i32
      %419 = arith.addi %409, %c1_i32_292 : i32
      %c0_293 = arith.constant 0 : index
      %420 = arith.index_cast %419 : i32 to index
      %c0_294 = arith.constant 0 : index
      %421 = vector.load %arg1[%c0_293, %420, %c0_294] : memref<1x2500x1xf32, #tpu.memory_space<vmem>>, vector<1x46x1xf32>
      %422 = vector.shape_cast %421 : vector<1x46x1xf32> to vector<46x1xf32>
      %c11 = arith.constant 11 : index
      %c0_295 = arith.constant 0 : index
      %423 = vector.load %arg2[%c11, %c0_295] : memref<25x32xf32, #tpu.memory_space<vmem>>, vector<1x32xf32>
      %424 = vector.broadcast %422 : vector<46x1xf32> to vector<46x32xf32>
      %425 = vector.broadcast %423 : vector<1x32xf32> to vector<46x32xf32>
      %426 = arith.mulf %424, %425 : vector<46x32xf32>
      %427 = arith.addf %418, %426 : vector<46x32xf32>
      %c2_i32_296 = arith.constant 2 : i32
      %428 = arith.addi %409, %c2_i32_296 : i32
      %c0_297 = arith.constant 0 : index
      %429 = arith.index_cast %428 : i32 to index
      %c0_298 = arith.constant 0 : index
      %430 = vector.load %arg1[%c0_297, %429, %c0_298] : memref<1x2500x1xf32, #tpu.memory_space<vmem>>, vector<1x46x1xf32>
      %431 = vector.shape_cast %430 : vector<1x46x1xf32> to vector<46x1xf32>
      %c12 = arith.constant 12 : index
      %c0_299 = arith.constant 0 : index
      %432 = vector.load %arg2[%c12, %c0_299] : memref<25x32xf32, #tpu.memory_space<vmem>>, vector<1x32xf32>
      %433 = vector.broadcast %431 : vector<46x1xf32> to vector<46x32xf32>
      %434 = vector.broadcast %432 : vector<1x32xf32> to vector<46x32xf32>
      %435 = arith.mulf %433, %434 : vector<46x32xf32>
      %436 = arith.addf %427, %435 : vector<46x32xf32>
      %c3_i32_300 = arith.constant 3 : i32
      %437 = arith.addi %409, %c3_i32_300 : i32
      %c0_301 = arith.constant 0 : index
      %438 = arith.index_cast %437 : i32 to index
      %c0_302 = arith.constant 0 : index
      %439 = vector.load %arg1[%c0_301, %438, %c0_302] : memref<1x2500x1xf32, #tpu.memory_space<vmem>>, vector<1x46x1xf32>
      %440 = vector.shape_cast %439 : vector<1x46x1xf32> to vector<46x1xf32>
      %c13 = arith.constant 13 : index
      %c0_303 = arith.constant 0 : index
      %441 = vector.load %arg2[%c13, %c0_303] : memref<25x32xf32, #tpu.memory_space<vmem>>, vector<1x32xf32>
      %442 = vector.broadcast %440 : vector<46x1xf32> to vector<46x32xf32>
      %443 = vector.broadcast %441 : vector<1x32xf32> to vector<46x32xf32>
      %444 = arith.mulf %442, %443 : vector<46x32xf32>
      %445 = arith.addf %436, %444 : vector<46x32xf32>
      %c4_i32_304 = arith.constant 4 : i32
      %446 = arith.addi %409, %c4_i32_304 : i32
      %c0_305 = arith.constant 0 : index
      %447 = arith.index_cast %446 : i32 to index
      %c0_306 = arith.constant 0 : index
      %448 = vector.load %arg1[%c0_305, %447, %c0_306] : memref<1x2500x1xf32, #tpu.memory_space<vmem>>, vector<1x46x1xf32>
      %449 = vector.shape_cast %448 : vector<1x46x1xf32> to vector<46x1xf32>
      %c14 = arith.constant 14 : index
      %c0_307 = arith.constant 0 : index
      %450 = vector.load %arg2[%c14, %c0_307] : memref<25x32xf32, #tpu.memory_space<vmem>>, vector<1x32xf32>
      %451 = vector.broadcast %449 : vector<46x1xf32> to vector<46x32xf32>
      %452 = vector.broadcast %450 : vector<1x32xf32> to vector<46x32xf32>
      %453 = arith.mulf %451, %452 : vector<46x32xf32>
      %454 = arith.addf %445, %453 : vector<46x32xf32>
      %c3_i32_308 = arith.constant 3 : i32
      %455 = arith.addi %arg19, %c3_i32_308 : i32
      %c50_i32_309 = arith.constant 50 : i32
      %456 = arith.muli %455, %c50_i32_309 : i32
      %c0_i32_310 = arith.constant 0 : i32
      %457 = arith.addi %456, %c0_i32_310 : i32
      %c0_311 = arith.constant 0 : index
      %458 = arith.index_cast %457 : i32 to index
      %c0_312 = arith.constant 0 : index
      %459 = vector.load %arg1[%c0_311, %458, %c0_312] : memref<1x2500x1xf32, #tpu.memory_space<vmem>>, vector<1x46x1xf32>
      %460 = vector.shape_cast %459 : vector<1x46x1xf32> to vector<46x1xf32>
      %c15 = arith.constant 15 : index
      %c0_313 = arith.constant 0 : index
      %461 = vector.load %arg2[%c15, %c0_313] : memref<25x32xf32, #tpu.memory_space<vmem>>, vector<1x32xf32>
      %462 = vector.broadcast %460 : vector<46x1xf32> to vector<46x32xf32>
      %463 = vector.broadcast %461 : vector<1x32xf32> to vector<46x32xf32>
      %464 = arith.mulf %462, %463 : vector<46x32xf32>
      %465 = arith.addf %454, %464 : vector<46x32xf32>
      %c1_i32_314 = arith.constant 1 : i32
      %466 = arith.addi %456, %c1_i32_314 : i32
      %c0_315 = arith.constant 0 : index
      %467 = arith.index_cast %466 : i32 to index
      %c0_316 = arith.constant 0 : index
      %468 = vector.load %arg1[%c0_315, %467, %c0_316] : memref<1x2500x1xf32, #tpu.memory_space<vmem>>, vector<1x46x1xf32>
      %469 = vector.shape_cast %468 : vector<1x46x1xf32> to vector<46x1xf32>
      %c16_317 = arith.constant 16 : index
      %c0_318 = arith.constant 0 : index
      %470 = vector.load %arg2[%c16_317, %c0_318] : memref<25x32xf32, #tpu.memory_space<vmem>>, vector<1x32xf32>
      %471 = vector.broadcast %469 : vector<46x1xf32> to vector<46x32xf32>
      %472 = vector.broadcast %470 : vector<1x32xf32> to vector<46x32xf32>
      %473 = arith.mulf %471, %472 : vector<46x32xf32>
      %474 = arith.addf %465, %473 : vector<46x32xf32>
      %c2_i32_319 = arith.constant 2 : i32
      %475 = arith.addi %456, %c2_i32_319 : i32
      %c0_320 = arith.constant 0 : index
      %476 = arith.index_cast %475 : i32 to index
      %c0_321 = arith.constant 0 : index
      %477 = vector.load %arg1[%c0_320, %476, %c0_321] : memref<1x2500x1xf32, #tpu.memory_space<vmem>>, vector<1x46x1xf32>
      %478 = vector.shape_cast %477 : vector<1x46x1xf32> to vector<46x1xf32>
      %c17_322 = arith.constant 17 : index
      %c0_323 = arith.constant 0 : index
      %479 = vector.load %arg2[%c17_322, %c0_323] : memref<25x32xf32, #tpu.memory_space<vmem>>, vector<1x32xf32>
      %480 = vector.broadcast %478 : vector<46x1xf32> to vector<46x32xf32>
      %481 = vector.broadcast %479 : vector<1x32xf32> to vector<46x32xf32>
      %482 = arith.mulf %480, %481 : vector<46x32xf32>
      %483 = arith.addf %474, %482 : vector<46x32xf32>
      %c3_i32_324 = arith.constant 3 : i32
      %484 = arith.addi %456, %c3_i32_324 : i32
      %c0_325 = arith.constant 0 : index
      %485 = arith.index_cast %484 : i32 to index
      %c0_326 = arith.constant 0 : index
      %486 = vector.load %arg1[%c0_325, %485, %c0_326] : memref<1x2500x1xf32, #tpu.memory_space<vmem>>, vector<1x46x1xf32>
      %487 = vector.shape_cast %486 : vector<1x46x1xf32> to vector<46x1xf32>
      %c18_327 = arith.constant 18 : index
      %c0_328 = arith.constant 0 : index
      %488 = vector.load %arg2[%c18_327, %c0_328] : memref<25x32xf32, #tpu.memory_space<vmem>>, vector<1x32xf32>
      %489 = vector.broadcast %487 : vector<46x1xf32> to vector<46x32xf32>
      %490 = vector.broadcast %488 : vector<1x32xf32> to vector<46x32xf32>
      %491 = arith.mulf %489, %490 : vector<46x32xf32>
      %492 = arith.addf %483, %491 : vector<46x32xf32>
      %c4_i32_329 = arith.constant 4 : i32
      %493 = arith.addi %456, %c4_i32_329 : i32
      %c0_330 = arith.constant 0 : index
      %494 = arith.index_cast %493 : i32 to index
      %c0_331 = arith.constant 0 : index
      %495 = vector.load %arg1[%c0_330, %494, %c0_331] : memref<1x2500x1xf32, #tpu.memory_space<vmem>>, vector<1x46x1xf32>
      %496 = vector.shape_cast %495 : vector<1x46x1xf32> to vector<46x1xf32>
      %c19 = arith.constant 19 : index
      %c0_332 = arith.constant 0 : index
      %497 = vector.load %arg2[%c19, %c0_332] : memref<25x32xf32, #tpu.memory_space<vmem>>, vector<1x32xf32>
      %498 = vector.broadcast %496 : vector<46x1xf32> to vector<46x32xf32>
      %499 = vector.broadcast %497 : vector<1x32xf32> to vector<46x32xf32>
      %500 = arith.mulf %498, %499 : vector<46x32xf32>
      %501 = arith.addf %492, %500 : vector<46x32xf32>
      %c4_i32_333 = arith.constant 4 : i32
      %502 = arith.addi %arg19, %c4_i32_333 : i32
      %c50_i32_334 = arith.constant 50 : i32
      %503 = arith.muli %502, %c50_i32_334 : i32
      %c0_i32_335 = arith.constant 0 : i32
      %504 = arith.addi %503, %c0_i32_335 : i32
      %c0_336 = arith.constant 0 : index
      %505 = arith.index_cast %504 : i32 to index
      %c0_337 = arith.constant 0 : index
      %506 = vector.load %arg1[%c0_336, %505, %c0_337] : memref<1x2500x1xf32, #tpu.memory_space<vmem>>, vector<1x46x1xf32>
      %507 = vector.shape_cast %506 : vector<1x46x1xf32> to vector<46x1xf32>
      %c20 = arith.constant 20 : index
      %c0_338 = arith.constant 0 : index
      %508 = vector.load %arg2[%c20, %c0_338] : memref<25x32xf32, #tpu.memory_space<vmem>>, vector<1x32xf32>
      %509 = vector.broadcast %507 : vector<46x1xf32> to vector<46x32xf32>
      %510 = vector.broadcast %508 : vector<1x32xf32> to vector<46x32xf32>
      %511 = arith.mulf %509, %510 : vector<46x32xf32>
      %512 = arith.addf %501, %511 : vector<46x32xf32>
      %c1_i32_339 = arith.constant 1 : i32
      %513 = arith.addi %503, %c1_i32_339 : i32
      %c0_340 = arith.constant 0 : index
      %514 = arith.index_cast %513 : i32 to index
      %c0_341 = arith.constant 0 : index
      %515 = vector.load %arg1[%c0_340, %514, %c0_341] : memref<1x2500x1xf32, #tpu.memory_space<vmem>>, vector<1x46x1xf32>
      %516 = vector.shape_cast %515 : vector<1x46x1xf32> to vector<46x1xf32>
      %c21 = arith.constant 21 : index
      %c0_342 = arith.constant 0 : index
      %517 = vector.load %arg2[%c21, %c0_342] : memref<25x32xf32, #tpu.memory_space<vmem>>, vector<1x32xf32>
      %518 = vector.broadcast %516 : vector<46x1xf32> to vector<46x32xf32>
      %519 = vector.broadcast %517 : vector<1x32xf32> to vector<46x32xf32>
      %520 = arith.mulf %518, %519 : vector<46x32xf32>
      %521 = arith.addf %512, %520 : vector<46x32xf32>
      %c2_i32_343 = arith.constant 2 : i32
      %522 = arith.addi %503, %c2_i32_343 : i32
      %c0_344 = arith.constant 0 : index
      %523 = arith.index_cast %522 : i32 to index
      %c0_345 = arith.constant 0 : index
      %524 = vector.load %arg1[%c0_344, %523, %c0_345] : memref<1x2500x1xf32, #tpu.memory_space<vmem>>, vector<1x46x1xf32>
      %525 = vector.shape_cast %524 : vector<1x46x1xf32> to vector<46x1xf32>
      %c22 = arith.constant 22 : index
      %c0_346 = arith.constant 0 : index
      %526 = vector.load %arg2[%c22, %c0_346] : memref<25x32xf32, #tpu.memory_space<vmem>>, vector<1x32xf32>
      %527 = vector.broadcast %525 : vector<46x1xf32> to vector<46x32xf32>
      %528 = vector.broadcast %526 : vector<1x32xf32> to vector<46x32xf32>
      %529 = arith.mulf %527, %528 : vector<46x32xf32>
      %530 = arith.addf %521, %529 : vector<46x32xf32>
      %c3_i32_347 = arith.constant 3 : i32
      %531 = arith.addi %503, %c3_i32_347 : i32
      %c0_348 = arith.constant 0 : index
      %532 = arith.index_cast %531 : i32 to index
      %c0_349 = arith.constant 0 : index
      %533 = vector.load %arg1[%c0_348, %532, %c0_349] : memref<1x2500x1xf32, #tpu.memory_space<vmem>>, vector<1x46x1xf32>
      %534 = vector.shape_cast %533 : vector<1x46x1xf32> to vector<46x1xf32>
      %c23_350 = arith.constant 23 : index
      %c0_351 = arith.constant 0 : index
      %535 = vector.load %arg2[%c23_350, %c0_351] : memref<25x32xf32, #tpu.memory_space<vmem>>, vector<1x32xf32>
      %536 = vector.broadcast %534 : vector<46x1xf32> to vector<46x32xf32>
      %537 = vector.broadcast %535 : vector<1x32xf32> to vector<46x32xf32>
      %538 = arith.mulf %536, %537 : vector<46x32xf32>
      %539 = arith.addf %530, %538 : vector<46x32xf32>
      %c4_i32_352 = arith.constant 4 : i32
      %540 = arith.addi %503, %c4_i32_352 : i32
      %c0_353 = arith.constant 0 : index
      %541 = arith.index_cast %540 : i32 to index
      %c0_354 = arith.constant 0 : index
      %542 = vector.load %arg1[%c0_353, %541, %c0_354] : memref<1x2500x1xf32, #tpu.memory_space<vmem>>, vector<1x46x1xf32>
      %543 = vector.shape_cast %542 : vector<1x46x1xf32> to vector<46x1xf32>
      %c24_355 = arith.constant 24 : index
      %c0_356 = arith.constant 0 : index
      %544 = vector.load %arg2[%c24_355, %c0_356] : memref<25x32xf32, #tpu.memory_space<vmem>>, vector<1x32xf32>
      %545 = vector.broadcast %543 : vector<46x1xf32> to vector<46x32xf32>
      %546 = vector.broadcast %544 : vector<1x32xf32> to vector<46x32xf32>
      %547 = arith.mulf %545, %546 : vector<46x32xf32>
      %548 = arith.addf %539, %547 : vector<46x32xf32>
      %c48_i32 = arith.constant 48 : i32
      %549 = arith.muli %arg19, %c48_i32 : i32
      %550 = tpu.assume_multiple %549, 8 : i32
      %551 = vector.broadcast %0 : vector<1x32xf32> to vector<46x32xf32>
      %552 = arith.addf %548, %551 : vector<46x32xf32>
      %cst_357 = arith.constant 0.000000e+00 : f32
      %553 = vector.broadcast %cst_357 : f32 to vector<46x32xf32>
      %554 = arith.maximumf %552, %553 : vector<46x32xf32>
      %555 = arith.index_cast %550 : i32 to index
      %c0_358 = arith.constant 0 : index
      %556 = vector.load %arg13[%555, %c0_358] : memref<2208x32xf32, #tpu.memory_space<vmem>>, vector<46x32xf32>
      tpu.vector_store %arg13[%555, %c0_358], %554 {strides = array<i32>} : memref<2208x32xf32, #tpu.memory_space<vmem>>, vector<46x32xf32>,
    }
    %c46_i32_1 = arith.constant 46 : i32
    %c0_2 = arith.constant 0 : index
    %c0_3 = arith.constant 0 : index
    %2 = tpu.strided_load %arg13[%c0_2, %c0_3] {strides = array<i32: 2, 1>} : memref<2208x32xf32, #tpu.memory_space<vmem>>, vector<23x32xf32>
    %c1 = arith.constant 1 : index
    %c0_4 = arith.constant 0 : index
    %3 = tpu.strided_load %arg13[%c1, %c0_4] {strides = array<i32: 2, 1>} : memref<2208x32xf32, #tpu.memory_space<vmem>>, vector<23x32xf32>
    %c48 = arith.constant 48 : index
    %c0_5 = arith.constant 0 : index
    %4 = tpu.strided_load %arg13[%c48, %c0_5] {strides = array<i32: 2, 1>} : memref<2208x32xf32, #tpu.memory_space<vmem>>, vector<23x32xf32>
    %c49 = arith.constant 49 : index
    %c0_6 = arith.constant 0 : index
    %5 = tpu.strided_load %arg13[%c49, %c0_6] {strides = array<i32: 2, 1>} : memref<2208x32xf32, #tpu.memory_space<vmem>>, vector<23x32xf32>
    %6 = arith.maximumf %2, %3 : vector<23x32xf32>
    %7 = arith.maximumf %4, %5 : vector<23x32xf32>
    %8 = arith.maximumf %6, %7 : vector<23x32xf32>
    %c0_7 = arith.constant 0 : index
    %c0_8 = arith.constant 0 : index
    %9 = vector.load %arg14[%c0_7, %c0_8] : memref<529x32xf32, #tpu.memory_space<vmem>>, vector<23x32xf32>
    tpu.vector_store %arg14[%c0_7, %c0_8], %8 {strides = array<i32>} : memref<529x32xf32, #tpu.memory_space<vmem>>, vector<23x32xf32>,
    %c96 = arith.constant 96 : index
    %c0_9 = arith.constant 0 : index
    %10 = tpu.strided_load %arg13[%c96, %c0_9] {strides = array<i32: 2, 1>} : memref<2208x32xf32, #tpu.memory_space<vmem>>, vector<23x32xf32>
    %c97 = arith.constant 97 : index
    %c0_10 = arith.constant 0 : index
    %11 = tpu.strided_load %arg13[%c97, %c0_10] {strides = array<i32: 2, 1>} : memref<2208x32xf32, #tpu.memory_space<vmem>>, vector<23x32xf32>
    %c144 = arith.constant 144 : index
    %c0_11 = arith.constant 0 : index
    %12 = tpu.strided_load %arg13[%c144, %c0_11] {strides = array<i32: 2, 1>} : memref<2208x32xf32, #tpu.memory_space<vmem>>, vector<23x32xf32>
    %c145 = arith.constant 145 : index
    %c0_12 = arith.constant 0 : index
    %13 = tpu.strided_load %arg13[%c145, %c0_12] {strides = array<i32: 2, 1>} : memref<2208x32xf32, #tpu.memory_space<vmem>>, vector<23x32xf32>
    %14 = arith.maximumf %10, %11 : vector<23x32xf32>
    %15 = arith.maximumf %12, %13 : vector<23x32xf32>
    %16 = arith.maximumf %14, %15 : vector<23x32xf32>
    %c23 = arith.constant 23 : index
    %c0_13 = arith.constant 0 : index
    %17 = vector.load %arg14[%c23, %c0_13] : memref<529x32xf32, #tpu.memory_space<vmem>>, vector<23x32xf32>
    tpu.vector_store %arg14[%c23, %c0_13], %16 {strides = array<i32>} : memref<529x32xf32, #tpu.memory_space<vmem>>, vector<23x32xf32>,
    %c192 = arith.constant 192 : index
    %c0_14 = arith.constant 0 : index
    %18 = tpu.strided_load %arg13[%c192, %c0_14] {strides = array<i32: 2, 1>} : memref<2208x32xf32, #tpu.memory_space<vmem>>, vector<23x32xf32>
    %c193 = arith.constant 193 : index
    %c0_15 = arith.constant 0 : index
    %19 = tpu.strided_load %arg13[%c193, %c0_15] {strides = array<i32: 2, 1>} : memref<2208x32xf32, #tpu.memory_space<vmem>>, vector<23x32xf32>
    %c240 = arith.constant 240 : index
    %c0_16 = arith.constant 0 : index
    %20 = tpu.strided_load %arg13[%c240, %c0_16] {strides = array<i32: 2, 1>} : memref<2208x32xf32, #tpu.memory_space<vmem>>, vector<23x32xf32>
    %c241 = arith.constant 241 : index
    %c0_17 = arith.constant 0 : index
    %21 = tpu.strided_load %arg13[%c241, %c0_17] {strides = array<i32: 2, 1>} : memref<2208x32xf32, #tpu.memory_space<vmem>>, vector<23x32xf32>
    %22 = arith.maximumf %18, %19 : vector<23x32xf32>
    %23 = arith.maximumf %20, %21 : vector<23x32xf32>
    %24 = arith.maximumf %22, %23 : vector<23x32xf32>
    %c46 = arith.constant 46 : index
    %c0_18 = arith.constant 0 : index
    %25 = vector.load %arg14[%c46, %c0_18] : memref<529x32xf32, #tpu.memory_space<vmem>>, vector<23x32xf32>
    tpu.vector_store %arg14[%c46, %c0_18], %24 {strides = array<i32>} : memref<529x32xf32, #tpu.memory_space<vmem>>, vector<23x32xf32>,
    %c288 = arith.constant 288 : index
    %c0_19 = arith.constant 0 : index
    %26 = tpu.strided_load %arg13[%c288, %c0_19] {strides = array<i32: 2, 1>} : memref<2208x32xf32, #tpu.memory_space<vmem>>, vector<23x32xf32>
    %c289 = arith.constant 289 : index
    %c0_20 = arith.constant 0 : index
    %27 = tpu.strided_load %arg13[%c289, %c0_20] {strides = array<i32: 2, 1>} : memref<2208x32xf32, #tpu.memory_space<vmem>>, vector<23x32xf32>
    %c336 = arith.constant 336 : index
    %c0_21 = arith.constant 0 : index
    %28 = tpu.strided_load %arg13[%c336, %c0_21] {strides = array<i32: 2, 1>} : memref<2208x32xf32, #tpu.memory_space<vmem>>, vector<23x32xf32>
    %c337 = arith.constant 337 : index
    %c0_22 = arith.constant 0 : index
    %29 = tpu.strided_load %arg13[%c337, %c0_22] {strides = array<i32: 2, 1>} : memref<2208x32xf32, #tpu.memory_space<vmem>>, vector<23x32xf32>
    %30 = arith.maximumf %26, %27 : vector<23x32xf32>
    %31 = arith.maximumf %28, %29 : vector<23x32xf32>
    %32 = arith.maximumf %30, %31 : vector<23x32xf32>
    %c69 = arith.constant 69 : index
    %c0_23 = arith.constant 0 : index
    %33 = vector.load %arg14[%c69, %c0_23] : memref<529x32xf32, #tpu.memory_space<vmem>>, vector<23x32xf32>
    tpu.vector_store %arg14[%c69, %c0_23], %32 {strides = array<i32>} : memref<529x32xf32, #tpu.memory_space<vmem>>, vector<23x32xf32>,
    %c384 = arith.constant 384 : index
    %c0_24 = arith.constant 0 : index
    %34 = tpu.strided_load %arg13[%c384, %c0_24] {strides = array<i32: 2, 1>} : memref<2208x32xf32, #tpu.memory_space<vmem>>, vector<23x32xf32>
    %c385 = arith.constant 385 : index
    %c0_25 = arith.constant 0 : index
    %35 = tpu.strided_load %arg13[%c385, %c0_25] {strides = array<i32: 2, 1>} : memref<2208x32xf32, #tpu.memory_space<vmem>>, vector<23x32xf32>
    %c432 = arith.constant 432 : index
    %c0_26 = arith.constant 0 : index
    %36 = tpu.strided_load %arg13[%c432, %c0_26] {strides = array<i32: 2, 1>} : memref<2208x32xf32, #tpu.memory_space<vmem>>, vector<23x32xf32>
    %c433 = arith.constant 433 : index
    %c0_27 = arith.constant 0 : index
    %37 = tpu.strided_load %arg13[%c433, %c0_27] {strides = array<i32: 2, 1>} : memref<2208x32xf32, #tpu.memory_space<vmem>>, vector<23x32xf32>
    %38 = arith.maximumf %34, %35 : vector<23x32xf32>
    %39 = arith.maximumf %36, %37 : vector<23x32xf32>
    %40 = arith.maximumf %38, %39 : vector<23x32xf32>
    %c92 = arith.constant 92 : index
    %c0_28 = arith.constant 0 : index
    %41 = vector.load %arg14[%c92, %c0_28] : memref<529x32xf32, #tpu.memory_space<vmem>>, vector<23x32xf32>
    tpu.vector_store %arg14[%c92, %c0_28], %40 {strides = array<i32>} : memref<529x32xf32, #tpu.memory_space<vmem>>, vector<23x32xf32>,
    %c480 = arith.constant 480 : index
    %c0_29 = arith.constant 0 : index
    %42 = tpu.strided_load %arg13[%c480, %c0_29] {strides = array<i32: 2, 1>} : memref<2208x32xf32, #tpu.memory_space<vmem>>, vector<23x32xf32>
    %c481 = arith.constant 481 : index
    %c0_30 = arith.constant 0 : index
    %43 = tpu.strided_load %arg13[%c481, %c0_30] {strides = array<i32: 2, 1>} : memref<2208x32xf32, #tpu.memory_space<vmem>>, vector<23x32xf32>
    %c528 = arith.constant 528 : index
    %c0_31 = arith.constant 0 : index
    %44 = tpu.strided_load %arg13[%c528, %c0_31] {strides = array<i32: 2, 1>} : memref<2208x32xf32, #tpu.memory_space<vmem>>, vector<23x32xf32>
    %c529 = arith.constant 529 : index
    %c0_32 = arith.constant 0 : index
    %45 = tpu.strided_load %arg13[%c529, %c0_32] {strides = array<i32: 2, 1>} : memref<2208x32xf32, #tpu.memory_space<vmem>>, vector<23x32xf32>
    %46 = arith.maximumf %42, %43 : vector<23x32xf32>
    %47 = arith.maximumf %44, %45 : vector<23x32xf32>
    %48 = arith.maximumf %46, %47 : vector<23x32xf32>
    %c115 = arith.constant 115 : index
    %c0_33 = arith.constant 0 : index
    %49 = vector.load %arg14[%c115, %c0_33] : memref<529x32xf32, #tpu.memory_space<vmem>>, vector<23x32xf32>
    tpu.vector_store %arg14[%c115, %c0_33], %48 {strides = array<i32>} : memref<529x32xf32, #tpu.memory_space<vmem>>, vector<23x32xf32>,
    %c576 = arith.constant 576 : index
    %c0_34 = arith.constant 0 : index
    %50 = tpu.strided_load %arg13[%c576, %c0_34] {strides = array<i32: 2, 1>} : memref<2208x32xf32, #tpu.memory_space<vmem>>, vector<23x32xf32>
    %c577 = arith.constant 577 : index
    %c0_35 = arith.constant 0 : index
    %51 = tpu.strided_load %arg13[%c577, %c0_35] {strides = array<i32: 2, 1>} : memref<2208x32xf32, #tpu.memory_space<vmem>>, vector<23x32xf32>
    %c624 = arith.constant 624 : index
    %c0_36 = arith.constant 0 : index
    %52 = tpu.strided_load %arg13[%c624, %c0_36] {strides = array<i32: 2, 1>} : memref<2208x32xf32, #tpu.memory_space<vmem>>, vector<23x32xf32>
    %c625 = arith.constant 625 : index
    %c0_37 = arith.constant 0 : index
    %53 = tpu.strided_load %arg13[%c625, %c0_37] {strides = array<i32: 2, 1>} : memref<2208x32xf32, #tpu.memory_space<vmem>>, vector<23x32xf32>
    %54 = arith.maximumf %50, %51 : vector<23x32xf32>
    %55 = arith.maximumf %52, %53 : vector<23x32xf32>
    %56 = arith.maximumf %54, %55 : vector<23x32xf32>
    %c138 = arith.constant 138 : index
    %c0_38 = arith.constant 0 : index
    %57 = vector.load %arg14[%c138, %c0_38] : memref<529x32xf32, #tpu.memory_space<vmem>>, vector<23x32xf32>
    tpu.vector_store %arg14[%c138, %c0_38], %56 {strides = array<i32>} : memref<529x32xf32, #tpu.memory_space<vmem>>, vector<23x32xf32>,
    %c672 = arith.constant 672 : index
    %c0_39 = arith.constant 0 : index
    %58 = tpu.strided_load %arg13[%c672, %c0_39] {strides = array<i32: 2, 1>} : memref<2208x32xf32, #tpu.memory_space<vmem>>, vector<23x32xf32>
    %c673 = arith.constant 673 : index
    %c0_40 = arith.constant 0 : index
    %59 = tpu.strided_load %arg13[%c673, %c0_40] {strides = array<i32: 2, 1>} : memref<2208x32xf32, #tpu.memory_space<vmem>>, vector<23x32xf32>
    %c720 = arith.constant 720 : index
    %c0_41 = arith.constant 0 : index
    %60 = tpu.strided_load %arg13[%c720, %c0_41] {strides = array<i32: 2, 1>} : memref<2208x32xf32, #tpu.memory_space<vmem>>, vector<23x32xf32>
    %c721 = arith.constant 721 : index
    %c0_42 = arith.constant 0 : index
    %61 = tpu.strided_load %arg13[%c721, %c0_42] {strides = array<i32: 2, 1>} : memref<2208x32xf32, #tpu.memory_space<vmem>>, vector<23x32xf32>
    %62 = arith.maximumf %58, %59 : vector<23x32xf32>
    %63 = arith.maximumf %60, %61 : vector<23x32xf32>
    %64 = arith.maximumf %62, %63 : vector<23x32xf32>
    %c161 = arith.constant 161 : index
    %c0_43 = arith.constant 0 : index
    %65 = vector.load %arg14[%c161, %c0_43] : memref<529x32xf32, #tpu.memory_space<vmem>>, vector<23x32xf32>
    tpu.vector_store %arg14[%c161, %c0_43], %64 {strides = array<i32>} : memref<529x32xf32, #tpu.memory_space<vmem>>, vector<23x32xf32>,
    %c768 = arith.constant 768 : index
    %c0_44 = arith.constant 0 : index
    %66 = tpu.strided_load %arg13[%c768, %c0_44] {strides = array<i32: 2, 1>} : memref<2208x32xf32, #tpu.memory_space<vmem>>, vector<23x32xf32>
    %c769 = arith.constant 769 : index
    %c0_45 = arith.constant 0 : index
    %67 = tpu.strided_load %arg13[%c769, %c0_45] {strides = array<i32: 2, 1>} : memref<2208x32xf32, #tpu.memory_space<vmem>>, vector<23x32xf32>
    %c816 = arith.constant 816 : index
    %c0_46 = arith.constant 0 : index
    %68 = tpu.strided_load %arg13[%c816, %c0_46] {strides = array<i32: 2, 1>} : memref<2208x32xf32, #tpu.memory_space<vmem>>, vector<23x32xf32>
    %c817 = arith.constant 817 : index
    %c0_47 = arith.constant 0 : index
    %69 = tpu.strided_load %arg13[%c817, %c0_47] {strides = array<i32: 2, 1>} : memref<2208x32xf32, #tpu.memory_space<vmem>>, vector<23x32xf32>
    %70 = arith.maximumf %66, %67 : vector<23x32xf32>
    %71 = arith.maximumf %68, %69 : vector<23x32xf32>
    %72 = arith.maximumf %70, %71 : vector<23x32xf32>
    %c184 = arith.constant 184 : index
    %c0_48 = arith.constant 0 : index
    %73 = vector.load %arg14[%c184, %c0_48] : memref<529x32xf32, #tpu.memory_space<vmem>>, vector<23x32xf32>
    tpu.vector_store %arg14[%c184, %c0_48], %72 {strides = array<i32>} : memref<529x32xf32, #tpu.memory_space<vmem>>, vector<23x32xf32>,
    %c864 = arith.constant 864 : index
    %c0_49 = arith.constant 0 : index
    %74 = tpu.strided_load %arg13[%c864, %c0_49] {strides = array<i32: 2, 1>} : memref<2208x32xf32, #tpu.memory_space<vmem>>, vector<23x32xf32>
    %c865 = arith.constant 865 : index
    %c0_50 = arith.constant 0 : index
    %75 = tpu.strided_load %arg13[%c865, %c0_50] {strides = array<i32: 2, 1>} : memref<2208x32xf32, #tpu.memory_space<vmem>>, vector<23x32xf32>
    %c912 = arith.constant 912 : index
    %c0_51 = arith.constant 0 : index
    %76 = tpu.strided_load %arg13[%c912, %c0_51] {strides = array<i32: 2, 1>} : memref<2208x32xf32, #tpu.memory_space<vmem>>, vector<23x32xf32>
    %c913 = arith.constant 913 : index
    %c0_52 = arith.constant 0 : index
    %77 = tpu.strided_load %arg13[%c913, %c0_52] {strides = array<i32: 2, 1>} : memref<2208x32xf32, #tpu.memory_space<vmem>>, vector<23x32xf32>
    %78 = arith.maximumf %74, %75 : vector<23x32xf32>
    %79 = arith.maximumf %76, %77 : vector<23x32xf32>
    %80 = arith.maximumf %78, %79 : vector<23x32xf32>
    %c207 = arith.constant 207 : index
    %c0_53 = arith.constant 0 : index
    %81 = vector.load %arg14[%c207, %c0_53] : memref<529x32xf32, #tpu.memory_space<vmem>>, vector<23x32xf32>
    tpu.vector_store %arg14[%c207, %c0_53], %80 {strides = array<i32>} : memref<529x32xf32, #tpu.memory_space<vmem>>, vector<23x32xf32>,
    %c960 = arith.constant 960 : index
    %c0_54 = arith.constant 0 : index
    %82 = tpu.strided_load %arg13[%c960, %c0_54] {strides = array<i32: 2, 1>} : memref<2208x32xf32, #tpu.memory_space<vmem>>, vector<23x32xf32>
    %c961 = arith.constant 961 : index
    %c0_55 = arith.constant 0 : index
    %83 = tpu.strided_load %arg13[%c961, %c0_55] {strides = array<i32: 2, 1>} : memref<2208x32xf32, #tpu.memory_space<vmem>>, vector<23x32xf32>
    %c1008 = arith.constant 1008 : index
    %c0_56 = arith.constant 0 : index
    %84 = tpu.strided_load %arg13[%c1008, %c0_56] {strides = array<i32: 2, 1>} : memref<2208x32xf32, #tpu.memory_space<vmem>>, vector<23x32xf32>
    %c1009 = arith.constant 1009 : index
    %c0_57 = arith.constant 0 : index
    %85 = tpu.strided_load %arg13[%c1009, %c0_57] {strides = array<i32: 2, 1>} : memref<2208x32xf32, #tpu.memory_space<vmem>>, vector<23x32xf32>
    %86 = arith.maximumf %82, %83 : vector<23x32xf32>
    %87 = arith.maximumf %84, %85 : vector<23x32xf32>
    %88 = arith.maximumf %86, %87 : vector<23x32xf32>
    %c230 = arith.constant 230 : index
    %c0_58 = arith.constant 0 : index
    %89 = vector.load %arg14[%c230, %c0_58] : memref<529x32xf32, #tpu.memory_space<vmem>>, vector<23x32xf32>
    tpu.vector_store %arg14[%c230, %c0_58], %88 {strides = array<i32>} : memref<529x32xf32, #tpu.memory_space<vmem>>, vector<23x32xf32>,
    %c1056 = arith.constant 1056 : index
    %c0_59 = arith.constant 0 : index
    %90 = tpu.strided_load %arg13[%c1056, %c0_59] {strides = array<i32: 2, 1>} : memref<2208x32xf32, #tpu.memory_space<vmem>>, vector<23x32xf32>
    %c1057 = arith.constant 1057 : index
    %c0_60 = arith.constant 0 : index
    %91 = tpu.strided_load %arg13[%c1057, %c0_60] {strides = array<i32: 2, 1>} : memref<2208x32xf32, #tpu.memory_space<vmem>>, vector<23x32xf32>
    %c1104 = arith.constant 1104 : index
    %c0_61 = arith.constant 0 : index
    %92 = tpu.strided_load %arg13[%c1104, %c0_61] {strides = array<i32: 2, 1>} : memref<2208x32xf32, #tpu.memory_space<vmem>>, vector<23x32xf32>
    %c1105 = arith.constant 1105 : index
    %c0_62 = arith.constant 0 : index
    %93 = tpu.strided_load %arg13[%c1105, %c0_62] {strides = array<i32: 2, 1>} : memref<2208x32xf32, #tpu.memory_space<vmem>>, vector<23x32xf32>
    %94 = arith.maximumf %90, %91 : vector<23x32xf32>
    %95 = arith.maximumf %92, %93 : vector<23x32xf32>
    %96 = arith.maximumf %94, %95 : vector<23x32xf32>
    %c253 = arith.constant 253 : index
    %c0_63 = arith.constant 0 : index
    %97 = vector.load %arg14[%c253, %c0_63] : memref<529x32xf32, #tpu.memory_space<vmem>>, vector<23x32xf32>
    tpu.vector_store %arg14[%c253, %c0_63], %96 {strides = array<i32>} : memref<529x32xf32, #tpu.memory_space<vmem>>, vector<23x32xf32>,
    %c1152 = arith.constant 1152 : index
    %c0_64 = arith.constant 0 : index
    %98 = tpu.strided_load %arg13[%c1152, %c0_64] {strides = array<i32: 2, 1>} : memref<2208x32xf32, #tpu.memory_space<vmem>>, vector<23x32xf32>
    %c1153 = arith.constant 1153 : index
    %c0_65 = arith.constant 0 : index
    %99 = tpu.strided_load %arg13[%c1153, %c0_65] {strides = array<i32: 2, 1>} : memref<2208x32xf32, #tpu.memory_space<vmem>>, vector<23x32xf32>
    %c1200 = arith.constant 1200 : index
    %c0_66 = arith.constant 0 : index
    %100 = tpu.strided_load %arg13[%c1200, %c0_66] {strides = array<i32: 2, 1>} : memref<2208x32xf32, #tpu.memory_space<vmem>>, vector<23x32xf32>
    %c1201 = arith.constant 1201 : index
    %c0_67 = arith.constant 0 : index
    %101 = tpu.strided_load %arg13[%c1201, %c0_67] {strides = array<i32: 2, 1>} : memref<2208x32xf32, #tpu.memory_space<vmem>>, vector<23x32xf32>
    %102 = arith.maximumf %98, %99 : vector<23x32xf32>
    %103 = arith.maximumf %100, %101 : vector<23x32xf32>
    %104 = arith.maximumf %102, %103 : vector<23x32xf32>
    %c276 = arith.constant 276 : index
    %c0_68 = arith.constant 0 : index
    %105 = vector.load %arg14[%c276, %c0_68] : memref<529x32xf32, #tpu.memory_space<vmem>>, vector<23x32xf32>
    tpu.vector_store %arg14[%c276, %c0_68], %104 {strides = array<i32>} : memref<529x32xf32, #tpu.memory_space<vmem>>, vector<23x32xf32>,
    %c1248 = arith.constant 1248 : index
    %c0_69 = arith.constant 0 : index
    %106 = tpu.strided_load %arg13[%c1248, %c0_69] {strides = array<i32: 2, 1>} : memref<2208x32xf32, #tpu.memory_space<vmem>>, vector<23x32xf32>
    %c1249 = arith.constant 1249 : index
    %c0_70 = arith.constant 0 : index
    %107 = tpu.strided_load %arg13[%c1249, %c0_70] {strides = array<i32: 2, 1>} : memref<2208x32xf32, #tpu.memory_space<vmem>>, vector<23x32xf32>
    %c1296 = arith.constant 1296 : index
    %c0_71 = arith.constant 0 : index
    %108 = tpu.strided_load %arg13[%c1296, %c0_71] {strides = array<i32: 2, 1>} : memref<2208x32xf32, #tpu.memory_space<vmem>>, vector<23x32xf32>
    %c1297 = arith.constant 1297 : index
    %c0_72 = arith.constant 0 : index
    %109 = tpu.strided_load %arg13[%c1297, %c0_72] {strides = array<i32: 2, 1>} : memref<2208x32xf32, #tpu.memory_space<vmem>>, vector<23x32xf32>
    %110 = arith.maximumf %106, %107 : vector<23x32xf32>
    %111 = arith.maximumf %108, %109 : vector<23x32xf32>
    %112 = arith.maximumf %110, %111 : vector<23x32xf32>
    %c299 = arith.constant 299 : index
    %c0_73 = arith.constant 0 : index
    %113 = vector.load %arg14[%c299, %c0_73] : memref<529x32xf32, #tpu.memory_space<vmem>>, vector<23x32xf32>
    tpu.vector_store %arg14[%c299, %c0_73], %112 {strides = array<i32>} : memref<529x32xf32, #tpu.memory_space<vmem>>, vector<23x32xf32>,
    %c1344 = arith.constant 1344 : index
    %c0_74 = arith.constant 0 : index
    %114 = tpu.strided_load %arg13[%c1344, %c0_74] {strides = array<i32: 2, 1>} : memref<2208x32xf32, #tpu.memory_space<vmem>>, vector<23x32xf32>
    %c1345 = arith.constant 1345 : index
    %c0_75 = arith.constant 0 : index
    %115 = tpu.strided_load %arg13[%c1345, %c0_75] {strides = array<i32: 2, 1>} : memref<2208x32xf32, #tpu.memory_space<vmem>>, vector<23x32xf32>
    %c1392 = arith.constant 1392 : index
    %c0_76 = arith.constant 0 : index
    %116 = tpu.strided_load %arg13[%c1392, %c0_76] {strides = array<i32: 2, 1>} : memref<2208x32xf32, #tpu.memory_space<vmem>>, vector<23x32xf32>
    %c1393 = arith.constant 1393 : index
    %c0_77 = arith.constant 0 : index
    %117 = tpu.strided_load %arg13[%c1393, %c0_77] {strides = array<i32: 2, 1>} : memref<2208x32xf32, #tpu.memory_space<vmem>>, vector<23x32xf32>
    %118 = arith.maximumf %114, %115 : vector<23x32xf32>
    %119 = arith.maximumf %116, %117 : vector<23x32xf32>
    %120 = arith.maximumf %118, %119 : vector<23x32xf32>
    %c322 = arith.constant 322 : index
    %c0_78 = arith.constant 0 : index
    %121 = vector.load %arg14[%c322, %c0_78] : memref<529x32xf32, #tpu.memory_space<vmem>>, vector<23x32xf32>
    tpu.vector_store %arg14[%c322, %c0_78], %120 {strides = array<i32>} : memref<529x32xf32, #tpu.memory_space<vmem>>, vector<23x32xf32>,
    %c1440 = arith.constant 1440 : index
    %c0_79 = arith.constant 0 : index
    %122 = tpu.strided_load %arg13[%c1440, %c0_79] {strides = array<i32: 2, 1>} : memref<2208x32xf32, #tpu.memory_space<vmem>>, vector<23x32xf32>
    %c1441 = arith.constant 1441 : index
    %c0_80 = arith.constant 0 : index
    %123 = tpu.strided_load %arg13[%c1441, %c0_80] {strides = array<i32: 2, 1>} : memref<2208x32xf32, #tpu.memory_space<vmem>>, vector<23x32xf32>
    %c1488 = arith.constant 1488 : index
    %c0_81 = arith.constant 0 : index
    %124 = tpu.strided_load %arg13[%c1488, %c0_81] {strides = array<i32: 2, 1>} : memref<2208x32xf32, #tpu.memory_space<vmem>>, vector<23x32xf32>
    %c1489 = arith.constant 1489 : index
    %c0_82 = arith.constant 0 : index
    %125 = tpu.strided_load %arg13[%c1489, %c0_82] {strides = array<i32: 2, 1>} : memref<2208x32xf32, #tpu.memory_space<vmem>>, vector<23x32xf32>
    %126 = arith.maximumf %122, %123 : vector<23x32xf32>
    %127 = arith.maximumf %124, %125 : vector<23x32xf32>
    %128 = arith.maximumf %126, %127 : vector<23x32xf32>
    %c345 = arith.constant 345 : index
    %c0_83 = arith.constant 0 : index
    %129 = vector.load %arg14[%c345, %c0_83] : memref<529x32xf32, #tpu.memory_space<vmem>>, vector<23x32xf32>
    tpu.vector_store %arg14[%c345, %c0_83], %128 {strides = array<i32>} : memref<529x32xf32, #tpu.memory_space<vmem>>, vector<23x32xf32>,
    %c1536 = arith.constant 1536 : index
    %c0_84 = arith.constant 0 : index
    %130 = tpu.strided_load %arg13[%c1536, %c0_84] {strides = array<i32: 2, 1>} : memref<2208x32xf32, #tpu.memory_space<vmem>>, vector<23x32xf32>
    %c1537 = arith.constant 1537 : index
    %c0_85 = arith.constant 0 : index
    %131 = tpu.strided_load %arg13[%c1537, %c0_85] {strides = array<i32: 2, 1>} : memref<2208x32xf32, #tpu.memory_space<vmem>>, vector<23x32xf32>
    %c1584 = arith.constant 1584 : index
    %c0_86 = arith.constant 0 : index
    %132 = tpu.strided_load %arg13[%c1584, %c0_86] {strides = array<i32: 2, 1>} : memref<2208x32xf32, #tpu.memory_space<vmem>>, vector<23x32xf32>
    %c1585 = arith.constant 1585 : index
    %c0_87 = arith.constant 0 : index
    %133 = tpu.strided_load %arg13[%c1585, %c0_87] {strides = array<i32: 2, 1>} : memref<2208x32xf32, #tpu.memory_space<vmem>>, vector<23x32xf32>
    %134 = arith.maximumf %130, %131 : vector<23x32xf32>
    %135 = arith.maximumf %132, %133 : vector<23x32xf32>
    %136 = arith.maximumf %134, %135 : vector<23x32xf32>
    %c368 = arith.constant 368 : index
    %c0_88 = arith.constant 0 : index
    %137 = vector.load %arg14[%c368, %c0_88] : memref<529x32xf32, #tpu.memory_space<vmem>>, vector<23x32xf32>
    tpu.vector_store %arg14[%c368, %c0_88], %136 {strides = array<i32>} : memref<529x32xf32, #tpu.memory_space<vmem>>, vector<23x32xf32>,
    %c1632 = arith.constant 1632 : index
    %c0_89 = arith.constant 0 : index
    %138 = tpu.strided_load %arg13[%c1632, %c0_89] {strides = array<i32: 2, 1>} : memref<2208x32xf32, #tpu.memory_space<vmem>>, vector<23x32xf32>
    %c1633 = arith.constant 1633 : index
    %c0_90 = arith.constant 0 : index
    %139 = tpu.strided_load %arg13[%c1633, %c0_90] {strides = array<i32: 2, 1>} : memref<2208x32xf32, #tpu.memory_space<vmem>>, vector<23x32xf32>
    %c1680 = arith.constant 1680 : index
    %c0_91 = arith.constant 0 : index
    %140 = tpu.strided_load %arg13[%c1680, %c0_91] {strides = array<i32: 2, 1>} : memref<2208x32xf32, #tpu.memory_space<vmem>>, vector<23x32xf32>
    %c1681 = arith.constant 1681 : index
    %c0_92 = arith.constant 0 : index
    %141 = tpu.strided_load %arg13[%c1681, %c0_92] {strides = array<i32: 2, 1>} : memref<2208x32xf32, #tpu.memory_space<vmem>>, vector<23x32xf32>
    %142 = arith.maximumf %138, %139 : vector<23x32xf32>
    %143 = arith.maximumf %140, %141 : vector<23x32xf32>
    %144 = arith.maximumf %142, %143 : vector<23x32xf32>
    %c391 = arith.constant 391 : index
    %c0_93 = arith.constant 0 : index
    %145 = vector.load %arg14[%c391, %c0_93] : memref<529x32xf32, #tpu.memory_space<vmem>>, vector<23x32xf32>
    tpu.vector_store %arg14[%c391, %c0_93], %144 {strides = array<i32>} : memref<529x32xf32, #tpu.memory_space<vmem>>, vector<23x32xf32>,
    %c1728 = arith.constant 1728 : index
    %c0_94 = arith.constant 0 : index
    %146 = tpu.strided_load %arg13[%c1728, %c0_94] {strides = array<i32: 2, 1>} : memref<2208x32xf32, #tpu.memory_space<vmem>>, vector<23x32xf32>
    %c1729 = arith.constant 1729 : index
    %c0_95 = arith.constant 0 : index
    %147 = tpu.strided_load %arg13[%c1729, %c0_95] {strides = array<i32: 2, 1>} : memref<2208x32xf32, #tpu.memory_space<vmem>>, vector<23x32xf32>
    %c1776 = arith.constant 1776 : index
    %c0_96 = arith.constant 0 : index
    %148 = tpu.strided_load %arg13[%c1776, %c0_96] {strides = array<i32: 2, 1>} : memref<2208x32xf32, #tpu.memory_space<vmem>>, vector<23x32xf32>
    %c1777 = arith.constant 1777 : index
    %c0_97 = arith.constant 0 : index
    %149 = tpu.strided_load %arg13[%c1777, %c0_97] {strides = array<i32: 2, 1>} : memref<2208x32xf32, #tpu.memory_space<vmem>>, vector<23x32xf32>
    %150 = arith.maximumf %146, %147 : vector<23x32xf32>
    %151 = arith.maximumf %148, %149 : vector<23x32xf32>
    %152 = arith.maximumf %150, %151 : vector<23x32xf32>
    %c414 = arith.constant 414 : index
    %c0_98 = arith.constant 0 : index
    %153 = vector.load %arg14[%c414, %c0_98] : memref<529x32xf32, #tpu.memory_space<vmem>>, vector<23x32xf32>
    tpu.vector_store %arg14[%c414, %c0_98], %152 {strides = array<i32>} : memref<529x32xf32, #tpu.memory_space<vmem>>, vector<23x32xf32>,
    %c1824 = arith.constant 1824 : index
    %c0_99 = arith.constant 0 : index
    %154 = tpu.strided_load %arg13[%c1824, %c0_99] {strides = array<i32: 2, 1>} : memref<2208x32xf32, #tpu.memory_space<vmem>>, vector<23x32xf32>
    %c1825 = arith.constant 1825 : index
    %c0_100 = arith.constant 0 : index
    %155 = tpu.strided_load %arg13[%c1825, %c0_100] {strides = array<i32: 2, 1>} : memref<2208x32xf32, #tpu.memory_space<vmem>>, vector<23x32xf32>
    %c1872 = arith.constant 1872 : index
    %c0_101 = arith.constant 0 : index
    %156 = tpu.strided_load %arg13[%c1872, %c0_101] {strides = array<i32: 2, 1>} : memref<2208x32xf32, #tpu.memory_space<vmem>>, vector<23x32xf32>
    %c1873 = arith.constant 1873 : index
    %c0_102 = arith.constant 0 : index
    %157 = tpu.strided_load %arg13[%c1873, %c0_102] {strides = array<i32: 2, 1>} : memref<2208x32xf32, #tpu.memory_space<vmem>>, vector<23x32xf32>
    %158 = arith.maximumf %154, %155 : vector<23x32xf32>
    %159 = arith.maximumf %156, %157 : vector<23x32xf32>
    %160 = arith.maximumf %158, %159 : vector<23x32xf32>
    %c437 = arith.constant 437 : index
    %c0_103 = arith.constant 0 : index
    %161 = vector.load %arg14[%c437, %c0_103] : memref<529x32xf32, #tpu.memory_space<vmem>>, vector<23x32xf32>
    tpu.vector_store %arg14[%c437, %c0_103], %160 {strides = array<i32>} : memref<529x32xf32, #tpu.memory_space<vmem>>, vector<23x32xf32>,
    %c1920 = arith.constant 1920 : index
    %c0_104 = arith.constant 0 : index
    %162 = tpu.strided_load %arg13[%c1920, %c0_104] {strides = array<i32: 2, 1>} : memref<2208x32xf32, #tpu.memory_space<vmem>>, vector<23x32xf32>
    %c1921 = arith.constant 1921 : index
    %c0_105 = arith.constant 0 : index
    %163 = tpu.strided_load %arg13[%c1921, %c0_105] {strides = array<i32: 2, 1>} : memref<2208x32xf32, #tpu.memory_space<vmem>>, vector<23x32xf32>
    %c1968 = arith.constant 1968 : index
    %c0_106 = arith.constant 0 : index
    %164 = tpu.strided_load %arg13[%c1968, %c0_106] {strides = array<i32: 2, 1>} : memref<2208x32xf32, #tpu.memory_space<vmem>>, vector<23x32xf32>
    %c1969 = arith.constant 1969 : index
    %c0_107 = arith.constant 0 : index
    %165 = tpu.strided_load %arg13[%c1969, %c0_107] {strides = array<i32: 2, 1>} : memref<2208x32xf32, #tpu.memory_space<vmem>>, vector<23x32xf32>
    %166 = arith.maximumf %162, %163 : vector<23x32xf32>
    %167 = arith.maximumf %164, %165 : vector<23x32xf32>
    %168 = arith.maximumf %166, %167 : vector<23x32xf32>
    %c460 = arith.constant 460 : index
    %c0_108 = arith.constant 0 : index
    %169 = vector.load %arg14[%c460, %c0_108] : memref<529x32xf32, #tpu.memory_space<vmem>>, vector<23x32xf32>
    tpu.vector_store %arg14[%c460, %c0_108], %168 {strides = array<i32>} : memref<529x32xf32, #tpu.memory_space<vmem>>, vector<23x32xf32>,
    %c2016 = arith.constant 2016 : index
    %c0_109 = arith.constant 0 : index
    %170 = tpu.strided_load %arg13[%c2016, %c0_109] {strides = array<i32: 2, 1>} : memref<2208x32xf32, #tpu.memory_space<vmem>>, vector<23x32xf32>
    %c2017 = arith.constant 2017 : index
    %c0_110 = arith.constant 0 : index
    %171 = tpu.strided_load %arg13[%c2017, %c0_110] {strides = array<i32: 2, 1>} : memref<2208x32xf32, #tpu.memory_space<vmem>>, vector<23x32xf32>
    %c2064 = arith.constant 2064 : index
    %c0_111 = arith.constant 0 : index
    %172 = tpu.strided_load %arg13[%c2064, %c0_111] {strides = array<i32: 2, 1>} : memref<2208x32xf32, #tpu.memory_space<vmem>>, vector<23x32xf32>
    %c2065 = arith.constant 2065 : index
    %c0_112 = arith.constant 0 : index
    %173 = tpu.strided_load %arg13[%c2065, %c0_112] {strides = array<i32: 2, 1>} : memref<2208x32xf32, #tpu.memory_space<vmem>>, vector<23x32xf32>
    %174 = arith.maximumf %170, %171 : vector<23x32xf32>
    %175 = arith.maximumf %172, %173 : vector<23x32xf32>
    %176 = arith.maximumf %174, %175 : vector<23x32xf32>
    %c483 = arith.constant 483 : index
    %c0_113 = arith.constant 0 : index
    %177 = vector.load %arg14[%c483, %c0_113] : memref<529x32xf32, #tpu.memory_space<vmem>>, vector<23x32xf32>
    tpu.vector_store %arg14[%c483, %c0_113], %176 {strides = array<i32>} : memref<529x32xf32, #tpu.memory_space<vmem>>, vector<23x32xf32>,
    %c2112 = arith.constant 2112 : index
    %c0_114 = arith.constant 0 : index
    %178 = tpu.strided_load %arg13[%c2112, %c0_114] {strides = array<i32: 2, 1>} : memref<2208x32xf32, #tpu.memory_space<vmem>>, vector<23x32xf32>
    %c2113 = arith.constant 2113 : index
    %c0_115 = arith.constant 0 : index
    %179 = tpu.strided_load %arg13[%c2113, %c0_115] {strides = array<i32: 2, 1>} : memref<2208x32xf32, #tpu.memory_space<vmem>>, vector<23x32xf32>
    %c2160 = arith.constant 2160 : index
    %c0_116 = arith.constant 0 : index
    %180 = tpu.strided_load %arg13[%c2160, %c0_116] {strides = array<i32: 2, 1>} : memref<2208x32xf32, #tpu.memory_space<vmem>>, vector<23x32xf32>
    %c2161 = arith.constant 2161 : index
    %c0_117 = arith.constant 0 : index
    %181 = tpu.strided_load %arg13[%c2161, %c0_117] {strides = array<i32: 2, 1>} : memref<2208x32xf32, #tpu.memory_space<vmem>>, vector<23x32xf32>
    %182 = arith.maximumf %178, %179 : vector<23x32xf32>
    %183 = arith.maximumf %180, %181 : vector<23x32xf32>
    %184 = arith.maximumf %182, %183 : vector<23x32xf32>
    %c506 = arith.constant 506 : index
    %c0_118 = arith.constant 0 : index
    %185 = vector.load %arg14[%c506, %c0_118] : memref<529x32xf32, #tpu.memory_space<vmem>>, vector<23x32xf32>
    tpu.vector_store %arg14[%c506, %c0_118], %184 {strides = array<i32>} : memref<529x32xf32, #tpu.memory_space<vmem>>, vector<23x32xf32>,
    %c0_119 = arith.constant 0 : index
    %c0_120 = arith.constant 0 : index
    %186 = vector.load %arg5[%c0_119, %c0_120] : memref<1x64xf32, #tpu.memory_space<vmem>>, vector<1x64xf32>
    %c0_i32_121 = arith.constant 0 : i32
    %c19_i32 = arith.constant 19 : i32
    %187 = arith.addi %c0_i32_121, %c19_i32 : i32
    %c1_i32_122 = arith.constant 1 : i32
    scf.for %arg19 = %c0_i32_121 to %187 step %c1_i32_122  : i32 {
      %cst_239 = arith.constant 0.000000e+00 : f32
      %313 = vector.broadcast %cst_239 : f32 to vector<19x64xf32>
      %c0_i32_240 = arith.constant 0 : i32
      %314 = arith.addi %arg19, %c0_i32_240 : i32
      %c23_i32 = arith.constant 23 : i32
      %315 = arith.muli %314, %c23_i32 : i32
      %c0_i32_241 = arith.constant 0 : i32
      %316 = arith.addi %315, %c0_i32_241 : i32
      %317 = arith.index_cast %316 : i32 to index
      %c0_242 = arith.constant 0 : index
      %318 = vector.load %arg14[%317, %c0_242] : memref<529x32xf32, #tpu.memory_space<vmem>>, vector<19x32xf32>
      %c0_243 = arith.constant 0 : index
      %c0_244 = arith.constant 0 : index
      %319 = vector.load %arg4[%c0_243, %c0_244] : memref<800x64xf32, #tpu.memory_space<vmem>>, vector<32x64xf32>
      %cst_245 = arith.constant dense<0.000000e+00> : vector<19x64xf32>
      %320 = tpu.matmul %318, %319, %cst_245 {dimension_numbers = #tpu.dot_dimension_numbers<[1], [0], [0], [1], [0, 0, 1, 1], [], []>} : vector<19x32xf32>, vector<32x64xf32>, vector<19x64xf32> -> vector<19x64xf32>
      %321 = arith.addf %313, %320 : vector<19x64xf32>
      %c1_i32_246 = arith.constant 1 : i32
      %322 = arith.addi %315, %c1_i32_246 : i32
      %323 = arith.index_cast %322 : i32 to index
      %c0_247 = arith.constant 0 : index
      %324 = vector.load %arg14[%323, %c0_247] : memref<529x32xf32, #tpu.memory_space<vmem>>, vector<19x32xf32>
      %c32 = arith.constant 32 : index
      %c0_248 = arith.constant 0 : index
      %325 = vector.load %arg4[%c32, %c0_248] : memref<800x64xf32, #tpu.memory_space<vmem>>, vector<32x64xf32>
      %cst_249 = arith.constant dense<0.000000e+00> : vector<19x64xf32>
      %326 = tpu.matmul %324, %325, %cst_249 {dimension_numbers = #tpu.dot_dimension_numbers<[1], [0], [0], [1], [0, 0, 1, 1], [], []>} : vector<19x32xf32>, vector<32x64xf32>, vector<19x64xf32> -> vector<19x64xf32>
      %327 = arith.addf %321, %326 : vector<19x64xf32>
      %c2_i32 = arith.constant 2 : i32
      %328 = arith.addi %315, %c2_i32 : i32
      %329 = arith.index_cast %328 : i32 to index
      %c0_250 = arith.constant 0 : index
      %330 = vector.load %arg14[%329, %c0_250] : memref<529x32xf32, #tpu.memory_space<vmem>>, vector<19x32xf32>
      %c64 = arith.constant 64 : index
      %c0_251 = arith.constant 0 : index
      %331 = vector.load %arg4[%c64, %c0_251] : memref<800x64xf32, #tpu.memory_space<vmem>>, vector<32x64xf32>
      %cst_252 = arith.constant dense<0.000000e+00> : vector<19x64xf32>
      %332 = tpu.matmul %330, %331, %cst_252 {dimension_numbers = #tpu.dot_dimension_numbers<[1], [0], [0], [1], [0, 0, 1, 1], [], []>} : vector<19x32xf32>, vector<32x64xf32>, vector<19x64xf32> -> vector<19x64xf32>
      %333 = arith.addf %327, %332 : vector<19x64xf32>
      %c3_i32 = arith.constant 3 : i32
      %334 = arith.addi %315, %c3_i32 : i32
      %335 = arith.index_cast %334 : i32 to index
      %c0_253 = arith.constant 0 : index
      %336 = vector.load %arg14[%335, %c0_253] : memref<529x32xf32, #tpu.memory_space<vmem>>, vector<19x32xf32>
      %c96_254 = arith.constant 96 : index
      %c0_255 = arith.constant 0 : index
      %337 = vector.load %arg4[%c96_254, %c0_255] : memref<800x64xf32, #tpu.memory_space<vmem>>, vector<32x64xf32>
      %cst_256 = arith.constant dense<0.000000e+00> : vector<19x64xf32>
      %338 = tpu.matmul %336, %337, %cst_256 {dimension_numbers = #tpu.dot_dimension_numbers<[1], [0], [0], [1], [0, 0, 1, 1], [], []>} : vector<19x32xf32>, vector<32x64xf32>, vector<19x64xf32> -> vector<19x64xf32>
      %339 = arith.addf %333, %338 : vector<19x64xf32>
      %c4_i32 = arith.constant 4 : i32
      %340 = arith.addi %315, %c4_i32 : i32
      %341 = arith.index_cast %340 : i32 to index
      %c0_257 = arith.constant 0 : index
      %342 = vector.load %arg14[%341, %c0_257] : memref<529x32xf32, #tpu.memory_space<vmem>>, vector<19x32xf32>
      %c128_258 = arith.constant 128 : index
      %c0_259 = arith.constant 0 : index
      %343 = vector.load %arg4[%c128_258, %c0_259] : memref<800x64xf32, #tpu.memory_space<vmem>>, vector<32x64xf32>
      %cst_260 = arith.constant dense<0.000000e+00> : vector<19x64xf32>
      %344 = tpu.matmul %342, %343, %cst_260 {dimension_numbers = #tpu.dot_dimension_numbers<[1], [0], [0], [1], [0, 0, 1, 1], [], []>} : vector<19x32xf32>, vector<32x64xf32>, vector<19x64xf32> -> vector<19x64xf32>
      %345 = arith.addf %339, %344 : vector<19x64xf32>
      %c1_i32_261 = arith.constant 1 : i32
      %346 = arith.addi %arg19, %c1_i32_261 : i32
      %c23_i32_262 = arith.constant 23 : i32
      %347 = arith.muli %346, %c23_i32_262 : i32
      %c0_i32_263 = arith.constant 0 : i32
      %348 = arith.addi %347, %c0_i32_263 : i32
      %349 = arith.index_cast %348 : i32 to index
      %c0_264 = arith.constant 0 : index
      %350 = vector.load %arg14[%349, %c0_264] : memref<529x32xf32, #tpu.memory_space<vmem>>, vector<19x32xf32>
      %c160 = arith.constant 160 : index
      %c0_265 = arith.constant 0 : index
      %351 = vector.load %arg4[%c160, %c0_265] : memref<800x64xf32, #tpu.memory_space<vmem>>, vector<32x64xf32>
      %cst_266 = arith.constant dense<0.000000e+00> : vector<19x64xf32>
      %352 = tpu.matmul %350, %351, %cst_266 {dimension_numbers = #tpu.dot_dimension_numbers<[1], [0], [0], [1], [0, 0, 1, 1], [], []>} : vector<19x32xf32>, vector<32x64xf32>, vector<19x64xf32> -> vector<19x64xf32>
      %353 = arith.addf %345, %352 : vector<19x64xf32>
      %c1_i32_267 = arith.constant 1 : i32
      %354 = arith.addi %347, %c1_i32_267 : i32
      %355 = arith.index_cast %354 : i32 to index
      %c0_268 = arith.constant 0 : index
      %356 = vector.load %arg14[%355, %c0_268] : memref<529x32xf32, #tpu.memory_space<vmem>>, vector<19x32xf32>
      %c192_269 = arith.constant 192 : index
      %c0_270 = arith.constant 0 : index
      %357 = vector.load %arg4[%c192_269, %c0_270] : memref<800x64xf32, #tpu.memory_space<vmem>>, vector<32x64xf32>
      %cst_271 = arith.constant dense<0.000000e+00> : vector<19x64xf32>
      %358 = tpu.matmul %356, %357, %cst_271 {dimension_numbers = #tpu.dot_dimension_numbers<[1], [0], [0], [1], [0, 0, 1, 1], [], []>} : vector<19x32xf32>, vector<32x64xf32>, vector<19x64xf32> -> vector<19x64xf32>
      %359 = arith.addf %353, %358 : vector<19x64xf32>
      %c2_i32_272 = arith.constant 2 : i32
      %360 = arith.addi %347, %c2_i32_272 : i32
      %361 = arith.index_cast %360 : i32 to index
      %c0_273 = arith.constant 0 : index
      %362 = vector.load %arg14[%361, %c0_273] : memref<529x32xf32, #tpu.memory_space<vmem>>, vector<19x32xf32>
      %c224 = arith.constant 224 : index
      %c0_274 = arith.constant 0 : index
      %363 = vector.load %arg4[%c224, %c0_274] : memref<800x64xf32, #tpu.memory_space<vmem>>, vector<32x64xf32>
      %cst_275 = arith.constant dense<0.000000e+00> : vector<19x64xf32>
      %364 = tpu.matmul %362, %363, %cst_275 {dimension_numbers = #tpu.dot_dimension_numbers<[1], [0], [0], [1], [0, 0, 1, 1], [], []>} : vector<19x32xf32>, vector<32x64xf32>, vector<19x64xf32> -> vector<19x64xf32>
      %365 = arith.addf %359, %364 : vector<19x64xf32>
      %c3_i32_276 = arith.constant 3 : i32
      %366 = arith.addi %347, %c3_i32_276 : i32
      %367 = arith.index_cast %366 : i32 to index
      %c0_277 = arith.constant 0 : index
      %368 = vector.load %arg14[%367, %c0_277] : memref<529x32xf32, #tpu.memory_space<vmem>>, vector<19x32xf32>
      %c256_278 = arith.constant 256 : index
      %c0_279 = arith.constant 0 : index
      %369 = vector.load %arg4[%c256_278, %c0_279] : memref<800x64xf32, #tpu.memory_space<vmem>>, vector<32x64xf32>
      %cst_280 = arith.constant dense<0.000000e+00> : vector<19x64xf32>
      %370 = tpu.matmul %368, %369, %cst_280 {dimension_numbers = #tpu.dot_dimension_numbers<[1], [0], [0], [1], [0, 0, 1, 1], [], []>} : vector<19x32xf32>, vector<32x64xf32>, vector<19x64xf32> -> vector<19x64xf32>
      %371 = arith.addf %365, %370 : vector<19x64xf32>
      %c4_i32_281 = arith.constant 4 : i32
      %372 = arith.addi %347, %c4_i32_281 : i32
      %373 = arith.index_cast %372 : i32 to index
      %c0_282 = arith.constant 0 : index
      %374 = vector.load %arg14[%373, %c0_282] : memref<529x32xf32, #tpu.memory_space<vmem>>, vector<19x32xf32>
      %c288_283 = arith.constant 288 : index
      %c0_284 = arith.constant 0 : index
      %375 = vector.load %arg4[%c288_283, %c0_284] : memref<800x64xf32, #tpu.memory_space<vmem>>, vector<32x64xf32>
      %cst_285 = arith.constant dense<0.000000e+00> : vector<19x64xf32>
      %376 = tpu.matmul %374, %375, %cst_285 {dimension_numbers = #tpu.dot_dimension_numbers<[1], [0], [0], [1], [0, 0, 1, 1], [], []>} : vector<19x32xf32>, vector<32x64xf32>, vector<19x64xf32> -> vector<19x64xf32>
      %377 = arith.addf %371, %376 : vector<19x64xf32>
      %c2_i32_286 = arith.constant 2 : i32
      %378 = arith.addi %arg19, %c2_i32_286 : i32
      %c23_i32_287 = arith.constant 23 : i32
      %379 = arith.muli %378, %c23_i32_287 : i32
      %c0_i32_288 = arith.constant 0 : i32
      %380 = arith.addi %379, %c0_i32_288 : i32
      %381 = arith.index_cast %380 : i32 to index
      %c0_289 = arith.constant 0 : index
      %382 = vector.load %arg14[%381, %c0_289] : memref<529x32xf32, #tpu.memory_space<vmem>>, vector<19x32xf32>
      %c320 = arith.constant 320 : index
      %c0_290 = arith.constant 0 : index
      %383 = vector.load %arg4[%c320, %c0_290] : memref<800x64xf32, #tpu.memory_space<vmem>>, vector<32x64xf32>
      %cst_291 = arith.constant dense<0.000000e+00> : vector<19x64xf32>
      %384 = tpu.matmul %382, %383, %cst_291 {dimension_numbers = #tpu.dot_dimension_numbers<[1], [0], [0], [1], [0, 0, 1, 1], [], []>} : vector<19x32xf32>, vector<32x64xf32>, vector<19x64xf32> -> vector<19x64xf32>
      %385 = arith.addf %377, %384 : vector<19x64xf32>
      %c1_i32_292 = arith.constant 1 : i32
      %386 = arith.addi %379, %c1_i32_292 : i32
      %387 = arith.index_cast %386 : i32 to index
      %c0_293 = arith.constant 0 : index
      %388 = vector.load %arg14[%387, %c0_293] : memref<529x32xf32, #tpu.memory_space<vmem>>, vector<19x32xf32>
      %c352 = arith.constant 352 : index
      %c0_294 = arith.constant 0 : index
      %389 = vector.load %arg4[%c352, %c0_294] : memref<800x64xf32, #tpu.memory_space<vmem>>, vector<32x64xf32>
      %cst_295 = arith.constant dense<0.000000e+00> : vector<19x64xf32>
      %390 = tpu.matmul %388, %389, %cst_295 {dimension_numbers = #tpu.dot_dimension_numbers<[1], [0], [0], [1], [0, 0, 1, 1], [], []>} : vector<19x32xf32>, vector<32x64xf32>, vector<19x64xf32> -> vector<19x64xf32>
      %391 = arith.addf %385, %390 : vector<19x64xf32>
      %c2_i32_296 = arith.constant 2 : i32
      %392 = arith.addi %379, %c2_i32_296 : i32
      %393 = arith.index_cast %392 : i32 to index
      %c0_297 = arith.constant 0 : index
      %394 = vector.load %arg14[%393, %c0_297] : memref<529x32xf32, #tpu.memory_space<vmem>>, vector<19x32xf32>
      %c384_298 = arith.constant 384 : index
      %c0_299 = arith.constant 0 : index
      %395 = vector.load %arg4[%c384_298, %c0_299] : memref<800x64xf32, #tpu.memory_space<vmem>>, vector<32x64xf32>
      %cst_300 = arith.constant dense<0.000000e+00> : vector<19x64xf32>
      %396 = tpu.matmul %394, %395, %cst_300 {dimension_numbers = #tpu.dot_dimension_numbers<[1], [0], [0], [1], [0, 0, 1, 1], [], []>} : vector<19x32xf32>, vector<32x64xf32>, vector<19x64xf32> -> vector<19x64xf32>
      %397 = arith.addf %391, %396 : vector<19x64xf32>
      %c3_i32_301 = arith.constant 3 : i32
      %398 = arith.addi %379, %c3_i32_301 : i32
      %399 = arith.index_cast %398 : i32 to index
      %c0_302 = arith.constant 0 : index
      %400 = vector.load %arg14[%399, %c0_302] : memref<529x32xf32, #tpu.memory_space<vmem>>, vector<19x32xf32>
      %c416 = arith.constant 416 : index
      %c0_303 = arith.constant 0 : index
      %401 = vector.load %arg4[%c416, %c0_303] : memref<800x64xf32, #tpu.memory_space<vmem>>, vector<32x64xf32>
      %cst_304 = arith.constant dense<0.000000e+00> : vector<19x64xf32>
      %402 = tpu.matmul %400, %401, %cst_304 {dimension_numbers = #tpu.dot_dimension_numbers<[1], [0], [0], [1], [0, 0, 1, 1], [], []>} : vector<19x32xf32>, vector<32x64xf32>, vector<19x64xf32> -> vector<19x64xf32>
      %403 = arith.addf %397, %402 : vector<19x64xf32>
      %c4_i32_305 = arith.constant 4 : i32
      %404 = arith.addi %379, %c4_i32_305 : i32
      %405 = arith.index_cast %404 : i32 to index
      %c0_306 = arith.constant 0 : index
      %406 = vector.load %arg14[%405, %c0_306] : memref<529x32xf32, #tpu.memory_space<vmem>>, vector<19x32xf32>
      %c448 = arith.constant 448 : index
      %c0_307 = arith.constant 0 : index
      %407 = vector.load %arg4[%c448, %c0_307] : memref<800x64xf32, #tpu.memory_space<vmem>>, vector<32x64xf32>
      %cst_308 = arith.constant dense<0.000000e+00> : vector<19x64xf32>
      %408 = tpu.matmul %406, %407, %cst_308 {dimension_numbers = #tpu.dot_dimension_numbers<[1], [0], [0], [1], [0, 0, 1, 1], [], []>} : vector<19x32xf32>, vector<32x64xf32>, vector<19x64xf32> -> vector<19x64xf32>
      %409 = arith.addf %403, %408 : vector<19x64xf32>
      %c3_i32_309 = arith.constant 3 : i32
      %410 = arith.addi %arg19, %c3_i32_309 : i32
      %c23_i32_310 = arith.constant 23 : i32
      %411 = arith.muli %410, %c23_i32_310 : i32
      %c0_i32_311 = arith.constant 0 : i32
      %412 = arith.addi %411, %c0_i32_311 : i32
      %413 = arith.index_cast %412 : i32 to index
      %c0_312 = arith.constant 0 : index
      %414 = vector.load %arg14[%413, %c0_312] : memref<529x32xf32, #tpu.memory_space<vmem>>, vector<19x32xf32>
      %c480_313 = arith.constant 480 : index
      %c0_314 = arith.constant 0 : index
      %415 = vector.load %arg4[%c480_313, %c0_314] : memref<800x64xf32, #tpu.memory_space<vmem>>, vector<32x64xf32>
      %cst_315 = arith.constant dense<0.000000e+00> : vector<19x64xf32>
      %416 = tpu.matmul %414, %415, %cst_315 {dimension_numbers = #tpu.dot_dimension_numbers<[1], [0], [0], [1], [0, 0, 1, 1], [], []>} : vector<19x32xf32>, vector<32x64xf32>, vector<19x64xf32> -> vector<19x64xf32>
      %417 = arith.addf %409, %416 : vector<19x64xf32>
      %c1_i32_316 = arith.constant 1 : i32
      %418 = arith.addi %411, %c1_i32_316 : i32
      %419 = arith.index_cast %418 : i32 to index
      %c0_317 = arith.constant 0 : index
      %420 = vector.load %arg14[%419, %c0_317] : memref<529x32xf32, #tpu.memory_space<vmem>>, vector<19x32xf32>
      %c512 = arith.constant 512 : index
      %c0_318 = arith.constant 0 : index
      %421 = vector.load %arg4[%c512, %c0_318] : memref<800x64xf32, #tpu.memory_space<vmem>>, vector<32x64xf32>
      %cst_319 = arith.constant dense<0.000000e+00> : vector<19x64xf32>
      %422 = tpu.matmul %420, %421, %cst_319 {dimension_numbers = #tpu.dot_dimension_numbers<[1], [0], [0], [1], [0, 0, 1, 1], [], []>} : vector<19x32xf32>, vector<32x64xf32>, vector<19x64xf32> -> vector<19x64xf32>
      %423 = arith.addf %417, %422 : vector<19x64xf32>
      %c2_i32_320 = arith.constant 2 : i32
      %424 = arith.addi %411, %c2_i32_320 : i32
      %425 = arith.index_cast %424 : i32 to index
      %c0_321 = arith.constant 0 : index
      %426 = vector.load %arg14[%425, %c0_321] : memref<529x32xf32, #tpu.memory_space<vmem>>, vector<19x32xf32>
      %c544 = arith.constant 544 : index
      %c0_322 = arith.constant 0 : index
      %427 = vector.load %arg4[%c544, %c0_322] : memref<800x64xf32, #tpu.memory_space<vmem>>, vector<32x64xf32>
      %cst_323 = arith.constant dense<0.000000e+00> : vector<19x64xf32>
      %428 = tpu.matmul %426, %427, %cst_323 {dimension_numbers = #tpu.dot_dimension_numbers<[1], [0], [0], [1], [0, 0, 1, 1], [], []>} : vector<19x32xf32>, vector<32x64xf32>, vector<19x64xf32> -> vector<19x64xf32>
      %429 = arith.addf %423, %428 : vector<19x64xf32>
      %c3_i32_324 = arith.constant 3 : i32
      %430 = arith.addi %411, %c3_i32_324 : i32
      %431 = arith.index_cast %430 : i32 to index
      %c0_325 = arith.constant 0 : index
      %432 = vector.load %arg14[%431, %c0_325] : memref<529x32xf32, #tpu.memory_space<vmem>>, vector<19x32xf32>
      %c576_326 = arith.constant 576 : index
      %c0_327 = arith.constant 0 : index
      %433 = vector.load %arg4[%c576_326, %c0_327] : memref<800x64xf32, #tpu.memory_space<vmem>>, vector<32x64xf32>
      %cst_328 = arith.constant dense<0.000000e+00> : vector<19x64xf32>
      %434 = tpu.matmul %432, %433, %cst_328 {dimension_numbers = #tpu.dot_dimension_numbers<[1], [0], [0], [1], [0, 0, 1, 1], [], []>} : vector<19x32xf32>, vector<32x64xf32>, vector<19x64xf32> -> vector<19x64xf32>
      %435 = arith.addf %429, %434 : vector<19x64xf32>
      %c4_i32_329 = arith.constant 4 : i32
      %436 = arith.addi %411, %c4_i32_329 : i32
      %437 = arith.index_cast %436 : i32 to index
      %c0_330 = arith.constant 0 : index
      %438 = vector.load %arg14[%437, %c0_330] : memref<529x32xf32, #tpu.memory_space<vmem>>, vector<19x32xf32>
      %c608 = arith.constant 608 : index
      %c0_331 = arith.constant 0 : index
      %439 = vector.load %arg4[%c608, %c0_331] : memref<800x64xf32, #tpu.memory_space<vmem>>, vector<32x64xf32>
      %cst_332 = arith.constant dense<0.000000e+00> : vector<19x64xf32>
      %440 = tpu.matmul %438, %439, %cst_332 {dimension_numbers = #tpu.dot_dimension_numbers<[1], [0], [0], [1], [0, 0, 1, 1], [], []>} : vector<19x32xf32>, vector<32x64xf32>, vector<19x64xf32> -> vector<19x64xf32>
      %441 = arith.addf %435, %440 : vector<19x64xf32>
      %c4_i32_333 = arith.constant 4 : i32
      %442 = arith.addi %arg19, %c4_i32_333 : i32
      %c23_i32_334 = arith.constant 23 : i32
      %443 = arith.muli %442, %c23_i32_334 : i32
      %c0_i32_335 = arith.constant 0 : i32
      %444 = arith.addi %443, %c0_i32_335 : i32
      %445 = arith.index_cast %444 : i32 to index
      %c0_336 = arith.constant 0 : index
      %446 = vector.load %arg14[%445, %c0_336] : memref<529x32xf32, #tpu.memory_space<vmem>>, vector<19x32xf32>
      %c640 = arith.constant 640 : index
      %c0_337 = arith.constant 0 : index
      %447 = vector.load %arg4[%c640, %c0_337] : memref<800x64xf32, #tpu.memory_space<vmem>>, vector<32x64xf32>
      %cst_338 = arith.constant dense<0.000000e+00> : vector<19x64xf32>
      %448 = tpu.matmul %446, %447, %cst_338 {dimension_numbers = #tpu.dot_dimension_numbers<[1], [0], [0], [1], [0, 0, 1, 1], [], []>} : vector<19x32xf32>, vector<32x64xf32>, vector<19x64xf32> -> vector<19x64xf32>
      %449 = arith.addf %441, %448 : vector<19x64xf32>
      %c1_i32_339 = arith.constant 1 : i32
      %450 = arith.addi %443, %c1_i32_339 : i32
      %451 = arith.index_cast %450 : i32 to index
      %c0_340 = arith.constant 0 : index
      %452 = vector.load %arg14[%451, %c0_340] : memref<529x32xf32, #tpu.memory_space<vmem>>, vector<19x32xf32>
      %c672_341 = arith.constant 672 : index
      %c0_342 = arith.constant 0 : index
      %453 = vector.load %arg4[%c672_341, %c0_342] : memref<800x64xf32, #tpu.memory_space<vmem>>, vector<32x64xf32>
      %cst_343 = arith.constant dense<0.000000e+00> : vector<19x64xf32>
      %454 = tpu.matmul %452, %453, %cst_343 {dimension_numbers = #tpu.dot_dimension_numbers<[1], [0], [0], [1], [0, 0, 1, 1], [], []>} : vector<19x32xf32>, vector<32x64xf32>, vector<19x64xf32> -> vector<19x64xf32>
      %455 = arith.addf %449, %454 : vector<19x64xf32>
      %c2_i32_344 = arith.constant 2 : i32
      %456 = arith.addi %443, %c2_i32_344 : i32
      %457 = arith.index_cast %456 : i32 to index
      %c0_345 = arith.constant 0 : index
      %458 = vector.load %arg14[%457, %c0_345] : memref<529x32xf32, #tpu.memory_space<vmem>>, vector<19x32xf32>
      %c704 = arith.constant 704 : index
      %c0_346 = arith.constant 0 : index
      %459 = vector.load %arg4[%c704, %c0_346] : memref<800x64xf32, #tpu.memory_space<vmem>>, vector<32x64xf32>
      %cst_347 = arith.constant dense<0.000000e+00> : vector<19x64xf32>
      %460 = tpu.matmul %458, %459, %cst_347 {dimension_numbers = #tpu.dot_dimension_numbers<[1], [0], [0], [1], [0, 0, 1, 1], [], []>} : vector<19x32xf32>, vector<32x64xf32>, vector<19x64xf32> -> vector<19x64xf32>
      %461 = arith.addf %455, %460 : vector<19x64xf32>
      %c3_i32_348 = arith.constant 3 : i32
      %462 = arith.addi %443, %c3_i32_348 : i32
      %463 = arith.index_cast %462 : i32 to index
      %c0_349 = arith.constant 0 : index
      %464 = vector.load %arg14[%463, %c0_349] : memref<529x32xf32, #tpu.memory_space<vmem>>, vector<19x32xf32>
      %c736 = arith.constant 736 : index
      %c0_350 = arith.constant 0 : index
      %465 = vector.load %arg4[%c736, %c0_350] : memref<800x64xf32, #tpu.memory_space<vmem>>, vector<32x64xf32>
      %cst_351 = arith.constant dense<0.000000e+00> : vector<19x64xf32>
      %466 = tpu.matmul %464, %465, %cst_351 {dimension_numbers = #tpu.dot_dimension_numbers<[1], [0], [0], [1], [0, 0, 1, 1], [], []>} : vector<19x32xf32>, vector<32x64xf32>, vector<19x64xf32> -> vector<19x64xf32>
      %467 = arith.addf %461, %466 : vector<19x64xf32>
      %c4_i32_352 = arith.constant 4 : i32
      %468 = arith.addi %443, %c4_i32_352 : i32
      %469 = arith.index_cast %468 : i32 to index
      %c0_353 = arith.constant 0 : index
      %470 = vector.load %arg14[%469, %c0_353] : memref<529x32xf32, #tpu.memory_space<vmem>>, vector<19x32xf32>
      %c768_354 = arith.constant 768 : index
      %c0_355 = arith.constant 0 : index
      %471 = vector.load %arg4[%c768_354, %c0_355] : memref<800x64xf32, #tpu.memory_space<vmem>>, vector<32x64xf32>
      %cst_356 = arith.constant dense<0.000000e+00> : vector<19x64xf32>
      %472 = tpu.matmul %470, %471, %cst_356 {dimension_numbers = #tpu.dot_dimension_numbers<[1], [0], [0], [1], [0, 0, 1, 1], [], []>} : vector<19x32xf32>, vector<32x64xf32>, vector<19x64xf32> -> vector<19x64xf32>
      %473 = arith.addf %467, %472 : vector<19x64xf32>
      %c24_i32 = arith.constant 24 : i32
      %474 = arith.muli %arg19, %c24_i32 : i32
      %475 = tpu.assume_multiple %474, 8 : i32
      %476 = vector.broadcast %186 : vector<1x64xf32> to vector<19x64xf32>
      %477 = arith.addf %473, %476 : vector<19x64xf32>
      %cst_357 = arith.constant 0.000000e+00 : f32
      %478 = vector.broadcast %cst_357 : f32 to vector<19x64xf32>
      %479 = arith.maximumf %477, %478 : vector<19x64xf32>
      %480 = arith.index_cast %475 : i32 to index
      %c0_358 = arith.constant 0 : index
      %481 = vector.load %arg15[%480, %c0_358] : memref<456x64xf32, #tpu.memory_space<vmem>>, vector<19x64xf32>
      tpu.vector_store %arg15[%480, %c0_358], %479 {strides = array<i32>} : memref<456x64xf32, #tpu.memory_space<vmem>>, vector<19x64xf32>,
    }
    %c19_i32_123 = arith.constant 19 : i32
    %c0_124 = arith.constant 0 : index
    %c0_125 = arith.constant 0 : index
    %188 = tpu.strided_load %arg15[%c0_124, %c0_125] {strides = array<i32: 2, 1>} : memref<456x64xf32, #tpu.memory_space<vmem>>, vector<9x64xf32>
    %c1_126 = arith.constant 1 : index
    %c0_127 = arith.constant 0 : index
    %189 = tpu.strided_load %arg15[%c1_126, %c0_127] {strides = array<i32: 2, 1>} : memref<456x64xf32, #tpu.memory_space<vmem>>, vector<9x64xf32>
    %c24 = arith.constant 24 : index
    %c0_128 = arith.constant 0 : index
    %190 = tpu.strided_load %arg15[%c24, %c0_128] {strides = array<i32: 2, 1>} : memref<456x64xf32, #tpu.memory_space<vmem>>, vector<9x64xf32>
    %c25 = arith.constant 25 : index
    %c0_129 = arith.constant 0 : index
    %191 = tpu.strided_load %arg15[%c25, %c0_129] {strides = array<i32: 2, 1>} : memref<456x64xf32, #tpu.memory_space<vmem>>, vector<9x64xf32>
    %192 = arith.maximumf %188, %189 : vector<9x64xf32>
    %193 = arith.maximumf %190, %191 : vector<9x64xf32>
    %194 = arith.maximumf %192, %193 : vector<9x64xf32>
    %c0_130 = arith.constant 0 : index
    %c0_131 = arith.constant 0 : index
    %195 = vector.load %arg16[%c0_130, %c0_131] : memref<81x64xf32, #tpu.memory_space<vmem>>, vector<9x64xf32>
    tpu.vector_store %arg16[%c0_130, %c0_131], %194 {strides = array<i32>} : memref<81x64xf32, #tpu.memory_space<vmem>>, vector<9x64xf32>,
    %c48_132 = arith.constant 48 : index
    %c0_133 = arith.constant 0 : index
    %196 = tpu.strided_load %arg15[%c48_132, %c0_133] {strides = array<i32: 2, 1>} : memref<456x64xf32, #tpu.memory_space<vmem>>, vector<9x64xf32>
    %c49_134 = arith.constant 49 : index
    %c0_135 = arith.constant 0 : index
    %197 = tpu.strided_load %arg15[%c49_134, %c0_135] {strides = array<i32: 2, 1>} : memref<456x64xf32, #tpu.memory_space<vmem>>, vector<9x64xf32>
    %c72 = arith.constant 72 : index
    %c0_136 = arith.constant 0 : index
    %198 = tpu.strided_load %arg15[%c72, %c0_136] {strides = array<i32: 2, 1>} : memref<456x64xf32, #tpu.memory_space<vmem>>, vector<9x64xf32>
    %c73 = arith.constant 73 : index
    %c0_137 = arith.constant 0 : index
    %199 = tpu.strided_load %arg15[%c73, %c0_137] {strides = array<i32: 2, 1>} : memref<456x64xf32, #tpu.memory_space<vmem>>, vector<9x64xf32>
    %200 = arith.maximumf %196, %197 : vector<9x64xf32>
    %201 = arith.maximumf %198, %199 : vector<9x64xf32>
    %202 = arith.maximumf %200, %201 : vector<9x64xf32>
    %c9 = arith.constant 9 : index
    %c0_138 = arith.constant 0 : index
    %203 = vector.load %arg16[%c9, %c0_138] : memref<81x64xf32, #tpu.memory_space<vmem>>, vector<9x64xf32>
    tpu.vector_store %arg16[%c9, %c0_138], %202 {strides = array<i32>} : memref<81x64xf32, #tpu.memory_space<vmem>>, vector<9x64xf32>,
    %c96_139 = arith.constant 96 : index
    %c0_140 = arith.constant 0 : index
    %204 = tpu.strided_load %arg15[%c96_139, %c0_140] {strides = array<i32: 2, 1>} : memref<456x64xf32, #tpu.memory_space<vmem>>, vector<9x64xf32>
    %c97_141 = arith.constant 97 : index
    %c0_142 = arith.constant 0 : index
    %205 = tpu.strided_load %arg15[%c97_141, %c0_142] {strides = array<i32: 2, 1>} : memref<456x64xf32, #tpu.memory_space<vmem>>, vector<9x64xf32>
    %c120 = arith.constant 120 : index
    %c0_143 = arith.constant 0 : index
    %206 = tpu.strided_load %arg15[%c120, %c0_143] {strides = array<i32: 2, 1>} : memref<456x64xf32, #tpu.memory_space<vmem>>, vector<9x64xf32>
    %c121 = arith.constant 121 : index
    %c0_144 = arith.constant 0 : index
    %207 = tpu.strided_load %arg15[%c121, %c0_144] {strides = array<i32: 2, 1>} : memref<456x64xf32, #tpu.memory_space<vmem>>, vector<9x64xf32>
    %208 = arith.maximumf %204, %205 : vector<9x64xf32>
    %209 = arith.maximumf %206, %207 : vector<9x64xf32>
    %210 = arith.maximumf %208, %209 : vector<9x64xf32>
    %c18 = arith.constant 18 : index
    %c0_145 = arith.constant 0 : index
    %211 = vector.load %arg16[%c18, %c0_145] : memref<81x64xf32, #tpu.memory_space<vmem>>, vector<9x64xf32>
    tpu.vector_store %arg16[%c18, %c0_145], %210 {strides = array<i32>} : memref<81x64xf32, #tpu.memory_space<vmem>>, vector<9x64xf32>,
    %c144_146 = arith.constant 144 : index
    %c0_147 = arith.constant 0 : index
    %212 = tpu.strided_load %arg15[%c144_146, %c0_147] {strides = array<i32: 2, 1>} : memref<456x64xf32, #tpu.memory_space<vmem>>, vector<9x64xf32>
    %c145_148 = arith.constant 145 : index
    %c0_149 = arith.constant 0 : index
    %213 = tpu.strided_load %arg15[%c145_148, %c0_149] {strides = array<i32: 2, 1>} : memref<456x64xf32, #tpu.memory_space<vmem>>, vector<9x64xf32>
    %c168 = arith.constant 168 : index
    %c0_150 = arith.constant 0 : index
    %214 = tpu.strided_load %arg15[%c168, %c0_150] {strides = array<i32: 2, 1>} : memref<456x64xf32, #tpu.memory_space<vmem>>, vector<9x64xf32>
    %c169 = arith.constant 169 : index
    %c0_151 = arith.constant 0 : index
    %215 = tpu.strided_load %arg15[%c169, %c0_151] {strides = array<i32: 2, 1>} : memref<456x64xf32, #tpu.memory_space<vmem>>, vector<9x64xf32>
    %216 = arith.maximumf %212, %213 : vector<9x64xf32>
    %217 = arith.maximumf %214, %215 : vector<9x64xf32>
    %218 = arith.maximumf %216, %217 : vector<9x64xf32>
    %c27 = arith.constant 27 : index
    %c0_152 = arith.constant 0 : index
    %219 = vector.load %arg16[%c27, %c0_152] : memref<81x64xf32, #tpu.memory_space<vmem>>, vector<9x64xf32>
    tpu.vector_store %arg16[%c27, %c0_152], %218 {strides = array<i32>} : memref<81x64xf32, #tpu.memory_space<vmem>>, vector<9x64xf32>,
    %c192_153 = arith.constant 192 : index
    %c0_154 = arith.constant 0 : index
    %220 = tpu.strided_load %arg15[%c192_153, %c0_154] {strides = array<i32: 2, 1>} : memref<456x64xf32, #tpu.memory_space<vmem>>, vector<9x64xf32>
    %c193_155 = arith.constant 193 : index
    %c0_156 = arith.constant 0 : index
    %221 = tpu.strided_load %arg15[%c193_155, %c0_156] {strides = array<i32: 2, 1>} : memref<456x64xf32, #tpu.memory_space<vmem>>, vector<9x64xf32>
    %c216 = arith.constant 216 : index
    %c0_157 = arith.constant 0 : index
    %222 = tpu.strided_load %arg15[%c216, %c0_157] {strides = array<i32: 2, 1>} : memref<456x64xf32, #tpu.memory_space<vmem>>, vector<9x64xf32>
    %c217 = arith.constant 217 : index
    %c0_158 = arith.constant 0 : index
    %223 = tpu.strided_load %arg15[%c217, %c0_158] {strides = array<i32: 2, 1>} : memref<456x64xf32, #tpu.memory_space<vmem>>, vector<9x64xf32>
    %224 = arith.maximumf %220, %221 : vector<9x64xf32>
    %225 = arith.maximumf %222, %223 : vector<9x64xf32>
    %226 = arith.maximumf %224, %225 : vector<9x64xf32>
    %c36 = arith.constant 36 : index
    %c0_159 = arith.constant 0 : index
    %227 = vector.load %arg16[%c36, %c0_159] : memref<81x64xf32, #tpu.memory_space<vmem>>, vector<9x64xf32>
    tpu.vector_store %arg16[%c36, %c0_159], %226 {strides = array<i32>} : memref<81x64xf32, #tpu.memory_space<vmem>>, vector<9x64xf32>,
    %c240_160 = arith.constant 240 : index
    %c0_161 = arith.constant 0 : index
    %228 = tpu.strided_load %arg15[%c240_160, %c0_161] {strides = array<i32: 2, 1>} : memref<456x64xf32, #tpu.memory_space<vmem>>, vector<9x64xf32>
    %c241_162 = arith.constant 241 : index
    %c0_163 = arith.constant 0 : index
    %229 = tpu.strided_load %arg15[%c241_162, %c0_163] {strides = array<i32: 2, 1>} : memref<456x64xf32, #tpu.memory_space<vmem>>, vector<9x64xf32>
    %c264 = arith.constant 264 : index
    %c0_164 = arith.constant 0 : index
    %230 = tpu.strided_load %arg15[%c264, %c0_164] {strides = array<i32: 2, 1>} : memref<456x64xf32, #tpu.memory_space<vmem>>, vector<9x64xf32>
    %c265 = arith.constant 265 : index
    %c0_165 = arith.constant 0 : index
    %231 = tpu.strided_load %arg15[%c265, %c0_165] {strides = array<i32: 2, 1>} : memref<456x64xf32, #tpu.memory_space<vmem>>, vector<9x64xf32>
    %232 = arith.maximumf %228, %229 : vector<9x64xf32>
    %233 = arith.maximumf %230, %231 : vector<9x64xf32>
    %234 = arith.maximumf %232, %233 : vector<9x64xf32>
    %c45 = arith.constant 45 : index
    %c0_166 = arith.constant 0 : index
    %235 = vector.load %arg16[%c45, %c0_166] : memref<81x64xf32, #tpu.memory_space<vmem>>, vector<9x64xf32>
    tpu.vector_store %arg16[%c45, %c0_166], %234 {strides = array<i32>} : memref<81x64xf32, #tpu.memory_space<vmem>>, vector<9x64xf32>,
    %c288_167 = arith.constant 288 : index
    %c0_168 = arith.constant 0 : index
    %236 = tpu.strided_load %arg15[%c288_167, %c0_168] {strides = array<i32: 2, 1>} : memref<456x64xf32, #tpu.memory_space<vmem>>, vector<9x64xf32>
    %c289_169 = arith.constant 289 : index
    %c0_170 = arith.constant 0 : index
    %237 = tpu.strided_load %arg15[%c289_169, %c0_170] {strides = array<i32: 2, 1>} : memref<456x64xf32, #tpu.memory_space<vmem>>, vector<9x64xf32>
    %c312 = arith.constant 312 : index
    %c0_171 = arith.constant 0 : index
    %238 = tpu.strided_load %arg15[%c312, %c0_171] {strides = array<i32: 2, 1>} : memref<456x64xf32, #tpu.memory_space<vmem>>, vector<9x64xf32>
    %c313 = arith.constant 313 : index
    %c0_172 = arith.constant 0 : index
    %239 = tpu.strided_load %arg15[%c313, %c0_172] {strides = array<i32: 2, 1>} : memref<456x64xf32, #tpu.memory_space<vmem>>, vector<9x64xf32>
    %240 = arith.maximumf %236, %237 : vector<9x64xf32>
    %241 = arith.maximumf %238, %239 : vector<9x64xf32>
    %242 = arith.maximumf %240, %241 : vector<9x64xf32>
    %c54 = arith.constant 54 : index
    %c0_173 = arith.constant 0 : index
    %243 = vector.load %arg16[%c54, %c0_173] : memref<81x64xf32, #tpu.memory_space<vmem>>, vector<9x64xf32>
    tpu.vector_store %arg16[%c54, %c0_173], %242 {strides = array<i32>} : memref<81x64xf32, #tpu.memory_space<vmem>>, vector<9x64xf32>,
    %c336_174 = arith.constant 336 : index
    %c0_175 = arith.constant 0 : index
    %244 = tpu.strided_load %arg15[%c336_174, %c0_175] {strides = array<i32: 2, 1>} : memref<456x64xf32, #tpu.memory_space<vmem>>, vector<9x64xf32>
    %c337_176 = arith.constant 337 : index
    %c0_177 = arith.constant 0 : index
    %245 = tpu.strided_load %arg15[%c337_176, %c0_177] {strides = array<i32: 2, 1>} : memref<456x64xf32, #tpu.memory_space<vmem>>, vector<9x64xf32>
    %c360 = arith.constant 360 : index
    %c0_178 = arith.constant 0 : index
    %246 = tpu.strided_load %arg15[%c360, %c0_178] {strides = array<i32: 2, 1>} : memref<456x64xf32, #tpu.memory_space<vmem>>, vector<9x64xf32>
    %c361 = arith.constant 361 : index
    %c0_179 = arith.constant 0 : index
    %247 = tpu.strided_load %arg15[%c361, %c0_179] {strides = array<i32: 2, 1>} : memref<456x64xf32, #tpu.memory_space<vmem>>, vector<9x64xf32>
    %248 = arith.maximumf %244, %245 : vector<9x64xf32>
    %249 = arith.maximumf %246, %247 : vector<9x64xf32>
    %250 = arith.maximumf %248, %249 : vector<9x64xf32>
    %c63 = arith.constant 63 : index
    %c0_180 = arith.constant 0 : index
    %251 = vector.load %arg16[%c63, %c0_180] : memref<81x64xf32, #tpu.memory_space<vmem>>, vector<9x64xf32>
    tpu.vector_store %arg16[%c63, %c0_180], %250 {strides = array<i32>} : memref<81x64xf32, #tpu.memory_space<vmem>>, vector<9x64xf32>,
    %c384_181 = arith.constant 384 : index
    %c0_182 = arith.constant 0 : index
    %252 = tpu.strided_load %arg15[%c384_181, %c0_182] {strides = array<i32: 2, 1>} : memref<456x64xf32, #tpu.memory_space<vmem>>, vector<9x64xf32>
    %c385_183 = arith.constant 385 : index
    %c0_184 = arith.constant 0 : index
    %253 = tpu.strided_load %arg15[%c385_183, %c0_184] {strides = array<i32: 2, 1>} : memref<456x64xf32, #tpu.memory_space<vmem>>, vector<9x64xf32>
    %c408 = arith.constant 408 : index
    %c0_185 = arith.constant 0 : index
    %254 = tpu.strided_load %arg15[%c408, %c0_185] {strides = array<i32: 2, 1>} : memref<456x64xf32, #tpu.memory_space<vmem>>, vector<9x64xf32>
    %c409 = arith.constant 409 : index
    %c0_186 = arith.constant 0 : index
    %255 = tpu.strided_load %arg15[%c409, %c0_186] {strides = array<i32: 2, 1>} : memref<456x64xf32, #tpu.memory_space<vmem>>, vector<9x64xf32>
    %256 = arith.maximumf %252, %253 : vector<9x64xf32>
    %257 = arith.maximumf %254, %255 : vector<9x64xf32>
    %258 = arith.maximumf %256, %257 : vector<9x64xf32>
    %c72_187 = arith.constant 72 : index
    %c0_188 = arith.constant 0 : index
    %259 = vector.load %arg16[%c72_187, %c0_188] : memref<81x64xf32, #tpu.memory_space<vmem>>, vector<9x64xf32>
    tpu.vector_store %arg16[%c72_187, %c0_188], %258 {strides = array<i32>} : memref<81x64xf32, #tpu.memory_space<vmem>>, vector<9x64xf32>,
    %c0_189 = arith.constant 0 : index
    %c0_190 = arith.constant 0 : index
    %260 = vector.load %arg7[%c0_189, %c0_190] : memref<1x128xf32, #tpu.memory_space<vmem>>, vector<1x128xf32>
    %c0_i32_191 = arith.constant 0 : i32
    %c5_i32 = arith.constant 5 : i32
    %261 = arith.addi %c0_i32_191, %c5_i32 : i32
    %c1_i32_192 = arith.constant 1 : i32
    scf.for %arg19 = %c0_i32_191 to %261 step %c1_i32_192  : i32 {
      %cst_239 = arith.constant 0.000000e+00 : f32
      %313 = vector.broadcast %cst_239 : f32 to vector<5x128xf32>
      %c0_i32_240 = arith.constant 0 : i32
      %314 = arith.addi %arg19, %c0_i32_240 : i32
      %c9_i32 = arith.constant 9 : i32
      %315 = arith.muli %314, %c9_i32 : i32
      %c0_i32_241 = arith.constant 0 : i32
      %316 = arith.addi %315, %c0_i32_241 : i32
      %317 = arith.index_cast %316 : i32 to index
      %c0_242 = arith.constant 0 : index
      %318 = vector.load %arg16[%317, %c0_242] : memref<81x64xf32, #tpu.memory_space<vmem>>, vector<5x64xf32>
      %c0_243 = arith.constant 0 : index
      %c0_244 = arith.constant 0 : index
      %319 = vector.load %arg6[%c0_243, %c0_244] : memref<1600x128xf32, #tpu.memory_space<vmem>>, vector<64x128xf32>
      %cst_245 = arith.constant dense<0.000000e+00> : vector<5x128xf32>
      %320 = tpu.matmul %318, %319, %cst_245 {dimension_numbers = #tpu.dot_dimension_numbers<[1], [0], [0], [1], [0, 0, 1, 1], [], []>} : vector<5x64xf32>, vector<64x128xf32>, vector<5x128xf32> -> vector<5x128xf32>
      %321 = arith.addf %313, %320 : vector<5x128xf32>
      %c1_i32_246 = arith.constant 1 : i32
      %322 = arith.addi %315, %c1_i32_246 : i32
      %323 = arith.index_cast %322 : i32 to index
      %c0_247 = arith.constant 0 : index
      %324 = vector.load %arg16[%323, %c0_247] : memref<81x64xf32, #tpu.memory_space<vmem>>, vector<5x64xf32>
      %c64 = arith.constant 64 : index
      %c0_248 = arith.constant 0 : index
      %325 = vector.load %arg6[%c64, %c0_248] : memref<1600x128xf32, #tpu.memory_space<vmem>>, vector<64x128xf32>
      %cst_249 = arith.constant dense<0.000000e+00> : vector<5x128xf32>
      %326 = tpu.matmul %324, %325, %cst_249 {dimension_numbers = #tpu.dot_dimension_numbers<[1], [0], [0], [1], [0, 0, 1, 1], [], []>} : vector<5x64xf32>, vector<64x128xf32>, vector<5x128xf32> -> vector<5x128xf32>
      %327 = arith.addf %321, %326 : vector<5x128xf32>
      %c2_i32 = arith.constant 2 : i32
      %328 = arith.addi %315, %c2_i32 : i32
      %329 = arith.index_cast %328 : i32 to index
      %c0_250 = arith.constant 0 : index
      %330 = vector.load %arg16[%329, %c0_250] : memref<81x64xf32, #tpu.memory_space<vmem>>, vector<5x64xf32>
      %c128_251 = arith.constant 128 : index
      %c0_252 = arith.constant 0 : index
      %331 = vector.load %arg6[%c128_251, %c0_252] : memref<1600x128xf32, #tpu.memory_space<vmem>>, vector<64x128xf32>
      %cst_253 = arith.constant dense<0.000000e+00> : vector<5x128xf32>
      %332 = tpu.matmul %330, %331, %cst_253 {dimension_numbers = #tpu.dot_dimension_numbers<[1], [0], [0], [1], [0, 0, 1, 1], [], []>} : vector<5x64xf32>, vector<64x128xf32>, vector<5x128xf32> -> vector<5x128xf32>
      %333 = arith.addf %327, %332 : vector<5x128xf32>
      %c3_i32 = arith.constant 3 : i32
      %334 = arith.addi %315, %c3_i32 : i32
      %335 = arith.index_cast %334 : i32 to index
      %c0_254 = arith.constant 0 : index
      %336 = vector.load %arg16[%335, %c0_254] : memref<81x64xf32, #tpu.memory_space<vmem>>, vector<5x64xf32>
      %c192_255 = arith.constant 192 : index
      %c0_256 = arith.constant 0 : index
      %337 = vector.load %arg6[%c192_255, %c0_256] : memref<1600x128xf32, #tpu.memory_space<vmem>>, vector<64x128xf32>
      %cst_257 = arith.constant dense<0.000000e+00> : vector<5x128xf32>
      %338 = tpu.matmul %336, %337, %cst_257 {dimension_numbers = #tpu.dot_dimension_numbers<[1], [0], [0], [1], [0, 0, 1, 1], [], []>} : vector<5x64xf32>, vector<64x128xf32>, vector<5x128xf32> -> vector<5x128xf32>
      %339 = arith.addf %333, %338 : vector<5x128xf32>
      %c4_i32 = arith.constant 4 : i32
      %340 = arith.addi %315, %c4_i32 : i32
      %341 = arith.index_cast %340 : i32 to index
      %c0_258 = arith.constant 0 : index
      %342 = vector.load %arg16[%341, %c0_258] : memref<81x64xf32, #tpu.memory_space<vmem>>, vector<5x64xf32>
      %c256_259 = arith.constant 256 : index
      %c0_260 = arith.constant 0 : index
      %343 = vector.load %arg6[%c256_259, %c0_260] : memref<1600x128xf32, #tpu.memory_space<vmem>>, vector<64x128xf32>
      %cst_261 = arith.constant dense<0.000000e+00> : vector<5x128xf32>
      %344 = tpu.matmul %342, %343, %cst_261 {dimension_numbers = #tpu.dot_dimension_numbers<[1], [0], [0], [1], [0, 0, 1, 1], [], []>} : vector<5x64xf32>, vector<64x128xf32>, vector<5x128xf32> -> vector<5x128xf32>
      %345 = arith.addf %339, %344 : vector<5x128xf32>
      %c1_i32_262 = arith.constant 1 : i32
      %346 = arith.addi %arg19, %c1_i32_262 : i32
      %c9_i32_263 = arith.constant 9 : i32
      %347 = arith.muli %346, %c9_i32_263 : i32
      %c0_i32_264 = arith.constant 0 : i32
      %348 = arith.addi %347, %c0_i32_264 : i32
      %349 = arith.index_cast %348 : i32 to index
      %c0_265 = arith.constant 0 : index
      %350 = vector.load %arg16[%349, %c0_265] : memref<81x64xf32, #tpu.memory_space<vmem>>, vector<5x64xf32>
      %c320 = arith.constant 320 : index
      %c0_266 = arith.constant 0 : index
      %351 = vector.load %arg6[%c320, %c0_266] : memref<1600x128xf32, #tpu.memory_space<vmem>>, vector<64x128xf32>
      %cst_267 = arith.constant dense<0.000000e+00> : vector<5x128xf32>
      %352 = tpu.matmul %350, %351, %cst_267 {dimension_numbers = #tpu.dot_dimension_numbers<[1], [0], [0], [1], [0, 0, 1, 1], [], []>} : vector<5x64xf32>, vector<64x128xf32>, vector<5x128xf32> -> vector<5x128xf32>
      %353 = arith.addf %345, %352 : vector<5x128xf32>
      %c1_i32_268 = arith.constant 1 : i32
      %354 = arith.addi %347, %c1_i32_268 : i32
      %355 = arith.index_cast %354 : i32 to index
      %c0_269 = arith.constant 0 : index
      %356 = vector.load %arg16[%355, %c0_269] : memref<81x64xf32, #tpu.memory_space<vmem>>, vector<5x64xf32>
      %c384_270 = arith.constant 384 : index
      %c0_271 = arith.constant 0 : index
      %357 = vector.load %arg6[%c384_270, %c0_271] : memref<1600x128xf32, #tpu.memory_space<vmem>>, vector<64x128xf32>
      %cst_272 = arith.constant dense<0.000000e+00> : vector<5x128xf32>
      %358 = tpu.matmul %356, %357, %cst_272 {dimension_numbers = #tpu.dot_dimension_numbers<[1], [0], [0], [1], [0, 0, 1, 1], [], []>} : vector<5x64xf32>, vector<64x128xf32>, vector<5x128xf32> -> vector<5x128xf32>
      %359 = arith.addf %353, %358 : vector<5x128xf32>
      %c2_i32_273 = arith.constant 2 : i32
      %360 = arith.addi %347, %c2_i32_273 : i32
      %361 = arith.index_cast %360 : i32 to index
      %c0_274 = arith.constant 0 : index
      %362 = vector.load %arg16[%361, %c0_274] : memref<81x64xf32, #tpu.memory_space<vmem>>, vector<5x64xf32>
      %c448 = arith.constant 448 : index
      %c0_275 = arith.constant 0 : index
      %363 = vector.load %arg6[%c448, %c0_275] : memref<1600x128xf32, #tpu.memory_space<vmem>>, vector<64x128xf32>
      %cst_276 = arith.constant dense<0.000000e+00> : vector<5x128xf32>
      %364 = tpu.matmul %362, %363, %cst_276 {dimension_numbers = #tpu.dot_dimension_numbers<[1], [0], [0], [1], [0, 0, 1, 1], [], []>} : vector<5x64xf32>, vector<64x128xf32>, vector<5x128xf32> -> vector<5x128xf32>
      %365 = arith.addf %359, %364 : vector<5x128xf32>
      %c3_i32_277 = arith.constant 3 : i32
      %366 = arith.addi %347, %c3_i32_277 : i32
      %367 = arith.index_cast %366 : i32 to index
      %c0_278 = arith.constant 0 : index
      %368 = vector.load %arg16[%367, %c0_278] : memref<81x64xf32, #tpu.memory_space<vmem>>, vector<5x64xf32>
      %c512 = arith.constant 512 : index
      %c0_279 = arith.constant 0 : index
      %369 = vector.load %arg6[%c512, %c0_279] : memref<1600x128xf32, #tpu.memory_space<vmem>>, vector<64x128xf32>
      %cst_280 = arith.constant dense<0.000000e+00> : vector<5x128xf32>
      %370 = tpu.matmul %368, %369, %cst_280 {dimension_numbers = #tpu.dot_dimension_numbers<[1], [0], [0], [1], [0, 0, 1, 1], [], []>} : vector<5x64xf32>, vector<64x128xf32>, vector<5x128xf32> -> vector<5x128xf32>
      %371 = arith.addf %365, %370 : vector<5x128xf32>
      %c4_i32_281 = arith.constant 4 : i32
      %372 = arith.addi %347, %c4_i32_281 : i32
      %373 = arith.index_cast %372 : i32 to index
      %c0_282 = arith.constant 0 : index
      %374 = vector.load %arg16[%373, %c0_282] : memref<81x64xf32, #tpu.memory_space<vmem>>, vector<5x64xf32>
      %c576_283 = arith.constant 576 : index
      %c0_284 = arith.constant 0 : index
      %375 = vector.load %arg6[%c576_283, %c0_284] : memref<1600x128xf32, #tpu.memory_space<vmem>>, vector<64x128xf32>
      %cst_285 = arith.constant dense<0.000000e+00> : vector<5x128xf32>
      %376 = tpu.matmul %374, %375, %cst_285 {dimension_numbers = #tpu.dot_dimension_numbers<[1], [0], [0], [1], [0, 0, 1, 1], [], []>} : vector<5x64xf32>, vector<64x128xf32>, vector<5x128xf32> -> vector<5x128xf32>
      %377 = arith.addf %371, %376 : vector<5x128xf32>
      %c2_i32_286 = arith.constant 2 : i32
      %378 = arith.addi %arg19, %c2_i32_286 : i32
      %c9_i32_287 = arith.constant 9 : i32
      %379 = arith.muli %378, %c9_i32_287 : i32
      %c0_i32_288 = arith.constant 0 : i32
      %380 = arith.addi %379, %c0_i32_288 : i32
      %381 = arith.index_cast %380 : i32 to index
      %c0_289 = arith.constant 0 : index
      %382 = vector.load %arg16[%381, %c0_289] : memref<81x64xf32, #tpu.memory_space<vmem>>, vector<5x64xf32>
      %c640 = arith.constant 640 : index
      %c0_290 = arith.constant 0 : index
      %383 = vector.load %arg6[%c640, %c0_290] : memref<1600x128xf32, #tpu.memory_space<vmem>>, vector<64x128xf32>
      %cst_291 = arith.constant dense<0.000000e+00> : vector<5x128xf32>
      %384 = tpu.matmul %382, %383, %cst_291 {dimension_numbers = #tpu.dot_dimension_numbers<[1], [0], [0], [1], [0, 0, 1, 1], [], []>} : vector<5x64xf32>, vector<64x128xf32>, vector<5x128xf32> -> vector<5x128xf32>
      %385 = arith.addf %377, %384 : vector<5x128xf32>
      %c1_i32_292 = arith.constant 1 : i32
      %386 = arith.addi %379, %c1_i32_292 : i32
      %387 = arith.index_cast %386 : i32 to index
      %c0_293 = arith.constant 0 : index
      %388 = vector.load %arg16[%387, %c0_293] : memref<81x64xf32, #tpu.memory_space<vmem>>, vector<5x64xf32>
      %c704 = arith.constant 704 : index
      %c0_294 = arith.constant 0 : index
      %389 = vector.load %arg6[%c704, %c0_294] : memref<1600x128xf32, #tpu.memory_space<vmem>>, vector<64x128xf32>
      %cst_295 = arith.constant dense<0.000000e+00> : vector<5x128xf32>
      %390 = tpu.matmul %388, %389, %cst_295 {dimension_numbers = #tpu.dot_dimension_numbers<[1], [0], [0], [1], [0, 0, 1, 1], [], []>} : vector<5x64xf32>, vector<64x128xf32>, vector<5x128xf32> -> vector<5x128xf32>
      %391 = arith.addf %385, %390 : vector<5x128xf32>
      %c2_i32_296 = arith.constant 2 : i32
      %392 = arith.addi %379, %c2_i32_296 : i32
      %393 = arith.index_cast %392 : i32 to index
      %c0_297 = arith.constant 0 : index
      %394 = vector.load %arg16[%393, %c0_297] : memref<81x64xf32, #tpu.memory_space<vmem>>, vector<5x64xf32>
      %c768_298 = arith.constant 768 : index
      %c0_299 = arith.constant 0 : index
      %395 = vector.load %arg6[%c768_298, %c0_299] : memref<1600x128xf32, #tpu.memory_space<vmem>>, vector<64x128xf32>
      %cst_300 = arith.constant dense<0.000000e+00> : vector<5x128xf32>
      %396 = tpu.matmul %394, %395, %cst_300 {dimension_numbers = #tpu.dot_dimension_numbers<[1], [0], [0], [1], [0, 0, 1, 1], [], []>} : vector<5x64xf32>, vector<64x128xf32>, vector<5x128xf32> -> vector<5x128xf32>
      %397 = arith.addf %391, %396 : vector<5x128xf32>
      %c3_i32_301 = arith.constant 3 : i32
      %398 = arith.addi %379, %c3_i32_301 : i32
      %399 = arith.index_cast %398 : i32 to index
      %c0_302 = arith.constant 0 : index
      %400 = vector.load %arg16[%399, %c0_302] : memref<81x64xf32, #tpu.memory_space<vmem>>, vector<5x64xf32>
      %c832 = arith.constant 832 : index
      %c0_303 = arith.constant 0 : index
      %401 = vector.load %arg6[%c832, %c0_303] : memref<1600x128xf32, #tpu.memory_space<vmem>>, vector<64x128xf32>
      %cst_304 = arith.constant dense<0.000000e+00> : vector<5x128xf32>
      %402 = tpu.matmul %400, %401, %cst_304 {dimension_numbers = #tpu.dot_dimension_numbers<[1], [0], [0], [1], [0, 0, 1, 1], [], []>} : vector<5x64xf32>, vector<64x128xf32>, vector<5x128xf32> -> vector<5x128xf32>
      %403 = arith.addf %397, %402 : vector<5x128xf32>
      %c4_i32_305 = arith.constant 4 : i32
      %404 = arith.addi %379, %c4_i32_305 : i32
      %405 = arith.index_cast %404 : i32 to index
      %c0_306 = arith.constant 0 : index
      %406 = vector.load %arg16[%405, %c0_306] : memref<81x64xf32, #tpu.memory_space<vmem>>, vector<5x64xf32>
      %c896 = arith.constant 896 : index
      %c0_307 = arith.constant 0 : index
      %407 = vector.load %arg6[%c896, %c0_307] : memref<1600x128xf32, #tpu.memory_space<vmem>>, vector<64x128xf32>
      %cst_308 = arith.constant dense<0.000000e+00> : vector<5x128xf32>
      %408 = tpu.matmul %406, %407, %cst_308 {dimension_numbers = #tpu.dot_dimension_numbers<[1], [0], [0], [1], [0, 0, 1, 1], [], []>} : vector<5x64xf32>, vector<64x128xf32>, vector<5x128xf32> -> vector<5x128xf32>
      %409 = arith.addf %403, %408 : vector<5x128xf32>
      %c3_i32_309 = arith.constant 3 : i32
      %410 = arith.addi %arg19, %c3_i32_309 : i32
      %c9_i32_310 = arith.constant 9 : i32
      %411 = arith.muli %410, %c9_i32_310 : i32
      %c0_i32_311 = arith.constant 0 : i32
      %412 = arith.addi %411, %c0_i32_311 : i32
      %413 = arith.index_cast %412 : i32 to index
      %c0_312 = arith.constant 0 : index
      %414 = vector.load %arg16[%413, %c0_312] : memref<81x64xf32, #tpu.memory_space<vmem>>, vector<5x64xf32>
      %c960_313 = arith.constant 960 : index
      %c0_314 = arith.constant 0 : index
      %415 = vector.load %arg6[%c960_313, %c0_314] : memref<1600x128xf32, #tpu.memory_space<vmem>>, vector<64x128xf32>
      %cst_315 = arith.constant dense<0.000000e+00> : vector<5x128xf32>
      %416 = tpu.matmul %414, %415, %cst_315 {dimension_numbers = #tpu.dot_dimension_numbers<[1], [0], [0], [1], [0, 0, 1, 1], [], []>} : vector<5x64xf32>, vector<64x128xf32>, vector<5x128xf32> -> vector<5x128xf32>
      %417 = arith.addf %409, %416 : vector<5x128xf32>
      %c1_i32_316 = arith.constant 1 : i32
      %418 = arith.addi %411, %c1_i32_316 : i32
      %419 = arith.index_cast %418 : i32 to index
      %c0_317 = arith.constant 0 : index
      %420 = vector.load %arg16[%419, %c0_317] : memref<81x64xf32, #tpu.memory_space<vmem>>, vector<5x64xf32>
      %c1024 = arith.constant 1024 : index
      %c0_318 = arith.constant 0 : index
      %421 = vector.load %arg6[%c1024, %c0_318] : memref<1600x128xf32, #tpu.memory_space<vmem>>, vector<64x128xf32>
      %cst_319 = arith.constant dense<0.000000e+00> : vector<5x128xf32>
      %422 = tpu.matmul %420, %421, %cst_319 {dimension_numbers = #tpu.dot_dimension_numbers<[1], [0], [0], [1], [0, 0, 1, 1], [], []>} : vector<5x64xf32>, vector<64x128xf32>, vector<5x128xf32> -> vector<5x128xf32>
      %423 = arith.addf %417, %422 : vector<5x128xf32>
      %c2_i32_320 = arith.constant 2 : i32
      %424 = arith.addi %411, %c2_i32_320 : i32
      %425 = arith.index_cast %424 : i32 to index
      %c0_321 = arith.constant 0 : index
      %426 = vector.load %arg16[%425, %c0_321] : memref<81x64xf32, #tpu.memory_space<vmem>>, vector<5x64xf32>
      %c1088 = arith.constant 1088 : index
      %c0_322 = arith.constant 0 : index
      %427 = vector.load %arg6[%c1088, %c0_322] : memref<1600x128xf32, #tpu.memory_space<vmem>>, vector<64x128xf32>
      %cst_323 = arith.constant dense<0.000000e+00> : vector<5x128xf32>
      %428 = tpu.matmul %426, %427, %cst_323 {dimension_numbers = #tpu.dot_dimension_numbers<[1], [0], [0], [1], [0, 0, 1, 1], [], []>} : vector<5x64xf32>, vector<64x128xf32>, vector<5x128xf32> -> vector<5x128xf32>
      %429 = arith.addf %423, %428 : vector<5x128xf32>
      %c3_i32_324 = arith.constant 3 : i32
      %430 = arith.addi %411, %c3_i32_324 : i32
      %431 = arith.index_cast %430 : i32 to index
      %c0_325 = arith.constant 0 : index
      %432 = vector.load %arg16[%431, %c0_325] : memref<81x64xf32, #tpu.memory_space<vmem>>, vector<5x64xf32>
      %c1152_326 = arith.constant 1152 : index
      %c0_327 = arith.constant 0 : index
      %433 = vector.load %arg6[%c1152_326, %c0_327] : memref<1600x128xf32, #tpu.memory_space<vmem>>, vector<64x128xf32>
      %cst_328 = arith.constant dense<0.000000e+00> : vector<5x128xf32>
      %434 = tpu.matmul %432, %433, %cst_328 {dimension_numbers = #tpu.dot_dimension_numbers<[1], [0], [0], [1], [0, 0, 1, 1], [], []>} : vector<5x64xf32>, vector<64x128xf32>, vector<5x128xf32> -> vector<5x128xf32>
      %435 = arith.addf %429, %434 : vector<5x128xf32>
      %c4_i32_329 = arith.constant 4 : i32
      %436 = arith.addi %411, %c4_i32_329 : i32
      %437 = arith.index_cast %436 : i32 to index
      %c0_330 = arith.constant 0 : index
      %438 = vector.load %arg16[%437, %c0_330] : memref<81x64xf32, #tpu.memory_space<vmem>>, vector<5x64xf32>
      %c1216 = arith.constant 1216 : index
      %c0_331 = arith.constant 0 : index
      %439 = vector.load %arg6[%c1216, %c0_331] : memref<1600x128xf32, #tpu.memory_space<vmem>>, vector<64x128xf32>
      %cst_332 = arith.constant dense<0.000000e+00> : vector<5x128xf32>
      %440 = tpu.matmul %438, %439, %cst_332 {dimension_numbers = #tpu.dot_dimension_numbers<[1], [0], [0], [1], [0, 0, 1, 1], [], []>} : vector<5x64xf32>, vector<64x128xf32>, vector<5x128xf32> -> vector<5x128xf32>
      %441 = arith.addf %435, %440 : vector<5x128xf32>
      %c4_i32_333 = arith.constant 4 : i32
      %442 = arith.addi %arg19, %c4_i32_333 : i32
      %c9_i32_334 = arith.constant 9 : i32
      %443 = arith.muli %442, %c9_i32_334 : i32
      %c0_i32_335 = arith.constant 0 : i32
      %444 = arith.addi %443, %c0_i32_335 : i32
      %445 = arith.index_cast %444 : i32 to index
      %c0_336 = arith.constant 0 : index
      %446 = vector.load %arg16[%445, %c0_336] : memref<81x64xf32, #tpu.memory_space<vmem>>, vector<5x64xf32>
      %c1280 = arith.constant 1280 : index
      %c0_337 = arith.constant 0 : index
      %447 = vector.load %arg6[%c1280, %c0_337] : memref<1600x128xf32, #tpu.memory_space<vmem>>, vector<64x128xf32>
      %cst_338 = arith.constant dense<0.000000e+00> : vector<5x128xf32>
      %448 = tpu.matmul %446, %447, %cst_338 {dimension_numbers = #tpu.dot_dimension_numbers<[1], [0], [0], [1], [0, 0, 1, 1], [], []>} : vector<5x64xf32>, vector<64x128xf32>, vector<5x128xf32> -> vector<5x128xf32>
      %449 = arith.addf %441, %448 : vector<5x128xf32>
      %c1_i32_339 = arith.constant 1 : i32
      %450 = arith.addi %443, %c1_i32_339 : i32
      %451 = arith.index_cast %450 : i32 to index
      %c0_340 = arith.constant 0 : index
      %452 = vector.load %arg16[%451, %c0_340] : memref<81x64xf32, #tpu.memory_space<vmem>>, vector<5x64xf32>
      %c1344_341 = arith.constant 1344 : index
      %c0_342 = arith.constant 0 : index
      %453 = vector.load %arg6[%c1344_341, %c0_342] : memref<1600x128xf32, #tpu.memory_space<vmem>>, vector<64x128xf32>
      %cst_343 = arith.constant dense<0.000000e+00> : vector<5x128xf32>
      %454 = tpu.matmul %452, %453, %cst_343 {dimension_numbers = #tpu.dot_dimension_numbers<[1], [0], [0], [1], [0, 0, 1, 1], [], []>} : vector<5x64xf32>, vector<64x128xf32>, vector<5x128xf32> -> vector<5x128xf32>
      %455 = arith.addf %449, %454 : vector<5x128xf32>
      %c2_i32_344 = arith.constant 2 : i32
      %456 = arith.addi %443, %c2_i32_344 : i32
      %457 = arith.index_cast %456 : i32 to index
      %c0_345 = arith.constant 0 : index
      %458 = vector.load %arg16[%457, %c0_345] : memref<81x64xf32, #tpu.memory_space<vmem>>, vector<5x64xf32>
      %c1408 = arith.constant 1408 : index
      %c0_346 = arith.constant 0 : index
      %459 = vector.load %arg6[%c1408, %c0_346] : memref<1600x128xf32, #tpu.memory_space<vmem>>, vector<64x128xf32>
      %cst_347 = arith.constant dense<0.000000e+00> : vector<5x128xf32>
      %460 = tpu.matmul %458, %459, %cst_347 {dimension_numbers = #tpu.dot_dimension_numbers<[1], [0], [0], [1], [0, 0, 1, 1], [], []>} : vector<5x64xf32>, vector<64x128xf32>, vector<5x128xf32> -> vector<5x128xf32>
      %461 = arith.addf %455, %460 : vector<5x128xf32>
      %c3_i32_348 = arith.constant 3 : i32
      %462 = arith.addi %443, %c3_i32_348 : i32
      %463 = arith.index_cast %462 : i32 to index
      %c0_349 = arith.constant 0 : index
      %464 = vector.load %arg16[%463, %c0_349] : memref<81x64xf32, #tpu.memory_space<vmem>>, vector<5x64xf32>
      %c1472 = arith.constant 1472 : index
      %c0_350 = arith.constant 0 : index
      %465 = vector.load %arg6[%c1472, %c0_350] : memref<1600x128xf32, #tpu.memory_space<vmem>>, vector<64x128xf32>
      %cst_351 = arith.constant dense<0.000000e+00> : vector<5x128xf32>
      %466 = tpu.matmul %464, %465, %cst_351 {dimension_numbers = #tpu.dot_dimension_numbers<[1], [0], [0], [1], [0, 0, 1, 1], [], []>} : vector<5x64xf32>, vector<64x128xf32>, vector<5x128xf32> -> vector<5x128xf32>
      %467 = arith.addf %461, %466 : vector<5x128xf32>
      %c4_i32_352 = arith.constant 4 : i32
      %468 = arith.addi %443, %c4_i32_352 : i32
      %469 = arith.index_cast %468 : i32 to index
      %c0_353 = arith.constant 0 : index
      %470 = vector.load %arg16[%469, %c0_353] : memref<81x64xf32, #tpu.memory_space<vmem>>, vector<5x64xf32>
      %c1536_354 = arith.constant 1536 : index
      %c0_355 = arith.constant 0 : index
      %471 = vector.load %arg6[%c1536_354, %c0_355] : memref<1600x128xf32, #tpu.memory_space<vmem>>, vector<64x128xf32>
      %cst_356 = arith.constant dense<0.000000e+00> : vector<5x128xf32>
      %472 = tpu.matmul %470, %471, %cst_356 {dimension_numbers = #tpu.dot_dimension_numbers<[1], [0], [0], [1], [0, 0, 1, 1], [], []>} : vector<5x64xf32>, vector<64x128xf32>, vector<5x128xf32> -> vector<5x128xf32>
      %473 = arith.addf %467, %472 : vector<5x128xf32>
      %c8_i32 = arith.constant 8 : i32
      %474 = arith.muli %arg19, %c8_i32 : i32
      %475 = tpu.assume_multiple %474, 8 : i32
      %476 = vector.broadcast %260 : vector<1x128xf32> to vector<5x128xf32>
      %477 = arith.addf %473, %476 : vector<5x128xf32>
      %cst_357 = arith.constant 0.000000e+00 : f32
      %478 = vector.broadcast %cst_357 : f32 to vector<5x128xf32>
      %479 = arith.maximumf %477, %478 : vector<5x128xf32>
      %480 = arith.index_cast %475 : i32 to index
      %c0_358 = arith.constant 0 : index
      %481 = vector.load %arg17[%480, %c0_358] : memref<40x128xf32, #tpu.memory_space<vmem>>, vector<5x128xf32>
      tpu.vector_store %arg17[%480, %c0_358], %479 {strides = array<i32>} : memref<40x128xf32, #tpu.memory_space<vmem>>, vector<5x128xf32>,
    }
    %c5_i32_193 = arith.constant 5 : i32
    %c0_194 = arith.constant 0 : index
    %c0_195 = arith.constant 0 : index
    %262 = tpu.strided_load %arg17[%c0_194, %c0_195] {strides = array<i32: 2, 1>} : memref<40x128xf32, #tpu.memory_space<vmem>>, vector<2x128xf32>
    %c1_196 = arith.constant 1 : index
    %c0_197 = arith.constant 0 : index
    %263 = tpu.strided_load %arg17[%c1_196, %c0_197] {strides = array<i32: 2, 1>} : memref<40x128xf32, #tpu.memory_space<vmem>>, vector<2x128xf32>
    %c8 = arith.constant 8 : index
    %c0_198 = arith.constant 0 : index
    %264 = tpu.strided_load %arg17[%c8, %c0_198] {strides = array<i32: 2, 1>} : memref<40x128xf32, #tpu.memory_space<vmem>>, vector<2x128xf32>
    %c9_199 = arith.constant 9 : index
    %c0_200 = arith.constant 0 : index
    %265 = tpu.strided_load %arg17[%c9_199, %c0_200] {strides = array<i32: 2, 1>} : memref<40x128xf32, #tpu.memory_space<vmem>>, vector<2x128xf32>
    %266 = arith.maximumf %262, %263 : vector<2x128xf32>
    %267 = arith.maximumf %264, %265 : vector<2x128xf32>
    %268 = arith.maximumf %266, %267 : vector<2x128xf32>
    %c0_201 = arith.constant 0 : index
    %c0_202 = arith.constant 0 : index
    %269 = vector.load %arg18[%c0_201, %c0_202] : memref<4x128xf32, #tpu.memory_space<vmem>>, vector<2x128xf32>
    tpu.vector_store %arg18[%c0_201, %c0_202], %268 {strides = array<i32>} : memref<4x128xf32, #tpu.memory_space<vmem>>, vector<2x128xf32>,
    %c16 = arith.constant 16 : index
    %c0_203 = arith.constant 0 : index
    %270 = tpu.strided_load %arg17[%c16, %c0_203] {strides = array<i32: 2, 1>} : memref<40x128xf32, #tpu.memory_space<vmem>>, vector<2x128xf32>
    %c17 = arith.constant 17 : index
    %c0_204 = arith.constant 0 : index
    %271 = tpu.strided_load %arg17[%c17, %c0_204] {strides = array<i32: 2, 1>} : memref<40x128xf32, #tpu.memory_space<vmem>>, vector<2x128xf32>
    %c24_205 = arith.constant 24 : index
    %c0_206 = arith.constant 0 : index
    %272 = tpu.strided_load %arg17[%c24_205, %c0_206] {strides = array<i32: 2, 1>} : memref<40x128xf32, #tpu.memory_space<vmem>>, vector<2x128xf32>
    %c25_207 = arith.constant 25 : index
    %c0_208 = arith.constant 0 : index
    %273 = tpu.strided_load %arg17[%c25_207, %c0_208] {strides = array<i32: 2, 1>} : memref<40x128xf32, #tpu.memory_space<vmem>>, vector<2x128xf32>
    %274 = arith.maximumf %270, %271 : vector<2x128xf32>
    %275 = arith.maximumf %272, %273 : vector<2x128xf32>
    %276 = arith.maximumf %274, %275 : vector<2x128xf32>
    %c2 = arith.constant 2 : index
    %c0_209 = arith.constant 0 : index
    %277 = vector.load %arg18[%c2, %c0_209] : memref<4x128xf32, #tpu.memory_space<vmem>>, vector<2x128xf32>
    tpu.vector_store %arg18[%c2, %c0_209], %276 {strides = array<i32>} : memref<4x128xf32, #tpu.memory_space<vmem>>, vector<2x128xf32>,
    %c0_210 = arith.constant 0 : index
    %c0_211 = arith.constant 0 : index
    %278 = vector.load %arg9[%c0_210, %c0_211] : memref<1x512xf32, #tpu.memory_space<vmem>>, vector<1x512xf32>
    %c0_212 = arith.constant 0 : index
    %c0_213 = arith.constant 0 : index
    %279 = vector.load %arg18[%c0_212, %c0_213] : memref<4x128xf32, #tpu.memory_space<vmem>>, vector<1x128xf32>
    %c0_214 = arith.constant 0 : index
    %c0_215 = arith.constant 0 : index
    %280 = vector.load %arg8[%c0_214, %c0_215] : memref<512x512xf32, #tpu.memory_space<vmem>>, vector<128x512xf32>
    %cst = arith.constant dense<0.000000e+00> : vector<1x512xf32>
    %281 = tpu.matmul %279, %280, %cst {dimension_numbers = #tpu.dot_dimension_numbers<[1], [0], [0], [1], [0, 0, 1, 1], [], []>} : vector<1x128xf32>, vector<128x512xf32>, vector<1x512xf32> -> vector<1x512xf32>
    %282 = arith.addf %278, %281 : vector<1x512xf32>
    %c1_216 = arith.constant 1 : index
    %c0_217 = arith.constant 0 : index
    %283 = vector.load %arg18[%c1_216, %c0_217] : memref<4x128xf32, #tpu.memory_space<vmem>>, vector<1x128xf32>
    %c128 = arith.constant 128 : index
    %c0_218 = arith.constant 0 : index
    %284 = vector.load %arg8[%c128, %c0_218] : memref<512x512xf32, #tpu.memory_space<vmem>>, vector<128x512xf32>
    %cst_219 = arith.constant dense<0.000000e+00> : vector<1x512xf32>
    %285 = tpu.matmul %283, %284, %cst_219 {dimension_numbers = #tpu.dot_dimension_numbers<[1], [0], [0], [1], [0, 0, 1, 1], [], []>} : vector<1x128xf32>, vector<128x512xf32>, vector<1x512xf32> -> vector<1x512xf32>
    %286 = arith.addf %282, %285 : vector<1x512xf32>
    %c2_220 = arith.constant 2 : index
    %c0_221 = arith.constant 0 : index
    %287 = vector.load %arg18[%c2_220, %c0_221] : memref<4x128xf32, #tpu.memory_space<vmem>>, vector<1x128xf32>
    %c256 = arith.constant 256 : index
    %c0_222 = arith.constant 0 : index
    %288 = vector.load %arg8[%c256, %c0_222] : memref<512x512xf32, #tpu.memory_space<vmem>>, vector<128x512xf32>
    %cst_223 = arith.constant dense<0.000000e+00> : vector<1x512xf32>
    %289 = tpu.matmul %287, %288, %cst_223 {dimension_numbers = #tpu.dot_dimension_numbers<[1], [0], [0], [1], [0, 0, 1, 1], [], []>} : vector<1x128xf32>, vector<128x512xf32>, vector<1x512xf32> -> vector<1x512xf32>
    %290 = arith.addf %286, %289 : vector<1x512xf32>
    %c3 = arith.constant 3 : index
    %c0_224 = arith.constant 0 : index
    %291 = vector.load %arg18[%c3, %c0_224] : memref<4x128xf32, #tpu.memory_space<vmem>>, vector<1x128xf32>
    %c384_225 = arith.constant 384 : index
    %c0_226 = arith.constant 0 : index
    %292 = vector.load %arg8[%c384_225, %c0_226] : memref<512x512xf32, #tpu.memory_space<vmem>>, vector<128x512xf32>
    %cst_227 = arith.constant dense<0.000000e+00> : vector<1x512xf32>
    %293 = tpu.matmul %291, %292, %cst_227 {dimension_numbers = #tpu.dot_dimension_numbers<[1], [0], [0], [1], [0, 0, 1, 1], [], []>} : vector<1x128xf32>, vector<128x512xf32>, vector<1x512xf32> -> vector<1x512xf32>
    %294 = arith.addf %290, %293 : vector<1x512xf32>
    %cst_228 = arith.constant 0.000000e+00 : f32
    %295 = vector.broadcast %cst_228 : f32 to vector<1x512xf32>
    %296 = arith.maximumf %294, %295 : vector<1x512xf32>
    %c0_229 = arith.constant 0 : index
    %c0_230 = arith.constant 0 : index
    %297 = vector.load %arg10[%c0_229, %c0_230] : memref<512x2xf32, #tpu.memory_space<vmem>>, vector<512x2xf32>
    %cst_231 = arith.constant dense<0.000000e+00> : vector<1x2xf32>
    %298 = tpu.matmul %296, %297, %cst_231 {dimension_numbers = #tpu.dot_dimension_numbers<[1], [0], [0], [1], [0, 0, 1, 1], [], []>} : vector<1x512xf32>, vector<512x2xf32>, vector<1x2xf32> -> vector<1x2xf32>
    %c0_232 = arith.constant 0 : index
    %c0_233 = arith.constant 0 : index
    %299 = vector.load %arg11[%c0_232, %c0_233] : memref<1x2xf32, #tpu.memory_space<vmem>>, vector<1x2xf32>
    %300 = arith.addf %298, %299 : vector<1x2xf32>
    %cst_234 = arith.constant dense<0xFF800000> : vector<1xf32>
    %301 = vector.multi_reduction <maximumf>, %300, %cst_234 [1] : vector<1x2xf32> to vector<1xf32>
    %302 = vector.shape_cast %301 : vector<1xf32> to vector<1x1xf32>
    %303 = vector.broadcast %302 : vector<1x1xf32> to vector<1x2xf32>
    %304 = arith.subf %300, %303 : vector<1x2xf32>
    %305 = math.exp %304 : vector<1x2xf32>
    %cst_235 = arith.constant dense<0.000000e+00> : vector<1xf32>
    %306 = vector.multi_reduction <add>, %305, %cst_235 [1] : vector<1x2xf32> to vector<1xf32>
    %307 = vector.shape_cast %306 : vector<1xf32> to vector<1x1xf32>
    %308 = vector.broadcast %307 : vector<1x1xf32> to vector<1x2xf32>
    %309 = arith.divf %305, %308 : vector<1x2xf32>
    %c0_236 = arith.constant 0 : index
    %c0_237 = arith.constant 0 : index
    %c0_238 = arith.constant 0 : index
    %310 = vector.load %arg12[%c0_236, %c0_237, %c0_238] : memref<1x1x2xf32, #tpu.memory_space<vmem>>, vector<1x1x2xf32>
    %311 = vector.shape_cast %310 : vector<1x1x2xf32> to vector<1x2xf32>
    %312 = vector.shape_cast %309 : vector<1x2xf32> to vector<1x1x2xf32>
    tpu.vector_store %arg12[%c0_236, %c0_237, %c0_238], %312 {strides = array<i32>} : memref<1x1x2xf32, #tpu.memory_space<vmem>>, vector<1x1x2xf32>,
    return
  }
  func.func @transform_0(%arg0: i32) -> (i32, i32, i32) {
    %c0_i32 = arith.constant 0 : i32
    %c0_i32_0 = arith.constant 0 : i32
    %c0_i32_1 = arith.constant 0 : i32
    return %arg0, %c0_i32, %c0_i32_0 : i32, i32, i32
  }
  func.func @transform_1(%arg0: i32) -> (i32, i32) {
    %c0_i32 = arith.constant 0 : i32
    %c0_i32_0 = arith.constant 0 : i32
    %c0_i32_1 = arith.constant 0 : i32
    return %c0_i32, %c0_i32_0 : i32, i32
  }
  func.func @transform_2(%arg0: i32) -> (i32, i32) {
    %c0_i32 = arith.constant 0 : i32
    %c0_i32_0 = arith.constant 0 : i32
    %c0_i32_1 = arith.constant 0 : i32
    return %c0_i32, %c0_i32_0 : i32, i32
  }
  func.func @transform_3(%arg0: i32) -> (i32, i32) {
    %c0_i32 = arith.constant 0 : i32
    %c0_i32_0 = arith.constant 0 : i32
    %c0_i32_1 = arith.constant 0 : i32
    return %c0_i32, %c0_i32_0 : i32, i32
  }
  func.func @transform_4(%arg0: i32) -> (i32, i32) {
    %c0_i32 = arith.constant 0 : i32
    %c0_i32_0 = arith.constant 0 : i32
    %c0_i32_1 = arith.constant 0 : i32
    return %c0_i32, %c0_i32_0 : i32, i32
  }
  func.func @transform_5(%arg0: i32) -> (i32, i32) {
    %c0_i32 = arith.constant 0 : i32
    %c0_i32_0 = arith.constant 0 : i32
    %c0_i32_1 = arith.constant 0 : i32
    return %c0_i32, %c0_i32_0 : i32, i32
  }
  func.func @transform_6(%arg0: i32) -> (i32, i32) {
    %c0_i32 = arith.constant 0 : i32
    %c0_i32_0 = arith.constant 0 : i32
    %c0_i32_1 = arith.constant 0 : i32
    return %c0_i32, %c0_i32_0 : i32, i32
  }
  func.func @transform_7(%arg0: i32) -> (i32, i32) {
    %c0_i32 = arith.constant 0 : i32
    %c0_i32_0 = arith.constant 0 : i32
    %c0_i32_1 = arith.constant 0 : i32
    return %c0_i32, %c0_i32_0 : i32, i32
  }
  func.func @transform_8(%arg0: i32) -> (i32, i32) {
    %c0_i32 = arith.constant 0 : i32
    %c0_i32_0 = arith.constant 0 : i32
    %c0_i32_1 = arith.constant 0 : i32
    return %c0_i32, %c0_i32_0 : i32, i32
  }
  func.func @transform_9(%arg0: i32) -> (i32, i32) {
    %c0_i32 = arith.constant 0 : i32
    %c0_i32_0 = arith.constant 0 : i32
    %c0_i32_1 = arith.constant 0 : i32
    return %c0_i32, %c0_i32_0 : i32, i32
  }
  func.func @transform_10(%arg0: i32) -> (i32, i32) {
    %c0_i32 = arith.constant 0 : i32
    %c0_i32_0 = arith.constant 0 : i32
    %c0_i32_1 = arith.constant 0 : i32
    return %c0_i32, %c0_i32_0 : i32, i32
  }
  func.func @transform_11(%arg0: i32) -> (i32, i32, i32) {
    %c0_i32 = arith.constant 0 : i32
    %c0_i32_0 = arith.constant 0 : i32
    %c0_i32_1 = arith.constant 0 : i32
    return %arg0, %c0_i32, %c0_i32_0 : i32, i32, i32
  }
}

</mosaic_0001>

<bundles_post_ra>
// kernel: forward.1
= control target key start
LH: loop header
LB: loop body
LE: loop exit
PB: predicated region body
PF: predicated region fallthrough
CT: control target
= control target key end

     0   :  { %s9372_s0 = inlined_call_operand.vmem [shape: f32[2,2500,1], index: 0, kind: input, shape index: {}]   ;;  %s9373_s1 = inlined_call_operand.vmem [shape: f32[25,32], index: 1, kind: input, shape index: {}]   ;;  %s9374_s2 = inlined_call_operand.vmem [shape: f32[1,32], index: 2, kind: input, shape index: {}]   ;;  %s9375_s3 = inlined_call_operand.vmem [shape: f32[800,64], index: 3, kind: input, shape index: {}]   ;;  %s9376_s4 = inlined_call_operand.vmem [shape: f32[1,64], index: 4, kind: input, shape index: {}]   ;;  %s9377_s5 = inlined_call_operand.vmem [shape: f32[1600,128], index: 5, kind: input, shape index: {}]   ;;  %s9378_s6 = inlined_call_operand.vmem [shape: f32[1,128], index: 6, kind: input, shape index: {}]   ;;  %s9379_s7 = inlined_call_operand.vmem [shape: f32[512,512], index: 7, kind: input, shape index: {}]   ;;  %s9380_s8 = inlined_call_operand.vmem [shape: f32[1,512], index: 8, kind: input, shape index: {}]   ;;  %s9381_s9 = inlined_call_operand.vmem [shape: f32[512,2], index: 9, kind: input, shape index: {}]   ;;  %s9382_s10 = inlined_call_operand.vmem [shape: f32[1,2], index: 10, kind: input, shape index: {}]   ;;  %s9383_s11 = inlined_call_operand.hbm [shape: f32[2,1,2], index: 11, kind: output, shape index: {}]  }
   0x1   :  { %9385 = sst [smem:[#allocation11_spill]] %s9372_s0 }
   0x2   :  { %9386 = sst [smem:[#allocation12_spill]] %s9373_s1 }
   0x3   :  { %9387 = sst [smem:[#allocation13_spill]] %s9374_s2 }
   0x4   :  { %16 = vsyncpa [#allocation9], 0 }
   0x5   :  { %18 = vsyncpa [#allocation9 + $0x1], 0  ;;  %s6603_s17 = smov 0   ;;  %s6605_s18 = smov 0  }
   0x6   :  { %s6607_s19 = smov 0   ;;  %s6609_s20 = smov 0  }
   0x7 LB: > { %s6624_s21 = sadd.s32 4294967295, %s6528_s20   ;;  %s6001_s22 = sadd.s32 4294967294, %s6528_s20   ;;  %s6528_s20 = sphi %s6609_s20, %s9397_s20   ;;  %s6524_s19 = sphi %s6607_s19, %s9396_s19   ;;  %s6520_s18 = sphi %s6605_s18, %s9395_s18   ;;  %s6516_s17 = sphi %s6603_s17, %s9394_s17  }
   0x8   : > { %s6628_s23 = sadd.s32 1, %s6528_s20   ;;  %s267_s24 = sadd.s32 1, %s6524_s19 }
   0x9   : > { %s264_s25 = ssub.s32 %s6528_s20, %s6628_s23  ;;  %p277_p0 = scmp.ne.s32.totalorder %s6524_s19, %s6520_s18 }
   0xa   : > { %p265_p1 = scmp.eq.s32.totalorder %s264_s25, 0  ;;  %p278_p2 = scmp.eq.s32.totalorder %s6624_s21, 1 }
   0xb   : > { %p283_p3 = scmp.ne.s32.totalorder %s6520_s18, %s6516_s17  ;;  %p284_p4 = scmp.eq.s32.totalorder %s6001_s22, 1 }
   0xc   : > { %s6639_s26 = scalar_select %p265_p1, %s6524_s19, %s267_s24  }
   0xd   : > { %p6641_p5 = por %p278_p2, %p277_p0  ;;  %p6645_p6 = por %p284_p4, %p283_p3 }
   0xe   : > { %p6004_p7 = scmp.ge.s32.totalorder %s6528_s20, 1  ;;  %p340_p8 = scmp.lt.s32.totalorder %s6528_s20, 3 }
  0x10   : > { %p341_p9 = pnand %p6004_p7, %p340_p8 }
  0x11   : > { %s9384_s29 = sand.u32 (!%p341_p9), 1, %s6520_s18   ;;  %p379_p10 = scmp.lt.s32.totalorder (!%p341_p9), %s6624_s21, 1 }
  0x12   : > { %344 = sbr.rel (%p341_p9) target bundleno = 1940 (0x794), region = 64  ;;  %s9390_s2 = sld [smem:[#allocation13_spill]] (!%p341_p9) }
  0x13   : > { %s9391_s0 = sld [smem:[#allocation11_spill]] (!%p341_p9)  ;;  %s6666_s24 = scalar_lea.vmem (!%p341_p9), [#allocation8], %s9384_s29 }
  0x14   : > { %s6668_s25 = smov (!%p341_p9), 0  }
  0x17   : > { %s380_s13 = scalar_select %p379_p10, %s6624_s21, 1 }
  0x18   : > { %v6656_v0 = vld [vmem:[%s9390_s2] sm:$0x1] }
  0x19   : > { %s6357_s14 = smul.u32 2504, %s380_s13 }
  0x1b   : > { %s6662_s22 = scalar_lea.vmem %s9391_s0, %s6357_s14 }
  0x1c LB: >> { %v6542_v1 = vmov 0   ;;  %s391_s30 = smul.u32 50, %s6532_s25  ;;  %s9392_s1 = sld [smem:[#allocation12_spill]]  ;;  %vm1712_vm0 = vcmask 261120   ;;  %vm1718_vm1 = vcmask 259072   ;;  %s6532_s25 = sphi %s6668_s25, %s390_s25  }
  0x1d   : >> { %6424 = vset.pattern.permute.xlu2 %v6542_v1  ;;  %6423 = vset.pattern.permute.xlu1 %v6542_v1  ;;  %s1695_s0 = smul.u32 48, %s6532_s25  ;;  %s390_s25 = sadd.s32 1, %s6532_s25  }
  0x1e   : >> { %6422 = vset.pattern.permute.xlu0 %v6542_v1  ;;  %s6675_s12 = scalar_lea.vmem %s6662_s22, %s391_s30  ;;  %p387_p11 = scmp.ge.s32.totalorder %s390_s25, 46  }
  0x1f   : >> { %v397_v2 = vld [vmem:[%s6675_s12 + $0x20] sm:$0xff]  ;;  %v395_v3 = vld [vmem:[%s6675_s12 + $0x10] sm:$0xff]  ;;  %v398_v5 = vld [vmem:[%s6675_s12 + $0x28] sm:$0x3f]  ;;  %s7085_s29 = scalar_lea.vmem [#allocation2], %s1695_s0  ;;  %vm1755_vm2 = vcmask (%p387_p11), 260096  }
  0x20   : >> { %v393_v4 = vld [vmem:[%s6675_s12] sm:$0xff]  ;;  %422 = vperm.xlu2 %6424, %v397_v2   ;;  %412 = vperm.xlu1 %6423, %v395_v3   ;;  %v396_v6 = vld [vmem:[%s6675_s12 + $0x18] sm:$0xff]  ;;  %v394_v7 = vld [vmem:[%s6675_s12 + $0x8] sm:$0xff]  ;;  %s7205_s14 = smov (%p387_p11), 0  }
  0x21   : >> { %402 = vperm.xlu0 %6422, %v393_v4   ;;  %v6008_v8 = vld [vmem:[%s6675_s12 + $0x11] sm:$0xff]  ;;  %v6007_v9 = vld [vmem:[%s6675_s12 + $0x9] sm:$0xff]  ;;  %v6006_v10 = vld [vmem:[%s6675_s12 + $0x1] sm:$0xff] }
  0x22   : >> { %v6011_v11 = vld [vmem:[%s6675_s12 + $0x29] sm:$0x3f]  ;;  %v6010_v12 = vld [vmem:[%s6675_s12 + $0x21] sm:$0xff]  ;;  %v6009_v13 = vld [vmem:[%s6675_s12 + $0x19] sm:$0xff] }
  0x23   : >> { %v6014_v14 = vld [vmem:[%s6675_s12 + $0x12] sm:$0xff]  ;;  %v6013_v15 = vld [vmem:[%s6675_s12 + $0xa] sm:$0xff]  ;;  %v6012_v16 = vld [vmem:[%s6675_s12 + $0x2] sm:$0xff] }
  0x24   : >> { %v6017_v17 = vld [vmem:[%s6675_s12 + $0x2a] sm:$0x3f]  ;;  %v6016_v18 = vld [vmem:[%s6675_s12 + $0x22] sm:$0xff]  ;;  %v6015_v19 = vld [vmem:[%s6675_s12 + $0x1a] sm:$0xff] }
  0x25   : >> { %v6020_v20 = vld [vmem:[%s6675_s12 + $0x13] sm:$0xff]  ;;  %v6019_v21 = vld [vmem:[%s6675_s12 + $0xb] sm:$0xff]  ;;  %v6018_v22 = vld [vmem:[%s6675_s12 + $0x3] sm:$0xff] }
  0x26   : >> { %v6023_v23 = vld [vmem:[%s6675_s12 + $0x2b] sm:$0x3f]  ;;  %v6022_v24 = vld [vmem:[%s6675_s12 + $0x23] sm:$0xff]  ;;  %v6021_v25 = vld [vmem:[%s6675_s12 + $0x1b] sm:$0xff] }
  0x27   : >> { %v6026_v26 = vld [vmem:[%s6675_s12 + $0x14] sm:$0xff]  ;;  %v6025_v27 = vld [vmem:[%s6675_s12 + $0xc] sm:$0xff]  ;;  %v6024_v28 = vld [vmem:[%s6675_s12 + $0x4] sm:$0xff] }
  0x28   : >> { %427 = vperm.xlu2 %6424, %v398_v5   ;;  %417 = vperm.xlu1 %6423, %v396_v6   ;;  %v6029_v29 = vld [vmem:[%s6675_s12 + $0x2c] sm:$0x3f]  ;;  %v6028_v30 = vld [vmem:[%s6675_s12 + $0x24] sm:$0xff]  ;;  %v6027_v31 = vld [vmem:[%s6675_s12 + $0x1c] sm:$0xff] }
  0x29   : >> { %407 = vperm.xlu0 %6422, %v394_v7   ;;  %v6032_v32 = vld [vmem:[%s6675_s12 + $0x42] sm:$0xff]  ;;  %v6031_v33 = vld [vmem:[%s6675_s12 + $0x3a] sm:$0xff]  ;;  %v6030_v34 = vld [vmem:[%s6675_s12 + $0x32] sm:$0xff] }
  0x2a   : >> { %v6035_v35 = vld [vmem:[%s6675_s12 + $0x5a] sm:$0x3f]  ;;  %v6034_v36 = vld [vmem:[%s6675_s12 + $0x52] sm:$0xff]  ;;  %v6033_v37 = vld [vmem:[%s6675_s12 + $0x4a] sm:$0xff] }
  0x2b   : >> { %v6038_v39 = vld [vmem:[%s6675_s12 + $0x43] sm:$0xff]  ;;  %v6037_v40 = vld [vmem:[%s6675_s12 + $0x3b] sm:$0xff]  ;;  %v6036_v41 = vld [vmem:[%s6675_s12 + $0x33] sm:$0xff] }
  0x2c   : >> { %v6041_v43 = vld [vmem:[%s6675_s12 + $0x5b] sm:$0x3f]  ;;  %v6040_v44 = vld [vmem:[%s6675_s12 + $0x53] sm:$0xff]  ;;  %v6039_v45 = vld [vmem:[%s6675_s12 + $0x4b] sm:$0xff] }
  0x2d   : >> { %v6724_v47 = vld [vmem:[%s9392_s1] ss:$0 sm:$0xff]  ;;  %v6044_v48 = vld [vmem:[%s6675_s12 + $0x44] sm:$0xff]  ;;  %v6042_v50 = vld [vmem:[%s6675_s12 + $0x34] sm:$0xff] }
  0x2e   : >> { %v6043_v49 = vld [vmem:[%s6675_s12 + $0x3c] sm:$0xff]  ;;  %v6046_v59 = vld [vmem:[%s6675_s12 + $0x54] sm:$0xff]  ;;  %v6045_v60 = vld [vmem:[%s6675_s12 + $0x4c] sm:$0xff] }
  0x2f   : >> { %v6732_v51 = vld [vmem:[%s9392_s1 + $0x1] ss:$0 sm:$0xff]  ;;  %v6744_v63 = vld [vmem:[%s9392_s1 + $0x2] ss:$0 sm:$0xff]  ;;  %v6050_v7 = vld [vmem:[%s6675_s12 + $0x45] sm:$0xff] }
  0x30   : >> { %464 = vperm.xlu2 %6424, %v6008_v8   ;;  %459 = vperm.xlu1 %6423, %v6007_v9   ;;  %v6047_v58 = vld [vmem:[%s6675_s12 + $0x5c] sm:$0x3f] }
  0x31   : >> { %454 = vperm.xlu0 %6422, %v6006_v10   ;;  %v6049_v8 = vld [vmem:[%s6675_s12 + $0x3d] sm:$0xff]  ;;  %v6048_v9 = vld [vmem:[%s6675_s12 + $0x35] sm:$0xff] }
  0x38   : >> { %479 = vperm.xlu2 %6424, %v6011_v11   ;;  %474 = vperm.xlu1 %6423, %v6010_v12  }
  0x39   : >> { %469 = vperm.xlu0 %6422, %v6009_v13  }
  0x40   : >> { %516 = vperm.xlu2 %6424, %v6014_v14   ;;  %511 = vperm.xlu1 %6423, %v6013_v15  }
  0x41   : >> { %506 = vperm.xlu0 %6422, %v6012_v16  }
  0x48   : >> { %531 = vperm.xlu2 %6424, %v6017_v17   ;;  %526 = vperm.xlu1 %6423, %v6016_v18   ;;  %v6053_v18 = vld [vmem:[%s6675_s12 + $0x5d] sm:$0x3f] }
  0x49   : >> { %521 = vperm.xlu0 %6422, %v6015_v19   ;;  %v6052_v19 = vld [vmem:[%s6675_s12 + $0x55] sm:$0xff] }
  0x50   : >> { %568 = vperm.xlu2 %6424, %v6020_v20   ;;  %563 = vperm.xlu1 %6423, %v6019_v21   ;;  %v6051_v20 = vld [vmem:[%s6675_s12 + $0x4d] sm:$0xff]  ;;  %v6759_v21 = vld [vmem:[%s9392_s1 + $0x3] ss:$0 sm:$0xff] }
  0x51   : >> { %558 = vperm.xlu0 %6422, %v6018_v22  }
  0x58   : >> { %583 = vperm.xlu2 %6424, %v6023_v23   ;;  %578 = vperm.xlu1 %6423, %v6022_v24  }
  0x59   : >> { %573 = vperm.xlu0 %6422, %v6021_v25  }
  0x60   : >> { %620 = vperm.xlu2 %6424, %v6026_v26   ;;  %615 = vperm.xlu1 %6423, %v6025_v27  }
  0x61   : >> { %610 = vperm.xlu0 %6422, %v6024_v28  }
  0x68   : >> { %635 = vperm.xlu2 %6424, %v6029_v29   ;;  %630 = vperm.xlu1 %6423, %v6028_v30   ;;  %v6056_v29 = vld [vmem:[%s6675_s12 + $0x46] sm:$0xff]  ;;  %v6055_v30 = vld [vmem:[%s6675_s12 + $0x3e] sm:$0xff] }
  0x69   : >> { %625 = vperm.xlu0 %6422, %v6027_v31  }
  0x70   : >> { %673 = vperm.xlu2 %6424, %v6032_v32   ;;  %668 = vperm.xlu1 %6423, %v6031_v33   ;;  %v6054_v32 = vld [vmem:[%s6675_s12 + $0x36] sm:$0xff] }
  0x71   : >> { %663 = vperm.xlu0 %6422, %v6030_v34  }
  0x78   : >> { %688 = vperm.xlu2 %6424, %v6035_v35   ;;  %683 = vperm.xlu1 %6423, %v6034_v36  }
  0x79   : >> { %678 = vperm.xlu0 %6422, %v6033_v37  }
  0x7a   : >> { %v6713_v38 = vpop.permute.xlu2 %422 }
  0x80   : >> { %725 = vperm.xlu2 %6424, %v6038_v39   ;;  %720 = vperm.xlu1 %6423, %v6037_v40  }
  0x81   : >> { %715 = vperm.xlu0 %6422, %v6036_v41  }
  0x82   : >> { %v428_v42 = vpop.permute.xlu2 %427 }
  0x83   : >> { %v436_v52 = vmul.f32 %v6724_v47, %v428_v42 }
  0x88   : >> { %740 = vperm.xlu2 %6424, %v6041_v43   ;;  %735 = vperm.xlu1 %6423, %v6040_v44  }
  0x89   : >> { %730 = vperm.xlu0 %6422, %v6039_v45   ;;  %v6059_v45 = vld [vmem:[%s6675_s12 + $0x5e] sm:$0x3f] }
  0x8a   : >> { %v465_v46 = vpop.permute.xlu2 %464 }
  0x8b   : >> { %v485_v61 = vmul.f32 %v6732_v51, %v465_v46  ;;  %v6058_v46 = vld [vmem:[%s6675_s12 + $0x56] sm:$0xff] }
  0x90   : >> { %777 = vperm.xlu2 %6424, %v6044_v48   ;;  %772 = vperm.xlu1 %6423, %v6043_v49   ;;  %v6057_v49 = vld [vmem:[%s6675_s12 + $0x4e] sm:$0xff] }
  0x91   : >> { %767 = vperm.xlu0 %6422, %v6042_v50  }
  0x92   : >> { %v480_v53 = vpop.permute.xlu2 %479  ;;  %v413_v54 = vpop.permute.xlu1 %412 }
  0x93   : >> { %v488_v55 = vmul.f32 %v6732_v51, %v480_v53  ;;  %v403_v56 = vpop.permute.xlu0 %402  ;;  %v433_v62 = vmul.f32 %v6724_v47, %v413_v54  ;;  %v435_v53 = vmul.f32 %v6724_v47, %v6713_v38  ;;  %v6060_v38 = vld [vmem:[%s6675_s12 + $0x64] sm:$0xff] }
  0x94   : >> { %v431_v34 = vmul.f32 %v6724_v47, %v403_v56 }
  0x95   : >> { %v494_v57 = vadd.f32 %v488_v55, %v436_v52  ;;  %v491_v3 = vadd.f32 %v485_v61, %v433_v62  ;;  %v6779_v52 = vld [vmem:[%s9392_s1 + $0x4] ss:$0 sm:$0xff]  ;;  %v6062_v62 = vld [vmem:[%s6675_s12 + $0x74] sm:$0xff] }
  0x98   : >> { %792 = vperm.xlu2 %6424, %v6047_v58   ;;  %787 = vperm.xlu1 %6423, %v6046_v59  }
  0x99   : >> { %782 = vperm.xlu0 %6422, %v6045_v60  }
  0x9a   : >> { %v517_v1 = vpop.permute.xlu2 %516  ;;  %v418_v2 = vpop.permute.xlu1 %417 }
  0x9b   : >> { %v537_v4 = vmul.f32 %v6744_v63, %v517_v1  ;;  %v408_v5 = vpop.permute.xlu0 %407  ;;  %v434_v26 = vmul.f32 %v6724_v47, %v418_v2  ;;  %v6061_v1 = vld [vmem:[%s6675_s12 + $0x6c] sm:$0xff] }
  0x9c   : >> { %v432_v12 = vmul.f32 %v6724_v47, %v408_v5 }
  0x9d   : >> { %v543_v6 = vadd.f32 %v537_v4, %v491_v3 }
  0xa0   : >> { %829 = vperm.xlu2 %6424, %v6050_v7   ;;  %824 = vperm.xlu1 %6423, %v6049_v8  }
  0xa1   : >> { %819 = vperm.xlu0 %6422, %v6048_v9   ;;  %v6065_v9 = vld [vmem:[%s6675_s12 + $0x8c] sm:$0x3f] }
  0xa2   : >> { %v532_v10 = vpop.permute.xlu2 %531  ;;  %v460_v11 = vpop.permute.xlu1 %459 }
  0xa3   : >> { %v540_v13 = vmul.f32 %v6744_v63, %v532_v10  ;;  %v484_v14 = vmul.f32 %v6732_v51, %v460_v11  ;;  %v455_v15 = vpop.permute.xlu0 %454  ;;  %v6064_v10 = vld [vmem:[%s6675_s12 + $0x84] sm:$0xff] }
  0xa4   : >> { %v483_v33 = vmul.f32 %v6732_v51, %v455_v15 }
  0xa5   : >> { %v546_v16 = vadd.f32 %v540_v13, %v494_v57  ;;  %v490_v17 = vadd.f32 %v484_v14, %v432_v12  ;;  %v6063_v12 = vld [vmem:[%s6675_s12 + $0x7c] sm:$0xff]  ;;  %v6798_v13 = vld [vmem:[%s9392_s1 + $0x5] ss:$0 sm:$0xff] }
  0xa6   : >> { %v489_v41 = vadd.f32 %v483_v33, %v431_v34  ;;  %v6071_v34 = vld [vmem:[%s6675_s12 + $0x8d] sm:$0x3f] }
  0xa8   : >> { %844 = vperm.xlu2 %6424, %v6053_v18   ;;  %839 = vperm.xlu1 %6423, %v6052_v19  }
  0xa9   : >> { %834 = vperm.xlu0 %6422, %v6051_v20  }
  0xaa   : >> { %v569_v22 = vpop.permute.xlu2 %568  ;;  %v475_v23 = vpop.permute.xlu1 %474 }
  0xab   : >> { %v589_v24 = vmul.f32 %v6759_v21, %v569_v22  ;;  %v470_v25 = vpop.permute.xlu0 %469  ;;  %v487_v50 = vmul.f32 %v6732_v51, %v475_v23  ;;  %v6068_v23 = vld [vmem:[%s6675_s12 + $0x75] sm:$0xff] }
  0xac   : >> { %v486_v27 = vmul.f32 %v6732_v51, %v470_v25 }
  0xad   : >> { %v595_v28 = vadd.f32 %v589_v24, %v543_v6  ;;  %v493_v56 = vadd.f32 %v487_v50, %v435_v53  ;;  %v6067_v24 = vld [vmem:[%s6675_s12 + $0x6d] sm:$0xff] }
  0xae   : >> { %v492_v31 = vadd.f32 %v486_v27, %v434_v26  ;;  %v6066_v26 = vld [vmem:[%s6675_s12 + $0x65] sm:$0xff]  ;;  %v6073_v50 = vld [vmem:[%s6675_s12 + $0x6e] sm:$0xff] }
  0xb0   : >> { %881 = vperm.xlu2 %6424, %v6056_v29   ;;  %876 = vperm.xlu1 %6423, %v6055_v30  }
  0xb1   : >> { %871 = vperm.xlu0 %6422, %v6054_v32  }
  0xb2   : >> { %v584_v35 = vpop.permute.xlu2 %583  ;;  %v512_v36 = vpop.permute.xlu1 %511 }
  0xb3   : >> { %v592_v37 = vmul.f32 %v6759_v21, %v584_v35  ;;  %v536_v39 = vmul.f32 %v6744_v63, %v512_v36  ;;  %v507_v40 = vpop.permute.xlu0 %506  ;;  %v6070_v35 = vld [vmem:[%s6675_s12 + $0x85] sm:$0xff] }
  0xb4   : >> { %v535_v42 = vmul.f32 %v6744_v63, %v507_v40 }
  0xb5   : >> { %v598_v43 = vadd.f32 %v592_v37, %v546_v16  ;;  %v542_v44 = vadd.f32 %v536_v39, %v490_v17  ;;  %v6069_v37 = vld [vmem:[%s6675_s12 + $0x7d] sm:$0xff]  ;;  %v6815_v39 = vld [vmem:[%s9392_s1 + $0x6] ss:$0 sm:$0xff] }
  0xb6   : >> { %v541_v48 = vadd.f32 %v535_v42, %v489_v41 }
  0xb8   : >> { %896 = vperm.xlu2 %6424, %v6059_v45   ;;  %891 = vperm.xlu1 %6423, %v6058_v46  }
  0xb9   : >> { %886 = vperm.xlu0 %6422, %v6057_v49   ;;  %v6074_v49 = vld [vmem:[%s6675_s12 + $0x76] sm:$0xff] }
  0xba   : >> { %v621_v54 = vpop.permute.xlu2 %620  ;;  %v527_v55 = vpop.permute.xlu1 %526 }
  0xbb   : >> { %v641_v57 = vmul.f32 %v6779_v52, %v621_v54  ;;  %v539_v51 = vmul.f32 %v6744_v63, %v527_v55  ;;  %v522_v58 = vpop.permute.xlu0 %521  ;;  %v6072_v54 = vld [vmem:[%s6675_s12 + $0x66] sm:$0xff] }
  0xbc   : >> { %v538_v59 = vmul.f32 %v6744_v63, %v522_v58 }
  0xbd   : >> { %v647_v60 = vadd.f32 %v641_v57, %v595_v28  ;;  %v545_v61 = vadd.f32 %v539_v51, %v493_v56 }
  0xbe   : >> { %v544_v2 = vadd.f32 %v538_v59, %v492_v31 }
  0xc0   : >> { %934 = vperm.xlu2 %6424, %v6062_v62   ;;  %929 = vperm.xlu1 %6423, %v6061_v1   ;;  %v6076_v62 = vld [vmem:[%s6675_s12 + $0x86] sm:$0xff] }
  0xc1   : >> { %924 = vperm.xlu0 %6422, %v6060_v38   ;;  %v6832_v38 = vld [vmem:[%s9392_s1 + $0x7] ss:$0 sm:$0xff] }
  0xc2   : >> { %v636_v47 = vpop.permute.xlu2 %635  ;;  %v564_v3 = vpop.permute.xlu1 %563 }
  0xc3   : >> { %v644_v4 = vmul.f32 %v6779_v52, %v636_v47  ;;  %v588_v5 = vmul.f32 %v6759_v21, %v564_v3  ;;  %v559_v6 = vpop.permute.xlu0 %558 }
  0xc4   : >> { %v587_v63 = vmul.f32 %v6759_v21, %v559_v6 }
  0xc5   : >> { %v650_v7 = vadd.f32 %v644_v4, %v598_v43  ;;  %v594_v8 = vadd.f32 %v588_v5, %v542_v44 }
  0xc6   : >> { %v593_v11 = vadd.f32 %v587_v63, %v541_v48 }
  0xc8   : >> { %949 = vperm.xlu2 %6424, %v6065_v9   ;;  %944 = vperm.xlu1 %6423, %v6064_v10   ;;  %v6080_v9 = vld [vmem:[%s6675_s12 + $0x77] sm:$0xff]  ;;  %v6079_v10 = vld [vmem:[%s6675_s12 + $0x6f] sm:$0xff] }
  0xc9   : >> { %939 = vperm.xlu0 %6422, %v6063_v12   ;;  %v6078_v12 = vld [vmem:[%s6675_s12 + $0x67] sm:$0xff] }
  0xca   : >> { %v674_v14 = vpop.permute.xlu2 %673  ;;  %v579_v15 = vpop.permute.xlu1 %578 }
  0xcb   : >> { %v694_v16 = vmul.f32 %v6798_v13, %v674_v14  ;;  %v591_v17 = vmul.f32 %v6759_v21, %v579_v15  ;;  %v574_v18 = vpop.permute.xlu0 %573 }
  0xcc   : >> { %v590_v19 = vmul.f32 %v6759_v21, %v574_v18 }
  0xcd   : >> { %v700_v20 = vadd.f32 %v694_v16, %v647_v60  ;;  %v597_v22 = vadd.f32 %v591_v17, %v545_v61  ;;  %v6077_v61 = vld [vmem:[%s6675_s12 + $0x8e] sm:$0x3f] }
  0xce   : >> { %v596_v25 = vadd.f32 %v590_v19, %v544_v2  ;;  %v6075_v2 = vld [vmem:[%s6675_s12 + $0x7e] sm:$0xff] }
  0xd0   : >> { %986 = vperm.xlu2 %6424, %v6068_v23   ;;  %981 = vperm.xlu1 %6423, %v6067_v24   ;;  %v6082_v23 = vld [vmem:[%s6675_s12 + $0x87] sm:$0xff] }
  0xd1   : >> { %976 = vperm.xlu0 %6422, %v6066_v26   ;;  %v6849_v26 = vld [vmem:[%s9392_s1 + $0x8] ss:$0 sm:$0xff] }
  0xd2   : >> { %v689_v27 = vpop.permute.xlu2 %688  ;;  %v616_v28 = vpop.permute.xlu1 %615 }
  0xd3   : >> { %v697_v29 = vmul.f32 %v6798_v13, %v689_v27  ;;  %v640_v30 = vmul.f32 %v6779_v52, %v616_v28  ;;  %v611_v31 = vpop.permute.xlu0 %610 }
  0xd4   : >> { %v639_v21 = vmul.f32 %v6779_v52, %v611_v31 }
  0xd5   : >> { %v703_v32 = vadd.f32 %v697_v29, %v650_v7  ;;  %v646_v33 = vadd.f32 %v640_v30, %v594_v8 }
  0xd6   : >> { %v645_v36 = vadd.f32 %v639_v21, %v593_v11 }
  0xd8   : >> { %1001 = vperm.xlu2 %6424, %v6071_v34   ;;  %996 = vperm.xlu1 %6423, %v6070_v35   ;;  %v6086_v34 = vld [vmem:[%s6675_s12 + $0x78] sm:$0xff]  ;;  %v6085_v35 = vld [vmem:[%s6675_s12 + $0x70] sm:$0xff] }
  0xd9   : >> { %991 = vperm.xlu0 %6422, %v6069_v37   ;;  %v6084_v37 = vld [vmem:[%s6675_s12 + $0x68] sm:$0xff] }
  0xda   : >> { %v726_v40 = vpop.permute.xlu2 %725  ;;  %v631_v41 = vpop.permute.xlu1 %630 }
  0xdb   : >> { %v746_v42 = vmul.f32 %v6815_v39, %v726_v40  ;;  %v643_v43 = vmul.f32 %v6779_v52, %v631_v41  ;;  %v626_v44 = vpop.permute.xlu0 %625 }
  0xdc   : >> { %v642_v45 = vmul.f32 %v6779_v52, %v626_v44 }
  0xdd   : >> { %v752_v46 = vadd.f32 %v746_v42, %v700_v20  ;;  %v649_v48 = vadd.f32 %v643_v43, %v597_v22  ;;  %v6083_v22 = vld [vmem:[%s6675_s12 + $0x8f] sm:$0x3f] }
  0xde   : >> { %v648_v53 = vadd.f32 %v642_v45, %v596_v25  ;;  %v6081_v25 = vld [vmem:[%s6675_s12 + $0x7f] sm:$0xff] }
  0xe0   : >> { %1038 = vperm.xlu2 %6424, %v6074_v49   ;;  %1033 = vperm.xlu1 %6423, %v6073_v50   ;;  %v6088_v49 = vld [vmem:[%s6675_s12 + $0x88] sm:$0xff] }
  0xe1   : >> { %1028 = vperm.xlu0 %6422, %v6072_v54   ;;  %v6866_v54 = vld [vmem:[%s9392_s1 + $0x9] ss:$0 sm:$0xff] }
  0xe2   : >> { %v741_v55 = vpop.permute.xlu2 %740  ;;  %v669_v56 = vpop.permute.xlu1 %668 }
  0xe3   : >> { %v749_v57 = vmul.f32 %v6815_v39, %v741_v55  ;;  %v693_v51 = vmul.f32 %v6798_v13, %v669_v56  ;;  %v664_v58 = vpop.permute.xlu0 %663 }
  0xe4   : >> { %v692_v52 = vmul.f32 %v6798_v13, %v664_v58 }
  0xe5   : >> { %v755_v59 = vadd.f32 %v749_v57, %v703_v32  ;;  %v699_v60 = vadd.f32 %v693_v51, %v646_v33 }
  0xe6   : >> { %v698_v1 = vadd.f32 %v692_v52, %v645_v36 }
  0xe8   : >> { %1053 = vperm.xlu2 %6424, %v6077_v61   ;;  %1048 = vperm.xlu1 %6423, %v6076_v62   ;;  %v6092_v61 = vld [vmem:[%s6675_s12 + $0xa6] sm:$0xff]  ;;  %v6091_v62 = vld [vmem:[%s6675_s12 + $0x9e] sm:$0xff] }
  0xe9   : >> { %1043 = vperm.xlu0 %6422, %v6075_v2   ;;  %v6090_v2 = vld [vmem:[%s6675_s12 + $0x96] sm:$0xff] }
  0xea   : >> { %v778_v47 = vpop.permute.xlu2 %777  ;;  %v684_v3 = vpop.permute.xlu1 %683 }
  0xeb   : >> { %v798_v4 = vmul.f32 %v6832_v38, %v778_v47  ;;  %v696_v5 = vmul.f32 %v6798_v13, %v684_v3  ;;  %v679_v6 = vpop.permute.xlu0 %678 }
  0xec   : >> { %v695_v63 = vmul.f32 %v6798_v13, %v679_v6 }
  0xed   : >> { %v804_v7 = vadd.f32 %v798_v4, %v752_v46  ;;  %v702_v8 = vadd.f32 %v696_v5, %v649_v48  ;;  %v6089_v48 = vld [vmem:[%s6675_s12 + $0x90] sm:$0x3f] }
  0xee   : >> { %v701_v11 = vadd.f32 %v695_v63, %v648_v53  ;;  %v6087_v53 = vld [vmem:[%s6675_s12 + $0x80] sm:$0xff] }
  0xf0   : >> { %1090 = vperm.xlu2 %6424, %v6080_v9   ;;  %1085 = vperm.xlu1 %6423, %v6079_v10   ;;  %v6094_v9 = vld [vmem:[%s6675_s12 + $0xb6] sm:$0xff] }
  0xf1   : >> { %1080 = vperm.xlu0 %6422, %v6078_v12   ;;  %v6883_v12 = vld [vmem:[%s9392_s1 + $0xa] ss:$0 sm:$0xff] }
  0xf2   : >> { %v793_v14 = vpop.permute.xlu2 %792  ;;  %v721_v15 = vpop.permute.xlu1 %720 }
  0xf3   : >> { %v801_v16 = vmul.f32 %v6832_v38, %v793_v14  ;;  %v745_v17 = vmul.f32 %v6815_v39, %v721_v15  ;;  %v716_v18 = vpop.permute.xlu0 %715 }
  0xf4   : >> { %v744_v13 = vmul.f32 %v6815_v39, %v716_v18 }
  0xf5   : >> { %v807_v19 = vadd.f32 %v801_v16, %v755_v59  ;;  %v751_v20 = vadd.f32 %v745_v17, %v699_v60 }
  0xf6   : >> { %v750_v24 = vadd.f32 %v744_v13, %v698_v1 }
  0xf8   : >> { %1105 = vperm.xlu2 %6424, %v6083_v22   ;;  %1100 = vperm.xlu1 %6423, %v6082_v23   ;;  %v6098_v22 = vld [vmem:[%s6675_s12 + $0xa7] sm:$0xff]  ;;  %v6097_v23 = vld [vmem:[%s6675_s12 + $0x9f] sm:$0xff] }
  0xf9   : >> { %1095 = vperm.xlu0 %6422, %v6081_v25   ;;  %v6096_v25 = vld [vmem:[%s6675_s12 + $0x97] sm:$0xff] }
  0xfa   : >> { %v830_v27 = vpop.permute.xlu2 %829  ;;  %v736_v28 = vpop.permute.xlu1 %735 }
  0xfb   : >> { %v850_v29 = vmul.f32 %v6849_v26, %v830_v27  ;;  %v748_v30 = vmul.f32 %v6815_v39, %v736_v28  ;;  %v731_v31 = vpop.permute.xlu0 %730 }
  0xfc   : >> { %v747_v21 = vmul.f32 %v6815_v39, %v731_v31 }
  0xfd   : >> { %v856_v32 = vadd.f32 %v850_v29, %v804_v7  ;;  %v754_v33 = vadd.f32 %v748_v30, %v702_v8  ;;  %v6095_v8 = vld [vmem:[%s6675_s12 + $0xbe] sm:$0x3f] }
  0xfe   : >> { %v753_v36 = vadd.f32 %v747_v21, %v701_v11  ;;  %v6093_v11 = vld [vmem:[%s6675_s12 + $0xae] sm:$0xff] }
 0x100   : >> { %1142 = vperm.xlu2 %6424, %v6086_v34   ;;  %1137 = vperm.xlu1 %6423, %v6085_v35   ;;  %v6100_v34 = vld [vmem:[%s6675_s12 + $0xb7] sm:$0xff] }
 0x101   : >> { %1132 = vperm.xlu0 %6422, %v6084_v37   ;;  %v6900_v37 = vld [vmem:[%s9392_s1 + $0xb] ss:$0 sm:$0xff] }
 0x102   : >> { %v845_v40 = vpop.permute.xlu2 %844  ;;  %v773_v41 = vpop.permute.xlu1 %772 }
 0x103   : >> { %v853_v42 = vmul.f32 %v6849_v26, %v845_v40  ;;  %v797_v43 = vmul.f32 %v6832_v38, %v773_v41  ;;  %v768_v44 = vpop.permute.xlu0 %767 }
 0x104   : >> { %v796_v39 = vmul.f32 %v6832_v38, %v768_v44 }
 0x105   : >> { %v859_v45 = vadd.f32 %v853_v42, %v807_v19  ;;  %v803_v46 = vadd.f32 %v797_v43, %v751_v20 }
 0x106   : >> { %v802_v50 = vadd.f32 %v796_v39, %v750_v24 }
 0x108   : >> { %1157 = vperm.xlu2 %6424, %v6089_v48   ;;  %1152 = vperm.xlu1 %6423, %v6088_v49   ;;  %v6104_v48 = vld [vmem:[%s6675_s12 + $0xa8] sm:$0xff]  ;;  %v6103_v49 = vld [vmem:[%s6675_s12 + $0xa0] sm:$0xff] }
 0x109   : >> { %1147 = vperm.xlu0 %6422, %v6087_v53   ;;  %v6102_v53 = vld [vmem:[%s6675_s12 + $0x98] sm:$0xff] }
 0x10a   : >> { %v882_v55 = vpop.permute.xlu2 %881  ;;  %v788_v56 = vpop.permute.xlu1 %787 }
 0x10b   : >> { %v902_v57 = vmul.f32 %v6866_v54, %v882_v55  ;;  %v800_v51 = vmul.f32 %v6832_v38, %v788_v56  ;;  %v783_v58 = vpop.permute.xlu0 %782 }
 0x10c   : >> { %v799_v52 = vmul.f32 %v6832_v38, %v783_v58 }
 0x10d   : >> { %v908_v59 = vadd.f32 %v902_v57, %v856_v32  ;;  %v806_v60 = vadd.f32 %v800_v51, %v754_v33  ;;  %v6101_v33 = vld [vmem:[%s6675_s12 + $0xbf] sm:$0x3f] }
 0x10e   : >> { %v805_v1 = vadd.f32 %v799_v52, %v753_v36  ;;  %v6099_v36 = vld [vmem:[%s6675_s12 + $0xaf] sm:$0xff] }
 0x110   : >> { %1195 = vperm.xlu2 %6424, %v6092_v61   ;;  %1190 = vperm.xlu1 %6423, %v6091_v62   ;;  %v6106_v61 = vld [vmem:[%s6675_s12 + $0xb8] sm:$0xff] }
 0x111   : >> { %1185 = vperm.xlu0 %6422, %v6090_v2   ;;  %v6917_v2 = vld [vmem:[%s9392_s1 + $0xc] ss:$0 sm:$0xff] }
 0x112   : >> { %v897_v47 = vpop.permute.xlu2 %896  ;;  %v825_v3 = vpop.permute.xlu1 %824 }
 0x113   : >> { %v905_v4 = vmul.f32 %v6866_v54, %v897_v47  ;;  %v849_v5 = vmul.f32 %v6849_v26, %v825_v3  ;;  %v820_v6 = vpop.permute.xlu0 %819 }
 0x114   : >> { %v848_v38 = vmul.f32 %v6849_v26, %v820_v6 }
 0x115   : >> { %v911_v63 = vadd.f32 %v905_v4, %v859_v45  ;;  %v855_v7 = vadd.f32 %v849_v5, %v803_v46 }
 0x116   : >> { %v854_v10 = vadd.f32 %v848_v38, %v802_v50 }
 0x118   : >> { %1210 = vperm.xlu2 %6424, %v6095_v8   ;;  %1205 = vperm.xlu1 %6423, %v6094_v9   ;;  %v6110_v8 = vld [vmem:[%s6675_s12 + $0xa9] sm:$0xff]  ;;  %v6109_v9 = vld [vmem:[%s6675_s12 + $0xa1] sm:$0xff] }
 0x119   : >> { %1200 = vperm.xlu0 %6422, %v6093_v11   ;;  %v6108_v11 = vld [vmem:[%s6675_s12 + $0x99] sm:$0xff] }
 0x11a   : >> { %v935_v14 = vpop.permute.xlu2 %934  ;;  %v840_v15 = vpop.permute.xlu1 %839 }
 0x11b   : >> { %v955_v16 = vmul.f32 %v6883_v12, %v935_v14  ;;  %v852_v17 = vmul.f32 %v6849_v26, %v840_v15  ;;  %v835_v18 = vpop.permute.xlu0 %834 }
 0x11c   : >> { %v851_v13 = vmul.f32 %v6849_v26, %v835_v18 }
 0x11d   : >> { %v961_v19 = vadd.f32 %v955_v16, %v908_v59  ;;  %v858_v20 = vadd.f32 %v852_v17, %v806_v60  ;;  %v6107_v60 = vld [vmem:[%s6675_s12 + $0xc0] sm:$0x3f] }
 0x11e   : >> { %v857_v24 = vadd.f32 %v851_v13, %v805_v1  ;;  %v6105_v1 = vld [vmem:[%s6675_s12 + $0xb0] sm:$0xff] }
 0x120   : >> { %1247 = vperm.xlu2 %6424, %v6098_v22   ;;  %1242 = vperm.xlu1 %6423, %v6097_v23   ;;  %v6112_v22 = vld [vmem:[%s6675_s12 + $0xb9] sm:$0xff] }
 0x121   : >> { %1237 = vperm.xlu0 %6422, %v6096_v25   ;;  %v6934_v25 = vld [vmem:[%s9392_s1 + $0xd] ss:$0 sm:$0xff] }
 0x122   : >> { %v950_v27 = vpop.permute.xlu2 %949  ;;  %v877_v28 = vpop.permute.xlu1 %876 }
 0x123   : >> { %v958_v29 = vmul.f32 %v6883_v12, %v950_v27  ;;  %v901_v30 = vmul.f32 %v6866_v54, %v877_v28  ;;  %v872_v31 = vpop.permute.xlu0 %871 }
 0x124   : >> { %v900_v26 = vmul.f32 %v6866_v54, %v872_v31 }
 0x125   : >> { %v964_v21 = vadd.f32 %v958_v29, %v911_v63  ;;  %v907_v32 = vadd.f32 %v901_v30, %v855_v7 }
 0x126   : >> { %v906_v35 = vadd.f32 %v900_v26, %v854_v10 }
 0x128   : >> { %1262 = vperm.xlu2 %6424, %v6101_v33   ;;  %1257 = vperm.xlu1 %6423, %v6100_v34   ;;  %v6116_v33 = vld [vmem:[%s6675_s12 + $0xaa] sm:$0xff]  ;;  %v6115_v34 = vld [vmem:[%s6675_s12 + $0xa2] sm:$0xff] }
 0x129   : >> { %1252 = vperm.xlu0 %6422, %v6099_v36   ;;  %v6114_v36 = vld [vmem:[%s6675_s12 + $0x9a] sm:$0xff] }
 0x12a   : >> { %v987_v40 = vpop.permute.xlu2 %986  ;;  %v892_v41 = vpop.permute.xlu1 %891 }
 0x12b   : >> { %v1007_v42 = vmul.f32 %v6900_v37, %v987_v40  ;;  %v904_v43 = vmul.f32 %v6866_v54, %v892_v41  ;;  %v887_v44 = vpop.permute.xlu0 %886 }
 0x12c   : >> { %v903_v39 = vmul.f32 %v6866_v54, %v887_v44 }
 0x12d   : >> { %v1013_v45 = vadd.f32 %v1007_v42, %v961_v19  ;;  %v910_v46 = vadd.f32 %v904_v43, %v858_v20  ;;  %v6113_v20 = vld [vmem:[%s6675_s12 + $0xc1] sm:$0x3f] }
 0x12e   : >> { %v909_v50 = vadd.f32 %v903_v39, %v857_v24  ;;  %v6111_v24 = vld [vmem:[%s6675_s12 + $0xb1] sm:$0xff] }
 0x130   : >> { %1299 = vperm.xlu2 %6424, %v6104_v48   ;;  %1294 = vperm.xlu1 %6423, %v6103_v49   ;;  %v6118_v48 = vld [vmem:[%s6675_s12 + $0xba] sm:$0xff] }
 0x131   : >> { %1289 = vperm.xlu0 %6422, %v6102_v53   ;;  %v6951_v53 = vld [vmem:[%s9392_s1 + $0xe] ss:$0 sm:$0xff] }
 0x132   : >> { %v1002_v55 = vpop.permute.xlu2 %1001  ;;  %v930_v56 = vpop.permute.xlu1 %929 }
 0x133   : >> { %v1010_v57 = vmul.f32 %v6900_v37, %v1002_v55  ;;  %v954_v51 = vmul.f32 %v6883_v12, %v930_v56  ;;  %v925_v58 = vpop.permute.xlu0 %924 }
 0x134   : >> { %v953_v54 = vmul.f32 %v6883_v12, %v925_v58 }
 0x135   : >> { %v1016_v52 = vadd.f32 %v1010_v57, %v964_v21  ;;  %v960_v59 = vadd.f32 %v954_v51, %v907_v32 }
 0x136   : >> { %v959_v62 = vadd.f32 %v953_v54, %v906_v35 }
 0x138   : >> { %1314 = vperm.xlu2 %6424, %v6107_v60   ;;  %1309 = vperm.xlu1 %6423, %v6106_v61   ;;  %v6122_v60 = vld [vmem:[%s6675_s12 + $0xd8] sm:$0xff]  ;;  %v6121_v61 = vld [vmem:[%s6675_s12 + $0xd0] sm:$0xff] }
 0x139   : >> { %1304 = vperm.xlu0 %6422, %v6105_v1   ;;  %v6120_v1 = vld [vmem:[%s6675_s12 + $0xc8] sm:$0xff] }
 0x13a   : >> { %v1039_v47 = vpop.permute.xlu2 %1038  ;;  %v945_v3 = vpop.permute.xlu1 %944 }
 0x13b   : >> { %v1059_v4 = vmul.f32 %v6917_v2, %v1039_v47  ;;  %v957_v5 = vmul.f32 %v6883_v12, %v945_v3  ;;  %v940_v6 = vpop.permute.xlu0 %939 }
 0x13c   : >> { %v956_v38 = vmul.f32 %v6883_v12, %v940_v6 }
 0x13d   : >> { %v1065_v63 = vadd.f32 %v1059_v4, %v1013_v45  ;;  %v963_v7 = vadd.f32 %v957_v5, %v910_v46  ;;  %v6119_v46 = vld [vmem:[%s6675_s12 + $0xc2] sm:$0x3f] }
 0x13e   : >> { %v962_v10 = vadd.f32 %v956_v38, %v909_v50  ;;  %v6117_v50 = vld [vmem:[%s6675_s12 + $0xb2] sm:$0xff] }
 0x140   : >> { %1351 = vperm.xlu2 %6424, %v6110_v8   ;;  %1346 = vperm.xlu1 %6423, %v6109_v9   ;;  %v6124_v8 = vld [vmem:[%s6675_s12 + $0xe8] sm:$0xff] }
 0x141   : >> { %1341 = vperm.xlu0 %6422, %v6108_v11   ;;  %v6968_v11 = vld [vmem:[%s9392_s1 + $0xf] ss:$0 sm:$0xff] }
 0x142   : >> { %v1054_v14 = vpop.permute.xlu2 %1053  ;;  %v982_v15 = vpop.permute.xlu1 %981 }
 0x143   : >> { %v1062_v16 = vmul.f32 %v6917_v2, %v1054_v14  ;;  %v1006_v17 = vmul.f32 %v6900_v37, %v982_v15  ;;  %v977_v18 = vpop.permute.xlu0 %976 }
 0x144   : >> { %v1005_v12 = vmul.f32 %v6900_v37, %v977_v18 }
 0x145   : >> { %v1068_v13 = vadd.f32 %v1062_v16, %v1016_v52  ;;  %v1012_v19 = vadd.f32 %v1006_v17, %v960_v59 }
 0x146   : >> { %v1011_v23 = vadd.f32 %v1005_v12, %v959_v62 }
 0x148   : >> { %1366 = vperm.xlu2 %6424, %v6113_v20   ;;  %1361 = vperm.xlu1 %6423, %v6112_v22   ;;  %v6128_v20 = vld [vmem:[%s6675_s12 + $0xd9] sm:$0xff]  ;;  %v6127_v22 = vld [vmem:[%s6675_s12 + $0xd1] sm:$0xff] }
 0x149   : >> { %1356 = vperm.xlu0 %6422, %v6111_v24   ;;  %v6126_v24 = vld [vmem:[%s6675_s12 + $0xc9] sm:$0xff] }
 0x14a   : >> { %v1091_v27 = vpop.permute.xlu2 %1090  ;;  %v997_v28 = vpop.permute.xlu1 %996 }
 0x14b   : >> { %v1111_v29 = vmul.f32 %v6934_v25, %v1091_v27  ;;  %v1009_v30 = vmul.f32 %v6900_v37, %v997_v28  ;;  %v992_v31 = vpop.permute.xlu0 %991 }
 0x14c   : >> { %v1008_v26 = vmul.f32 %v6900_v37, %v992_v31 }
 0x14d   : >> { %v1117_v21 = vadd.f32 %v1111_v29, %v1065_v63  ;;  %v1015_v32 = vadd.f32 %v1009_v30, %v963_v7  ;;  %v6125_v7 = vld [vmem:[%s6675_s12 + $0xf0] sm:$0x3f] }
 0x14e   : >> { %v1014_v35 = vadd.f32 %v1008_v26, %v962_v10  ;;  %v6123_v10 = vld [vmem:[%s6675_s12 + $0xe0] sm:$0xff] }
 0x150   : >> { %1403 = vperm.xlu2 %6424, %v6116_v33   ;;  %1398 = vperm.xlu1 %6423, %v6115_v34   ;;  %v6130_v33 = vld [vmem:[%s6675_s12 + $0xe9] sm:$0xff] }
 0x151   : >> { %1393 = vperm.xlu0 %6422, %v6114_v36   ;;  %v6985_v36 = vld [vmem:[%s9392_s1 + $0x10] ss:$0 sm:$0xff] }
 0x152   : >> { %v1106_v40 = vpop.permute.xlu2 %1105  ;;  %v1034_v41 = vpop.permute.xlu1 %1033 }
 0x153   : >> { %v1114_v42 = vmul.f32 %v6934_v25, %v1106_v40  ;;  %v1058_v43 = vmul.f32 %v6917_v2, %v1034_v41  ;;  %v1029_v44 = vpop.permute.xlu0 %1028 }
 0x154   : >> { %v1057_v37 = vmul.f32 %v6917_v2, %v1029_v44 }
 0x155   : >> { %v1120_v39 = vadd.f32 %v1114_v42, %v1068_v13  ;;  %v1064_v45 = vadd.f32 %v1058_v43, %v1012_v19 }
 0x156   : >> { %v1063_v49 = vadd.f32 %v1057_v37, %v1011_v23 }
 0x158   : >> { %1418 = vperm.xlu2 %6424, %v6119_v46   ;;  %1413 = vperm.xlu1 %6423, %v6118_v48   ;;  %v6134_v46 = vld [vmem:[%s6675_s12 + $0xda] sm:$0xff]  ;;  %v6133_v48 = vld [vmem:[%s6675_s12 + $0xd2] sm:$0xff] }
 0x159   : >> { %1408 = vperm.xlu0 %6422, %v6117_v50   ;;  %v6132_v50 = vld [vmem:[%s6675_s12 + $0xca] sm:$0xff] }
 0x15a   : >> { %v1143_v55 = vpop.permute.xlu2 %1142  ;;  %v1049_v56 = vpop.permute.xlu1 %1048 }
 0x15b   : >> { %v1163_v57 = vmul.f32 %v6951_v53, %v1143_v55  ;;  %v1061_v51 = vmul.f32 %v6917_v2, %v1049_v56  ;;  %v1044_v58 = vpop.permute.xlu0 %1043 }
 0x15c   : >> { %v1060_v54 = vmul.f32 %v6917_v2, %v1044_v58 }
 0x15d   : >> { %v1169_v52 = vadd.f32 %v1163_v57, %v1117_v21  ;;  %v1067_v59 = vadd.f32 %v1061_v51, %v1015_v32  ;;  %v6131_v32 = vld [vmem:[%s6675_s12 + $0xf1] sm:$0x3f] }
 0x15e   : >> { %v1066_v62 = vadd.f32 %v1060_v54, %v1014_v35  ;;  %v6129_v35 = vld [vmem:[%s6675_s12 + $0xe1] sm:$0xff] }
 0x160   : >> { %1456 = vperm.xlu2 %6424, %v6122_v60   ;;  %1451 = vperm.xlu1 %6423, %v6121_v61   ;;  %v6136_v60 = vld [vmem:[%s6675_s12 + $0xea] sm:$0xff] }
 0x161   : >> { %1446 = vperm.xlu0 %6422, %v6120_v1   ;;  %v7002_v1 = vld [vmem:[%s9392_s1 + $0x11] ss:$0 sm:$0xff] }
 0x162   : >> { %v1158_v47 = vpop.permute.xlu2 %1157  ;;  %v1086_v3 = vpop.permute.xlu1 %1085 }
 0x163   : >> { %v1166_v4 = vmul.f32 %v6951_v53, %v1158_v47  ;;  %v1110_v5 = vmul.f32 %v6934_v25, %v1086_v3  ;;  %v1081_v6 = vpop.permute.xlu0 %1080 }
 0x164   : >> { %v1109_v2 = vmul.f32 %v6934_v25, %v1081_v6 }
 0x165   : >> { %v1172_v38 = vadd.f32 %v1166_v4, %v1120_v39  ;;  %v1116_v63 = vadd.f32 %v1110_v5, %v1064_v45 }
 0x166   : >> { %v1115_v9 = vadd.f32 %v1109_v2, %v1063_v49 }
 0x168   : >> { %1471 = vperm.xlu2 %6424, %v6125_v7   ;;  %1466 = vperm.xlu1 %6423, %v6124_v8   ;;  %v6140_v7 = vld [vmem:[%s6675_s12 + $0xdb] sm:$0xff]  ;;  %v6139_v8 = vld [vmem:[%s6675_s12 + $0xd3] sm:$0xff] }
 0x169   : >> { %1461 = vperm.xlu0 %6422, %v6123_v10   ;;  %v6138_v10 = vld [vmem:[%s6675_s12 + $0xcb] sm:$0xff] }
 0x16a   : >> { %v1196_v14 = vpop.permute.xlu2 %1195  ;;  %v1101_v15 = vpop.permute.xlu1 %1100 }
 0x16b   : >> { %v1216_v16 = vmul.f32 %v6968_v11, %v1196_v14  ;;  %v1113_v17 = vmul.f32 %v6934_v25, %v1101_v15  ;;  %v1096_v18 = vpop.permute.xlu0 %1095 }
 0x16c   : >> { %v1112_v12 = vmul.f32 %v6934_v25, %v1096_v18 }
 0x16d   : >> { %v1222_v13 = vadd.f32 %v1216_v16, %v1169_v52  ;;  %v1119_v19 = vadd.f32 %v1113_v17, %v1067_v59  ;;  %v6137_v59 = vld [vmem:[%s6675_s12 + $0xf2] sm:$0x3f] }
 0x16e   : >> { %v1118_v23 = vadd.f32 %v1112_v12, %v1066_v62  ;;  %v6135_v62 = vld [vmem:[%s6675_s12 + $0xe2] sm:$0xff] }
 0x170   : >> { %1508 = vperm.xlu2 %6424, %v6128_v20   ;;  %1503 = vperm.xlu1 %6423, %v6127_v22   ;;  %v6142_v20 = vld [vmem:[%s6675_s12 + $0xeb] sm:$0xff] }
 0x171   : >> { %1498 = vperm.xlu0 %6422, %v6126_v24   ;;  %v6443_v24 = vld [vmem:[%s9392_s1 + $0x12] ss:$0 sm:$0xff] }
 0x172   : >> { %v1211_v27 = vpop.permute.xlu2 %1210  ;;  %v1138_v28 = vpop.permute.xlu1 %1137 }
 0x173   : >> { %v1219_v29 = vmul.f32 %v6968_v11, %v1211_v27  ;;  %v1162_v30 = vmul.f32 %v6951_v53, %v1138_v28  ;;  %v1133_v31 = vpop.permute.xlu0 %1132 }
 0x174   : >> { %v1161_v25 = vmul.f32 %v6951_v53, %v1133_v31 }
 0x175   : >> { %v1225_v26 = vadd.f32 %v1219_v29, %v1172_v38  ;;  %v1168_v21 = vadd.f32 %v1162_v30, %v1116_v63 }
 0x176   : >> { %v1167_v34 = vadd.f32 %v1161_v25, %v1115_v9 }
 0x178   : >> { %1523 = vperm.xlu2 %6424, %v6131_v32   ;;  %1518 = vperm.xlu1 %6423, %v6130_v33   ;;  %v6146_v32 = vld [vmem:[%s6675_s12 + $0xdc] sm:$0xff]  ;;  %v6145_v33 = vld [vmem:[%s6675_s12 + $0xd4] sm:$0xff] }
 0x179   : >> { %1513 = vperm.xlu0 %6422, %v6129_v35   ;;  %v6144_v35 = vld [vmem:[%s6675_s12 + $0xcc] sm:$0xff] }
 0x17a   : >> { %v1248_v40 = vpop.permute.xlu2 %1247  ;;  %v1153_v41 = vpop.permute.xlu1 %1152 }
 0x17b   : >> { %v1268_v42 = vmul.f32 %v6985_v36, %v1248_v40  ;;  %v1165_v43 = vmul.f32 %v6951_v53, %v1153_v41  ;;  %v1148_v44 = vpop.permute.xlu0 %1147 }
 0x17c   : >> { %v1164_v37 = vmul.f32 %v6951_v53, %v1148_v44 }
 0x17d   : >> { %v1274_v39 = vadd.f32 %v1268_v42, %v1222_v13  ;;  %v1171_v45 = vadd.f32 %v1165_v43, %v1119_v19  ;;  %v6143_v19 = vld [vmem:[%s6675_s12 + $0xf3] sm:$0x3f] }
 0x17e   : >> { %v1170_v49 = vadd.f32 %v1164_v37, %v1118_v23  ;;  %v6141_v23 = vld [vmem:[%s6675_s12 + $0xe3] sm:$0xff] }
 0x180   : >> { %1560 = vperm.xlu2 %6424, %v6134_v46   ;;  %1555 = vperm.xlu1 %6423, %v6133_v48   ;;  %v6148_v46 = vld [vmem:[%s6675_s12 + $0xec] sm:$0xff] }
 0x181   : >> { %1550 = vperm.xlu0 %6422, %v6132_v50   ;;  %v6444_v50 = vld [vmem:[%s9392_s1 + $0x13] ss:$0 sm:$0xff] }
 0x182   : >> { %v1263_v55 = vpop.permute.xlu2 %1262  ;;  %v1191_v56 = vpop.permute.xlu1 %1190 }
 0x183   : >> { %v1271_v57 = vmul.f32 %v6985_v36, %v1263_v55  ;;  %v1215_v51 = vmul.f32 %v6968_v11, %v1191_v56  ;;  %v1186_v58 = vpop.permute.xlu0 %1185 }
 0x184   : >> { %v1214_v53 = vmul.f32 %v6968_v11, %v1186_v58 }
 0x185   : >> { %v1277_v54 = vadd.f32 %v1271_v57, %v1225_v26  ;;  %v1221_v52 = vadd.f32 %v1215_v51, %v1168_v21 }
 0x186   : >> { %v1220_v61 = vadd.f32 %v1214_v53, %v1167_v34 }
 0x188   : >> { %1575 = vperm.xlu2 %6424, %v6137_v59   ;;  %1570 = vperm.xlu1 %6423, %v6136_v60  }
 0x189   : >> { %1565 = vperm.xlu0 %6422, %v6135_v62  }
 0x18a   : >> { %v1300_v47 = vpop.permute.xlu2 %1299  ;;  %v1206_v3 = vpop.permute.xlu1 %1205 }
 0x18b   : >> { %v1320_v4 = vmul.f32 %v7002_v1, %v1300_v47  ;;  %v1218_v5 = vmul.f32 %v6968_v11, %v1206_v3  ;;  %v1201_v6 = vpop.permute.xlu0 %1200 }
 0x18c   : >> { %v1217_v2 = vmul.f32 %v6968_v11, %v1201_v6 }
 0x18d   : >> { %v1326_v38 = vadd.f32 %v1320_v4, %v1274_v39  ;;  %v1224_v63 = vadd.f32 %v1218_v5, %v1171_v45  ;;  %v6149_v45 = vld [vmem:[%s6675_s12 + $0xf4] sm:$0x3f] }
 0x18e   : >> { %v1223_v9 = vadd.f32 %v1217_v2, %v1170_v49  ;;  %v6147_v49 = vld [vmem:[%s6675_s12 + $0xe4] sm:$0xff] }
 0x190   : >> { %1612 = vperm.xlu2 %6424, %v6140_v7   ;;  %1607 = vperm.xlu1 %6423, %v6139_v8  }
 0x191   : >> { %1602 = vperm.xlu0 %6422, %v6138_v10  }
 0x192   : >> { %v1315_v14 = vpop.permute.xlu2 %1314  ;;  %v1243_v15 = vpop.permute.xlu1 %1242 }
 0x193   : >> { %v1323_v16 = vmul.f32 %v7002_v1, %v1315_v14  ;;  %v1267_v17 = vmul.f32 %v6985_v36, %v1243_v15  ;;  %v1238_v18 = vpop.permute.xlu0 %1237 }
 0x194   : >> { %v1266_v11 = vmul.f32 %v6985_v36, %v1238_v18 }
 0x195   : >> { %v1329_v12 = vadd.f32 %v1323_v16, %v1277_v54  ;;  %v1273_v13 = vadd.f32 %v1267_v17, %v1221_v52 }
 0x196   : >> { %v1272_v22 = vadd.f32 %v1266_v11, %v1220_v61 }
 0x198   : >> { %1627 = vperm.xlu2 %6424, %v6143_v19   ;;  %1622 = vperm.xlu1 %6423, %v6142_v20  }
 0x199   : >> { %1617 = vperm.xlu0 %6422, %v6141_v23  }
 0x19a   : >> { %v1352_v27 = vpop.permute.xlu2 %1351  ;;  %v1258_v28 = vpop.permute.xlu1 %1257 }
 0x19b   : >> { %v1372_v29 = vmul.f32 %v6443_v24, %v1352_v27  ;;  %v1270_v30 = vmul.f32 %v6985_v36, %v1258_v28  ;;  %v1253_v31 = vpop.permute.xlu0 %1252 }
 0x19c   : >> { %v1269_v25 = vmul.f32 %v6985_v36, %v1253_v31 }
 0x19d   : >> { %v1378_v26 = vadd.f32 %v1372_v29, %v1326_v38  ;;  %v1276_v21 = vadd.f32 %v1270_v30, %v1224_v63 }
 0x19e   : >> { %v1275_v34 = vadd.f32 %v1269_v25, %v1223_v9 }
 0x1a0   : >> { %1664 = vperm.xlu2 %6424, %v6146_v32   ;;  %1659 = vperm.xlu1 %6423, %v6145_v33  }
 0x1a1   : >> { %1654 = vperm.xlu0 %6422, %v6144_v35  }
 0x1a2   : >> { %v1367_v40 = vpop.permute.xlu2 %1366  ;;  %v1295_v41 = vpop.permute.xlu1 %1294 }
 0x1a3   : >> { %v1375_v42 = vmul.f32 %v6443_v24, %v1367_v40  ;;  %v1319_v43 = vmul.f32 %v7002_v1, %v1295_v41  ;;  %v1290_v44 = vpop.permute.xlu0 %1289  ;;  %v6445_v41 = vld [vmem:[%s9392_s1 + $0x14] ss:$0 sm:$0xff] }
 0x1a4   : >> { %v1318_v36 = vmul.f32 %v7002_v1, %v1290_v44  ;;  %v7061_v44 = vld [vmem:[%s9392_s1 + $0x16] ss:$0 sm:$0xff] }
 0x1a5   : >> { %v1381_v37 = vadd.f32 %v1375_v42, %v1329_v12  ;;  %v1325_v39 = vadd.f32 %v1319_v43, %v1273_v13  ;;  %v7056_v42 = vld [vmem:[%s9392_s1 + $0x15] ss:$0 sm:$0xff] }
 0x1a6   : >> { %v1324_v48 = vadd.f32 %v1318_v36, %v1272_v22 }
 0x1a8   : >> { %1679 = vperm.xlu2 %6424, %v6149_v45   ;;  %1674 = vperm.xlu1 %6423, %v6148_v46   ;;  %v7067_v45 = vld [vmem:[%s9392_s1 + $0x17] ss:$0 sm:$0xff] }
 0x1a9   : >> { %1669 = vperm.xlu0 %6422, %v6147_v49  }
 0x1aa   : >> { %v1404_v55 = vpop.permute.xlu2 %1403  ;;  %v1310_v56 = vpop.permute.xlu1 %1309 }
 0x1ab   : >> { %v1424_v57 = vmul.f32 %v6444_v50, %v1404_v55  ;;  %v1322_v51 = vmul.f32 %v7002_v1, %v1310_v56  ;;  %v1305_v58 = vpop.permute.xlu0 %1304  ;;  %v7074_v56 = vld [vmem:[%s9392_s1 + $0x18] ss:$0 sm:$0xff] }
 0x1ac   : >> { %v1321_v53 = vmul.f32 %v7002_v1, %v1305_v58 }
 0x1ad   : >> { %v1430_v54 = vadd.f32 %v1424_v57, %v1378_v26  ;;  %v1328_v52 = vadd.f32 %v1322_v51, %v1276_v21 }
 0x1ae   : >> { %v1327_v59 = vadd.f32 %v1321_v53, %v1275_v34 }
 0x1b2   : >> { %v1419_v60 = vpop.permute.xlu2 %1418  ;;  %v1347_v61 = vpop.permute.xlu1 %1346 }
 0x1b3   : >> { %v1427_v62 = vmul.f32 %v6444_v50, %v1419_v60  ;;  %v1371_v47 = vmul.f32 %v6443_v24, %v1347_v61  ;;  %v1342_v3 = vpop.permute.xlu0 %1341  ;;  %v7078_v60 = vperm.slane %v6656_v0, 0 }
 0x1b4   : >> { %v1370_v4 = vmul.f32 %v6443_v24, %v1342_v3 }
 0x1b5   : >> { %v1433_v5 = vadd.f32 %v1427_v62, %v1381_v37  ;;  %v1377_v6 = vadd.f32 %v1371_v47, %v1325_v39 }
 0x1b6   : >> { %v1376_v2 = vadd.f32 %v1370_v4, %v1324_v48 }
 0x1ba   : >> { %v1457_v38 = vpop.permute.xlu2 %1456  ;;  %v1362_v63 = vpop.permute.xlu1 %1361 }
 0x1bb   : >> { %v1374_v7 = vmul.f32 %v6443_v24, %v1362_v63  ;;  %v1357_v8 = vpop.permute.xlu0 %1356  ;;  %v1477_v43 = vmul.f32 %v6445_v41, %v1457_v38 }
 0x1bc   : >> { %v1373_v9 = vmul.f32 %v6443_v24, %v1357_v8 }
 0x1bd   : >> { %v1380_v10 = vadd.f32 %v1374_v7, %v1328_v52  ;;  %v1483_v48 = vadd.f32 %v1477_v43, %v1430_v54 }
 0x1be   : >> { %v1379_v14 = vadd.f32 %v1373_v9, %v1327_v59 }
 0x1c2   : >> { %v1472_v1 = vpop.permute.xlu2 %1471  ;;  %v1399_v15 = vpop.permute.xlu1 %1398 }
 0x1c3   : >> { %v1423_v16 = vmul.f32 %v6444_v50, %v1399_v15  ;;  %v1394_v17 = vpop.permute.xlu0 %1393  ;;  %v1480_v57 = vmul.f32 %v6445_v41, %v1472_v1 }
 0x1c4   : >> { %v1422_v18 = vmul.f32 %v6444_v50, %v1394_v17 }
 0x1c5   : >> { %v7034_v11 = vadd.f32 %v1423_v16, %v1377_v6  ;;  %v1486_v62 = vadd.f32 %v1480_v57, %v1433_v5 }
 0x1c6   : >> { %v7036_v12 = vadd.f32 %v1422_v18, %v1376_v2 }
 0x1ca   : >> { %v1509_v13 = vpop.permute.xlu2 %1508  ;;  %v1414_v19 = vpop.permute.xlu1 %1413 }
 0x1cb   : >> { %v1426_v20 = vmul.f32 %v6444_v50, %v1414_v19  ;;  %v1409_v22 = vpop.permute.xlu0 %1408  ;;  %v1529_v39 = vmul.f32 %v7056_v42, %v1509_v13 }
 0x1cc   : >> { %v1425_v23 = vmul.f32 %v6444_v50, %v1409_v22 }
 0x1cd   : >> { %v7038_v27 = vadd.f32 %v1426_v20, %v1380_v10  ;;  %v1535_v50 = vadd.f32 %v1529_v39, %v1483_v48 }
 0x1ce   : >> { %v7040_v28 = vadd.f32 %v1425_v23, %v1379_v14 }
 0x1d2   : >> { %v1524_v24 = vpop.permute.xlu2 %1523  ;;  %v1452_v29 = vpop.permute.xlu1 %1451 }
 0x1d3   : >> { %v1447_v30 = vpop.permute.xlu0 %1446  ;;  %v1532_v52 = vmul.f32 %v7056_v42, %v1524_v24  ;;  %v1476_v15 = vmul.f32 %v6445_v41, %v1452_v29 }
 0x1d4   : >> { %v1475_v17 = vmul.f32 %v6445_v41, %v1447_v30 }
 0x1d5   : >> { %v1538_v4 = vadd.f32 %v1532_v52, %v1486_v62  ;;  %v1482_v22 = vadd.f32 %v1476_v15, %v7034_v11 }
 0x1d6   : >> { %v1481_v24 = vadd.f32 %v1475_v17, %v7036_v12 }
 0x1da   : >> { %v1561_v31 = vpop.permute.xlu2 %1560  ;;  %v7042_v25 = vpop.permute.xlu1 %1466 }
 0x1db   : >> { %v7044_v26 = vpop.permute.xlu0 %1461  ;;  %v1581_v49 = vmul.f32 %v7061_v44, %v1561_v31 }
 0x1dd   : >> { %v1587_v51 = vadd.f32 %v1581_v49, %v1535_v50 }
 0x1e2   : >> { %v1576_v21 = vpop.permute.xlu2 %1575  ;;  %v1504_v32 = vpop.permute.xlu1 %1503 }
 0x1e3   : >> { %v1499_v33 = vpop.permute.xlu0 %1498  ;;  %v1584_v47 = vmul.f32 %v7061_v44, %v1576_v21  ;;  %v1528_v13 = vmul.f32 %v7056_v42, %v1504_v32  ;;  %v1479_v32 = vmul.f32 %v6445_v41, %v7042_v25 }
 0x1e4   : >> { %v1527_v20 = vmul.f32 %v7056_v42, %v1499_v33 }
 0x1e5   : >> { %v1590_v38 = vadd.f32 %v1584_v47, %v1538_v4  ;;  %v1534_v21 = vadd.f32 %v1528_v13, %v1482_v22  ;;  %v1485_v25 = vadd.f32 %v1479_v32, %v7038_v27 }
 0x1ea   : >> { %v1613_v34 = vpop.permute.xlu2 %1612  ;;  %v7046_v35 = vpop.permute.xlu1 %1518 }
 0x1eb   : >> { %v7048_v40 = vpop.permute.xlu0 %1513  ;;  %v1633_v55 = vmul.f32 %v7067_v45, %v1613_v34  ;;  %v1533_v34 = vadd.f32 %v1527_v20, %v1481_v24  ;;  %v1531_v11 = vmul.f32 %v7056_v42, %v7046_v35 }
 0x1ec   : >> { %v1530_v48 = vmul.f32 %v7056_v42, %v7048_v40 }
 0x1ed   : >> { %v1639_v59 = vadd.f32 %v1633_v55, %v1587_v51  ;;  %v1537_v51 = vadd.f32 %v1531_v11, %v1485_v25 }
 0x1f2   : >> { %v1628_v36 = vpop.permute.xlu2 %1627  ;;  %v1556_v37 = vpop.permute.xlu1 %1555 }
 0x1f3   : >> { %v1551_v46 = vpop.permute.xlu0 %1550  ;;  %v1636_v6 = vmul.f32 %v7067_v45, %v1628_v36  ;;  %v1580_v23 = vmul.f32 %v7061_v44, %v1556_v37  ;;  %v1478_v36 = vmul.f32 %v6445_v41, %v7044_v26 }
 0x1f4   : >> { %v1579_v31 = vmul.f32 %v7061_v44, %v1551_v46 }
 0x1f5   : >> { %v1642_v9 = vadd.f32 %v1636_v6, %v1590_v38  ;;  %v1586_v43 = vadd.f32 %v1580_v23, %v1534_v21  ;;  %v1484_v41 = vadd.f32 %v1478_v36, %v7040_v28 }
 0x1f6   : >> { %v1585_v33 = vadd.f32 %v1579_v31, %v1533_v34 }
 0x1f7   : >> { %v1536_v42 = vadd.f32 %v1530_v48, %v1484_v41 }
 0x1fa   : >> { %v1665_v58 = vpop.permute.xlu2 %1664  ;;  %v1571_v53 = vpop.permute.xlu1 %1570 }
 0x1fb   : >> { %v1685_v54 = vmul.f32 %v7074_v56, %v1665_v58  ;;  %v1566_v61 = vpop.permute.xlu0 %1565  ;;  %v1583_v55 = vmul.f32 %v7061_v44, %v1571_v53 }
 0x1fc   : >> { %v1582_v35 = vmul.f32 %v7061_v44, %v1566_v61 }
 0x1fd   : >> { %v1691_v3 = vadd.f32 %v1685_v54, %v1639_v59  ;;  %v1589_v59 = vadd.f32 %v1583_v55, %v1537_v51 }
 0x1fe   : >> { %v1588_v54 = vadd.f32 %v1582_v35, %v1536_v42 }
 0x1ff   : >> { %v1701_v2 = vadd.f32 %v7078_v60, %v1691_v3 }
 0x201   : >> { %v1707_v63 = vmax.f32 %v1701_v2, 0.0 }
 0x202   : >> { %v1680_v7 = vpop.permute.xlu2 %1679  ;;  %v1608_v8 = vpop.permute.xlu1 %1607 }
 0x203   : >> { %1715 = vst.msk [vmem:[%s7085_s29 + $0x10] sm:$0xff] %vm1712_vm0, %v1707_v63  ;;  %v1688_v5 = vmul.f32 %v7074_v56, %v1680_v7  ;;  %v1603_v10 = vpop.permute.xlu0 %1602  ;;  %v1632_v29 = vmul.f32 %v7067_v45, %v1608_v8 }
 0x204   : >> { %v1631_v30 = vmul.f32 %v7067_v45, %v1603_v10 }
 0x205   : >> { %v1694_v14 = vadd.f32 %v1688_v5, %v1642_v9  ;;  %v1638_v37 = vadd.f32 %v1632_v29, %v1586_v43 }
 0x206   : >> { %v1637_v49 = vadd.f32 %v1631_v30, %v1585_v33 }
 0x207   : >> { %v1704_v1 = vadd.f32 %v7078_v60, %v1694_v14 }
 0x209   : >> { %v1710_v16 = vmax.f32 %v1704_v1, 0.0 }
 0x20a   : >> { %v1623_v18 = vpop.permute.xlu1 %1622 }
 0x20b   : >> { %1719 = vst.msk [vmem:[%s7085_s29 + $0x28] sm:$0x3f] %vm1718_vm1, %v1710_v16  ;;  %v1618_v19 = vpop.permute.xlu0 %1617  ;;  %v1635_v58 = vmul.f32 %v7067_v45, %v1623_v18 }
 0x20c   : >> { %v1634_v52 = vmul.f32 %v7067_v45, %v1618_v19 }
 0x20d   : >> { %v1641_v44 = vadd.f32 %v1635_v58, %v1589_v59 }
 0x20e   : >> { %v1640_v3 = vadd.f32 %v1634_v52, %v1588_v54 }
 0x212   : >> { %v1660_v39 = vpop.permute.xlu1 %1659 }
 0x213   : >> { %v1684_v12 = vmul.f32 %v7074_v56, %v1660_v39  ;;  %v1655_v46 = vpop.permute.xlu0 %1654 }
 0x214   : >> { %v1683_v50 = vmul.f32 %v7074_v56, %v1655_v46 }
 0x215   : >> { %v1690_v26 = vadd.f32 %v1684_v12, %v1638_v37 }
 0x216   : >> { %v1689_v57 = vadd.f32 %v1683_v50, %v1637_v49 }
 0x217   : >> { %v1700_v40 = vadd.f32 %v7078_v60, %v1690_v26 }
 0x218   : >> { %v1699_v27 = vadd.f32 %v7078_v60, %v1689_v57 }
 0x219   : >> { %v1706_v53 = vmax.f32 %v1700_v40, 0.0 }
 0x21a   : >> { %v1705_v62 = vmax.f32 %v1699_v27, 0.0  ;;  %v1675_v28 = vpop.permute.xlu1 %1674 }
 0x21b   : >> { %1714 = vst.msk [vmem:[%s7085_s29 + $0x8] sm:$0xff] %vm1712_vm0, %v1706_v53  ;;  %v1687_v61 = vmul.f32 %v7074_v56, %v1675_v28  ;;  %v1670_v47 = vpop.permute.xlu0 %1669 }
 0x21c   : >> { %1713 = vst.msk [vmem:[%s7085_s29] sm:$0xff] %vm1712_vm0, %v1705_v62  ;;  %v1686_v45 = vmul.f32 %v7074_v56, %v1670_v47 }
 0x21d   : >> { %v1693_v4 = vadd.f32 %v1687_v61, %v1641_v44 }
 0x21e   : >> { %v1692_v6 = vadd.f32 %v1686_v45, %v1640_v3 }
 0x21f   : >> { %v1703_v2 = vadd.f32 %v7078_v60, %v1693_v4 }
 0x220   : >> { %v1702_v38 = vadd.f32 %v7078_v60, %v1692_v6  ;;  %389 = sbr.rel (!%p387_p11) target bundleno = 28 (0x1c), region = 551 }
 0x221   : >> { %v1709_v63 = vmax.f32 %v1703_v2, 0.0 }
 0x222   : >> { %v1708_v7 = vmax.f32 %v1702_v38, 0.0 }
 0x223   : >> { %1717 = vst.msk [vmem:[%s7085_s29 + $0x20] sm:$0xff] %vm1712_vm0, %v1709_v63 }
 0x224   : >> { %1716 = vst.msk [vmem:[%s7085_s29 + $0x18] sm:$0xff] %vm1712_vm0, %v1708_v7 }
 0x22b   : > { %v1720_v8 = vld [vmem:[#allocation2] ss:$2 sm:$0xff]  ;;  %v1726_v56 = vld [vmem:[#allocation2 + $0x1] ss:$2 sm:$0xff]  ;;  %v1732_v9 = vld [vmem:[#allocation2 + $0x30] ss:$2 sm:$0xff] }
 0x22c   : > { %v1738_v5 = vld [vmem:[#allocation2 + $0x31] ss:$2 sm:$0xff]  ;;  %v1743_v10 = vmax.f32 %v1720_v8, %v1726_v56  ;;  %v1722_v14 = vld [vmem:[#allocation2 + $0x10] ss:$2 sm:$0xff]  ;;  %v1734_v15 = vld [vmem:[#allocation2 + $0x40] ss:$2 sm:$0xff] }
 0x22d   : > { %v1728_v1 = vld [vmem:[#allocation2 + $0x11] ss:$2 sm:$0xff]  ;;  %v1746_v60 = vmax.f32 %v1732_v9, %v1738_v5  ;;  %v1740_v16 = vld [vmem:[#allocation2 + $0x41] ss:$2 sm:$0xff]  ;;  %v1758_v0 = vld [vmem:[#allocation2 + $0x60] ss:$2 sm:$0xff] }
 0x22e   : > { %v1744_v17 = vmax.f32 %v1722_v14, %v1728_v1  ;;  %v1747_v18 = vmax.f32 %v1734_v15, %v1740_v16  ;;  %v1724_v13 = vld [vmem:[#allocation2 + $0x20] ss:$2 sm:$0x7f]  ;;  %v1730_v19 = vld [vmem:[#allocation2 + $0x21] ss:$2 sm:$0x7f] }
 0x22f   : > { %v1749_v20 = vmax.f32 %v1743_v10, %v1746_v60  ;;  %v1736_v22 = vld [vmem:[#allocation2 + $0x50] ss:$2 sm:$0x7f]  ;;  %v1742_v23 = vld [vmem:[#allocation2 + $0x51] ss:$2 sm:$0x7f]  ;;  %v1745_v24 = vmax.f32 %v1724_v13, %v1730_v19 }
 0x230   : > { %v1750_v31 = vmax.f32 %v1744_v17, %v1747_v18  ;;  %v1748_v21 = vmax.f32 %v1736_v22, %v1742_v23  ;;  %v1764_v29 = vld [vmem:[#allocation2 + $0x61] ss:$2 sm:$0xff]  ;;  %v1770_v34 = vld [vmem:[#allocation2 + $0x90] ss:$2 sm:$0xff]  ;;  %v1776_v30 = vld [vmem:[#allocation2 + $0x91] ss:$2 sm:$0xff] }
 0x231   : > { %1753 = vst.msk [vmem:[#allocation3] sm:$0xff] %vm1712_vm0, %v1749_v20  ;;  %v1781_v32 = vmax.f32 %v1758_v0, %v1764_v29  ;;  %v1760_v43 = vld [vmem:[#allocation2 + $0x70] ss:$2 sm:$0xff]  ;;  %v1784_v33 = vmax.f32 %v1770_v34, %v1776_v30  ;;  %v1766_v39 = vld [vmem:[#allocation2 + $0x71] ss:$2 sm:$0xff] }
 0x232   : > { %1754 = vst.msk [vmem:[#allocation3 + $0x8] sm:$0xff] %vm1712_vm0, %v1750_v31  ;;  %v1751_v36 = vmax.f32 %v1745_v24, %v1748_v21  ;;  %v1772_v11 = vld [vmem:[#allocation2 + $0xa0] ss:$2 sm:$0xff]  ;;  %v1778_v37 = vld [vmem:[#allocation2 + $0xa1] ss:$2 sm:$0xff]  ;;  %v1782_v12 = vmax.f32 %v1760_v43, %v1766_v39 }
 0x233   : > { %v1762_v46 = vld [vmem:[#allocation2 + $0x80] ss:$2 sm:$0x7f]  ;;  %v1787_v48 = vmax.f32 %v1781_v32, %v1784_v33  ;;  %v1785_v49 = vmax.f32 %v1772_v11, %v1778_v37  ;;  %v1768_v50 = vld [vmem:[#allocation2 + $0x81] ss:$2 sm:$0x7f] }
 0x234   : > { %1756 = vst.msk [vmem:[#allocation3 + $0x10] sm:$0x7f] %vm1755_vm2, %v1751_v36  ;;  %v1774_v25 = vld [vmem:[#allocation2 + $0xb0] ss:$2 sm:$0x7f]  ;;  %v1783_v26 = vmax.f32 %v1762_v46, %v1768_v50 }
 0x235   : > { %v1780_v55 = vld [vmem:[#allocation2 + $0xb1] ss:$2 sm:$0x7f]  ;;  %1790 = vst.msk [vmem:[#allocation3 + $0x17] sm:$0xff] %vm1712_vm0, %v1787_v48  ;;  %v1788_v41 = vmax.f32 %v1782_v12, %v1785_v49  ;;  %v1794_v57 = vld [vmem:[#allocation2 + $0xc0] ss:$2 sm:$0xff] }
 0x236   : > { %v1786_v35 = vmax.f32 %v1774_v25, %v1780_v55  ;;  %v1800_v51 = vld [vmem:[#allocation2 + $0xc1] ss:$2 sm:$0xff]  ;;  %v1806_v58 = vld [vmem:[#allocation2 + $0xf0] ss:$2 sm:$0xff]  ;;  %v1812_v40 = vld [vmem:[#allocation2 + $0xf1] ss:$2 sm:$0xff] }
 0x237   : > { %v1817_v42 = vmax.f32 %v1794_v57, %v1800_v51  ;;  %v1796_v52 = vld [vmem:[#allocation2 + $0xd0] ss:$2 sm:$0xff]  ;;  %1791 = vst.msk [vmem:[#allocation3 + $0x1f] sm:$0xff] %vm1712_vm0, %v1788_v41  ;;  %v1820_v59 = vmax.f32 %v1806_v58, %v1812_v40  ;;  %v1802_v53 = vld [vmem:[#allocation2 + $0xd1] ss:$2 sm:$0xff] }
 0x238   : > { %v1789_v27 = vmax.f32 %v1783_v26, %v1786_v35  ;;  %v1808_v54 = vld [vmem:[#allocation2 + $0x100] ss:$2 sm:$0xff]  ;;  %v1814_v62 = vld [vmem:[#allocation2 + $0x101] ss:$2 sm:$0xff]  ;;  %v1818_v28 = vmax.f32 %v1796_v52, %v1802_v53  ;;  %v1842_v8 = vld [vmem:[#allocation2 + $0x150] ss:$2 sm:$0xff] }
 0x239   : > { %v1798_v44 = vld [vmem:[#allocation2 + $0xe0] ss:$2 sm:$0x7f]  ;;  %v1823_v61 = vmax.f32 %v1817_v42, %v1820_v59  ;;  %v1821_v47 = vmax.f32 %v1808_v54, %v1814_v62  ;;  %v1804_v3 = vld [vmem:[#allocation2 + $0xe1] ss:$2 sm:$0x7f] }
 0x23a   : > { %1792 = vst.msk [vmem:[#allocation3 + $0x27] sm:$0x7f] %vm1755_vm2, %v1789_v27  ;;  %v1810_v45 = vld [vmem:[#allocation2 + $0x110] ss:$2 sm:$0x7f]  ;;  %v1819_v6 = vmax.f32 %v1798_v44, %v1804_v3 }
 0x23b   : > { %v1816_v4 = vld [vmem:[#allocation2 + $0x111] ss:$2 sm:$0x7f]  ;;  %1826 = vst.msk [vmem:[#allocation3 + $0x2e] sm:$0xff] %vm1712_vm0, %v1823_v61  ;;  %v1824_v2 = vmax.f32 %v1818_v28, %v1821_v47  ;;  %v1830_v63 = vld [vmem:[#allocation2 + $0x120] ss:$2 sm:$0xff] }
 0x23c   : > { %v1822_v38 = vmax.f32 %v1810_v45, %v1816_v4  ;;  %v1836_v7 = vld [vmem:[#allocation2 + $0x121] ss:$2 sm:$0xff]  ;;  %v1848_v56 = vld [vmem:[#allocation2 + $0x151] ss:$2 sm:$0xff]  ;;  %v1832_v5 = vld [vmem:[#allocation2 + $0x130] ss:$2 sm:$0xff] }
 0x23d   : > { %v1853_v9 = vmax.f32 %v1830_v63, %v1836_v7  ;;  %1827 = vst.msk [vmem:[#allocation3 + $0x36] sm:$0xff] %vm1712_vm0, %v1824_v2  ;;  %v1856_v14 = vmax.f32 %v1842_v8, %v1848_v56  ;;  %v1838_v1 = vld [vmem:[#allocation2 + $0x131] ss:$2 sm:$0xff]  ;;  %v1844_v60 = vld [vmem:[#allocation2 + $0x160] ss:$2 sm:$0xff] }
 0x23e   : > { %v1825_v10 = vmax.f32 %v1819_v6, %v1822_v38  ;;  %v1850_v15 = vld [vmem:[#allocation2 + $0x161] ss:$2 sm:$0xff]  ;;  %v1854_v16 = vmax.f32 %v1832_v5, %v1838_v1  ;;  %v1834_v17 = vld [vmem:[#allocation2 + $0x140] ss:$2 sm:$0x7f] }
 0x23f   : > { %v1859_v18 = vmax.f32 %v1853_v9, %v1856_v14  ;;  %v1857_v13 = vmax.f32 %v1844_v60, %v1850_v15  ;;  %v1840_v19 = vld [vmem:[#allocation2 + $0x141] ss:$2 sm:$0x7f]  ;;  %v1846_v20 = vld [vmem:[#allocation2 + $0x170] ss:$2 sm:$0x7f] }
 0x240   : > { %1828 = vst.msk [vmem:[#allocation3 + $0x3e] sm:$0x7f] %vm1755_vm2, %v1825_v10  ;;  %v1852_v22 = vld [vmem:[#allocation2 + $0x171] ss:$2 sm:$0x7f]  ;;  %v1855_v23 = vmax.f32 %v1834_v17, %v1840_v19 }
 0x241   : > { %1862 = vst.msk [vmem:[#allocation3 + $0x45] sm:$0xff] %vm1712_vm0, %v1859_v18  ;;  %v1860_v24 = vmax.f32 %v1854_v16, %v1857_v13  ;;  %v1858_v31 = vmax.f32 %v1846_v20, %v1852_v22  ;;  %v1866_v21 = vld [vmem:[#allocation2 + $0x180] ss:$2 sm:$0xff]  ;;  %v1872_v0 = vld [vmem:[#allocation2 + $0x181] ss:$2 sm:$0xff] }
 0x242   : > { %v1878_v29 = vld [vmem:[#allocation2 + $0x1b0] ss:$2 sm:$0xff]  ;;  %v1884_v34 = vld [vmem:[#allocation2 + $0x1b1] ss:$2 sm:$0xff]  ;;  %v1889_v30 = vmax.f32 %v1866_v21, %v1872_v0  ;;  %v1880_v39 = vld [vmem:[#allocation2 + $0x1c0] ss:$2 sm:$0xff] }
 0x243   : > { %v1868_v32 = vld [vmem:[#allocation2 + $0x190] ss:$2 sm:$0xff]  ;;  %1863 = vst.msk [vmem:[#allocation3 + $0x4d] sm:$0xff] %vm1712_vm0, %v1860_v24  ;;  %v1861_v43 = vmax.f32 %v1855_v23, %v1858_v31  ;;  %v1892_v36 = vmax.f32 %v1878_v29, %v1884_v34  ;;  %v1874_v33 = vld [vmem:[#allocation2 + $0x191] ss:$2 sm:$0xff] }
 0x244   : > { %v1886_v11 = vld [vmem:[#allocation2 + $0x1c1] ss:$2 sm:$0xff]  ;;  %v1890_v37 = vmax.f32 %v1868_v32, %v1874_v33  ;;  %v1870_v12 = vld [vmem:[#allocation2 + $0x1a0] ss:$2 sm:$0x7f] }
 0x245   : > { %1864 = vst.msk [vmem:[#allocation3 + $0x55] sm:$0x7f] %vm1755_vm2, %v1861_v43  ;;  %v1895_v46 = vmax.f32 %v1889_v30, %v1892_v36  ;;  %v1893_v48 = vmax.f32 %v1880_v39, %v1886_v11  ;;  %v1876_v49 = vld [vmem:[#allocation2 + $0x1a1] ss:$2 sm:$0x7f] }
 0x246   : > { %v1882_v50 = vld [vmem:[#allocation2 + $0x1d0] ss:$2 sm:$0x7f]  ;;  %v1888_v25 = vld [vmem:[#allocation2 + $0x1d1] ss:$2 sm:$0x7f]  ;;  %v1891_v55 = vmax.f32 %v1870_v12, %v1876_v49 }
 0x247   : > { %1898 = vst.msk [vmem:[#allocation3 + $0x5c] sm:$0xff] %vm1712_vm0, %v1895_v46  ;;  %v1896_v26 = vmax.f32 %v1890_v37, %v1893_v48  ;;  %v1894_v41 = vmax.f32 %v1882_v50, %v1888_v25  ;;  %v1902_v35 = vld [vmem:[#allocation2 + $0x1e0] ss:$2 sm:$0xff]  ;;  %v1908_v57 = vld [vmem:[#allocation2 + $0x1e1] ss:$2 sm:$0xff] }
 0x248   : > { %v1914_v51 = vld [vmem:[#allocation2 + $0x210] ss:$2 sm:$0xff]  ;;  %v1920_v58 = vld [vmem:[#allocation2 + $0x211] ss:$2 sm:$0xff]  ;;  %v1925_v40 = vmax.f32 %v1902_v35, %v1908_v57  ;;  %v1916_v53 = vld [vmem:[#allocation2 + $0x220] ss:$2 sm:$0xff] }
 0x249   : > { %v1904_v42 = vld [vmem:[#allocation2 + $0x1f0] ss:$2 sm:$0xff]  ;;  %1899 = vst.msk [vmem:[#allocation3 + $0x64] sm:$0xff] %vm1712_vm0, %v1896_v26  ;;  %v1897_v52 = vmax.f32 %v1891_v55, %v1894_v41  ;;  %v1928_v27 = vmax.f32 %v1914_v51, %v1920_v58  ;;  %v1910_v59 = vld [vmem:[#allocation2 + $0x1f1] ss:$2 sm:$0xff] }
 0x24a   : > { %v1922_v54 = vld [vmem:[#allocation2 + $0x221] ss:$2 sm:$0xff]  ;;  %v1926_v62 = vmax.f32 %v1904_v42, %v1910_v59  ;;  %v1906_v28 = vld [vmem:[#allocation2 + $0x200] ss:$2 sm:$0x7f] }
 0x24b   : > { %1900 = vst.msk [vmem:[#allocation3 + $0x6c] sm:$0x7f] %vm1755_vm2, %v1897_v52  ;;  %v1931_v44 = vmax.f32 %v1925_v40, %v1928_v27  ;;  %v1929_v61 = vmax.f32 %v1916_v53, %v1922_v54  ;;  %v1912_v47 = vld [vmem:[#allocation2 + $0x201] ss:$2 sm:$0x7f] }
 0x24c   : > { %v1918_v3 = vld [vmem:[#allocation2 + $0x230] ss:$2 sm:$0x7f]  ;;  %v1924_v45 = vld [vmem:[#allocation2 + $0x231] ss:$2 sm:$0x7f]  ;;  %v1927_v4 = vmax.f32 %v1906_v28, %v1912_v47 }
 0x24d   : > { %1934 = vst.msk [vmem:[#allocation3 + $0x73] sm:$0xff] %vm1712_vm0, %v1931_v44  ;;  %v1932_v6 = vmax.f32 %v1926_v62, %v1929_v61  ;;  %v1930_v2 = vmax.f32 %v1918_v3, %v1924_v45  ;;  %v1938_v38 = vld [vmem:[#allocation2 + $0x240] ss:$2 sm:$0xff]  ;;  %v1944_v63 = vld [vmem:[#allocation2 + $0x241] ss:$2 sm:$0xff] }
 0x24e   : > { %v1950_v7 = vld [vmem:[#allocation2 + $0x270] ss:$2 sm:$0xff]  ;;  %v1956_v8 = vld [vmem:[#allocation2 + $0x271] ss:$2 sm:$0xff]  ;;  %v1961_v56 = vmax.f32 %v1938_v38, %v1944_v63  ;;  %v1952_v1 = vld [vmem:[#allocation2 + $0x280] ss:$2 sm:$0xff] }
 0x24f   : > { %v1940_v9 = vld [vmem:[#allocation2 + $0x250] ss:$2 sm:$0xff]  ;;  %1935 = vst.msk [vmem:[#allocation3 + $0x7b] sm:$0xff] %vm1712_vm0, %v1932_v6  ;;  %v1933_v5 = vmax.f32 %v1927_v4, %v1930_v2  ;;  %v1964_v10 = vmax.f32 %v1950_v7, %v1956_v8  ;;  %v1946_v14 = vld [vmem:[#allocation2 + $0x251] ss:$2 sm:$0xff] }
 0x250   : > { %v1958_v60 = vld [vmem:[#allocation2 + $0x281] ss:$2 sm:$0xff]  ;;  %v1962_v15 = vmax.f32 %v1940_v9, %v1946_v14  ;;  %v1942_v16 = vld [vmem:[#allocation2 + $0x260] ss:$2 sm:$0x7f] }
 0x251   : > { %1936 = vst.msk [vmem:[#allocation3 + $0x83] sm:$0x7f] %vm1755_vm2, %v1933_v5  ;;  %v1967_v17 = vmax.f32 %v1961_v56, %v1964_v10  ;;  %v1965_v18 = vmax.f32 %v1952_v1, %v1958_v60  ;;  %v1948_v13 = vld [vmem:[#allocation2 + $0x261] ss:$2 sm:$0x7f] }
 0x252   : > { %v1954_v19 = vld [vmem:[#allocation2 + $0x290] ss:$2 sm:$0x7f]  ;;  %v1960_v20 = vld [vmem:[#allocation2 + $0x291] ss:$2 sm:$0x7f]  ;;  %v1963_v22 = vmax.f32 %v1942_v16, %v1948_v13 }
 0x253   : > { %1970 = vst.msk [vmem:[#allocation3 + $0x8a] sm:$0xff] %vm1712_vm0, %v1967_v17  ;;  %v1968_v23 = vmax.f32 %v1962_v15, %v1965_v18  ;;  %v1966_v24 = vmax.f32 %v1954_v19, %v1960_v20  ;;  %v1974_v31 = vld [vmem:[#allocation2 + $0x2a0] ss:$2 sm:$0xff]  ;;  %v1980_v21 = vld [vmem:[#allocation2 + $0x2a1] ss:$2 sm:$0xff] }
 0x254   : > { %v1986_v0 = vld [vmem:[#allocation2 + $0x2d0] ss:$2 sm:$0xff]  ;;  %v1992_v29 = vld [vmem:[#allocation2 + $0x2d1] ss:$2 sm:$0xff]  ;;  %v1997_v34 = vmax.f32 %v1974_v31, %v1980_v21  ;;  %v1988_v33 = vld [vmem:[#allocation2 + $0x2e0] ss:$2 sm:$0xff] }
 0x255   : > { %v1976_v30 = vld [vmem:[#allocation2 + $0x2b0] ss:$2 sm:$0xff]  ;;  %1971 = vst.msk [vmem:[#allocation3 + $0x92] sm:$0xff] %vm1712_vm0, %v1968_v23  ;;  %v1969_v32 = vmax.f32 %v1963_v22, %v1966_v24  ;;  %v2000_v43 = vmax.f32 %v1986_v0, %v1992_v29  ;;  %v1982_v36 = vld [vmem:[#allocation2 + $0x2b1] ss:$2 sm:$0xff] }
 0x256   : > { %v1994_v39 = vld [vmem:[#allocation2 + $0x2e1] ss:$2 sm:$0xff]  ;;  %v1998_v11 = vmax.f32 %v1976_v30, %v1982_v36  ;;  %v1978_v37 = vld [vmem:[#allocation2 + $0x2c0] ss:$2 sm:$0x7f] }
 0x257   : > { %1972 = vst.msk [vmem:[#allocation3 + $0x9a] sm:$0x7f] %vm1755_vm2, %v1969_v32  ;;  %v2003_v12 = vmax.f32 %v1997_v34, %v2000_v43  ;;  %v2001_v46 = vmax.f32 %v1988_v33, %v1994_v39  ;;  %v1984_v48 = vld [vmem:[#allocation2 + $0x2c1] ss:$2 sm:$0x7f] }
 0x258   : > { %v1990_v49 = vld [vmem:[#allocation2 + $0x2f0] ss:$2 sm:$0x7f]  ;;  %v1996_v50 = vld [vmem:[#allocation2 + $0x2f1] ss:$2 sm:$0x7f]  ;;  %v1999_v25 = vmax.f32 %v1978_v37, %v1984_v48 }
 0x259   : > { %2006 = vst.msk [vmem:[#allocation3 + $0xa1] sm:$0xff] %vm1712_vm0, %v2003_v12  ;;  %v2004_v55 = vmax.f32 %v1998_v11, %v2001_v46  ;;  %v2002_v26 = vmax.f32 %v1990_v49, %v1996_v50  ;;  %v2010_v41 = vld [vmem:[#allocation2 + $0x300] ss:$2 sm:$0xff]  ;;  %v2016_v35 = vld [vmem:[#allocation2 + $0x301] ss:$2 sm:$0xff] }
 0x25a   : > { %v2022_v57 = vld [vmem:[#allocation2 + $0x330] ss:$2 sm:$0xff]  ;;  %v2028_v51 = vld [vmem:[#allocation2 + $0x331] ss:$2 sm:$0xff]  ;;  %v2033_v58 = vmax.f32 %v2010_v41, %v2016_v35  ;;  %v2024_v59 = vld [vmem:[#allocation2 + $0x340] ss:$2 sm:$0xff] }
 0x25b   : > { %v2012_v40 = vld [vmem:[#allocation2 + $0x310] ss:$2 sm:$0xff]  ;;  %2007 = vst.msk [vmem:[#allocation3 + $0xa9] sm:$0xff] %vm1712_vm0, %v2004_v55  ;;  %v2005_v42 = vmax.f32 %v1999_v25, %v2002_v26  ;;  %v2036_v52 = vmax.f32 %v2022_v57, %v2028_v51  ;;  %v2018_v27 = vld [vmem:[#allocation2 + $0x311] ss:$2 sm:$0xff] }
 0x25c   : > { %v2030_v53 = vld [vmem:[#allocation2 + $0x341] ss:$2 sm:$0xff]  ;;  %v2034_v54 = vmax.f32 %v2012_v40, %v2018_v27  ;;  %v2014_v62 = vld [vmem:[#allocation2 + $0x320] ss:$2 sm:$0x7f] }
 0x25d   : > { %2008 = vst.msk [vmem:[#allocation3 + $0xb1] sm:$0x7f] %vm1755_vm2, %v2005_v42  ;;  %v2039_v28 = vmax.f32 %v2033_v58, %v2036_v52  ;;  %v2037_v44 = vmax.f32 %v2024_v59, %v2030_v53  ;;  %v2020_v61 = vld [vmem:[#allocation2 + $0x321] ss:$2 sm:$0x7f] }
 0x25e   : > { %v2026_v47 = vld [vmem:[#allocation2 + $0x350] ss:$2 sm:$0x7f]  ;;  %v2032_v3 = vld [vmem:[#allocation2 + $0x351] ss:$2 sm:$0x7f]  ;;  %v2035_v45 = vmax.f32 %v2014_v62, %v2020_v61 }
 0x25f   : > { %2042 = vst.msk [vmem:[#allocation3 + $0xb8] sm:$0xff] %vm1712_vm0, %v2039_v28  ;;  %v2040_v4 = vmax.f32 %v2034_v54, %v2037_v44  ;;  %v2038_v6 = vmax.f32 %v2026_v47, %v2032_v3  ;;  %v2046_v2 = vld [vmem:[#allocation2 + $0x360] ss:$2 sm:$0xff]  ;;  %v2052_v38 = vld [vmem:[#allocation2 + $0x361] ss:$2 sm:$0xff] }
 0x260   : > { %v2058_v63 = vld [vmem:[#allocation2 + $0x390] ss:$2 sm:$0xff]  ;;  %v2064_v7 = vld [vmem:[#allocation2 + $0x391] ss:$2 sm:$0xff]  ;;  %v2069_v8 = vmax.f32 %v2046_v2, %v2052_v38  ;;  %v2060_v14 = vld [vmem:[#allocation2 + $0x3a0] ss:$2 sm:$0xff] }
 0x261   : > { %v2048_v56 = vld [vmem:[#allocation2 + $0x370] ss:$2 sm:$0xff]  ;;  %2043 = vst.msk [vmem:[#allocation3 + $0xc0] sm:$0xff] %vm1712_vm0, %v2040_v4  ;;  %v2041_v9 = vmax.f32 %v2035_v45, %v2038_v6  ;;  %v2072_v5 = vmax.f32 %v2058_v63, %v2064_v7  ;;  %v2054_v10 = vld [vmem:[#allocation2 + $0x371] ss:$2 sm:$0xff] }
 0x262   : > { %v2066_v1 = vld [vmem:[#allocation2 + $0x3a1] ss:$2 sm:$0xff]  ;;  %v2070_v60 = vmax.f32 %v2048_v56, %v2054_v10  ;;  %v2050_v15 = vld [vmem:[#allocation2 + $0x380] ss:$2 sm:$0x7f] }
 0x263   : > { %2044 = vst.msk [vmem:[#allocation3 + $0xc8] sm:$0x7f] %vm1755_vm2, %v2041_v9  ;;  %v2075_v16 = vmax.f32 %v2069_v8, %v2072_v5  ;;  %v2073_v17 = vmax.f32 %v2060_v14, %v2066_v1  ;;  %v2056_v18 = vld [vmem:[#allocation2 + $0x381] ss:$2 sm:$0x7f] }
 0x264   : > { %v2062_v13 = vld [vmem:[#allocation2 + $0x3b0] ss:$2 sm:$0x7f]  ;;  %v2068_v19 = vld [vmem:[#allocation2 + $0x3b1] ss:$2 sm:$0x7f]  ;;  %v2071_v20 = vmax.f32 %v2050_v15, %v2056_v18 }
 0x265   : > { %2078 = vst.msk [vmem:[#allocation3 + $0xcf] sm:$0xff] %vm1712_vm0, %v2075_v16  ;;  %v2076_v22 = vmax.f32 %v2070_v60, %v2073_v17  ;;  %v2074_v23 = vmax.f32 %v2062_v13, %v2068_v19  ;;  %v2082_v24 = vld [vmem:[#allocation2 + $0x3c0] ss:$2 sm:$0xff]  ;;  %v2088_v31 = vld [vmem:[#allocation2 + $0x3c1] ss:$2 sm:$0xff] }
 0x266   : > { %v2094_v21 = vld [vmem:[#allocation2 + $0x3f0] ss:$2 sm:$0xff]  ;;  %v2100_v0 = vld [vmem:[#allocation2 + $0x3f1] ss:$2 sm:$0xff]  ;;  %v2105_v29 = vmax.f32 %v2082_v24, %v2088_v31  ;;  %v2096_v36 = vld [vmem:[#allocation2 + $0x400] ss:$2 sm:$0xff] }
 0x267   : > { %v2084_v34 = vld [vmem:[#allocation2 + $0x3d0] ss:$2 sm:$0xff]  ;;  %2079 = vst.msk [vmem:[#allocation3 + $0xd7] sm:$0xff] %vm1712_vm0, %v2076_v22  ;;  %v2077_v30 = vmax.f32 %v2071_v20, %v2074_v23  ;;  %v2108_v32 = vmax.f32 %v2094_v21, %v2100_v0  ;;  %v2090_v43 = vld [vmem:[#allocation2 + $0x3d1] ss:$2 sm:$0xff] }
 0x268   : > { %v2102_v33 = vld [vmem:[#allocation2 + $0x401] ss:$2 sm:$0xff]  ;;  %v2106_v39 = vmax.f32 %v2084_v34, %v2090_v43  ;;  %v2086_v11 = vld [vmem:[#allocation2 + $0x3e0] ss:$2 sm:$0x7f] }
 0x269   : > { %2080 = vst.msk [vmem:[#allocation3 + $0xdf] sm:$0x7f] %vm1755_vm2, %v2077_v30  ;;  %v2111_v37 = vmax.f32 %v2105_v29, %v2108_v32  ;;  %v2109_v12 = vmax.f32 %v2096_v36, %v2102_v33  ;;  %v2092_v46 = vld [vmem:[#allocation2 + $0x3e1] ss:$2 sm:$0x7f] }
 0x26a   : > { %v2098_v48 = vld [vmem:[#allocation2 + $0x410] ss:$2 sm:$0x7f]  ;;  %v2104_v49 = vld [vmem:[#allocation2 + $0x411] ss:$2 sm:$0x7f]  ;;  %v2107_v50 = vmax.f32 %v2086_v11, %v2092_v46 }
 0x26b   : > { %2114 = vst.msk [vmem:[#allocation3 + $0xe6] sm:$0xff] %vm1712_vm0, %v2111_v37  ;;  %v2112_v25 = vmax.f32 %v2106_v39, %v2109_v12  ;;  %v2110_v55 = vmax.f32 %v2098_v48, %v2104_v49  ;;  %v2118_v26 = vld [vmem:[#allocation2 + $0x420] ss:$2 sm:$0xff]  ;;  %v2124_v41 = vld [vmem:[#allocation2 + $0x421] ss:$2 sm:$0xff] }
 0x26c   : > { %v2130_v35 = vld [vmem:[#allocation2 + $0x450] ss:$2 sm:$0xff]  ;;  %v2136_v57 = vld [vmem:[#allocation2 + $0x451] ss:$2 sm:$0xff]  ;;  %v2141_v51 = vmax.f32 %v2118_v26, %v2124_v41  ;;  %v2132_v27 = vld [vmem:[#allocation2 + $0x460] ss:$2 sm:$0xff] }
 0x26d   : > { %v2120_v58 = vld [vmem:[#allocation2 + $0x430] ss:$2 sm:$0xff]  ;;  %2115 = vst.msk [vmem:[#allocation3 + $0xee] sm:$0xff] %vm1712_vm0, %v2112_v25  ;;  %v2113_v40 = vmax.f32 %v2107_v50, %v2110_v55  ;;  %v2144_v42 = vmax.f32 %v2130_v35, %v2136_v57  ;;  %v2126_v52 = vld [vmem:[#allocation2 + $0x431] ss:$2 sm:$0xff] }
 0x26e   : > { %v2138_v59 = vld [vmem:[#allocation2 + $0x461] ss:$2 sm:$0xff]  ;;  %v2142_v53 = vmax.f32 %v2120_v58, %v2126_v52  ;;  %v2122_v54 = vld [vmem:[#allocation2 + $0x440] ss:$2 sm:$0x7f] }
 0x26f   : > { %2116 = vst.msk [vmem:[#allocation3 + $0xf6] sm:$0x7f] %vm1755_vm2, %v2113_v40  ;;  %v2147_v62 = vmax.f32 %v2141_v51, %v2144_v42  ;;  %v2145_v28 = vmax.f32 %v2132_v27, %v2138_v59  ;;  %v2128_v44 = vld [vmem:[#allocation2 + $0x441] ss:$2 sm:$0x7f] }
 0x270   : > { %v2134_v61 = vld [vmem:[#allocation2 + $0x470] ss:$2 sm:$0x7f]  ;;  %v2140_v47 = vld [vmem:[#allocation2 + $0x471] ss:$2 sm:$0x7f]  ;;  %v2143_v3 = vmax.f32 %v2122_v54, %v2128_v44 }
 0x271   : > { %2150 = vst.msk [vmem:[#allocation3 + $0xfd] sm:$0xff] %vm1712_vm0, %v2147_v62  ;;  %v2148_v45 = vmax.f32 %v2142_v53, %v2145_v28  ;;  %v2146_v4 = vmax.f32 %v2134_v61, %v2140_v47  ;;  %v2154_v6 = vld [vmem:[#allocation2 + $0x480] ss:$2 sm:$0xff]  ;;  %v2160_v2 = vld [vmem:[#allocation2 + $0x481] ss:$2 sm:$0xff] }
 0x272   : > { %v2166_v38 = vld [vmem:[#allocation2 + $0x4b0] ss:$2 sm:$0xff]  ;;  %v2172_v63 = vld [vmem:[#allocation2 + $0x4b1] ss:$2 sm:$0xff]  ;;  %v2177_v7 = vmax.f32 %v2154_v6, %v2160_v2  ;;  %v2168_v10 = vld [vmem:[#allocation2 + $0x4c0] ss:$2 sm:$0xff] }
 0x273   : > { %v2156_v8 = vld [vmem:[#allocation2 + $0x490] ss:$2 sm:$0xff]  ;;  %2151 = vst.msk [vmem:[#allocation3 + $0x105] sm:$0xff] %vm1712_vm0, %v2148_v45  ;;  %v2149_v56 = vmax.f32 %v2143_v3, %v2146_v4  ;;  %v2180_v9 = vmax.f32 %v2166_v38, %v2172_v63  ;;  %v2162_v5 = vld [vmem:[#allocation2 + $0x491] ss:$2 sm:$0xff] }
 0x274   : > { %v2174_v14 = vld [vmem:[#allocation2 + $0x4c1] ss:$2 sm:$0xff]  ;;  %v2178_v1 = vmax.f32 %v2156_v8, %v2162_v5  ;;  %v2158_v60 = vld [vmem:[#allocation2 + $0x4a0] ss:$2 sm:$0x7f] }
 0x275   : > { %2152 = vst.msk [vmem:[#allocation3 + $0x10d] sm:$0x7f] %vm1755_vm2, %v2149_v56  ;;  %v2183_v15 = vmax.f32 %v2177_v7, %v2180_v9  ;;  %v2181_v16 = vmax.f32 %v2168_v10, %v2174_v14  ;;  %v2164_v17 = vld [vmem:[#allocation2 + $0x4a1] ss:$2 sm:$0x7f] }
 0x276   : > { %v2170_v18 = vld [vmem:[#allocation2 + $0x4d0] ss:$2 sm:$0x7f]  ;;  %v2176_v13 = vld [vmem:[#allocation2 + $0x4d1] ss:$2 sm:$0x7f]  ;;  %v2179_v19 = vmax.f32 %v2158_v60, %v2164_v17 }
 0x277   : > { %2186 = vst.msk [vmem:[#allocation3 + $0x114] sm:$0xff] %vm1712_vm0, %v2183_v15  ;;  %v2184_v20 = vmax.f32 %v2178_v1, %v2181_v16  ;;  %v2182_v22 = vmax.f32 %v2170_v18, %v2176_v13  ;;  %v2190_v23 = vld [vmem:[#allocation2 + $0x4e0] ss:$2 sm:$0xff]  ;;  %v2196_v24 = vld [vmem:[#allocation2 + $0x4e1] ss:$2 sm:$0xff] }
 0x278   : > { %v2202_v31 = vld [vmem:[#allocation2 + $0x510] ss:$2 sm:$0xff]  ;;  %v2208_v21 = vld [vmem:[#allocation2 + $0x511] ss:$2 sm:$0xff]  ;;  %v2213_v0 = vmax.f32 %v2190_v23, %v2196_v24  ;;  %v2204_v43 = vld [vmem:[#allocation2 + $0x520] ss:$2 sm:$0xff] }
 0x279   : > { %v2192_v29 = vld [vmem:[#allocation2 + $0x4f0] ss:$2 sm:$0xff]  ;;  %2187 = vst.msk [vmem:[#allocation3 + $0x11c] sm:$0xff] %vm1712_vm0, %v2184_v20  ;;  %v2185_v34 = vmax.f32 %v2179_v19, %v2182_v22  ;;  %v2216_v30 = vmax.f32 %v2202_v31, %v2208_v21  ;;  %v2198_v32 = vld [vmem:[#allocation2 + $0x4f1] ss:$2 sm:$0xff] }
 0x27a   : > { %v2210_v36 = vld [vmem:[#allocation2 + $0x521] ss:$2 sm:$0xff]  ;;  %v2214_v33 = vmax.f32 %v2192_v29, %v2198_v32  ;;  %v2194_v39 = vld [vmem:[#allocation2 + $0x500] ss:$2 sm:$0x7f] }
 0x27b   : > { %2188 = vst.msk [vmem:[#allocation3 + $0x124] sm:$0x7f] %vm1755_vm2, %v2185_v34  ;;  %v2219_v11 = vmax.f32 %v2213_v0, %v2216_v30  ;;  %v2217_v37 = vmax.f32 %v2204_v43, %v2210_v36  ;;  %v2200_v12 = vld [vmem:[#allocation2 + $0x501] ss:$2 sm:$0x7f] }
 0x27c   : > { %v2206_v46 = vld [vmem:[#allocation2 + $0x530] ss:$2 sm:$0x7f]  ;;  %v2212_v48 = vld [vmem:[#allocation2 + $0x531] ss:$2 sm:$0x7f]  ;;  %v2215_v49 = vmax.f32 %v2194_v39, %v2200_v12 }
 0x27d   : > { %2222 = vst.msk [vmem:[#allocation3 + $0x12b] sm:$0xff] %vm1712_vm0, %v2219_v11  ;;  %v2220_v50 = vmax.f32 %v2214_v33, %v2217_v37  ;;  %v2218_v25 = vmax.f32 %v2206_v46, %v2212_v48  ;;  %v2226_v55 = vld [vmem:[#allocation2 + $0x540] ss:$2 sm:$0xff]  ;;  %v2232_v26 = vld [vmem:[#allocation2 + $0x541] ss:$2 sm:$0xff] }
 0x27e   : > { %v2238_v41 = vld [vmem:[#allocation2 + $0x570] ss:$2 sm:$0xff]  ;;  %v2244_v35 = vld [vmem:[#allocation2 + $0x571] ss:$2 sm:$0xff]  ;;  %v2249_v57 = vmax.f32 %v2226_v55, %v2232_v26  ;;  %v2240_v52 = vld [vmem:[#allocation2 + $0x580] ss:$2 sm:$0xff] }
 0x27f   : > { %v2228_v51 = vld [vmem:[#allocation2 + $0x550] ss:$2 sm:$0xff]  ;;  %2223 = vst.msk [vmem:[#allocation3 + $0x133] sm:$0xff] %vm1712_vm0, %v2220_v50  ;;  %v2221_v58 = vmax.f32 %v2215_v49, %v2218_v25  ;;  %v2252_v40 = vmax.f32 %v2238_v41, %v2244_v35  ;;  %v2234_v42 = vld [vmem:[#allocation2 + $0x551] ss:$2 sm:$0xff] }
 0x280   : > { %v2246_v27 = vld [vmem:[#allocation2 + $0x581] ss:$2 sm:$0xff]  ;;  %v2250_v59 = vmax.f32 %v2228_v51, %v2234_v42  ;;  %v2230_v53 = vld [vmem:[#allocation2 + $0x560] ss:$2 sm:$0x7f] }
 0x281   : > { %2224 = vst.msk [vmem:[#allocation3 + $0x13b] sm:$0x7f] %vm1755_vm2, %v2221_v58  ;;  %v2255_v54 = vmax.f32 %v2249_v57, %v2252_v40  ;;  %v2253_v62 = vmax.f32 %v2240_v52, %v2246_v27  ;;  %v2236_v28 = vld [vmem:[#allocation2 + $0x561] ss:$2 sm:$0x7f] }
 0x282   : > { %v2242_v44 = vld [vmem:[#allocation2 + $0x590] ss:$2 sm:$0x7f]  ;;  %v2248_v61 = vld [vmem:[#allocation2 + $0x591] ss:$2 sm:$0x7f]  ;;  %v2251_v47 = vmax.f32 %v2230_v53, %v2236_v28 }
 0x283   : > { %2258 = vst.msk [vmem:[#allocation3 + $0x142] sm:$0xff] %vm1712_vm0, %v2255_v54  ;;  %v2256_v3 = vmax.f32 %v2250_v59, %v2253_v62  ;;  %v2254_v45 = vmax.f32 %v2242_v44, %v2248_v61  ;;  %v2262_v4 = vld [vmem:[#allocation2 + $0x5a0] ss:$2 sm:$0xff]  ;;  %v2268_v6 = vld [vmem:[#allocation2 + $0x5a1] ss:$2 sm:$0xff] }
 0x284   : > { %v2274_v2 = vld [vmem:[#allocation2 + $0x5d0] ss:$2 sm:$0xff]  ;;  %v2280_v38 = vld [vmem:[#allocation2 + $0x5d1] ss:$2 sm:$0xff]  ;;  %v2285_v63 = vmax.f32 %v2262_v4, %v2268_v6  ;;  %v2276_v5 = vld [vmem:[#allocation2 + $0x5e0] ss:$2 sm:$0xff] }
 0x285   : > { %v2264_v7 = vld [vmem:[#allocation2 + $0x5b0] ss:$2 sm:$0xff]  ;;  %2259 = vst.msk [vmem:[#allocation3 + $0x14a] sm:$0xff] %vm1712_vm0, %v2256_v3  ;;  %v2257_v8 = vmax.f32 %v2251_v47, %v2254_v45  ;;  %v2288_v56 = vmax.f32 %v2274_v2, %v2280_v38  ;;  %v2270_v9 = vld [vmem:[#allocation2 + $0x5b1] ss:$2 sm:$0xff] }
 0x286   : > { %v2282_v10 = vld [vmem:[#allocation2 + $0x5e1] ss:$2 sm:$0xff]  ;;  %v2286_v14 = vmax.f32 %v2264_v7, %v2270_v9  ;;  %v2266_v1 = vld [vmem:[#allocation2 + $0x5c0] ss:$2 sm:$0x7f] }
 0x287   : > { %2260 = vst.msk [vmem:[#allocation3 + $0x152] sm:$0x7f] %vm1755_vm2, %v2257_v8  ;;  %v2291_v60 = vmax.f32 %v2285_v63, %v2288_v56  ;;  %v2289_v15 = vmax.f32 %v2276_v5, %v2282_v10  ;;  %v2272_v16 = vld [vmem:[#allocation2 + $0x5c1] ss:$2 sm:$0x7f] }
 0x288   : > { %v2278_v17 = vld [vmem:[#allocation2 + $0x5f0] ss:$2 sm:$0x7f]  ;;  %v2284_v18 = vld [vmem:[#allocation2 + $0x5f1] ss:$2 sm:$0x7f]  ;;  %v2287_v13 = vmax.f32 %v2266_v1, %v2272_v16 }
 0x289   : > { %2294 = vst.msk [vmem:[#allocation3 + $0x159] sm:$0xff] %vm1712_vm0, %v2291_v60  ;;  %v2292_v19 = vmax.f32 %v2286_v14, %v2289_v15  ;;  %v2290_v20 = vmax.f32 %v2278_v17, %v2284_v18  ;;  %v2298_v22 = vld [vmem:[#allocation2 + $0x600] ss:$2 sm:$0xff]  ;;  %v2304_v23 = vld [vmem:[#allocation2 + $0x601] ss:$2 sm:$0xff] }
 0x28a   : > { %v2310_v24 = vld [vmem:[#allocation2 + $0x630] ss:$2 sm:$0xff]  ;;  %v2316_v31 = vld [vmem:[#allocation2 + $0x631] ss:$2 sm:$0xff]  ;;  %v2321_v21 = vmax.f32 %v2298_v22, %v2304_v23  ;;  %v2312_v32 = vld [vmem:[#allocation2 + $0x640] ss:$2 sm:$0xff] }
 0x28b   : > { %v2300_v0 = vld [vmem:[#allocation2 + $0x610] ss:$2 sm:$0xff]  ;;  %2295 = vst.msk [vmem:[#allocation3 + $0x161] sm:$0xff] %vm1712_vm0, %v2292_v19  ;;  %v2293_v29 = vmax.f32 %v2287_v13, %v2290_v20  ;;  %v2324_v34 = vmax.f32 %v2310_v24, %v2316_v31  ;;  %v2306_v30 = vld [vmem:[#allocation2 + $0x611] ss:$2 sm:$0xff] }
 0x28c   : > { %v2318_v43 = vld [vmem:[#allocation2 + $0x641] ss:$2 sm:$0xff]  ;;  %v2322_v36 = vmax.f32 %v2300_v0, %v2306_v30  ;;  %v2302_v33 = vld [vmem:[#allocation2 + $0x620] ss:$2 sm:$0x7f] }
 0x28d   : > { %2296 = vst.msk [vmem:[#allocation3 + $0x169] sm:$0x7f] %vm1755_vm2, %v2293_v29  ;;  %v2327_v39 = vmax.f32 %v2321_v21, %v2324_v34  ;;  %v2325_v11 = vmax.f32 %v2312_v32, %v2318_v43  ;;  %v2308_v37 = vld [vmem:[#allocation2 + $0x621] ss:$2 sm:$0x7f] }
 0x28e   : > { %v2314_v12 = vld [vmem:[#allocation2 + $0x650] ss:$2 sm:$0x7f]  ;;  %v2320_v46 = vld [vmem:[#allocation2 + $0x651] ss:$2 sm:$0x7f]  ;;  %v2323_v48 = vmax.f32 %v2302_v33, %v2308_v37 }
 0x28f   : > { %2330 = vst.msk [vmem:[#allocation3 + $0x170] sm:$0xff] %vm1712_vm0, %v2327_v39  ;;  %v2328_v49 = vmax.f32 %v2322_v36, %v2325_v11  ;;  %v2326_v50 = vmax.f32 %v2314_v12, %v2320_v46  ;;  %v2334_v25 = vld [vmem:[#allocation2 + $0x660] ss:$2 sm:$0xff]  ;;  %v2340_v55 = vld [vmem:[#allocation2 + $0x661] ss:$2 sm:$0xff] }
 0x290   : > { %v2346_v26 = vld [vmem:[#allocation2 + $0x690] ss:$2 sm:$0xff]  ;;  %v2352_v41 = vld [vmem:[#allocation2 + $0x691] ss:$2 sm:$0xff]  ;;  %v2357_v35 = vmax.f32 %v2334_v25, %v2340_v55  ;;  %v2348_v42 = vld [vmem:[#allocation2 + $0x6a0] ss:$2 sm:$0xff] }
 0x291   : > { %v2336_v57 = vld [vmem:[#allocation2 + $0x670] ss:$2 sm:$0xff]  ;;  %2331 = vst.msk [vmem:[#allocation3 + $0x178] sm:$0xff] %vm1712_vm0, %v2328_v49  ;;  %v2329_v51 = vmax.f32 %v2323_v48, %v2326_v50  ;;  %v2360_v58 = vmax.f32 %v2346_v26, %v2352_v41  ;;  %v2342_v40 = vld [vmem:[#allocation2 + $0x671] ss:$2 sm:$0xff] }
 0x292   : > { %v2354_v52 = vld [vmem:[#allocation2 + $0x6a1] ss:$2 sm:$0xff]  ;;  %v2358_v27 = vmax.f32 %v2336_v57, %v2342_v40  ;;  %v2338_v59 = vld [vmem:[#allocation2 + $0x680] ss:$2 sm:$0x7f] }
 0x293   : > { %2332 = vst.msk [vmem:[#allocation3 + $0x180] sm:$0x7f] %vm1755_vm2, %v2329_v51  ;;  %v2363_v53 = vmax.f32 %v2357_v35, %v2360_v58  ;;  %v2361_v54 = vmax.f32 %v2348_v42, %v2354_v52  ;;  %v2344_v62 = vld [vmem:[#allocation2 + $0x681] ss:$2 sm:$0x7f] }
 0x294   : > { %v2350_v28 = vld [vmem:[#allocation2 + $0x6b0] ss:$2 sm:$0x7f]  ;;  %v2356_v44 = vld [vmem:[#allocation2 + $0x6b1] ss:$2 sm:$0x7f]  ;;  %v2359_v61 = vmax.f32 %v2338_v59, %v2344_v62 }
 0x295   : > { %2366 = vst.msk [vmem:[#allocation3 + $0x187] sm:$0xff] %vm1712_vm0, %v2363_v53  ;;  %v2364_v47 = vmax.f32 %v2358_v27, %v2361_v54  ;;  %v2362_v3 = vmax.f32 %v2350_v28, %v2356_v44  ;;  %v2370_v45 = vld [vmem:[#allocation2 + $0x6c0] ss:$2 sm:$0xff]  ;;  %v2376_v4 = vld [vmem:[#allocation2 + $0x6c1] ss:$2 sm:$0xff] }
 0x296   : > { %v2382_v6 = vld [vmem:[#allocation2 + $0x6f0] ss:$2 sm:$0xff]  ;;  %v2388_v2 = vld [vmem:[#allocation2 + $0x6f1] ss:$2 sm:$0xff]  ;;  %v2393_v38 = vmax.f32 %v2370_v45, %v2376_v4  ;;  %v2384_v9 = vld [vmem:[#allocation2 + $0x700] ss:$2 sm:$0xff] }
 0x297   : > { %v2372_v63 = vld [vmem:[#allocation2 + $0x6d0] ss:$2 sm:$0xff]  ;;  %2367 = vst.msk [vmem:[#allocation3 + $0x18f] sm:$0xff] %vm1712_vm0, %v2364_v47  ;;  %v2365_v7 = vmax.f32 %v2359_v61, %v2362_v3  ;;  %v2396_v8 = vmax.f32 %v2382_v6, %v2388_v2  ;;  %v2378_v56 = vld [vmem:[#allocation2 + $0x6d1] ss:$2 sm:$0xff] }
 0x298   : > { %v2390_v5 = vld [vmem:[#allocation2 + $0x701] ss:$2 sm:$0xff]  ;;  %v2394_v10 = vmax.f32 %v2372_v63, %v2378_v56  ;;  %v2374_v14 = vld [vmem:[#allocation2 + $0x6e0] ss:$2 sm:$0x7f] }
 0x299   : > { %2368 = vst.msk [vmem:[#allocation3 + $0x197] sm:$0x7f] %vm1755_vm2, %v2365_v7  ;;  %v2399_v1 = vmax.f32 %v2393_v38, %v2396_v8  ;;  %v2397_v60 = vmax.f32 %v2384_v9, %v2390_v5  ;;  %v2380_v15 = vld [vmem:[#allocation2 + $0x6e1] ss:$2 sm:$0x7f] }
 0x29a   : > { %v2386_v16 = vld [vmem:[#allocation2 + $0x710] ss:$2 sm:$0x7f]  ;;  %v2392_v17 = vld [vmem:[#allocation2 + $0x711] ss:$2 sm:$0x7f]  ;;  %v2395_v18 = vmax.f32 %v2374_v14, %v2380_v15 }
 0x29b   : > { %2402 = vst.msk [vmem:[#allocation3 + $0x19e] sm:$0xff] %vm1712_vm0, %v2399_v1  ;;  %v2400_v13 = vmax.f32 %v2394_v10, %v2397_v60  ;;  %v2398_v19 = vmax.f32 %v2386_v16, %v2392_v17  ;;  %v2406_v20 = vld [vmem:[#allocation2 + $0x720] ss:$2 sm:$0xff]  ;;  %v2412_v22 = vld [vmem:[#allocation2 + $0x721] ss:$2 sm:$0xff] }
 0x29c   : > { %v2418_v23 = vld [vmem:[#allocation2 + $0x750] ss:$2 sm:$0xff]  ;;  %v2424_v24 = vld [vmem:[#allocation2 + $0x751] ss:$2 sm:$0xff]  ;;  %v2429_v31 = vmax.f32 %v2406_v20, %v2412_v22  ;;  %v2420_v30 = vld [vmem:[#allocation2 + $0x760] ss:$2 sm:$0xff] }
 0x29d   : > { %v2408_v21 = vld [vmem:[#allocation2 + $0x730] ss:$2 sm:$0xff]  ;;  %2403 = vst.msk [vmem:[#allocation3 + $0x1a6] sm:$0xff] %vm1712_vm0, %v2400_v13  ;;  %v2401_v0 = vmax.f32 %v2395_v18, %v2398_v19  ;;  %v2432_v29 = vmax.f32 %v2418_v23, %v2424_v24  ;;  %v2414_v34 = vld [vmem:[#allocation2 + $0x731] ss:$2 sm:$0xff] }
 0x29e   : > { %v2426_v32 = vld [vmem:[#allocation2 + $0x761] ss:$2 sm:$0xff]  ;;  %v2430_v43 = vmax.f32 %v2408_v21, %v2414_v34  ;;  %v2410_v36 = vld [vmem:[#allocation2 + $0x740] ss:$2 sm:$0x7f] }
 0x29f   : > { %2404 = vst.msk [vmem:[#allocation3 + $0x1ae] sm:$0x7f] %vm1755_vm2, %v2401_v0  ;;  %v2435_v33 = vmax.f32 %v2429_v31, %v2432_v29  ;;  %v2433_v39 = vmax.f32 %v2420_v30, %v2426_v32  ;;  %v2416_v11 = vld [vmem:[#allocation2 + $0x741] ss:$2 sm:$0x7f] }
 0x2a0   : > { %v2422_v37 = vld [vmem:[#allocation2 + $0x770] ss:$2 sm:$0x7f]  ;;  %v2428_v12 = vld [vmem:[#allocation2 + $0x771] ss:$2 sm:$0x7f]  ;;  %v2431_v46 = vmax.f32 %v2410_v36, %v2416_v11 }
 0x2a1   : > { %2438 = vst.msk [vmem:[#allocation3 + $0x1b5] sm:$0xff] %vm1712_vm0, %v2435_v33  ;;  %v2436_v48 = vmax.f32 %v2430_v43, %v2433_v39  ;;  %v2434_v49 = vmax.f32 %v2422_v37, %v2428_v12  ;;  %v2442_v50 = vld [vmem:[#allocation2 + $0x780] ss:$2 sm:$0xff]  ;;  %v2448_v25 = vld [vmem:[#allocation2 + $0x781] ss:$2 sm:$0xff] }
 0x2a2   : > { %v2454_v55 = vld [vmem:[#allocation2 + $0x7b0] ss:$2 sm:$0xff]  ;;  %v2460_v26 = vld [vmem:[#allocation2 + $0x7b1] ss:$2 sm:$0xff]  ;;  %v2465_v41 = vmax.f32 %v2442_v50, %v2448_v25  ;;  %v2456_v40 = vld [vmem:[#allocation2 + $0x7c0] ss:$2 sm:$0xff] }
 0x2a3   : > { %v2444_v35 = vld [vmem:[#allocation2 + $0x790] ss:$2 sm:$0xff]  ;;  %2439 = vst.msk [vmem:[#allocation3 + $0x1bd] sm:$0xff] %vm1712_vm0, %v2436_v48  ;;  %v2437_v57 = vmax.f32 %v2431_v46, %v2434_v49  ;;  %v2468_v51 = vmax.f32 %v2454_v55, %v2460_v26  ;;  %v2450_v58 = vld [vmem:[#allocation2 + $0x791] ss:$2 sm:$0xff] }
 0x2a4   : > { %v2462_v42 = vld [vmem:[#allocation2 + $0x7c1] ss:$2 sm:$0xff]  ;;  %v2466_v52 = vmax.f32 %v2444_v35, %v2450_v58  ;;  %v2446_v27 = vld [vmem:[#allocation2 + $0x7a0] ss:$2 sm:$0x7f] }
 0x2a5   : > { %2440 = vst.msk [vmem:[#allocation3 + $0x1c5] sm:$0x7f] %vm1755_vm2, %v2437_v57  ;;  %v2471_v59 = vmax.f32 %v2465_v41, %v2468_v51  ;;  %v2469_v53 = vmax.f32 %v2456_v40, %v2462_v42  ;;  %v2452_v54 = vld [vmem:[#allocation2 + $0x7a1] ss:$2 sm:$0x7f] }
 0x2a6   : > { %v2458_v62 = vld [vmem:[#allocation2 + $0x7d0] ss:$2 sm:$0x7f]  ;;  %v2464_v28 = vld [vmem:[#allocation2 + $0x7d1] ss:$2 sm:$0x7f]  ;;  %v2467_v44 = vmax.f32 %v2446_v27, %v2452_v54 }
 0x2a7   : > { %2474 = vst.msk [vmem:[#allocation3 + $0x1cc] sm:$0xff] %vm1712_vm0, %v2471_v59  ;;  %v2472_v61 = vmax.f32 %v2466_v52, %v2469_v53  ;;  %v2470_v47 = vmax.f32 %v2458_v62, %v2464_v28  ;;  %v2478_v3 = vld [vmem:[#allocation2 + $0x7e0] ss:$2 sm:$0xff]  ;;  %v2484_v45 = vld [vmem:[#allocation2 + $0x7e1] ss:$2 sm:$0xff] }
 0x2a8   : > { %v2490_v4 = vld [vmem:[#allocation2 + $0x810] ss:$2 sm:$0xff]  ;;  %v2496_v6 = vld [vmem:[#allocation2 + $0x811] ss:$2 sm:$0xff]  ;;  %v2501_v2 = vmax.f32 %v2478_v3, %v2484_v45  ;;  %v2492_v56 = vld [vmem:[#allocation2 + $0x820] ss:$2 sm:$0xff] }
 0x2a9   : > { %v2480_v38 = vld [vmem:[#allocation2 + $0x7f0] ss:$2 sm:$0xff]  ;;  %2475 = vst.msk [vmem:[#allocation3 + $0x1d4] sm:$0xff] %vm1712_vm0, %v2472_v61  ;;  %v2473_v63 = vmax.f32 %v2467_v44, %v2470_v47  ;;  %v2504_v7 = vmax.f32 %v2490_v4, %v2496_v6  ;;  %v2486_v8 = vld [vmem:[#allocation2 + $0x7f1] ss:$2 sm:$0xff] }
 0x2aa   : > { %v2498_v9 = vld [vmem:[#allocation2 + $0x821] ss:$2 sm:$0xff]  ;;  %v2502_v5 = vmax.f32 %v2480_v38, %v2486_v8  ;;  %v2482_v10 = vld [vmem:[#allocation2 + $0x800] ss:$2 sm:$0x7f] }
 0x2ab   : > { %2476 = vst.msk [vmem:[#allocation3 + $0x1dc] sm:$0x7f] %vm1755_vm2, %v2473_v63  ;;  %v2507_v14 = vmax.f32 %v2501_v2, %v2504_v7  ;;  %v2505_v1 = vmax.f32 %v2492_v56, %v2498_v9  ;;  %v2488_v60 = vld [vmem:[#allocation2 + $0x801] ss:$2 sm:$0x7f] }
 0x2ac   : > { %v2494_v15 = vld [vmem:[#allocation2 + $0x830] ss:$2 sm:$0x7f]  ;;  %v2500_v16 = vld [vmem:[#allocation2 + $0x831] ss:$2 sm:$0x7f]  ;;  %v2503_v17 = vmax.f32 %v2482_v10, %v2488_v60 }
 0x2ad   : > { %2510 = vst.msk [vmem:[#allocation3 + $0x1e3] sm:$0xff] %vm1712_vm0, %v2507_v14  ;;  %v2508_v18 = vmax.f32 %v2502_v5, %v2505_v1  ;;  %v2506_v13 = vmax.f32 %v2494_v15, %v2500_v16  ;;  %v2514_v19 = vld [vmem:[#allocation2 + $0x840] ss:$2 sm:$0xff]  ;;  %v2520_v20 = vld [vmem:[#allocation2 + $0x841] ss:$2 sm:$0xff] }
 0x2ae   : > { %v2526_v22 = vld [vmem:[#allocation2 + $0x870] ss:$2 sm:$0xff]  ;;  %v2532_v23 = vld [vmem:[#allocation2 + $0x871] ss:$2 sm:$0xff]  ;;  %v2537_v24 = vmax.f32 %v2514_v19, %v2520_v20  ;;  %v2528_v34 = vld [vmem:[#allocation2 + $0x880] ss:$2 sm:$0xff] }
 0x2af   : > { %v2516_v31 = vld [vmem:[#allocation2 + $0x850] ss:$2 sm:$0xff]  ;;  %2511 = vst.msk [vmem:[#allocation3 + $0x1eb] sm:$0xff] %vm1712_vm0, %v2508_v18  ;;  %v2509_v21 = vmax.f32 %v2503_v17, %v2506_v13  ;;  %v2540_v0 = vmax.f32 %v2526_v22, %v2532_v23  ;;  %v2522_v29 = vld [vmem:[#allocation2 + $0x851] ss:$2 sm:$0xff] }
 0x2b0   : > { %v2534_v30 = vld [vmem:[#allocation2 + $0x881] ss:$2 sm:$0xff]  ;;  %v2538_v32 = vmax.f32 %v2516_v31, %v2522_v29  ;;  %v2518_v43 = vld [vmem:[#allocation2 + $0x860] ss:$2 sm:$0x7f] }
 0x2b1   : > { %2512 = vst.msk [vmem:[#allocation3 + $0x1f3] sm:$0x7f] %vm1755_vm2, %v2509_v21  ;;  %v2543_v36 = vmax.f32 %v2537_v24, %v2540_v0  ;;  %v2541_v33 = vmax.f32 %v2528_v34, %v2534_v30  ;;  %v2524_v39 = vld [vmem:[#allocation2 + $0x861] ss:$2 sm:$0x7f] }
 0x2b2   : > { %v2530_v11 = vld [vmem:[#allocation2 + $0x890] ss:$2 sm:$0x7f]  ;;  %v2536_v37 = vld [vmem:[#allocation2 + $0x891] ss:$2 sm:$0x7f]  ;;  %v2539_v12 = vmax.f32 %v2518_v43, %v2524_v39 }
 0x2b3   : > { %2546 = vst.msk [vmem:[#allocation3 + $0x1fa] sm:$0xff] %vm1712_vm0, %v2543_v36  ;;  %v2544_v46 = vmax.f32 %v2538_v32, %v2541_v33  ;;  %v2542_v48 = vmax.f32 %v2530_v11, %v2536_v37  ;;  %v7201_v49 = vld [vmem:[%s9376_s4] sm:$0x1] }
 0x2b5   : > { %2547 = vst.msk [vmem:[#allocation3 + $0x202] sm:$0xff] %vm1712_vm0, %v2544_v46  ;;  %v2545_v50 = vmax.f32 %v2539_v12, %v2542_v48 }
 0x2b7   : > { %2548 = vst.msk [vmem:[#allocation3 + $0x20a] sm:$0x7f] %vm1755_vm2, %v2545_v50 }
 0x2b8 LB: >> { %v2573_v25 = vld [vmem:[%s9375_s3 + $0x38] sm:$0xff]  ;;  %v2572_v55 = vld [vmem:[%s9375_s3 + $0x30] sm:$0xff]  ;;  %v2571_v26 = vld [vmem:[%s9375_s3 + $0x28] sm:$0xff]  ;;  %s2556_s29 = smul.u32 23, %s6536_s14  ;;  %vm3740_vm3 = vcmask 523264   ;;  %vm3743_vm4 = vcmask 518144   ;;  %s6536_s14 = sphi %s7205_s14, %s2555_s14  }
 0x2b9   : >> { %6349 = vmatpush.msra.mxu1 %v2573_v25  ;;  %6350 = vmatpush.msra.mxu2 %v2573_v25  ;;  %v2699_v41 = vld [vmem:[%s9375_s3 + $0x78] sm:$0xff]  ;;  %v2698_v35 = vld [vmem:[%s9375_s3 + $0x70] sm:$0xff]  ;;  %v2570_v57 = vld [vmem:[%s9375_s3 + $0x20] sm:$0xff] }
 0x2ba   : >> { %2595 = vmatpush.msra.mxu0 %v2573_v25  ;;  %2721 = vmatpush.msra.mxu3 %v2699_v41  ;;  %s7229_s13 = scalar_lea.vmem [#allocation3], %s2556_s29  ;;  %v2652_v40 = vld [vmem:[%s9375_s3 + $0x58] sm:$0xff]  ;;  %v2697_v52 = vld [vmem:[%s9375_s3 + $0x68] sm:$0xff]  ;;  %v2651_v27 = vld [vmem:[%s9375_s3 + $0x50] sm:$0xff] }
 0x2bb   : >> { %6351 = vmatpush.msra.mxu1 %v2572_v55  ;;  %6352 = vmatpush.msra.mxu2 %v2572_v55  ;;  %v2564_v42 = vld [vmem:[%s9375_s3 + $0x18] sm:$0xff]  ;;  %v2563_v59 = vld [vmem:[%s9375_s3 + $0x10] sm:$0xff]  ;;  %v2696_v53 = vld [vmem:[%s9375_s3 + $0x60] sm:$0xff] }
 0x2bc   : >> { %2596 = vmatpush.msra.mxu0 %v2572_v55  ;;  %2722 = vmatpush.msra.mxu3 %v2698_v35  ;;  %v2650_v62 = vld [vmem:[%s9375_s3 + $0x48] sm:$0xff]  ;;  %v2746_v61 = vld [vmem:[%s9375_s3 + $0x98] sm:$0xff]  ;;  %v2649_v47 = vld [vmem:[%s9375_s3 + $0x40] sm:$0xff] }
 0x2bd   : >> { %6353 = vmatpush.msra.mxu1 %v2571_v26  ;;  %6354 = vmatpush.msra.mxu2 %v2571_v26  ;;  %v2562_v28 = vld [vmem:[%s9375_s3 + $0x8] sm:$0xff]  ;;  %v2561_v3 = vld [vmem:[%s9375_s3] sm:$0xff]  ;;  %v2841_v6 = vld [vmem:[%s9375_s3 + $0xd8] sm:$0xff] }
 0x2be   : >> { %v6151_v51 = vld [vmem:[%s7229_s13 + $0x9] sm:$0xff]  ;;  %v6152_v58 = vld [vmem:[%s7229_s13 + $0x11] sm:$0x7]  ;;  %2597 = vmatpush.msra.mxu0 %v2571_v26  ;;  %v6150_v54 = vld [vmem:[%s7229_s13 + $0x1] sm:$0xff]  ;;  %2723 = vmatpush.msra.mxu3 %v2697_v52 }
 0x2bf   : >> { %6355 = vmatpush.msra.mxu1 %v2570_v57  ;;  %6356 = vmatpush.msra.mxu2 %v2570_v57  ;;  %v6165_v44 = vld [vmem:[%s7229_s13 + $0x3] sm:$0xff]  ;;  %v2888_v2 = vld [vmem:[%s9375_s3 + $0xf8] sm:$0xff]  ;;  %v2745_v38 = vld [vmem:[%s9375_s3 + $0x90] sm:$0xff] }
 0x2c0   : >> { %6154 = vmatmul.msk.f32.vlgmr.msra.gmra.mxu1 %vm1712_vm0, %v6151_v51  ;;  %6155 = vmatmul.msk.f32.vlgmr.msra.gmra.mxu2 %vm1712_vm0, %v6152_v58  ;;  %v2558_v45 = vld [vmem:[%s7229_s13] sm:$0xff]  ;;  %v2794_v63 = vld [vmem:[%s9375_s3 + $0xb8] sm:$0xff]  ;;  %v2840_v7 = vld [vmem:[%s9375_s3 + $0xd0] sm:$0xff] }
 0x2c1   : >> { %2674 = vmatpush.msrb.mxu2 %v2652_v40  ;;  %2630 = vmatpush.msrb.mxu1 %v2564_v42  ;;  %v6159_v4 = vld [vmem:[%s7229_s13 + $0x2] sm:$0xff]  ;;  %v2887_v8 = vld [vmem:[%s9375_s3 + $0xf0] sm:$0xff]  ;;  %v2935_v18 = vld [vmem:[%s9375_s3 + $0x118] sm:$0xff] }
 0x2c2   : >> { %2598 = vmatpush.msra.mxu0 %v2570_v57  ;;  %2724 = vmatpush.msra.mxu3 %v2696_v53  ;;  %v2744_v56 = vld [vmem:[%s9375_s3 + $0x88] sm:$0xff]  ;;  %v2793_v9 = vld [vmem:[%s9375_s3 + $0xb0] sm:$0xff]  ;;  %v2743_v14 = vld [vmem:[%s9375_s3 + $0x80] sm:$0xff] }
 0x2c3   : >> { %2675 = vmatpush.msrb.mxu2 %v2651_v27  ;;  %2631 = vmatpush.msrb.mxu1 %v2563_v59  ;;  %v2839_v5 = vld [vmem:[%s9375_s3 + $0xc8] sm:$0xff]  ;;  %v2838_v13 = vld [vmem:[%s9375_s3 + $0xc0] sm:$0xff]  ;;  %v2934_v22 = vld [vmem:[%s9375_s3 + $0x110] sm:$0xff] }
 0x2c4   : >> { %6153 = vmatmul.msk.f32.vlgmr.msra.gmra.mxu0 %vm1712_vm0, %v6150_v54  ;;  %6168 = vmatmul.msk.f32.vlgmr.msra.gmra.mxu3 %vm1712_vm0, %v6165_v44  ;;  %v2886_v10 = vld [vmem:[%s9375_s3 + $0xe8] sm:$0xff]  ;;  %v2885_v19 = vld [vmem:[%s9375_s3 + $0xe0] sm:$0xff]  ;;  %v3030_v23 = vld [vmem:[%s9375_s3 + $0x158] sm:$0xff] }
 0x2c5   : >> { %2676 = vmatpush.msrb.mxu2 %v2650_v62  ;;  %2632 = vmatpush.msrb.mxu1 %v2562_v28  ;;  %v6166_v1 = vld [vmem:[%s7229_s13 + $0xb] sm:$0xff]  ;;  %v2791_v20 = vld [vmem:[%s9375_s3 + $0xa0] sm:$0xff]  ;;  %v3077_v24 = vld [vmem:[%s9375_s3 + $0x178] sm:$0xff] }
 0x2c6   : >> { %2768 = vmatpush.msrb.mxu0 %v2746_v61  ;;  %2910 = vmatpush.msrb.mxu3 %v2888_v2  ;;  %v6171_v60 = vld [vmem:[%s7229_s13 + $0x4] sm:$0xff]  ;;  %v2982_v31 = vld [vmem:[%s9375_s3 + $0x138] sm:$0xff]  ;;  %v3029_v0 = vld [vmem:[%s9375_s3 + $0x150] sm:$0xff] }
 0x2c7   : >> { %2677 = vmatpush.msrb.mxu2 %v2649_v47  ;;  %2633 = vmatpush.msrb.mxu1 %v2561_v3  ;;  %v2792_v15 = vld [vmem:[%s9375_s3 + $0xa8] sm:$0xff]  ;;  %v6167_v29 = vld [vmem:[%s7229_s13 + $0x13] sm:$0x7]  ;;  %v2560_v43 = vld [vmem:[%s7229_s13 + $0x10] sm:$0x7] }
 0x2c8   : >> { %6156 = vmatmul.msk.f32.vlgmr.msrb.gmra.mxu1 %vm1712_vm0, %v2558_v45  ;;  %6162 = vmatmul.msk.f32.vlgmr.msrb.gmra.mxu2 %vm1712_vm0, %v6159_v4  ;;  %v2559_v16 = vld [vmem:[%s7229_s13 + $0x8] sm:$0xff]  ;;  %v2981_v34 = vld [vmem:[%s9375_s3 + $0x130] sm:$0xff]  ;;  %v2932_v33 = vld [vmem:[%s9375_s3 + $0x100] sm:$0xff] }
 0x2c9   : >> { %2863 = vmatpush.msra.mxu2 %v2841_v6  ;;  %2769 = vmatpush.msrb.mxu0 %v2745_v38  ;;  %v6160_v17 = vld [vmem:[%s7229_s13 + $0xa] sm:$0xff]  ;;  %v6161_v36 = vld [vmem:[%s7229_s13 + $0x12] sm:$0x7]  ;;  %v3124_v11 = vld [vmem:[%s9375_s3 + $0x198] sm:$0xff] }
 0x2ca   : >> { %2816 = vmatpush.msra.mxu1 %v2794_v63  ;;  %2911 = vmatpush.msrb.mxu3 %v2887_v8  ;;  %v2933_v21 = vld [vmem:[%s9375_s3 + $0x108] sm:$0xff]  ;;  %v3076_v32 = vld [vmem:[%s9375_s3 + $0x170] sm:$0xff]  ;;  %v3027_v46 = vld [vmem:[%s9375_s3 + $0x140] sm:$0xff] }
 0x2cb   : >> { %2864 = vmatpush.msra.mxu2 %v2840_v7  ;;  %2770 = vmatpush.msrb.mxu0 %v2744_v56  ;;  %v6172_v30 = vld [vmem:[%s7229_s13 + $0xc] sm:$0xff]  ;;  %v3074_v50 = vld [vmem:[%s9375_s3 + $0x160] sm:$0xff]  ;;  %v6173_v41 = vld [vmem:[%s7229_s13 + $0x14] sm:$0x7] }
 0x2cc   : >> { %2817 = vmatpush.msra.mxu1 %v2793_v9  ;;  %2912 = vmatpush.msrb.mxu3 %v2886_v10  ;;  %v3028_v39 = vld [vmem:[%s9375_s3 + $0x148] sm:$0xff]  ;;  %v3123_v48 = vld [vmem:[%s9375_s3 + $0x190] sm:$0xff]  ;;  %v2979_v25 = vld [vmem:[%s9375_s3 + $0x120] sm:$0xff] }
 0x2cd   : >> { %2865 = vmatpush.msra.mxu2 %v2839_v5  ;;  %2771 = vmatpush.msrb.mxu0 %v2743_v14  ;;  %v3075_v37 = vld [vmem:[%s9375_s3 + $0x168] sm:$0xff]  ;;  %v6189_v55 = vld [vmem:[%s7229_s13 + $0x19] sm:$0xff]  ;;  %v3217_v52 = vld [vmem:[%s9375_s3 + $0x1d0] sm:$0xff] }
 0x2ce   : >> { %6169 = vmatmul.msk.f32.gmra.mxu3 %vm1712_vm0, %v6166_v1  ;;  %6174 = vmatmul.msk.f32.vlgmr.msrb.gmra.mxu0 %vm1712_vm0, %v6171_v60  ;;  %v2980_v12 = vld [vmem:[%s9375_s3 + $0x128] sm:$0xff]  ;;  %v3266_v35 = vld [vmem:[%s9375_s3 + $0x1f8] sm:$0xff]  ;;  %v3121_v40 = vld [vmem:[%s9375_s3 + $0x180] sm:$0xff] }
 0x2cf   : >> { %2818 = vmatpush.msra.mxu1 %v2792_v15  ;;  %2957 = vmatpush.msra.mxu0 %v2935_v18  ;;  %v3122_v26 = vld [vmem:[%s9375_s3 + $0x188] sm:$0xff]  ;;  %v6177_v57 = vld [vmem:[%s7229_s13 + $0x17] sm:$0xff]  ;;  %v6178_v44 = vld [vmem:[%s7229_s13 + $0x1f] sm:$0xff] }
 0x2d0   : >> { %6157 = vmatmul.msk.f32.gmra.mxu1 %vm1712_vm0, %v2559_v16  ;;  %6163 = vmatmul.msk.f32.gmra.mxu2 %vm1712_vm0, %v6160_v17  ;;  %v6183_v51 = vld [vmem:[%s7229_s13 + $0x18] sm:$0xff]  ;;  %v3265_v27 = vld [vmem:[%s9375_s3 + $0x1f0] sm:$0xff]  ;;  %v3216_v53 = vld [vmem:[%s9375_s3 + $0x1c8] sm:$0xff] }
 0x2d1   : >> { %2866 = vmatpush.msra.mxu2 %v2838_v13  ;;  %2913 = vmatpush.msrb.mxu3 %v2885_v19  ;;  %v3218_v58 = vld [vmem:[%s9375_s3 + $0x1d8] sm:$0xff]  ;;  %v3170_v59 = vld [vmem:[%s9375_s3 + $0x1b0] sm:$0xff]  ;;  %v3264_v54 = vld [vmem:[%s9375_s3 + $0x1e8] sm:$0xff] }
 0x2d2   : >> { %2819 = vmatpush.msra.mxu1 %v2791_v20  ;;  %2958 = vmatpush.msra.mxu0 %v2934_v22  ;;  %v3171_v42 = vld [vmem:[%s9375_s3 + $0x1b8] sm:$0xff]  ;;  %v6190_v62 = vld [vmem:[%s7229_s13 + $0x21] sm:$0xff]  ;;  %v3312_v45 = vld [vmem:[%s9375_s3 + $0x210] sm:$0xff] }
 0x2d3   : >> { %3052 = vmatpush.msrb.mxu2 %v3030_v23  ;;  %3099 = vmatpush.msra.mxu3 %v3077_v24  ;;  %v6195_v28 = vld [vmem:[%s7229_s13 + $0x1a] sm:$0xff]  ;;  %v3169_v3 = vld [vmem:[%s9375_s3 + $0x1a8] sm:$0xff]  ;;  %v3406_v17 = vld [vmem:[%s9375_s3 + $0x250] sm:$0xff] }
 0x2d4   : >> { %3004 = vmatpush.msrb.mxu1 %v2982_v31  ;;  %2959 = vmatpush.msra.mxu0 %v2933_v21  ;;  %v6184_v61 = vld [vmem:[%s7229_s13 + $0x20] sm:$0xff]  ;;  %v3313_v47 = vld [vmem:[%s9375_s3 + $0x218] sm:$0xff]  ;;  %v3311_v38 = vld [vmem:[%s9375_s3 + $0x208] sm:$0xff] }
 0x2d5   : >> { %3053 = vmatpush.msrb.mxu2 %v3029_v0  ;;  %3100 = vmatpush.msra.mxu3 %v3076_v32  ;;  %v3215_v4 = vld [vmem:[%s9375_s3 + $0x1c0] sm:$0xff]  ;;  %v6191_v63 = vld [vmem:[%s7229_s13 + $0x29] sm:$0x7]  ;;  %v6213_v5 = vld [vmem:[%s7229_s13 + $0x2f] sm:$0xff] }
 0x2d6   : >> { %6170 = vmatmul.msk.f32.gmra.mxu3 %vm1712_vm0, %v6167_v29  ;;  %3005 = vmatpush.msrb.mxu1 %v2981_v34  ;;  %v3263_v6 = vld [vmem:[%s9375_s3 + $0x1e0] sm:$0xff]  ;;  %v6185_v56 = vld [vmem:[%s7229_s13 + $0x28] sm:$0x7]  ;;  %v3454_v14 = vld [vmem:[%s9375_s3 + $0x278] sm:$0xff] }
 0x2d7   : >> { %6175 = vmatmul.msk.f32.gmra.mxu0 %vm1712_vm0, %v6172_v30  ;;  %3054 = vmatpush.msrb.mxu2 %v3028_v39  ;;  %v3168_v2 = vld [vmem:[%s9375_s3 + $0x1a0] sm:$0xff]  ;;  %v6197_v10 = vld [vmem:[%s7229_s13 + $0x2a] sm:$0x7]  ;;  %v6207_v60 = vld [vmem:[%s7229_s13 + $0x2e] sm:$0xff] }
 0x2d8   : >> { %6158 = vmatmul.msk.f32.gmra.mxu1 %vm1712_vm0, %v2560_v43  ;;  %6164 = vmatmul.msk.f32.gmra.mxu2 %vm1712_vm0, %v6161_v36  ;;  %v6196_v7 = vld [vmem:[%s7229_s13 + $0x22] sm:$0xff]  ;;  %v3407_v15 = vld [vmem:[%s9375_s3 + $0x258] sm:$0xff]  ;;  %v3453_v18 = vld [vmem:[%s9375_s3 + $0x270] sm:$0xff] }
 0x2d9   : >> { %2960 = vmatpush.msra.mxu0 %v2932_v33  ;;  %3101 = vmatpush.msra.mxu3 %v3075_v37  ;;  %v6179_v8 = vld [vmem:[%s7229_s13 + $0x27] sm:$0x7]  ;;  %v6201_v1 = vld [vmem:[%s7229_s13 + $0x1b] sm:$0xff]  ;;  %v3359_v13 = vld [vmem:[%s9375_s3 + $0x230] sm:$0xff] }
 0x2da   : >> { %3006 = vmatpush.msrb.mxu1 %v2980_v12  ;;  %3055 = vmatpush.msrb.mxu2 %v3027_v46  ;;  %v3310_v9 = vld [vmem:[%s9375_s3 + $0x200] sm:$0xff]  ;;  %v3360_v16 = vld [vmem:[%s9375_s3 + $0x238] sm:$0xff]  ;;  %v3405_v19 = vld [vmem:[%s9375_s3 + $0x248] sm:$0xff] }
 0x2db   : >> { %3146 = vmatpush.msrb.mxu0 %v3124_v11  ;;  %3102 = vmatpush.msra.mxu3 %v3074_v50  ;;  %v3452_v20 = vld [vmem:[%s9375_s3 + $0x268] sm:$0xff]  ;;  %v6214_v22 = vld [vmem:[%s7229_s13 + $0x37] sm:$0xff]  ;;  %v3404_v34 = vld [vmem:[%s9375_s3 + $0x240] sm:$0xff] }
 0x2dc   : >> { %3007 = vmatpush.msrb.mxu1 %v2979_v25  ;;  %v6219_v23 = vld [vmem:[%s7229_s13 + $0x30] sm:$0xff]  ;;  %v6202_v24 = vld [vmem:[%s7229_s13 + $0x23] sm:$0xff]  ;;  %v3502_v21 = vld [vmem:[%s9375_s3 + $0x298] sm:$0xff] }
 0x2dd   : >> { %3147 = vmatpush.msrb.mxu0 %v3123_v48  ;;  %v6208_v31 = vld [vmem:[%s7229_s13 + $0x36] sm:$0xff]  ;;  %v3358_v0 = vld [vmem:[%s9375_s3 + $0x228] sm:$0xff]  ;;  %v3451_v30 = vld [vmem:[%s9375_s3 + $0x260] sm:$0xff] }
 0x2de   : >> { %6192 = vmatmul.msk.f32.vlgmr.msrb.gmra.mxu3 %vm1712_vm0, %v6189_v55  ;;  %v3501_v29 = vld [vmem:[%s9375_s3 + $0x290] sm:$0xff]  ;;  %v3357_v32 = vld [vmem:[%s9375_s3 + $0x220] sm:$0xff]  ;;  %v3500_v43 = vld [vmem:[%s9375_s3 + $0x288] sm:$0xff] }
 0x2df   : >> { %3148 = vmatpush.msrb.mxu0 %v3122_v26  ;;  %3288 = vmatpush.msrb.mxu3 %v3266_v35  ;;  %v6215_v36 = vld [vmem:[%s7229_s13 + $0x3f] sm:$0x7]  ;;  %v6203_v39 = vld [vmem:[%s7229_s13 + $0x2b] sm:$0x7]  ;;  %v6225_v50 = vld [vmem:[%s7229_s13 + $0x31] sm:$0xff] }
 0x2e0   : >> { %6176 = vmatmul.msk.f32.gmra.mxu0 %vm1712_vm0, %v6173_v41  ;;  %6180 = vmatmul.msk.f32.vlgmr.msra.gmra.mxu1 %vm1712_vm0, %v6177_v57  ;;  %v6220_v33 = vld [vmem:[%s7229_s13 + $0x38] sm:$0xff]  ;;  %v3499_v37 = vld [vmem:[%s9375_s3 + $0x280] sm:$0xff]  ;;  %v3595_v41 = vld [vmem:[%s9375_s3 + $0x2d0] sm:$0xff] }
 0x2e1   : >> { %6186 = vmatmul.msk.f32.vlgmr.msra.gmra.mxu2 %vm1712_vm0, %v6183_v51  ;;  %3149 = vmatpush.msrb.mxu0 %v3121_v40  ;;  %v6209_v11 = vld [vmem:[%s7229_s13 + $0x3e] sm:$0x7]  ;;  %v6237_v12 = vld [vmem:[%s7229_s13 + $0x45] sm:$0xff]  ;;  %v6231_v25 = vld [vmem:[%s7229_s13 + $0x32] sm:$0xff] }
 0x2e2   : >> { %3240 = vmatpush.msra.mxu2 %v3218_v58  ;;  %3193 = vmatpush.msra.mxu1 %v3171_v42  ;;  %v6221_v46 = vld [vmem:[%s7229_s13 + $0x40] sm:$0x7]  ;;  %v3643_v48 = vld [vmem:[%s9375_s3 + $0x2f8] sm:$0xff]  ;;  %v3642_v35 = vld [vmem:[%s9375_s3 + $0x2f0] sm:$0xff] }
 0x2e3   : >> { %3289 = vmatpush.msrb.mxu3 %v3265_v27  ;;  %v3596_v55 = vld [vmem:[%s9375_s3 + $0x2d8] sm:$0xff]  ;;  %v3548_v57 = vld [vmem:[%s9375_s3 + $0x2b0] sm:$0xff]  ;;  %v3594_v51 = vld [vmem:[%s9375_s3 + $0x2c8] sm:$0xff] }
 0x2e4   : >> { %3241 = vmatpush.msra.mxu2 %v3217_v52  ;;  %3194 = vmatpush.msra.mxu1 %v3170_v59  ;;  %v3549_v26 = vld [vmem:[%s9375_s3 + $0x2b8] sm:$0xff]  ;;  %v3641_v58 = vld [vmem:[%s9375_s3 + $0x2e8] sm:$0xff] }
 0x2e5   : >> { %3290 = vmatpush.msrb.mxu3 %v3264_v54  ;;  %v6238_v40 = vld [vmem:[%s7229_s13 + $0x4d] sm:$0xff]  ;;  %v6226_v52 = vld [vmem:[%s7229_s13 + $0x39] sm:$0xff] }
 0x2e6   : >> { %3242 = vmatpush.msra.mxu2 %v3216_v53  ;;  %6193 = vmatmul.msk.f32.gmra.mxu3 %vm1712_vm0, %v6190_v62  ;;  %v6243_v42 = vld [vmem:[%s7229_s13 + $0x46] sm:$0xff]  ;;  %v6232_v27 = vld [vmem:[%s7229_s13 + $0x3a] sm:$0xff]  ;;  %v3689_v54 = vld [vmem:[%s9375_s3 + $0x310] sm:$0xff] }
 0x2e7   : >> { %3195 = vmatpush.msra.mxu1 %v3169_v3  ;;  %3291 = vmatpush.msrb.mxu3 %v3263_v6  ;;  %v3690_v59 = vld [vmem:[%s9375_s3 + $0x318] sm:$0xff]  ;;  %v3547_v53 = vld [vmem:[%s9375_s3 + $0x2a8] sm:$0xff]  ;;  %v3593_v62 = vld [vmem:[%s9375_s3 + $0x2c0] sm:$0xff] }
 0x2e8   : >> { %6198 = vmatmul.msk.f32.vlgmr.msra.gmra.mxu0 %vm1712_vm0, %v6195_v28  ;;  %6181 = vmatmul.msk.f32.gmra.mxu1 %vm1712_vm0, %v6178_v44  ;;  %v3640_v28 = vld [vmem:[%s9375_s3 + $0x2e0] sm:$0xff]  ;;  %v6239_v44 = vld [vmem:[%s7229_s13 + $0x55] sm:$0x7]  ;;  %v6261_v6 = vld [vmem:[%s7229_s13 + $0x49] sm:$0xff] }
 0x2e9   : >> { %6187 = vmatmul.msk.f32.gmra.mxu2 %vm1712_vm0, %v6184_v61  ;;  %3335 = vmatpush.msra.mxu0 %v3313_v47  ;;  %v6244_v61 = vld [vmem:[%s7229_s13 + $0x4e] sm:$0xff]  ;;  %v6227_v47 = vld [vmem:[%s7229_s13 + $0x41] sm:$0x7] }
 0x2ea   : >> { %3243 = vmatpush.msra.mxu2 %v3215_v4  ;;  %3196 = vmatpush.msra.mxu1 %v3168_v2  ;;  %v6233_v3 = vld [vmem:[%s7229_s13 + $0x42] sm:$0x7]  ;;  %v3688_v4 = vld [vmem:[%s9375_s3 + $0x308] sm:$0xff] }
 0x2eb   : >> { %3336 = vmatpush.msra.mxu0 %v3312_v45  ;;  %v3546_v45 = vld [vmem:[%s9375_s3 + $0x2a0] sm:$0xff] }
 0x2ec   : >> { %v3687_v2 = vld [vmem:[%s9375_s3 + $0x300] sm:$0xff] }
 0x2ed   : >> { %3337 = vmatpush.msra.mxu0 %v3311_v38  ;;  %v6245_v38 = vld [vmem:[%s7229_s13 + $0x56] sm:$0x7] }
 0x2ee   : >> { %6194 = vmatmul.msk.f32.gmra.mxu3 %vm1712_vm0, %v6191_v63  ;;  %v6249_v63 = vld [vmem:[%s7229_s13 + $0x47] sm:$0xff] }
 0x2ef   : >> { %3338 = vmatpush.msra.mxu0 %v3310_v9  ;;  %v6250_v9 = vld [vmem:[%s7229_s13 + $0x4f] sm:$0xff] }
 0x2f0   : >> { %6199 = vmatmul.msk.f32.gmra.mxu0 %vm1712_vm0, %v6196_v7  ;;  %6182 = vmatmul.msk.f32.gmra.mxu1 %vm1712_vm0, %v6179_v8  ;;  %v6255_v7 = vld [vmem:[%s7229_s13 + $0x48] sm:$0xff]  ;;  %v6262_v8 = vld [vmem:[%s7229_s13 + $0x51] sm:$0xff] }
 0x2f1   : >> { %6188 = vmatmul.msk.f32.gmra.mxu2 %vm1712_vm0, %v6185_v56  ;;  %v6267_v56 = vld [vmem:[%s7229_s13 + $0x5c] sm:$0xff] }
 0x2f6   : >> { %6216 = vmatmul.msk.f32.vlgmr.msra.gmra.mxu3 %vm1712_vm0, %v6213_v5  ;;  %v6256_v5 = vld [vmem:[%s7229_s13 + $0x50] sm:$0xff] }
 0x2f7   : >> { %3476 = vmatpush.msra.mxu3 %v3454_v14  ;;  %v6268_v14 = vld [vmem:[%s7229_s13 + $0x64] sm:$0xff] }
 0x2f8   : >> { %6200 = vmatmul.msk.f32.gmra.mxu0 %vm1712_vm0, %v6197_v10  ;;  %6204 = vmatmul.msk.f32.vlgmr.msrb.gmra.mxu1 %vm1712_vm0, %v6201_v1  ;;  %v6263_v10 = vld [vmem:[%s7229_s13 + $0x59] sm:$0x7] }
 0x2f9   : >> { %6210 = vmatmul.msk.f32.vlgmr.msrb.gmra.mxu2 %vm1712_vm0, %v6207_v60  ;;  %3382 = vmatpush.msrb.mxu1 %v3360_v16  ;;  %v6251_v1 = vld [vmem:[%s7229_s13 + $0x57] sm:$0x7]  ;;  %v6269_v16 = vld [vmem:[%s7229_s13 + $0x6c] sm:$0x7] }
 0x2fa   : >> { %3429 = vmatpush.msrb.mxu2 %v3407_v15  ;;  %3477 = vmatpush.msra.mxu3 %v3453_v18  ;;  %v6257_v60 = vld [vmem:[%s7229_s13 + $0x58] sm:$0x7]  ;;  %v6285_v15 = vld [vmem:[%s7229_s13 + $0x5f] sm:$0xff] }
 0x2fb   : >> { %3383 = vmatpush.msrb.mxu1 %v3359_v13  ;;  %v6273_v18 = vld [vmem:[%s7229_s13 + $0x5d] sm:$0xff] }
 0x2fc   : >> { %3430 = vmatpush.msrb.mxu2 %v3406_v17  ;;  %3478 = vmatpush.msra.mxu3 %v3452_v20  ;;  %v6279_v13 = vld [vmem:[%s7229_s13 + $0x5e] sm:$0xff] }
 0x2fd   : >> { %3384 = vmatpush.msrb.mxu1 %v3358_v0 }
 0x2fe   : >> { %3431 = vmatpush.msrb.mxu2 %v3405_v19  ;;  %6217 = vmatmul.msk.f32.gmra.mxu3 %vm1712_vm0, %v6214_v22  ;;  %v6286_v22 = vld [vmem:[%s7229_s13 + $0x67] sm:$0xff] }
 0x2ff   : >> { %3479 = vmatpush.msra.mxu3 %v3451_v30  ;;  %3385 = vmatpush.msrb.mxu1 %v3357_v32  ;;  %v6287_v30 = vld [vmem:[%s7229_s13 + $0x6f] sm:$0x7] }
 0x300   : >> { %6222 = vmatmul.msk.f32.vlgmr.msrb.gmra.mxu0 %vm1712_vm0, %v6219_v23  ;;  %6205 = vmatmul.msk.f32.gmra.mxu1 %vm1712_vm0, %v6202_v24  ;;  %v6291_v23 = vld [vmem:[%s7229_s13 + $0x60] sm:$0xff] }
 0x301   : >> { %6211 = vmatmul.msk.f32.gmra.mxu2 %vm1712_vm0, %v6208_v31  ;;  %3524 = vmatpush.msrb.mxu0 %v3502_v21  ;;  %v6274_v31 = vld [vmem:[%s7229_s13 + $0x65] sm:$0xff] }
 0x302   : >> { %3432 = vmatpush.msrb.mxu2 %v3404_v34  ;;  %v6280_v21 = vld [vmem:[%s7229_s13 + $0x66] sm:$0xff] }
 0x303   : >> { %3525 = vmatpush.msrb.mxu0 %v3501_v29 }
 0x305   : >> { %3526 = vmatpush.msrb.mxu0 %v3500_v43 }
 0x306   : >> { %6218 = vmatmul.msk.f32.gmra.mxu3 %vm1712_vm0, %v6215_v36  ;;  %v6292_v36 = vld [vmem:[%s7229_s13 + $0x68] sm:$0xff] }
 0x307   : >> { %3527 = vmatpush.msrb.mxu0 %v3499_v37 }
 0x308   : >> { %6223 = vmatmul.msk.f32.gmra.mxu0 %vm1712_vm0, %v6220_v33  ;;  %6206 = vmatmul.msk.f32.gmra.mxu1 %vm1712_vm0, %v6203_v39  ;;  %v6275_v39 = vld [vmem:[%s7229_s13 + $0x6d] sm:$0x7] }
 0x309   : >> { %6212 = vmatmul.msk.f32.gmra.mxu2 %vm1712_vm0, %v6209_v11  ;;  %v6281_v11 = vld [vmem:[%s7229_s13 + $0x6e] sm:$0x7] }
 0x30e   : >> { %6240 = vmatmul.msk.f32.vlgmr.msrb.gmra.mxu3 %vm1712_vm0, %v6237_v12 }
 0x30f   : >> { %3665 = vmatpush.msrb.mxu3 %v3643_v48 }
 0x310   : >> { %6224 = vmatmul.msk.f32.gmra.mxu0 %vm1712_vm0, %v6221_v46  ;;  %6228 = vmatmul.msk.f32.vlgmr.msra.gmra.mxu1 %vm1712_vm0, %v6225_v50 }
 0x311   : >> { %6234 = vmatmul.msk.f32.vlgmr.msra.gmra.mxu2 %vm1712_vm0, %v6231_v25  ;;  %3571 = vmatpush.msra.mxu1 %v3549_v26  ;;  %v6293_v26 = vld [vmem:[%s7229_s13 + $0x70] sm:$0x7]  ;;  %s3729_s13 = smul.u32 24, %s6536_s14  ;;  %s2555_s14 = sadd.s32 1, %s6536_s14  }
 0x312   : >> { %3618 = vmatpush.msra.mxu2 %v3596_v55  ;;  %3666 = vmatpush.msrb.mxu3 %v3642_v35  ;;  %p2552_p12 = scmp.ge.s32.totalorder %s2555_s14, 19  }
 0x313   : >> { %3572 = vmatpush.msra.mxu1 %v3548_v57  ;;  %s3739_s2 = scalar_lea.vmem [#allocation4], %s3729_s13  ;;  %vm3768_vm5 = vcmask (%p2552_p12), 516096   ;;  %s7693_s16 = smov (%p2552_p12), 0  }
 0x314   : >> { %3619 = vmatpush.msra.mxu2 %v3595_v41  ;;  %3667 = vmatpush.msrb.mxu3 %v3641_v58 }
 0x315   : >> { %3573 = vmatpush.msra.mxu1 %v3547_v53 }
 0x316   : >> { %3620 = vmatpush.msra.mxu2 %v3594_v51  ;;  %6241 = vmatmul.msk.f32.gmra.mxu3 %vm1712_vm0, %v6238_v40 }
 0x317   : >> { %3668 = vmatpush.msrb.mxu3 %v3640_v28  ;;  %3574 = vmatpush.msra.mxu1 %v3546_v45 }
 0x318   : >> { %6246 = vmatmul.msk.f32.vlgmr.msra.gmra.mxu0 %vm1712_vm0, %v6243_v42  ;;  %6229 = vmatmul.msk.f32.gmra.mxu1 %vm1712_vm0, %v6226_v52 }
 0x319   : >> { %6235 = vmatmul.msk.f32.gmra.mxu2 %vm1712_vm0, %v6232_v27  ;;  %3712 = vmatpush.msra.mxu0 %v3690_v59 }
 0x31a   : >> { %3621 = vmatpush.msra.mxu2 %v3593_v62 }
 0x31b   : >> { %3713 = vmatpush.msra.mxu0 %v3689_v54 }
 0x31d   : >> { %3714 = vmatpush.msra.mxu0 %v3688_v4 }
 0x31e   : >> { %6242 = vmatmul.msk.f32.gmra.mxu3 %vm1712_vm0, %v6239_v44 }
 0x31f   : >> { %3715 = vmatpush.msra.mxu0 %v3687_v2 }
 0x320   : >> { %6247 = vmatmul.msk.f32.gmra.mxu0 %vm1712_vm0, %v6244_v61  ;;  %6230 = vmatmul.msk.f32.gmra.mxu1 %vm1712_vm0, %v6227_v47 }
 0x321   : >> { %6236 = vmatmul.msk.f32.gmra.mxu2 %vm1712_vm0, %v6233_v3 }
 0x326   : >> { %6264 = vmatmul.msk.f32.vlgmr.msra.gmra.mxu3 %vm1712_vm0, %v6261_v6 }
 0x328   : >> { %6248 = vmatmul.msk.f32.gmra.mxu0 %vm1712_vm0, %v6245_v38  ;;  %6252 = vmatmul.msk.f32.vlgmr.msrb.gmra.mxu1 %vm1712_vm0, %v6249_v63 }
 0x329   : >> { %6258 = vmatmul.msk.f32.vlgmr.msrb.gmra.mxu2 %vm1712_vm0, %v6255_v7 }
 0x32e   : >> { %6265 = vmatmul.msk.f32.gmra.mxu3 %vm1712_vm0, %v6262_v8 }
 0x330   : >> { %6270 = vmatmul.msk.f32.vlgmr.msrb.gmra.mxu0 %vm1712_vm0, %v6267_v56  ;;  %6253 = vmatmul.msk.f32.gmra.mxu1 %vm1712_vm0, %v6250_v9 }
 0x331   : >> { %6259 = vmatmul.msk.f32.gmra.mxu2 %vm1712_vm0, %v6256_v5 }
 0x336   : >> { %6266 = vmatmul.msk.f32.gmra.mxu3 %vm1712_vm0, %v6263_v10 }
 0x338   : >> { %6271 = vmatmul.msk.f32.gmra.mxu0 %vm1712_vm0, %v6268_v14  ;;  %6254 = vmatmul.msk.f32.gmra.mxu1 %vm1712_vm0, %v6251_v1 }
 0x339   : >> { %6260 = vmatmul.msk.f32.gmra.mxu2 %vm1712_vm0, %v6257_v60 }
 0x33d   : >> { %v2603_v17 = vpop.f32.mrf.mxu1 }
 0x33e   : >> { %6288 = vmatmul.msk.f32.vlgmr.msrb.gmra.mxu3 %vm1712_vm0, %v6285_v15 }
 0x340   : >> { %6272 = vmatmul.msk.f32.gmra.mxu0 %vm1712_vm0, %v6269_v16  ;;  %6276 = vmatmul.msk.f32.vlgmr.msra.gmra.mxu1 %vm1712_vm0, %v6273_v18 }
 0x341   : >> { %6282 = vmatmul.msk.f32.vlgmr.msra.gmra.mxu2 %vm1712_vm0, %v6279_v13  ;;  %v2600_v19 = vpop.f32.mrf.mxu0 }
 0x343   : >> { %v2606_v20 = vpop.f32.mrf.mxu2 }
 0x345   : >> { %v2635_v24 = vpop.f32.mrf.mxu1 }
 0x346   : >> { %v2636_v0 = vadd.f32 %v2635_v24, %v2600_v19  ;;  %6289 = vmatmul.msk.f32.gmra.mxu3 %vm1712_vm0, %v6286_v22 }
 0x347   : >> { %v2726_v29 = vpop.f32.mrf.mxu3 }
 0x348   : >> { %6294 = vmatmul.msk.f32.vlgmr.msra.gmra.mxu0 %vm1712_vm0, %v6291_v23  ;;  %6277 = vmatmul.msk.f32.gmra.mxu1 %vm1712_vm0, %v6274_v31 }
 0x349   : >> { %6283 = vmatmul.msk.f32.gmra.mxu2 %vm1712_vm0, %v6280_v21 }
 0x34b   : >> { %v2679_v34 = vpop.f32.mrf.mxu2  ;;  %v2773_v43 = vpop.f32.mrf.mxu0 }
 0x34c   : >> { %v2688_v32 = vadd.f32 %v2679_v34, %v2636_v0 }
 0x34d   : >> { %v2638_v33 = vpop.f32.mrf.mxu1 }
 0x34e   : >> { %v2639_v37 = vadd.f32 %v2638_v33, %v2603_v17  ;;  %v2735_v12 = vadd.f32 %v2726_v29, %v2688_v32  ;;  %6290 = vmatmul.msk.f32.gmra.mxu3 %vm1712_vm0, %v6287_v30 }
 0x350   : >> { %6295 = vmatmul.msk.f32.gmra.mxu0 %vm1712_vm0, %v6292_v36  ;;  %v2782_v46 = vadd.f32 %v2773_v43, %v2735_v12  ;;  %6278 = vmatmul.msk.f32.gmra.mxu1 %vm1712_vm0, %v6275_v39 }
 0x351   : >> { %6284 = vmatmul.msk.f32.gmra.mxu2 %vm1712_vm0, %v6281_v11  ;;  %v2729_v48 = vpop.f32.mrf.mxu3 }
 0x353   : >> { %v2682_v50 = vpop.f32.mrf.mxu2 }
 0x354   : >> { %v2689_v25 = vadd.f32 %v2682_v50, %v2639_v37  ;;  %v2776_v55 = vpop.f32.mrf.mxu0 }
 0x355   : >> { %v2641_v41 = vpop.f32.mrf.mxu1 }
 0x356   : >> { %v2642_v35 = vadd.f32 %v2641_v41, %v2606_v20  ;;  %v2736_v57 = vadd.f32 %v2729_v48, %v2689_v25 }
 0x358   : >> { %6296 = vmatmul.msk.f32.gmra.mxu0 %vm1712_vm0, %v6293_v26  ;;  %v2783_v51 = vadd.f32 %v2776_v55, %v2736_v57 }
 0x359   : >> { %v2732_v58 = vpop.f32.mrf.mxu3 }
 0x35b   : >> { %v2685_v40 = vpop.f32.mrf.mxu2 }
 0x35c   : >> { %v2690_v42 = vadd.f32 %v2685_v40, %v2642_v35 }
 0x35d   : >> { %v2779_v52 = vpop.f32.mrf.mxu0  ;;  %v2821_v27 = vpop.f32.mrf.mxu1 }
 0x35e   : >> { %v2737_v59 = vadd.f32 %v2732_v58, %v2690_v42  ;;  %v2830_v53 = vadd.f32 %v2821_v27, %v2782_v46 }
 0x360   : >> { %v2784_v54 = vadd.f32 %v2779_v52, %v2737_v59 }
 0x361   : >> { %v2915_v62 = vpop.f32.mrf.mxu3 }
 0x364   : >> { %v2868_v28 = vpop.f32.mrf.mxu2 }
 0x365   : >> { %v2877_v44 = vadd.f32 %v2868_v28, %v2830_v53  ;;  %v2962_v61 = vpop.f32.mrf.mxu0  ;;  %v2824_v47 = vpop.f32.mrf.mxu1 }
 0x366   : >> { %v2831_v3 = vadd.f32 %v2824_v47, %v2783_v51 }
 0x367   : >> { %v2924_v45 = vadd.f32 %v2915_v62, %v2877_v44 }
 0x369   : >> { %v2971_v4 = vadd.f32 %v2962_v61, %v2924_v45  ;;  %v2918_v6 = vpop.f32.mrf.mxu3 }
 0x36c   : >> { %v2871_v2 = vpop.f32.mrf.mxu2 }
 0x36d   : >> { %v2878_v38 = vadd.f32 %v2871_v2, %v2831_v3  ;;  %v2965_v63 = vpop.f32.mrf.mxu0  ;;  %v2827_v7 = vpop.f32.mrf.mxu1 }
 0x36e   : >> { %v2832_v8 = vadd.f32 %v2827_v7, %v2784_v54 }
 0x36f   : >> { %v2925_v56 = vadd.f32 %v2918_v6, %v2878_v38 }
 0x371   : >> { %v2972_v9 = vadd.f32 %v2965_v63, %v2925_v56  ;;  %v2921_v5 = vpop.f32.mrf.mxu3 }
 0x374   : >> { %v2874_v10 = vpop.f32.mrf.mxu2 }
 0x375   : >> { %v2879_v14 = vadd.f32 %v2874_v10, %v2832_v8  ;;  %v2968_v1 = vpop.f32.mrf.mxu0  ;;  %v3009_v60 = vpop.f32.mrf.mxu1 }
 0x376   : >> { %v3018_v37 = vadd.f32 %v3009_v60, %v2971_v4 }
 0x377   : >> { %v2926_v15 = vadd.f32 %v2921_v5, %v2879_v14 }
 0x379   : >> { %v2973_v16 = vadd.f32 %v2968_v1, %v2926_v15  ;;  %v3104_v17 = vpop.f32.mrf.mxu3 }
 0x37c   : >> { %v3057_v18 = vpop.f32.mrf.mxu2 }
 0x37d   : >> { %v3151_v13 = vpop.f32.mrf.mxu0  ;;  %v3012_v19 = vpop.f32.mrf.mxu1  ;;  %v3066_v12 = vadd.f32 %v3057_v18, %v3018_v37 }
 0x37e   : >> { %v3019_v26 = vadd.f32 %v3012_v19, %v2972_v9 }
 0x37f   : >> { %v3113_v50 = vadd.f32 %v3104_v17, %v3066_v12 }
 0x381   : >> { %v3107_v20 = vpop.f32.mrf.mxu3  ;;  %v3160_v41 = vadd.f32 %v3151_v13, %v3113_v50 }
 0x384   : >> { %v3060_v22 = vpop.f32.mrf.mxu2 }
 0x385   : >> { %v3154_v23 = vpop.f32.mrf.mxu0  ;;  %v3015_v24 = vpop.f32.mrf.mxu1  ;;  %v3067_v35 = vadd.f32 %v3060_v22, %v3019_v26 }
 0x386   : >> { %v3020_v59 = vadd.f32 %v3015_v24, %v2973_v16 }
 0x387   : >> { %v3114_v40 = vadd.f32 %v3107_v20, %v3067_v35 }
 0x389   : >> { %v3110_v31 = vpop.f32.mrf.mxu3  ;;  %v3161_v53 = vadd.f32 %v3154_v23, %v3114_v40 }
 0x38c   : >> { %v3063_v21 = vpop.f32.mrf.mxu2 }
 0x38d   : >> { %v3157_v0 = vpop.f32.mrf.mxu0  ;;  %v3198_v29 = vpop.f32.mrf.mxu1  ;;  %v3068_v54 = vadd.f32 %v3063_v21, %v3020_v59 }
 0x38e   : >> { %v3207_v51 = vadd.f32 %v3198_v29, %v3160_v41 }
 0x38f   : >> { %v3115_v47 = vadd.f32 %v3110_v31, %v3068_v54 }
 0x391   : >> { %v3293_v34 = vpop.f32.mrf.mxu3  ;;  %v3162_v38 = vadd.f32 %v3157_v0, %v3115_v47 }
 0x394   : >> { %v3245_v30 = vpop.f32.mrf.mxu2 }
 0x395   : >> { %v3340_v32 = vpop.f32.mrf.mxu0  ;;  %v3201_v43 = vpop.f32.mrf.mxu1  ;;  %v3254_v42 = vadd.f32 %v3245_v30, %v3207_v51 }
 0x396   : >> { %v3208_v44 = vadd.f32 %v3201_v43, %v3161_v53 }
 0x397   : >> { %v3302_v62 = vadd.f32 %v3293_v34, %v3254_v42  ;;  %v3731_v34 = vperm.slane %v7201_v49, 0 }
 0x399   : >> { %v3296_v36 = vpop.f32.mrf.mxu3  ;;  %v3349_v3 = vadd.f32 %v3340_v32, %v3302_v62 }
 0x39c   : >> { %v3248_v33 = vpop.f32.mrf.mxu2 }
 0x39d   : >> { %v3343_v39 = vpop.f32.mrf.mxu0  ;;  %v3204_v11 = vpop.f32.mrf.mxu1  ;;  %v3255_v45 = vadd.f32 %v3248_v33, %v3208_v44 }
 0x39e   : >> { %v3209_v56 = vadd.f32 %v3204_v11, %v3162_v38 }
 0x39f   : >> { %v3303_v63 = vadd.f32 %v3296_v36, %v3255_v45 }
 0x3a1   : >> { %v3299_v46 = vpop.f32.mrf.mxu3  ;;  %v3350_v5 = vadd.f32 %v3343_v39, %v3303_v63 }
 0x3a4   : >> { %v3251_v48 = vpop.f32.mrf.mxu2 }
 0x3a5   : >> { %v3346_v25 = vpop.f32.mrf.mxu0  ;;  %v3387_v55 = vpop.f32.mrf.mxu1  ;;  %v3256_v10 = vadd.f32 %v3251_v48, %v3209_v56 }
 0x3a6   : >> { %v3396_v2 = vadd.f32 %v3387_v55, %v3349_v3 }
 0x3a7   : >> { %v3304_v16 = vadd.f32 %v3299_v46, %v3256_v10 }
 0x3a9   : >> { %v3481_v57 = vpop.f32.mrf.mxu3  ;;  %v3351_v22 = vadd.f32 %v3346_v25, %v3304_v16 }
 0x3ac   : >> { %v3434_v58 = vpop.f32.mrf.mxu2 }
 0x3ad   : >> { %v3529_v52 = vpop.f32.mrf.mxu0  ;;  %v3390_v27 = vpop.f32.mrf.mxu1  ;;  %v3443_v7 = vadd.f32 %v3434_v58, %v3396_v2 }
 0x3ae   : >> { %v3397_v15 = vadd.f32 %v3390_v27, %v3350_v5 }
 0x3af   : >> { %v3490_v14 = vadd.f32 %v3481_v57, %v3443_v7 }
 0x3b1   : >> { %v3484_v28 = vpop.f32.mrf.mxu3  ;;  %v3538_v17 = vadd.f32 %v3529_v52, %v3490_v14 }
 0x3b4   : >> { %v3437_v61 = vpop.f32.mrf.mxu2 }
 0x3b5   : >> { %v3532_v4 = vpop.f32.mrf.mxu0  ;;  %v3393_v6 = vpop.f32.mrf.mxu1  ;;  %v3444_v18 = vadd.f32 %v3437_v61, %v3397_v15 }
 0x3b6   : >> { %v3398_v0 = vadd.f32 %v3393_v6, %v3351_v22 }
 0x3b7   : >> { %v3491_v23 = vadd.f32 %v3484_v28, %v3444_v18 }
 0x3b9   : >> { %v3487_v8 = vpop.f32.mrf.mxu3  ;;  %v3539_v30 = vadd.f32 %v3532_v4, %v3491_v23 }
 0x3bc   : >> { %v3440_v9 = vpop.f32.mrf.mxu2 }
 0x3bd   : >> { %v3535_v1 = vpop.f32.mrf.mxu0  ;;  %v3576_v60 = vpop.f32.mrf.mxu1  ;;  %v3445_v32 = vadd.f32 %v3440_v9, %v3398_v0 }
 0x3be   : >> { %v3585_v19 = vadd.f32 %v3576_v60, %v3538_v17 }
 0x3bf   : >> { %v3492_v37 = vadd.f32 %v3487_v8, %v3445_v32 }
 0x3c1   : >> { %v3670_v13 = vpop.f32.mrf.mxu3  ;;  %v3540_v55 = vadd.f32 %v3535_v1, %v3492_v37 }
 0x3c4   : >> { %v3623_v20 = vpop.f32.mrf.mxu2 }
 0x3c5   : >> { %v3632_v24 = vadd.f32 %v3623_v20, %v3585_v19  ;;  %v3717_v31 = vpop.f32.mrf.mxu0  ;;  %v3579_v21 = vpop.f32.mrf.mxu1 }
 0x3c6   : >> { %v3586_v33 = vadd.f32 %v3579_v21, %v3539_v30 }
 0x3c7   : >> { %v3679_v29 = vadd.f32 %v3670_v13, %v3632_v24 }
 0x3c9   : >> { %v3726_v43 = vadd.f32 %v3717_v31, %v3679_v29  ;;  %v3673_v36 = vpop.f32.mrf.mxu3 }
 0x3cb   : >> { %v3733_v39 = vadd.f32 %v3731_v34, %v3726_v43 }
 0x3cc   : >> { %v3626_v11 = vpop.f32.mrf.mxu2 }
 0x3cd   : >> { %v3736_v12 = vmax.f32 %v3733_v39, 0.0  ;;  %v3633_v46 = vadd.f32 %v3626_v11, %v3586_v33  ;;  %v3720_v48 = vpop.f32.mrf.mxu0  ;;  %v3582_v25 = vpop.f32.mrf.mxu1 }
 0x3ce   : >> { %v3587_v41 = vadd.f32 %v3582_v25, %v3540_v55 }
 0x3cf   : >> { %3741 = vst.msk [vmem:[%s3739_s2] sm:$0xff] %vm3740_vm3, %v3736_v12  ;;  %v3680_v50 = vadd.f32 %v3673_v36, %v3633_v46 }
 0x3d1   : >> { %v3727_v26 = vadd.f32 %v3720_v48, %v3680_v50  ;;  %v3676_v51 = vpop.f32.mrf.mxu3 }
 0x3d3   : >> { %v3734_v35 = vadd.f32 %v3731_v34, %v3727_v26 }
 0x3d4   : >> { %v3629_v57 = vpop.f32.mrf.mxu2 }
 0x3d5   : >> { %v3737_v58 = vmax.f32 %v3734_v35, 0.0  ;;  %v3634_v40 = vadd.f32 %v3629_v57, %v3587_v41  ;;  %v3723_v42 = vpop.f32.mrf.mxu0 }
 0x3d7   : >> { %3742 = vst.msk [vmem:[%s3739_s2 + $0x8] sm:$0xff] %vm3740_vm3, %v3737_v58  ;;  %v3681_v52 = vadd.f32 %v3676_v51, %v3634_v40 }
 0x3d9   : >> { %v3728_v27 = vadd.f32 %v3723_v42, %v3681_v52 }
 0x3db   : >> { %v3735_v59 = vadd.f32 %v3731_v34, %v3728_v27  ;;  %2554 = sbr.rel (!%p2552_p12) target bundleno = 696 (0x2b8), region = 562 }
 0x3dd   : >> { %v3738_v53 = vmax.f32 %v3735_v59, 0.0 }
 0x3df   : >> { %3744 = vst.msk [vmem:[%s3739_s2 + $0x10] sm:$0x7] %vm3743_vm4, %v3738_v53 }
 0x3e6   : > { %v3745_v54 = vld [vmem:[#allocation4] ss:$2 sm:$0xff]  ;;  %v3749_v62 = vld [vmem:[#allocation4 + $0x1] ss:$2 sm:$0xff]  ;;  %v3771_v38 = vld [vmem:[#allocation4 + $0x30] ss:$2 sm:$0xff] }
 0x3e7   : > { %v3753_v28 = vld [vmem:[#allocation4 + $0x18] ss:$2 sm:$0xff]  ;;  %v3757_v44 = vld [vmem:[#allocation4 + $0x19] ss:$2 sm:$0xff]  ;;  %v3760_v61 = vmax.f32 %v3745_v54, %v3749_v62  ;;  %v3779_v56 = vld [vmem:[#allocation4 + $0x48] ss:$2 sm:$0xff] }
 0x3e8   : > { %v3747_v47 = vld [vmem:[#allocation4 + $0x10] ss:$2 sm:$0x1]  ;;  %v3762_v3 = vmax.f32 %v3753_v28, %v3757_v44  ;;  %v3751_v45 = vld [vmem:[#allocation4 + $0x11] ss:$2 sm:$0x1] }
 0x3e9   : > { %v3755_v4 = vld [vmem:[#allocation4 + $0x28] ss:$2 sm:$0x1]  ;;  %v3759_v6 = vld [vmem:[#allocation4 + $0x29] ss:$2 sm:$0x1]  ;;  %v3761_v2 = vmax.f32 %v3747_v47, %v3751_v45 }
 0x3ea   : > { %v3764_v63 = vmax.f32 %v3760_v61, %v3762_v3  ;;  %v3763_v7 = vmax.f32 %v3755_v4, %v3759_v6  ;;  %v3775_v8 = vld [vmem:[#allocation4 + $0x31] ss:$2 sm:$0xff]  ;;  %v3773_v49 = vld [vmem:[#allocation4 + $0x40] ss:$2 sm:$0x1] }
 0x3eb   : > { %v3783_v9 = vld [vmem:[#allocation4 + $0x49] ss:$2 sm:$0xff]  ;;  %v3786_v5 = vmax.f32 %v3771_v38, %v3775_v8  ;;  %v3777_v14 = vld [vmem:[#allocation4 + $0x41] ss:$2 sm:$0x1] }
 0x3ec   : > { %v3788_v10 = vmax.f32 %v3779_v56, %v3783_v9  ;;  %3767 = vst.msk [vmem:[#allocation5] sm:$0xff] %vm3740_vm3, %v3764_v63  ;;  %v3765_v1 = vmax.f32 %v3761_v2, %v3763_v7  ;;  %v3781_v60 = vld [vmem:[#allocation4 + $0x58] ss:$2 sm:$0x1]  ;;  %v3787_v15 = vmax.f32 %v3773_v49, %v3777_v14  ;;  %v3795_v16 = vld [vmem:[#allocation4 + $0x60] ss:$2 sm:$0xff] }
 0x3ed   : > { %v3785_v18 = vld [vmem:[#allocation4 + $0x59] ss:$2 sm:$0x1]  ;;  %v3799_v13 = vld [vmem:[#allocation4 + $0x61] ss:$2 sm:$0xff] }
 0x3ee   : > { %v3790_v17 = vmax.f32 %v3786_v5, %v3788_v10  ;;  %3769 = vst.msk [vmem:[#allocation5 + $0x8] sm:$0x1] %vm3768_vm5, %v3765_v1  ;;  %v3789_v19 = vmax.f32 %v3781_v60, %v3785_v18  ;;  %v3803_v20 = vld [vmem:[#allocation4 + $0x78] ss:$2 sm:$0xff]  ;;  %v3807_v22 = vld [vmem:[#allocation4 + $0x79] ss:$2 sm:$0xff]  ;;  %v3810_v23 = vmax.f32 %v3795_v16, %v3799_v13 }
 0x3ef   : > { %v3812_v24 = vmax.f32 %v3803_v20, %v3807_v22  ;;  %v3797_v31 = vld [vmem:[#allocation4 + $0x70] ss:$2 sm:$0x1]  ;;  %v3801_v29 = vld [vmem:[#allocation4 + $0x71] ss:$2 sm:$0x1] }
 0x3f0   : > { %3792 = vst.msk [vmem:[#allocation5 + $0x9] sm:$0xff] %vm3740_vm3, %v3790_v17  ;;  %v3819_v21 = vld [vmem:[#allocation4 + $0x90] ss:$2 sm:$0xff]  ;;  %v3791_v0 = vmax.f32 %v3787_v15, %v3789_v19  ;;  %v3805_v34 = vld [vmem:[#allocation4 + $0x88] ss:$2 sm:$0x1]  ;;  %v3811_v43 = vmax.f32 %v3797_v31, %v3801_v29 }
 0x3f1   : > { %v3814_v30 = vmax.f32 %v3810_v23, %v3812_v24  ;;  %v3809_v32 = vld [vmem:[#allocation4 + $0x89] ss:$2 sm:$0x1]  ;;  %v3823_v36 = vld [vmem:[#allocation4 + $0x91] ss:$2 sm:$0xff] }
 0x3f2   : > { %3793 = vst.msk [vmem:[#allocation5 + $0x11] sm:$0x1] %vm3768_vm5, %v3791_v0  ;;  %v3813_v33 = vmax.f32 %v3805_v34, %v3809_v32  ;;  %v3827_v39 = vld [vmem:[#allocation4 + $0xa8] ss:$2 sm:$0xff]  ;;  %v3831_v11 = vld [vmem:[#allocation4 + $0xa9] ss:$2 sm:$0xff]  ;;  %v3834_v37 = vmax.f32 %v3819_v21, %v3823_v36 }
 0x3f3   : > { %3816 = vst.msk [vmem:[#allocation5 + $0x12] sm:$0xff] %vm3740_vm3, %v3814_v30  ;;  %v3836_v12 = vmax.f32 %v3827_v39, %v3831_v11  ;;  %v3821_v46 = vld [vmem:[#allocation4 + $0xa0] ss:$2 sm:$0x1]  ;;  %v3847_v57 = vld [vmem:[#allocation4 + $0xc1] ss:$2 sm:$0xff] }
 0x3f4   : > { %v3843_v48 = vld [vmem:[#allocation4 + $0xc0] ss:$2 sm:$0xff]  ;;  %v3815_v50 = vmax.f32 %v3811_v43, %v3813_v33  ;;  %v3825_v25 = vld [vmem:[#allocation4 + $0xa1] ss:$2 sm:$0x1] }
 0x3f5   : > { %v3829_v55 = vld [vmem:[#allocation4 + $0xb8] ss:$2 sm:$0x1]  ;;  %v3838_v26 = vmax.f32 %v3834_v37, %v3836_v12  ;;  %v3833_v41 = vld [vmem:[#allocation4 + $0xb9] ss:$2 sm:$0x1]  ;;  %v3835_v35 = vmax.f32 %v3821_v46, %v3825_v25  ;;  %v3858_v42 = vmax.f32 %v3843_v48, %v3847_v57 }
 0x3f6   : > { %3817 = vst.msk [vmem:[#allocation5 + $0x1a] sm:$0x1] %vm3768_vm5, %v3815_v50  ;;  %v3837_v51 = vmax.f32 %v3829_v55, %v3833_v41  ;;  %v3851_v58 = vld [vmem:[#allocation4 + $0xd8] ss:$2 sm:$0xff]  ;;  %v3855_v40 = vld [vmem:[#allocation4 + $0xd9] ss:$2 sm:$0xff] }
 0x3f7   : > { %3840 = vst.msk [vmem:[#allocation5 + $0x1b] sm:$0xff] %vm3740_vm3, %v3838_v26  ;;  %v3860_v52 = vmax.f32 %v3851_v58, %v3855_v40  ;;  %v3845_v27 = vld [vmem:[#allocation4 + $0xd0] ss:$2 sm:$0x1]  ;;  %v3871_v47 = vld [vmem:[#allocation4 + $0xf1] ss:$2 sm:$0xff] }
 0x3f8   : > { %v3867_v59 = vld [vmem:[#allocation4 + $0xf0] ss:$2 sm:$0xff]  ;;  %v3839_v53 = vmax.f32 %v3835_v35, %v3837_v51  ;;  %v3849_v54 = vld [vmem:[#allocation4 + $0xd1] ss:$2 sm:$0x1] }
 0x3f9   : > { %v3853_v62 = vld [vmem:[#allocation4 + $0xe8] ss:$2 sm:$0x1]  ;;  %v3862_v28 = vmax.f32 %v3858_v42, %v3860_v52  ;;  %v3857_v44 = vld [vmem:[#allocation4 + $0xe9] ss:$2 sm:$0x1]  ;;  %v3859_v61 = vmax.f32 %v3845_v27, %v3849_v54  ;;  %v3882_v6 = vmax.f32 %v3867_v59, %v3871_v47 }
 0x3fa   : > { %3841 = vst.msk [vmem:[#allocation5 + $0x23] sm:$0x1] %vm3768_vm5, %v3839_v53  ;;  %v3861_v3 = vmax.f32 %v3853_v62, %v3857_v44  ;;  %v3875_v45 = vld [vmem:[#allocation4 + $0x108] ss:$2 sm:$0xff]  ;;  %v3879_v4 = vld [vmem:[#allocation4 + $0x109] ss:$2 sm:$0xff] }
 0x3fb   : > { %3864 = vst.msk [vmem:[#allocation5 + $0x24] sm:$0xff] %vm3740_vm3, %v3862_v28  ;;  %v3884_v2 = vmax.f32 %v3875_v45, %v3879_v4  ;;  %v3869_v38 = vld [vmem:[#allocation4 + $0x100] ss:$2 sm:$0x1]  ;;  %v3895_v49 = vld [vmem:[#allocation4 + $0x121] ss:$2 sm:$0xff] }
 0x3fc   : > { %v3891_v63 = vld [vmem:[#allocation4 + $0x120] ss:$2 sm:$0xff]  ;;  %v3863_v7 = vmax.f32 %v3859_v61, %v3861_v3  ;;  %v3873_v8 = vld [vmem:[#allocation4 + $0x101] ss:$2 sm:$0x1] }
 0x3fd   : > { %v3877_v56 = vld [vmem:[#allocation4 + $0x118] ss:$2 sm:$0x1]  ;;  %v3886_v9 = vmax.f32 %v3882_v6, %v3884_v2  ;;  %v3881_v5 = vld [vmem:[#allocation4 + $0x119] ss:$2 sm:$0x1]  ;;  %v3883_v10 = vmax.f32 %v3869_v38, %v3873_v8  ;;  %v3906_v15 = vmax.f32 %v3891_v63, %v3895_v49 }
 0x3fe   : > { %3865 = vst.msk [vmem:[#allocation5 + $0x2c] sm:$0x1] %vm3768_vm5, %v3863_v7  ;;  %v3885_v14 = vmax.f32 %v3877_v56, %v3881_v5  ;;  %v3899_v1 = vld [vmem:[#allocation4 + $0x138] ss:$2 sm:$0xff]  ;;  %v3903_v60 = vld [vmem:[#allocation4 + $0x139] ss:$2 sm:$0xff] }
 0x3ff   : > { %3888 = vst.msk [vmem:[#allocation5 + $0x2d] sm:$0xff] %vm3740_vm3, %v3886_v9  ;;  %v3908_v16 = vmax.f32 %v3899_v1, %v3903_v60  ;;  %v3893_v17 = vld [vmem:[#allocation4 + $0x130] ss:$2 sm:$0x1]  ;;  %v3919_v31 = vld [vmem:[#allocation4 + $0x151] ss:$2 sm:$0xff] }
 0x400   : > { %v3915_v18 = vld [vmem:[#allocation4 + $0x150] ss:$2 sm:$0xff]  ;;  %v3887_v13 = vmax.f32 %v3883_v10, %v3885_v14  ;;  %v3897_v19 = vld [vmem:[#allocation4 + $0x131] ss:$2 sm:$0x1] }
 0x401   : > { %v3901_v20 = vld [vmem:[#allocation4 + $0x148] ss:$2 sm:$0x1]  ;;  %v3910_v22 = vmax.f32 %v3906_v15, %v3908_v16  ;;  %v3905_v23 = vld [vmem:[#allocation4 + $0x149] ss:$2 sm:$0x1]  ;;  %v3907_v24 = vmax.f32 %v3893_v17, %v3897_v19  ;;  %v3930_v34 = vmax.f32 %v3915_v18, %v3919_v31 }
 0x402   : > { %3889 = vst.msk [vmem:[#allocation5 + $0x35] sm:$0x1] %vm3768_vm5, %v3887_v13  ;;  %v3909_v21 = vmax.f32 %v3901_v20, %v3905_v23  ;;  %v3923_v0 = vld [vmem:[#allocation4 + $0x168] ss:$2 sm:$0xff]  ;;  %v3927_v29 = vld [vmem:[#allocation4 + $0x169] ss:$2 sm:$0xff] }
 0x403   : > { %3912 = vst.msk [vmem:[#allocation5 + $0x36] sm:$0xff] %vm3740_vm3, %v3910_v22  ;;  %v3932_v30 = vmax.f32 %v3923_v0, %v3927_v29  ;;  %v3917_v32 = vld [vmem:[#allocation4 + $0x160] ss:$2 sm:$0x1]  ;;  %v3943_v46 = vld [vmem:[#allocation4 + $0x181] ss:$2 sm:$0xff] }
 0x404   : > { %v3939_v43 = vld [vmem:[#allocation4 + $0x180] ss:$2 sm:$0xff]  ;;  %v3911_v36 = vmax.f32 %v3907_v24, %v3909_v21  ;;  %v3921_v33 = vld [vmem:[#allocation4 + $0x161] ss:$2 sm:$0x1] }
 0x405   : > { %v3925_v39 = vld [vmem:[#allocation4 + $0x178] ss:$2 sm:$0x1]  ;;  %v3934_v11 = vmax.f32 %v3930_v34, %v3932_v30  ;;  %v3929_v37 = vld [vmem:[#allocation4 + $0x179] ss:$2 sm:$0x1]  ;;  %v3931_v12 = vmax.f32 %v3917_v32, %v3921_v33  ;;  %v3954_v55 = vmax.f32 %v3939_v43, %v3943_v46 }
 0x406   : > { %3913 = vst.msk [vmem:[#allocation5 + $0x3e] sm:$0x1] %vm3768_vm5, %v3911_v36  ;;  %v3933_v48 = vmax.f32 %v3925_v39, %v3929_v37  ;;  %v3947_v50 = vld [vmem:[#allocation4 + $0x198] ss:$2 sm:$0xff]  ;;  %v3951_v25 = vld [vmem:[#allocation4 + $0x199] ss:$2 sm:$0xff] }
 0x407   : > { %3936 = vst.msk [vmem:[#allocation5 + $0x3f] sm:$0xff] %vm3740_vm3, %v3934_v11  ;;  %v3956_v26 = vmax.f32 %v3947_v50, %v3951_v25  ;;  %v3941_v41 = vld [vmem:[#allocation4 + $0x190] ss:$2 sm:$0x1]  ;;  %v7688_v35 = vld [vmem:[%s9378_s6] sm:$0x1] }
 0x408   : > { %v3935_v57 = vmax.f32 %v3931_v12, %v3933_v48  ;;  %v3945_v51 = vld [vmem:[#allocation4 + $0x191] ss:$2 sm:$0x1]  ;;  %v3949_v58 = vld [vmem:[#allocation4 + $0x1a8] ss:$2 sm:$0x1] }
 0x409   : > { %v3958_v40 = vmax.f32 %v3954_v55, %v3956_v26  ;;  %v3953_v42 = vld [vmem:[#allocation4 + $0x1a9] ss:$2 sm:$0x1]  ;;  %v3955_v52 = vmax.f32 %v3941_v41, %v3945_v51 }
 0x40a   : > { %3937 = vst.msk [vmem:[#allocation5 + $0x47] sm:$0x1] %vm3768_vm5, %v3935_v57  ;;  %v3957_v27 = vmax.f32 %v3949_v58, %v3953_v42 }
 0x40b   : > { %3960 = vst.msk [vmem:[#allocation5 + $0x48] sm:$0xff] %vm3740_vm3, %v3958_v40 }
 0x40c   : > { %v3959_v59 = vmax.f32 %v3955_v52, %v3957_v27 }
 0x40e   : > { %3961 = vst.msk [vmem:[#allocation5 + $0x50] sm:$0x1] %vm3768_vm5, %v3959_v59 }
 0x40f LB: >> { %v3990_v53 = vld [vmem:[%s9377_s5 + $0x78] sm:$0xff]  ;;  %v3989_v62 = vld [vmem:[%s9377_s5 + $0x70] sm:$0xff]  ;;  %v3988_v47 = vld [vmem:[%s9377_s5 + $0x68] sm:$0xff]  ;;  %s3969_s13 = smul.u32 9, %s6540_s16  ;;  %s6540_s16 = sphi %s7693_s16, %s3968_s16  }
 0x410   : >> { %v4047_v54 = vld [vmem:[%s9377_s5 + $0xb8] sm:$0xff]  ;;  %4002 = vmatpush.msra.mxu0 %v3990_v53  ;;  %v4046_v44 = vld [vmem:[%s9377_s5 + $0xb0] sm:$0xff]  ;;  %v4045_v45 = vld [vmem:[%s9377_s5 + $0xa8] sm:$0xff] }
 0x411   : >> { %4059 = vmatpush.msra.mxu2 %v4047_v54  ;;  %v3979_v28 = vld [vmem:[%s9377_s5 + $0x38] sm:$0xff]  ;;  %v3978_v3 = vld [vmem:[%s9377_s5 + $0x30] sm:$0xff]  ;;  %v3977_v6 = vld [vmem:[%s9377_s5 + $0x28] sm:$0xff]  ;;  %s7861_s29 = scalar_lea.vmem [#allocation5], %s3969_s13 }
 0x412   : >> { %v4082_v61 = vld [vmem:[%s9377_s5 + $0xf8] sm:$0xff]  ;;  %4025 = vmatpush.msra.mxu1 %v3979_v28  ;;  %4003 = vmatpush.msra.mxu0 %v3989_v62  ;;  %v4081_v4 = vld [vmem:[%s9377_s5 + $0xf0] sm:$0xff]  ;;  %v3987_v2 = vld [vmem:[%s9377_s5 + $0x60] sm:$0xff] }
 0x413   : >> { %4094 = vmatpush.msra.mxu3 %v4082_v61  ;;  %4060 = vmatpush.msra.mxu2 %v4046_v44  ;;  %v4044_v38 = vld [vmem:[%s9377_s5 + $0xa0] sm:$0xff]  ;;  %v4080_v63 = vld [vmem:[%s9377_s5 + $0xe8] sm:$0xff]  ;;  %v3986_v56 = vld [vmem:[%s9377_s5 + $0x58] sm:$0xff] }
 0x414   : >> { %4026 = vmatpush.msra.mxu1 %v3978_v3  ;;  %4004 = vmatpush.msra.mxu0 %v3988_v47  ;;  %v3976_v7 = vld [vmem:[%s9377_s5 + $0x20] sm:$0xff]  ;;  %v4043_v9 = vld [vmem:[%s9377_s5 + $0x98] sm:$0xff]  ;;  %v3985_v49 = vld [vmem:[%s9377_s5 + $0x50] sm:$0xff] }
 0x415   : >> { %4095 = vmatpush.msra.mxu3 %v4081_v4  ;;  %4061 = vmatpush.msra.mxu2 %v4045_v45  ;;  %v4079_v8 = vld [vmem:[%s9377_s5 + $0xe0] sm:$0xff]  ;;  %v3975_v5 = vld [vmem:[%s9377_s5 + $0x18] sm:$0xff]  ;;  %v4042_v14 = vld [vmem:[%s9377_s5 + $0x90] sm:$0xff] }
 0x416   : >> { %4027 = vmatpush.msra.mxu1 %v3977_v6  ;;  %4005 = vmatpush.msra.mxu0 %v3987_v2  ;;  %v4078_v10 = vld [vmem:[%s9377_s5 + $0xd8] sm:$0xff]  ;;  %v3974_v1 = vld [vmem:[%s9377_s5 + $0x10] sm:$0xff]  ;;  %v3984_v15 = vld [vmem:[%s9377_s5 + $0x48] sm:$0xff] }
 0x417   : >> { %4096 = vmatpush.msra.mxu3 %v4080_v63  ;;  %4062 = vmatpush.msra.mxu2 %v4044_v38  ;;  %v4077_v60 = vld [vmem:[%s9377_s5 + $0xd0] sm:$0xff]  ;;  %v4041_v16 = vld [vmem:[%s9377_s5 + $0x88] sm:$0xff]  ;;  %v3983_v13 = vld [vmem:[%s9377_s5 + $0x40] sm:$0xff] }
 0x418   : >> { %4028 = vmatpush.msra.mxu1 %v3976_v7  ;;  %4006 = vmatpush.msra.mxu0 %v3986_v56  ;;  %v3973_v17 = vld [vmem:[%s9377_s5 + $0x8] sm:$0xff]  ;;  %v4040_v19 = vld [vmem:[%s9377_s5 + $0x80] sm:$0xff]  ;;  %v4117_v20 = vld [vmem:[%s9377_s5 + $0x138] sm:$0xff] }
 0x419   : >> { %4097 = vmatpush.msra.mxu3 %v4079_v8  ;;  %4063 = vmatpush.msra.mxu2 %v4043_v9  ;;  %v4076_v18 = vld [vmem:[%s9377_s5 + $0xc8] sm:$0xff]  ;;  %v4188_v22 = vld [vmem:[%s9377_s5 + $0x1b8] sm:$0xff]  ;;  %v3972_v23 = vld [vmem:[%s9377_s5] sm:$0xff] }
 0x41a   : >> { %4029 = vmatpush.msra.mxu1 %v3975_v5  ;;  %4007 = vmatpush.msra.mxu0 %v3985_v49  ;;  %v4075_v24 = vld [vmem:[%s9377_s5 + $0xc0] sm:$0xff]  ;;  %v4116_v31 = vld [vmem:[%s9377_s5 + $0x130] sm:$0xff]  ;;  %v4153_v21 = vld [vmem:[%s9377_s5 + $0x178] sm:$0xff] }
 0x41b   : >> { %4098 = vmatpush.msra.mxu3 %v4078_v10  ;;  %4064 = vmatpush.msra.mxu2 %v4042_v14  ;;  %v4187_v0 = vld [vmem:[%s9377_s5 + $0x1b0] sm:$0xff]  ;;  %v4223_v29 = vld [vmem:[%s9377_s5 + $0x1f8] sm:$0xff]  ;;  %v4115_v34 = vld [vmem:[%s9377_s5 + $0x128] sm:$0xff] }
 0x41c   : >> { %4030 = vmatpush.msra.mxu1 %v3974_v1  ;;  %4008 = vmatpush.msra.mxu0 %v3984_v15  ;;  %v4152_v30 = vld [vmem:[%s9377_s5 + $0x170] sm:$0xff]  ;;  %v4186_v32 = vld [vmem:[%s9377_s5 + $0x1a8] sm:$0xff]  ;;  %v4114_v36 = vld [vmem:[%s9377_s5 + $0x120] sm:$0xff] }
 0x41d   : >> { %4099 = vmatpush.msra.mxu3 %v4077_v60  ;;  %4065 = vmatpush.msra.mxu2 %v4041_v16  ;;  %v4222_v43 = vld [vmem:[%s9377_s5 + $0x1f0] sm:$0xff]  ;;  %v4151_v33 = vld [vmem:[%s9377_s5 + $0x168] sm:$0xff]  ;;  %v4185_v39 = vld [vmem:[%s9377_s5 + $0x1a0] sm:$0xff] }
 0x41e   : >> { %4031 = vmatpush.msra.mxu1 %v3973_v17  ;;  %4009 = vmatpush.msra.mxu0 %v3983_v13  ;;  %v4221_v11 = vld [vmem:[%s9377_s5 + $0x1e8] sm:$0xff]  ;;  %v4113_v37 = vld [vmem:[%s9377_s5 + $0x118] sm:$0xff]  ;;  %v4150_v12 = vld [vmem:[%s9377_s5 + $0x160] sm:$0xff] }
 0x41f   : >> { %4100 = vmatpush.msra.mxu3 %v4076_v18  ;;  %4066 = vmatpush.msra.mxu2 %v4040_v19  ;;  %v4184_v46 = vld [vmem:[%s9377_s5 + $0x198] sm:$0xff]  ;;  %v4220_v48 = vld [vmem:[%s9377_s5 + $0x1e0] sm:$0xff]  ;;  %v4112_v50 = vld [vmem:[%s9377_s5 + $0x110] sm:$0xff] }
 0x420   : >> { %4129 = vmatpush.msrb.mxu0 %v4117_v20  ;;  %4032 = vmatpush.msra.mxu1 %v3972_v23  ;;  %v4149_v25 = vld [vmem:[%s9377_s5 + $0x158] sm:$0xff]  ;;  %v4183_v55 = vld [vmem:[%s9377_s5 + $0x190] sm:$0xff]  ;;  %v6300_v41 = vld [vmem:[%s7861_s29 + $0x2] sm:$0x1f] }
 0x421   : >> { %4200 = vmatpush.msrb.mxu2 %v4188_v22  ;;  %4101 = vmatpush.msra.mxu3 %v4075_v24  ;;  %v4219_v26 = vld [vmem:[%s9377_s5 + $0x1d8] sm:$0xff]  ;;  %v4111_v57 = vld [vmem:[%s9377_s5 + $0x108] sm:$0xff]  ;;  %v4148_v51 = vld [vmem:[%s9377_s5 + $0x150] sm:$0xff] }
 0x422   : >> { %4130 = vmatpush.msrb.mxu0 %v4116_v31  ;;  %4165 = vmatpush.msrb.mxu1 %v4153_v21  ;;  %v4182_v58 = vld [vmem:[%s9377_s5 + $0x188] sm:$0xff]  ;;  %v4218_v40 = vld [vmem:[%s9377_s5 + $0x1d0] sm:$0xff]  ;;  %v6297_v42 = vld [vmem:[%s7861_s29 + $0x1] sm:$0x1f] }
 0x423   : >> { %4201 = vmatpush.msrb.mxu2 %v4187_v0  ;;  %4235 = vmatpush.msrb.mxu3 %v4223_v29  ;;  %v6302_v52 = vld [vmem:[%s7861_s29 + $0x3] sm:$0x1f]  ;;  %v4147_v59 = vld [vmem:[%s9377_s5 + $0x148] sm:$0xff]  ;;  %v4258_v28 = vld [vmem:[%s9377_s5 + $0x238] sm:$0xff] }
 0x424   : >> { %4131 = vmatpush.msrb.mxu0 %v4115_v34  ;;  %4166 = vmatpush.msrb.mxu1 %v4152_v30  ;;  %v4110_v27 = vld [vmem:[%s9377_s5 + $0x100] sm:$0xff]  ;;  %v4217_v54 = vld [vmem:[%s9377_s5 + $0x1c8] sm:$0xff]  ;;  %v4329_v44 = vld [vmem:[%s9377_s5 + $0x2b8] sm:$0xff] }
 0x425   : >> { %4202 = vmatpush.msrb.mxu2 %v4186_v32  ;;  %4236 = vmatpush.msrb.mxu3 %v4222_v43  ;;  %v4181_v53 = vld [vmem:[%s9377_s5 + $0x180] sm:$0xff]  ;;  %v4257_v3 = vld [vmem:[%s9377_s5 + $0x230] sm:$0xff]  ;;  %v4293_v45 = vld [vmem:[%s9377_s5 + $0x278] sm:$0xff] }
 0x426   : >> { %4132 = vmatpush.msrb.mxu0 %v4114_v36  ;;  %4167 = vmatpush.msrb.mxu1 %v4151_v33  ;;  %v3971_v62 = vld [vmem:[%s7861_s29] sm:$0x1f]  ;;  %v4328_v4 = vld [vmem:[%s9377_s5 + $0x2b0] sm:$0xff]  ;;  %v4364_v6 = vld [vmem:[%s9377_s5 + $0x2f8] sm:$0xff] }
 0x427   : >> { %4203 = vmatpush.msrb.mxu2 %v4185_v39  ;;  %4237 = vmatpush.msrb.mxu3 %v4221_v11  ;;  %v4146_v61 = vld [vmem:[%s9377_s5 + $0x140] sm:$0xff]  ;;  %v6308_v2 = vld [vmem:[%s7861_s29 + $0xa] sm:$0x1f]  ;;  %v4292_v63 = vld [vmem:[%s9377_s5 + $0x270] sm:$0xff] }
 0x428   : >> { %4133 = vmatpush.msrb.mxu0 %v4113_v37  ;;  %4168 = vmatpush.msrb.mxu1 %v4150_v12  ;;  %v4216_v47 = vld [vmem:[%s9377_s5 + $0x1c0] sm:$0xff]  ;;  %v4256_v38 = vld [vmem:[%s9377_s5 + $0x228] sm:$0xff]  ;;  %v4363_v8 = vld [vmem:[%s9377_s5 + $0x2f0] sm:$0xff] }
 0x429   : >> { %4204 = vmatpush.msrb.mxu2 %v4184_v46  ;;  %4238 = vmatpush.msrb.mxu3 %v4220_v48  ;;  %v4327_v7 = vld [vmem:[%s9377_s5 + $0x2a8] sm:$0xff]  ;;  %v4255_v5 = vld [vmem:[%s9377_s5 + $0x220] sm:$0xff]  ;;  %v4254_v60 = vld [vmem:[%s9377_s5 + $0x218] sm:$0xff] }
 0x42a   : >> { %4134 = vmatpush.msrb.mxu0 %v4112_v50  ;;  %4169 = vmatpush.msrb.mxu1 %v4149_v25  ;;  %v6304_v56 = vld [vmem:[%s7861_s29 + $0x4] sm:$0x1f]  ;;  %v6310_v9 = vld [vmem:[%s7861_s29 + $0xb] sm:$0x1f]  ;;  %v4325_v16 = vld [vmem:[%s9377_s5 + $0x298] sm:$0xff] }
 0x42b   : >> { %4205 = vmatpush.msrb.mxu2 %v4183_v55  ;;  %4239 = vmatpush.msrb.mxu3 %v4219_v26  ;;  %v4291_v10 = vld [vmem:[%s9377_s5 + $0x268] sm:$0xff]  ;;  %v4326_v49 = vld [vmem:[%s9377_s5 + $0x2a0] sm:$0xff]  ;;  %v4253_v18 = vld [vmem:[%s9377_s5 + $0x210] sm:$0xff] }
 0x42c   : >> { %6301 = vmatmul.msk.f32.vlgmr.msra.gmra.mxu2 %vm3740_vm3, %v6300_v41  ;;  %4135 = vmatpush.msrb.mxu0 %v4111_v57  ;;  %v4362_v14 = vld [vmem:[%s9377_s5 + $0x2e8] sm:$0xff]  ;;  %v4290_v15 = vld [vmem:[%s9377_s5 + $0x260] sm:$0xff]  ;;  %v4289_v13 = vld [vmem:[%s9377_s5 + $0x258] sm:$0xff] }
 0x42d   : >> { %4170 = vmatpush.msrb.mxu1 %v4148_v51  ;;  %4206 = vmatpush.msrb.mxu2 %v4182_v58  ;;  %v6306_v1 = vld [vmem:[%s7861_s29 + $0x9] sm:$0x1f]  ;;  %v4361_v17 = vld [vmem:[%s9377_s5 + $0x2e0] sm:$0xff]  ;;  %v4324_v19 = vld [vmem:[%s9377_s5 + $0x290] sm:$0xff] }
 0x42e   : >> { %4240 = vmatpush.msrb.mxu3 %v4218_v40  ;;  %6298 = vmatmul.msk.f32.vlgmr.msra.gmra.mxu0 %vm3740_vm3, %v6297_v42  ;;  %v4360_v20 = vld [vmem:[%s9377_s5 + $0x2d8] sm:$0xff]  ;;  %v4252_v22 = vld [vmem:[%s9377_s5 + $0x208] sm:$0xff]  ;;  %v4288_v23 = vld [vmem:[%s9377_s5 + $0x250] sm:$0xff] }
 0x42f   : >> { %6303 = vmatmul.msk.f32.vlgmr.msra.gmra.mxu3 %vm3740_vm3, %v6302_v52  ;;  %4136 = vmatpush.msrb.mxu0 %v4110_v27  ;;  %v4323_v24 = vld [vmem:[%s9377_s5 + $0x288] sm:$0xff]  ;;  %v4359_v31 = vld [vmem:[%s9377_s5 + $0x2d0] sm:$0xff]  ;;  %v4251_v21 = vld [vmem:[%s9377_s5 + $0x200] sm:$0xff] }
 0x430   : >> { %4171 = vmatpush.msrb.mxu1 %v4147_v59  ;;  %4207 = vmatpush.msrb.mxu2 %v4181_v53  ;;  %v4287_v0 = vld [vmem:[%s9377_s5 + $0x248] sm:$0xff]  ;;  %v4322_v29 = vld [vmem:[%s9377_s5 + $0x280] sm:$0xff]  ;;  %v6316_v32 = vld [vmem:[%s7861_s29 + $0x12] sm:$0x1f] }
 0x431   : >> { %4241 = vmatpush.msrb.mxu3 %v4217_v54  ;;  %6299 = vmatmul.msk.f32.vlgmr.msra.gmra.mxu1 %vm3740_vm3, %v3971_v62  ;;  %v4358_v34 = vld [vmem:[%s9377_s5 + $0x2c8] sm:$0xff]  ;;  %v4399_v43 = vld [vmem:[%s9377_s5 + $0x338] sm:$0xff]  ;;  %v4286_v33 = vld [vmem:[%s9377_s5 + $0x240] sm:$0xff] }
 0x432   : >> { %4270 = vmatpush.msra.mxu0 %v4258_v28  ;;  %4341 = vmatpush.msra.mxu2 %v4329_v44  ;;  %v6312_v30 = vld [vmem:[%s7861_s29 + $0xc] sm:$0x1f]  ;;  %v4469_v36 = vld [vmem:[%s9377_s5 + $0x3b8] sm:$0xff]  ;;  %v4357_v39 = vld [vmem:[%s9377_s5 + $0x2c0] sm:$0xff] }
 0x433   : >> { %4172 = vmatpush.msrb.mxu1 %v4146_v61  ;;  %4242 = vmatpush.msrb.mxu3 %v4216_v47  ;;  %v6314_v11 = vld [vmem:[%s7861_s29 + $0xd] sm:$0x1f]  ;;  %v6318_v37 = vld [vmem:[%s7861_s29 + $0x13] sm:$0x1f]  ;;  %v4434_v46 = vld [vmem:[%s9377_s5 + $0x378] sm:$0xff] }
 0x434   : >> { %4271 = vmatpush.msra.mxu0 %v4257_v3  ;;  %4342 = vmatpush.msra.mxu2 %v4328_v4  ;;  %v4398_v12 = vld [vmem:[%s9377_s5 + $0x330] sm:$0xff]  ;;  %v4505_v50 = vld [vmem:[%s9377_s5 + $0x3f8] sm:$0xff]  ;;  %v4397_v25 = vld [vmem:[%s9377_s5 + $0x328] sm:$0xff] }
 0x435   : >> { %4305 = vmatpush.msra.mxu1 %v4293_v45  ;;  %4376 = vmatpush.msra.mxu3 %v4364_v6  ;;  %v4468_v48 = vld [vmem:[%s9377_s5 + $0x3b0] sm:$0xff]  ;;  %v4467_v26 = vld [vmem:[%s9377_s5 + $0x3a8] sm:$0xff]  ;;  %v4396_v57 = vld [vmem:[%s9377_s5 + $0x320] sm:$0xff] }
 0x436   : >> { %6309 = vmatmul.msk.f32.vlgmr.msrb.gmra.mxu2 %vm3740_vm3, %v6308_v2  ;;  %4272 = vmatpush.msra.mxu0 %v4256_v38  ;;  %v4433_v55 = vld [vmem:[%s9377_s5 + $0x370] sm:$0xff]  ;;  %v4432_v51 = vld [vmem:[%s9377_s5 + $0x368] sm:$0xff]  ;;  %v4466_v58 = vld [vmem:[%s9377_s5 + $0x3a0] sm:$0xff] }
 0x437   : >> { %4306 = vmatpush.msra.mxu1 %v4292_v63  ;;  %4343 = vmatpush.msra.mxu2 %v4327_v7  ;;  %v4504_v41 = vld [vmem:[%s9377_s5 + $0x3f0] sm:$0xff]  ;;  %v4503_v40 = vld [vmem:[%s9377_s5 + $0x3e8] sm:$0xff]  ;;  %v4395_v42 = vld [vmem:[%s9377_s5 + $0x318] sm:$0xff] }
 0x438   : >> { %4377 = vmatpush.msra.mxu3 %v4363_v8  ;;  %6305 = vmatmul.msk.f32.vlgmr.msrb.gmra.mxu0 %vm3740_vm3, %v6304_v56  ;;  %v4431_v52 = vld [vmem:[%s9377_s5 + $0x360] sm:$0xff]  ;;  %v4465_v27 = vld [vmem:[%s9377_s5 + $0x398] sm:$0xff]  ;;  %v4394_v53 = vld [vmem:[%s9377_s5 + $0x310] sm:$0xff] }
 0x439   : >> { %6311 = vmatmul.msk.f32.vlgmr.msrb.gmra.mxu3 %vm3740_vm3, %v6310_v9  ;;  %4273 = vmatpush.msra.mxu0 %v4255_v5  ;;  %v4502_v59 = vld [vmem:[%s9377_s5 + $0x3e0] sm:$0xff]  ;;  %v4430_v54 = vld [vmem:[%s9377_s5 + $0x358] sm:$0xff]  ;;  %v4464_v62 = vld [vmem:[%s9377_s5 + $0x390] sm:$0xff] }
 0x43a   : >> { %4307 = vmatpush.msra.mxu1 %v4291_v10  ;;  %4344 = vmatpush.msra.mxu2 %v4326_v49  ;;  %v4501_v28 = vld [vmem:[%s9377_s5 + $0x3d8] sm:$0xff]  ;;  %v4393_v44 = vld [vmem:[%s9377_s5 + $0x308] sm:$0xff]  ;;  %v4429_v61 = vld [vmem:[%s9377_s5 + $0x350] sm:$0xff] }
 0x43b   : >> { %4378 = vmatpush.msra.mxu3 %v4362_v14  ;;  %6307 = vmatmul.msk.f32.vlgmr.msrb.gmra.mxu1 %vm3740_vm3, %v6306_v1  ;;  %v4463_v47 = vld [vmem:[%s9377_s5 + $0x388] sm:$0xff]  ;;  %v4500_v3 = vld [vmem:[%s9377_s5 + $0x3d0] sm:$0xff]  ;;  %v4392_v45 = vld [vmem:[%s9377_s5 + $0x300] sm:$0xff] }
 0x43c   : >> { %4274 = vmatpush.msra.mxu0 %v4254_v60  ;;  %4308 = vmatpush.msra.mxu1 %v4290_v15  ;;  %v4428_v4 = vld [vmem:[%s9377_s5 + $0x348] sm:$0xff]  ;;  %v4462_v6 = vld [vmem:[%s9377_s5 + $0x380] sm:$0xff]  ;;  %v6320_v38 = vld [vmem:[%s7861_s29 + $0x14] sm:$0x1f] }
 0x43d   : >> { %4345 = vmatpush.msra.mxu2 %v4325_v16  ;;  %4379 = vmatpush.msra.mxu3 %v4361_v17  ;;  %v4499_v2 = vld [vmem:[%s9377_s5 + $0x3c8] sm:$0xff]  ;;  %v6324_v63 = vld [vmem:[%s7861_s29 + $0x16] sm:$0x1f]  ;;  %v4427_v56 = vld [vmem:[%s9377_s5 + $0x340] sm:$0xff] }
 0x43e   : >> { %4275 = vmatpush.msra.mxu0 %v4253_v18  ;;  %4309 = vmatpush.msra.mxu1 %v4289_v13  ;;  %v4540_v7 = vld [vmem:[%s9377_s5 + $0x438] sm:$0xff]  ;;  %v4498_v9 = vld [vmem:[%s9377_s5 + $0x3c0] sm:$0xff]  ;;  %v4539_v49 = vld [vmem:[%s9377_s5 + $0x430] sm:$0xff] }
 0x43f   : >> { %4346 = vmatpush.msra.mxu2 %v4324_v19  ;;  %4380 = vmatpush.msra.mxu3 %v4360_v20  ;;  %v4610_v8 = vld [vmem:[%s9377_s5 + $0x4b8] sm:$0xff]  ;;  %v4609_v1 = vld [vmem:[%s9377_s5 + $0x4b0] sm:$0xff]  ;;  %v4538_v15 = vld [vmem:[%s9377_s5 + $0x428] sm:$0xff] }
 0x440   : >> { %4276 = vmatpush.msra.mxu0 %v4252_v22  ;;  %4310 = vmatpush.msra.mxu1 %v4288_v23  ;;  %v6322_v5 = vld [vmem:[%s7861_s29 + $0x15] sm:$0x1f]  ;;  %v6326_v10 = vld [vmem:[%s7861_s29 + $0x1b] sm:$0x1f]  ;;  %v4608_v17 = vld [vmem:[%s9377_s5 + $0x4a8] sm:$0xff] }
 0x441   : >> { %4347 = vmatpush.msra.mxu2 %v4323_v24  ;;  %4381 = vmatpush.msra.mxu3 %v4359_v31  ;;  %v4575_v14 = vld [vmem:[%s9377_s5 + $0x478] sm:$0xff]  ;;  %v4574_v16 = vld [vmem:[%s9377_s5 + $0x470] sm:$0xff]  ;;  %v4537_v13 = vld [vmem:[%s9377_s5 + $0x420] sm:$0xff] }
 0x442   : >> { %4277 = vmatpush.msra.mxu0 %v4251_v21  ;;  %4311 = vmatpush.msra.mxu1 %v4287_v0  ;;  %v4645_v60 = vld [vmem:[%s9377_s5 + $0x4f8] sm:$0xff]  ;;  %v4644_v18 = vld [vmem:[%s9377_s5 + $0x4f0] sm:$0xff]  ;;  %v4573_v19 = vld [vmem:[%s9377_s5 + $0x468] sm:$0xff] }
 0x443   : >> { %4348 = vmatpush.msra.mxu2 %v4322_v29  ;;  %4382 = vmatpush.msra.mxu3 %v4358_v34  ;;  %v4607_v20 = vld [vmem:[%s9377_s5 + $0x4a0] sm:$0xff]  ;;  %v4643_v22 = vld [vmem:[%s9377_s5 + $0x4e8] sm:$0xff]  ;;  %v4536_v23 = vld [vmem:[%s9377_s5 + $0x418] sm:$0xff] }
 0x444   : >> { %6313 = vmatmul.msk.f32.vlgmr.msra.gmra.mxu0 %vm3740_vm3, %v6312_v30  ;;  %6317 = vmatmul.msk.f32.vlgmr.msra.gmra.mxu2 %vm3740_vm3, %v6316_v32  ;;  %v4572_v24 = vld [vmem:[%s9377_s5 + $0x460] sm:$0xff]  ;;  %v4606_v31 = vld [vmem:[%s9377_s5 + $0x498] sm:$0xff]  ;;  %v4535_v0 = vld [vmem:[%s9377_s5 + $0x410] sm:$0xff] }
 0x445   : >> { %4411 = vmatpush.msrb.mxu0 %v4399_v43  ;;  %4481 = vmatpush.msrb.mxu2 %v4469_v36  ;;  %v4642_v21 = vld [vmem:[%s9377_s5 + $0x4e0] sm:$0xff]  ;;  %v4571_v29 = vld [vmem:[%s9377_s5 + $0x458] sm:$0xff]  ;;  %v4605_v34 = vld [vmem:[%s9377_s5 + $0x490] sm:$0xff] }
 0x446   : >> { %4312 = vmatpush.msra.mxu1 %v4286_v33  ;;  %4383 = vmatpush.msra.mxu3 %v4357_v39  ;;  %v4641_v30 = vld [vmem:[%s9377_s5 + $0x4d8] sm:$0xff]  ;;  %v4534_v32 = vld [vmem:[%s9377_s5 + $0x408] sm:$0xff]  ;;  %v4570_v43 = vld [vmem:[%s9377_s5 + $0x450] sm:$0xff] }
 0x447   : >> { %6315 = vmatmul.msk.f32.vlgmr.msra.gmra.mxu1 %vm3740_vm3, %v6314_v11  ;;  %6319 = vmatmul.msk.f32.vlgmr.msra.gmra.mxu3 %vm3740_vm3, %v6318_v37  ;;  %v4604_v36 = vld [vmem:[%s9377_s5 + $0x488] sm:$0xff]  ;;  %v4640_v33 = vld [vmem:[%s9377_s5 + $0x4d0] sm:$0xff]  ;;  %v4533_v39 = vld [vmem:[%s9377_s5 + $0x400] sm:$0xff] }
 0x448   : >> { %4412 = vmatpush.msrb.mxu0 %v4398_v12  ;;  %4446 = vmatpush.msrb.mxu1 %v4434_v46  ;;  %v4569_v11 = vld [vmem:[%s9377_s5 + $0x448] sm:$0xff]  ;;  %v4603_v37 = vld [vmem:[%s9377_s5 + $0x480] sm:$0xff] }
 0x449   : >> { %4482 = vmatpush.msrb.mxu2 %v4468_v48  ;;  %4517 = vmatpush.msrb.mxu3 %v4505_v50  ;;  %v4639_v12 = vld [vmem:[%s9377_s5 + $0x4c8] sm:$0xff]  ;;  %v6328_v46 = vld [vmem:[%s7861_s29 + $0x1c] sm:$0x1f] }
 0x44a   : >> { %4413 = vmatpush.msrb.mxu0 %v4397_v25  ;;  %4447 = vmatpush.msrb.mxu1 %v4433_v55  ;;  %v6332_v48 = vld [vmem:[%s7861_s29 + $0x1e] sm:$0x1f] }
 0x44b   : >> { %4483 = vmatpush.msrb.mxu2 %v4467_v26  ;;  %4518 = vmatpush.msrb.mxu3 %v4504_v41  ;;  %v4681_v50 = vld [vmem:[%s9377_s5 + $0x538] sm:$0xff]  ;;  %v4568_v55 = vld [vmem:[%s9377_s5 + $0x440] sm:$0xff] }
 0x44c   : >> { %4414 = vmatpush.msrb.mxu0 %v4396_v57  ;;  %4448 = vmatpush.msrb.mxu1 %v4432_v51  ;;  %v4751_v25 = vld [vmem:[%s9377_s5 + $0x5b8] sm:$0xff]  ;;  %v4638_v26 = vld [vmem:[%s9377_s5 + $0x4c0] sm:$0xff]  ;;  %v4680_v51 = vld [vmem:[%s9377_s5 + $0x530] sm:$0xff] }
 0x44d   : >> { %4484 = vmatpush.msrb.mxu2 %v4466_v58  ;;  %4519 = vmatpush.msrb.mxu3 %v4503_v40  ;;  %v6330_v41 = vld [vmem:[%s7861_s29 + $0x1d] sm:$0x1f]  ;;  %v4750_v40 = vld [vmem:[%s9377_s5 + $0x5b0] sm:$0xff] }
 0x44e   : >> { %4415 = vmatpush.msrb.mxu0 %v4395_v42  ;;  %4449 = vmatpush.msrb.mxu1 %v4431_v52  ;;  %v6334_v57 = vld [vmem:[%s7861_s29 + $0x1f] sm:$0x1f]  ;;  %v4679_v52 = vld [vmem:[%s9377_s5 + $0x528] sm:$0xff] }
 0x44f   : >> { %4485 = vmatpush.msrb.mxu2 %v4465_v27  ;;  %4520 = vmatpush.msrb.mxu3 %v4502_v59  ;;  %v4716_v58 = vld [vmem:[%s9377_s5 + $0x578] sm:$0xff]  ;;  %v4715_v27 = vld [vmem:[%s9377_s5 + $0x570] sm:$0xff]  ;;  %v4749_v59 = vld [vmem:[%s9377_s5 + $0x5a8] sm:$0xff] }
 0x450   : >> { %4416 = vmatpush.msrb.mxu0 %v4394_v53  ;;  %4450 = vmatpush.msrb.mxu1 %v4430_v54  ;;  %v4786_v42 = vld [vmem:[%s9377_s5 + $0x5f8] sm:$0xff]  ;;  %v4785_v53 = vld [vmem:[%s9377_s5 + $0x5f0] sm:$0xff]  ;;  %v4678_v54 = vld [vmem:[%s9377_s5 + $0x520] sm:$0xff] }
 0x451   : >> { %4486 = vmatpush.msrb.mxu2 %v4464_v62  ;;  %4521 = vmatpush.msrb.mxu3 %v4501_v28  ;;  %v4714_v62 = vld [vmem:[%s9377_s5 + $0x568] sm:$0xff]  ;;  %v4748_v28 = vld [vmem:[%s9377_s5 + $0x5a0] sm:$0xff] }
 0x452   : >> { %4417 = vmatpush.msrb.mxu0 %v4393_v44  ;;  %4451 = vmatpush.msrb.mxu1 %v4429_v61  ;;  %v4784_v44 = vld [vmem:[%s9377_s5 + $0x5e8] sm:$0xff]  ;;  %v4677_v61 = vld [vmem:[%s9377_s5 + $0x518] sm:$0xff] }
 0x453   : >> { %4487 = vmatpush.msrb.mxu2 %v4463_v47  ;;  %4522 = vmatpush.msrb.mxu3 %v4500_v3  ;;  %v4713_v47 = vld [vmem:[%s9377_s5 + $0x560] sm:$0xff]  ;;  %v4747_v3 = vld [vmem:[%s9377_s5 + $0x598] sm:$0xff] }
 0x454   : >> { %4418 = vmatpush.msrb.mxu0 %v4392_v45  ;;  %4452 = vmatpush.msrb.mxu1 %v4428_v4  ;;  %v4783_v45 = vld [vmem:[%s9377_s5 + $0x5e0] sm:$0xff]  ;;  %v4676_v4 = vld [vmem:[%s9377_s5 + $0x510] sm:$0xff] }
 0x455   : >> { %4488 = vmatpush.msrb.mxu2 %v4462_v6  ;;  %4523 = vmatpush.msrb.mxu3 %v4499_v2  ;;  %v4712_v6 = vld [vmem:[%s9377_s5 + $0x558] sm:$0xff]  ;;  %v4746_v2 = vld [vmem:[%s9377_s5 + $0x590] sm:$0xff] }
 0x456   : >> { %6321 = vmatmul.msk.f32.vlgmr.msrb.gmra.mxu0 %vm3740_vm3, %v6320_v38  ;;  %6325 = vmatmul.msk.f32.vlgmr.msrb.gmra.mxu2 %vm3740_vm3, %v6324_v63  ;;  %v4782_v38 = vld [vmem:[%s9377_s5 + $0x5d8] sm:$0xff]  ;;  %v4675_v63 = vld [vmem:[%s9377_s5 + $0x508] sm:$0xff] }
 0x457   : >> { %4552 = vmatpush.msra.mxu0 %v4540_v7  ;;  %4622 = vmatpush.msra.mxu2 %v4610_v8  ;;  %v4711_v7 = vld [vmem:[%s9377_s5 + $0x550] sm:$0xff]  ;;  %v4745_v8 = vld [vmem:[%s9377_s5 + $0x588] sm:$0xff] }
 0x458   : >> { %4453 = vmatpush.msrb.mxu1 %v4427_v56  ;;  %4524 = vmatpush.msrb.mxu3 %v4498_v9  ;;  %v4781_v56 = vld [vmem:[%s9377_s5 + $0x5d0] sm:$0xff]  ;;  %v4674_v9 = vld [vmem:[%s9377_s5 + $0x500] sm:$0xff] }
 0x459   : >> { %6323 = vmatmul.msk.f32.vlgmr.msrb.gmra.mxu1 %vm3740_vm3, %v6322_v5  ;;  %6327 = vmatmul.msk.f32.vlgmr.msrb.gmra.mxu3 %vm3740_vm3, %v6326_v10  ;;  %v4710_v5 = vld [vmem:[%s9377_s5 + $0x548] sm:$0xff]  ;;  %v4744_v10 = vld [vmem:[%s9377_s5 + $0x580] sm:$0xff] }
 0x45a   : >> { %4553 = vmatpush.msra.mxu0 %v4539_v49  ;;  %4587 = vmatpush.msra.mxu1 %v4575_v14  ;;  %v4780_v49 = vld [vmem:[%s9377_s5 + $0x5c8] sm:$0xff] }
 0x45b   : >> { %4623 = vmatpush.msra.mxu2 %v4609_v1  ;;  %4657 = vmatpush.msra.mxu3 %v4645_v60  ;;  %v6336_v14 = vld [vmem:[%s7861_s29 + $0x24] sm:$0x1f]  ;;  %v4821_v60 = vld [vmem:[%s9377_s5 + $0x638] sm:$0xff] }
 0x45c   : >> { %4554 = vmatpush.msra.mxu0 %v4538_v15  ;;  %4588 = vmatpush.msra.mxu1 %v4574_v16  ;;  %v6340_v1 = vld [vmem:[%s7861_s29 + $0x26] sm:$0x1f] }
 0x45d   : >> { %4624 = vmatpush.msra.mxu2 %v4608_v17  ;;  %4658 = vmatpush.msra.mxu3 %v4644_v18  ;;  %v4709_v15 = vld [vmem:[%s9377_s5 + $0x540] sm:$0xff] }
 0x45e   : >> { %4555 = vmatpush.msra.mxu0 %v4537_v13  ;;  %4589 = vmatpush.msra.mxu1 %v4573_v19  ;;  %v4779_v16 = vld [vmem:[%s9377_s5 + $0x5c0] sm:$0xff]  ;;  %v4820_v13 = vld [vmem:[%s9377_s5 + $0x630] sm:$0xff]  ;;  %v4819_v19 = vld [vmem:[%s9377_s5 + $0x628] sm:$0xff] }
 0x45f   : >> { %4625 = vmatpush.msra.mxu2 %v4607_v20  ;;  %4659 = vmatpush.msra.mxu3 %v4643_v22  ;;  %v6338_v17 = vld [vmem:[%s7861_s29 + $0x25] sm:$0x1f]  ;;  %v4817_v22 = vld [vmem:[%s9377_s5 + $0x618] sm:$0xff] }
 0x460   : >> { %4556 = vmatpush.msra.mxu0 %v4536_v23  ;;  %4590 = vmatpush.msra.mxu1 %v4572_v24  ;;  %v6342_v18 = vld [vmem:[%s7861_s29 + $0x27] sm:$0x1f]  ;;  %v4816_v23 = vld [vmem:[%s9377_s5 + $0x610] sm:$0xff] }
 0x461   : >> { %4626 = vmatpush.msra.mxu2 %v4606_v31  ;;  %4660 = vmatpush.msra.mxu3 %v4642_v21  ;;  %v4818_v20 = vld [vmem:[%s9377_s5 + $0x620] sm:$0xff]  ;;  %v4815_v24 = vld [vmem:[%s9377_s5 + $0x608] sm:$0xff] }
 0x462   : >> { %4557 = vmatpush.msra.mxu0 %v4535_v0  ;;  %4591 = vmatpush.msra.mxu1 %v4571_v29  ;;  %v4814_v31 = vld [vmem:[%s9377_s5 + $0x600] sm:$0xff]  ;;  %v6344_v21 = vld [vmem:[%s7861_s29 + $0x28] sm:$0x1f]  ;;  %s6346_s29 = sshll.u32 %s6540_s16, 3  ;;  %s3968_s16 = sadd.s32 1, %s6540_s16  }
 0x463   : >> { %4627 = vmatpush.msra.mxu2 %v4605_v34  ;;  %4661 = vmatpush.msra.mxu3 %v4641_v30  ;;  %s4852_s0 = scalar_lea.vmem [#allocation6], %s6346_s29  ;;  %p3965_p13 = scmp.ge.s32.totalorder %s3968_s16, 5  }
 0x464   : >> { %4558 = vmatpush.msra.mxu0 %v4534_v32  ;;  %4592 = vmatpush.msra.mxu1 %v4570_v43  ;;  %vm5032_vm6 = vcmask (%p3965_p13), 1042434   ;;  %vm5030_vm7 = vcmask (%p3965_p13), 1040384   ;;  %vm5034_vm8 = vcmask (%p3965_p13), 1041408   ;;  %vm5664_vm9 = vcmask (%p3965_p13), 8192   ;;  %s5699_s29 = scalar_lea.hbm (%p3965_p13), %s9383_s11, %s6624_s21  ;;  %s9393_s25 = sand.u32 (%p3965_p13), 1, %s6520_s18  }
 0x465   : >> { %4628 = vmatpush.msra.mxu2 %v4604_v36  ;;  %4662 = vmatpush.msra.mxu3 %v4640_v33  ;;  %s5703_s22 = sshll.u32 (%p3965_p13), %s5699_s29, 4  ;;  %s5691_s2 = scalar_lea.sflag (%p3965_p13), [#allocation9], %s9393_s25  ;;  %s5704_s22 = int_to_ptr.hbm [resolvable:$true] %s5703_s22 }
 0x466   : >> { %4559 = vmatpush.msra.mxu0 %v4533_v39  ;;  %4593 = vmatpush.msra.mxu1 %v4569_v11  ;;  %s6468_s13 = sshra.s32 (%p3965_p13), %s5704_s22, 4  ;;  %s6474_s1 = scalar_lea.hbm (%p3965_p13), %s9383_s11, 2  ;;  %s6469_s13 = int_to_ptr.hbm [resolvable:$true] %s6468_s13 }
 0x467   : >> { %4629 = vmatpush.msra.mxu2 %v4603_v37  ;;  %4663 = vmatpush.msra.mxu3 %v4639_v12  ;;  %s6470_s21 = scalar_lea.hbm (%p3965_p13), %s6469_s13, 1  ;;  %p6475_p3 = scmp.lt.s32.totalorder (%p3965_p13), %s6469_s13, %s9383_s11 }
 0x468   : >> { %6329 = vmatmul.msk.f32.vlgmr.msra.gmra.mxu0 %vm3740_vm3, %v6328_v46  ;;  %6333 = vmatmul.msk.f32.vlgmr.msra.gmra.mxu2 %vm3740_vm3, %v6332_v48  ;;  %p6471_p0 = scmp.ne.s32.totalorder (%p3965_p13), %s6469_s13, %s6470_s21  ;;  %p6476_p4 = scmp.lt.s32.totalorder (%p3965_p13), %s6474_s1, %s6470_s21 }
 0x469   : >> { %4693 = vmatpush.msrb.mxu0 %v4681_v50  ;;  %4763 = vmatpush.msrb.mxu2 %v4751_v25 }
 0x46a   : >> { %4594 = vmatpush.msra.mxu1 %v4568_v55  ;;  %4664 = vmatpush.msra.mxu3 %v4638_v26  ;;  %p6472_p1 = pnand (%p3965_p13), %p6471_p0, %p6641_p5  ;;  %p6477_p7 = por (%p3965_p13), %p6476_p4, %p6475_p3 }
 0x46b   : >> { %6331 = vmatmul.msk.f32.vlgmr.msra.gmra.mxu1 %vm3740_vm3, %v6330_v41  ;;  %6335 = vmatmul.msk.f32.vlgmr.msra.gmra.mxu3 %vm3740_vm3, %v6334_v57 }
 0x46c   : >> { %4694 = vmatpush.msrb.mxu0 %v4680_v51  ;;  %4728 = vmatpush.msrb.mxu1 %v4716_v58  ;;  %p6473_p2 = pneg (%p3965_p13), %p6472_p1 }
 0x46d   : >> { %4764 = vmatpush.msrb.mxu2 %v4750_v40  ;;  %4798 = vmatpush.msrb.mxu3 %v4786_v42 }
 0x46e   : >> { %4695 = vmatpush.msrb.mxu0 %v4679_v52  ;;  %4729 = vmatpush.msrb.mxu1 %v4715_v27  ;;  %p6478_p8 = pnand (%p3965_p13), %p6477_p7, %p6473_p2 }
 0x46f   : >> { %4765 = vmatpush.msrb.mxu2 %v4749_v59  ;;  %4799 = vmatpush.msrb.mxu3 %v4785_v53 }
 0x470   : >> { %4696 = vmatpush.msrb.mxu0 %v4678_v54  ;;  %4730 = vmatpush.msrb.mxu1 %v4714_v62 }
 0x471   : >> { %4766 = vmatpush.msrb.mxu2 %v4748_v28  ;;  %4800 = vmatpush.msrb.mxu3 %v4784_v44 }
 0x472   : >> { %4697 = vmatpush.msrb.mxu0 %v4677_v61  ;;  %4731 = vmatpush.msrb.mxu1 %v4713_v47 }
 0x473   : >> { %4767 = vmatpush.msrb.mxu2 %v4747_v3  ;;  %4801 = vmatpush.msrb.mxu3 %v4783_v45 }
 0x474   : >> { %4698 = vmatpush.msrb.mxu0 %v4676_v4  ;;  %4732 = vmatpush.msrb.mxu1 %v4712_v6 }
 0x475   : >> { %4768 = vmatpush.msrb.mxu2 %v4746_v2  ;;  %4802 = vmatpush.msrb.mxu3 %v4782_v38 }
 0x476   : >> { %4699 = vmatpush.msrb.mxu0 %v4675_v63  ;;  %4733 = vmatpush.msrb.mxu1 %v4711_v7 }
 0x477   : >> { %4769 = vmatpush.msrb.mxu2 %v4745_v8  ;;  %4803 = vmatpush.msrb.mxu3 %v4781_v56 }
 0x478   : >> { %4700 = vmatpush.msrb.mxu0 %v4674_v9  ;;  %4734 = vmatpush.msrb.mxu1 %v4710_v5 }
 0x479   : >> { %4770 = vmatpush.msrb.mxu2 %v4744_v10  ;;  %4804 = vmatpush.msrb.mxu3 %v4780_v49  ;;  %v4848_v49 = vperm.slane %v7688_v35, 0  ;;  %v4933_v35 = vld [vmem:[%s9379_s7 + $0x1b0] sm:$0xff] (%p3965_p13) }
 0x47a   : >> { %6337 = vmatmul.msk.f32.vlgmr.msrb.gmra.mxu0 %vm3740_vm3, %v6336_v14  ;;  %6341 = vmatmul.msk.f32.vlgmr.msrb.gmra.mxu2 %vm3740_vm3, %v6340_v1 }
 0x47b   : >> { %4833 = vmatpush.msra.mxu0 %v4821_v60  ;;  %4735 = vmatpush.msrb.mxu1 %v4709_v15 }
 0x47c   : >> { %4805 = vmatpush.msrb.mxu3 %v4779_v16  ;;  %6339 = vmatmul.msk.f32.vlgmr.msrb.gmra.mxu1 %vm3740_vm3, %v6338_v17  ;;  %v4941_v16 = vld [vmem:[%s9379_s7 + $0x1f0] sm:$0xff] (%p3965_p13)  ;;  %v4942_v17 = vld [vmem:[%s9379_s7 + $0x1f8] sm:$0xff] (%p3965_p13) }
 0x47d   : >> { %6343 = vmatmul.msk.f32.vlgmr.msrb.gmra.mxu3 %vm3740_vm3, %v6342_v18  ;;  %4834 = vmatpush.msra.mxu0 %v4820_v13  ;;  %v4937_v18 = vld [vmem:[%s9379_s7 + $0x1d0] sm:$0xff] (%p3965_p13)  ;;  %v4938_v13 = vld [vmem:[%s9379_s7 + $0x1d8] sm:$0xff] (%p3965_p13) }
 0x47e   : > { %4983 = vmatpush.msra.mxu2 (%p3965_p13), %v4941_v16  ;;  %5003 = vmatpush.msra.mxu3 (%p3965_p13), %v4942_v17  ;;  %v5097_v16 = vld [vmem:[%s9379_s7 + $0x3d0] sm:$0xff] (%p3965_p13)  ;;  %v5098_v17 = vld [vmem:[%s9379_s7 + $0x3d8] sm:$0xff] (%p3965_p13) }
 0x47f   : >> { %4835 = vmatpush.msra.mxu0 %v4819_v19  ;;  %v4934_v19 = vld [vmem:[%s9379_s7 + $0x1b8] sm:$0xff] (%p3965_p13) }
 0x480   : > { %4984 = vmatpush.msra.mxu2 (%p3965_p13), %v4937_v18  ;;  %5004 = vmatpush.msra.mxu3 (%p3965_p13), %v4938_v13  ;;  %v4880_v18 = vld [vmem:[%s9379_s7 + $0x8] sm:$0xff] (%p3965_p13)  ;;  %v4879_v13 = vld [vmem:[%s9379_s7] sm:$0xff] (%p3965_p13) }
 0x481   : >> { %4836 = vmatpush.msra.mxu0 %v4818_v20  ;;  %v4940_v20 = vld [vmem:[%s9379_s7 + $0x1e8] sm:$0xff] (%p3965_p13) }
 0x482   : > { %4963 = vmatpush.msra.mxu1 (%p3965_p13), %v4940_v20  ;;  %4985 = vmatpush.msra.mxu2 (%p3965_p13), %v4933_v35  ;;  %v5093_v35 = vld [vmem:[%s9379_s7 + $0x3b0] sm:$0xff] (%p3965_p13)  ;;  %v5100_v20 = vld [vmem:[%s9379_s7 + $0x3e8] sm:$0xff] (%p3965_p13) }
 0x483   : >> { %4837 = vmatpush.msra.mxu0 %v4817_v22  ;;  %v4939_v22 = vld [vmem:[%s9379_s7 + $0x1e0] sm:$0xff] (%p3965_p13)  ;;  %5005 = vmatpush.msra.mxu3 (%p3965_p13), %v4934_v19  ;;  %v5094_v19 = vld [vmem:[%s9379_s7 + $0x3b8] sm:$0xff] (%p3965_p13) }
 0x485   : >> { %4838 = vmatpush.msra.mxu0 %v4816_v23  ;;  %v4936_v23 = vld [vmem:[%s9379_s7 + $0x1c8] sm:$0xff] (%p3965_p13) }
 0x486   : > { %4964 = vmatpush.msra.mxu1 (%p3965_p13), %v4936_v23  ;;  %v5099_v23 = vld [vmem:[%s9379_s7 + $0x3e0] sm:$0xff] (%p3965_p13) }
 0x487   : >> { %4839 = vmatpush.msra.mxu0 %v4815_v24  ;;  %v4929_v24 = vld [vmem:[%s9379_s7 + $0x190] sm:$0xff] (%p3965_p13) }
 0x488   : > { %4986 = vmatpush.msra.mxu2 (%p3965_p13), %v4929_v24  ;;  %v5090_v24 = vld [vmem:[%s9379_s7 + $0x398] sm:$0xff] (%p3965_p13) }
 0x489   : >> { %4840 = vmatpush.msra.mxu0 %v4814_v31  ;;  %v4930_v31 = vld [vmem:[%s9379_s7 + $0x198] sm:$0xff] (%p3965_p13) }
 0x48a   : >> { %6345 = vmatmul.msk.f32.vlgmr.msra.gmra.mxu0 %vm3740_vm3, %v6344_v21  ;;  %v4935_v21 = vld [vmem:[%s9379_s7 + $0x1c0] sm:$0xff] (%p3965_p13)  ;;  %5006 = vmatpush.msra.mxu3 (%p3965_p13), %v4930_v31  ;;  %v5096_v31 = vld [vmem:[%s9379_s7 + $0x3c8] sm:$0xff] (%p3965_p13) }
 0x48b   : > { %4943 = vmatpush.msra.mxu0 (%p3965_p13), %v4939_v22  ;;  %v5089_v22 = vld [vmem:[%s9379_s7 + $0x390] sm:$0xff] (%p3965_p13) }
 0x48d   : > { %4944 = vmatpush.msra.mxu0 (%p3965_p13), %v4935_v21  ;;  %v5085_v21 = vld [vmem:[%s9379_s7 + $0x370] sm:$0xff] (%p3965_p13) }
 0x4ab   : >> { %v4011_v29 = vpop.f32.mrf.mxu0 }
 0x4ae   : >> { %v4034_v0 = vpop.f32.mrf.mxu1 }
 0x4af   : >> { %v4035_v34 = vadd.f32 %v4034_v0, %v4011_v29  ;;  %v4068_v30 = vpop.f32.mrf.mxu2  ;;  %v4932_v0 = vld [vmem:[%s9379_s7 + $0x1a8] sm:$0xff] (%p3965_p13)  ;;  %v4931_v29 = vld [vmem:[%s9379_s7 + $0x1a0] sm:$0xff] (%p3965_p13) }
 0x4b0   : > { %4965 = vmatpush.msra.mxu1 (%p3965_p13), %v4932_v0  ;;  %4945 = vmatpush.msra.mxu0 (%p3965_p13), %v4931_v29  ;;  %v5086_v0 = vld [vmem:[%s9379_s7 + $0x378] sm:$0xff] (%p3965_p13)  ;;  %v5095_v29 = vld [vmem:[%s9379_s7 + $0x3c0] sm:$0xff] (%p3965_p13) }
 0x4b1   : >> { %v4071_v32 = vadd.f32 %v4068_v30, %v4035_v34  ;;  %v4925_v34 = vld [vmem:[%s9379_s7 + $0x170] sm:$0xff] (%p3965_p13)  ;;  %v4926_v30 = vld [vmem:[%s9379_s7 + $0x178] sm:$0xff] (%p3965_p13) }
 0x4b2   : >> { %v4103_v43 = vpop.f32.mrf.mxu3  ;;  %4987 = vmatpush.msra.mxu2 (%p3965_p13), %v4925_v34  ;;  %5007 = vmatpush.msra.mxu3 (%p3965_p13), %v4926_v30 }
 0x4b3   : >> { %v4106_v36 = vadd.f32 %v4103_v43, %v4071_v32  ;;  %v4928_v32 = vld [vmem:[%s9379_s7 + $0x188] sm:$0xff] (%p3965_p13)  ;;  %v4927_v43 = vld [vmem:[%s9379_s7 + $0x180] sm:$0xff] (%p3965_p13) }
 0x4b4   : > { %4966 = vmatpush.msra.mxu1 (%p3965_p13), %v4928_v32  ;;  %4946 = vmatpush.msra.mxu0 (%p3965_p13), %v4927_v43  ;;  %v5092_v43 = vld [vmem:[%s9379_s7 + $0x3a8] sm:$0xff] (%p3965_p13) }
 0x4b5   : >> { %v4138_v33 = vpop.f32.mrf.mxu0 }
 0x4b6   : >> { %v4141_v39 = vadd.f32 %v4138_v33, %v4106_v36  ;;  %v4921_v36 = vld [vmem:[%s9379_s7 + $0x150] sm:$0xff] (%p3965_p13)  ;;  %v4922_v33 = vld [vmem:[%s9379_s7 + $0x158] sm:$0xff] (%p3965_p13) }
 0x4b7   : > { %4988 = vmatpush.msra.mxu2 (%p3965_p13), %v4921_v36  ;;  %5008 = vmatpush.msra.mxu3 (%p3965_p13), %v4922_v33  ;;  %v5091_v36 = vld [vmem:[%s9379_s7 + $0x3a0] sm:$0xff] (%p3965_p13) }
 0x4b8   : >> { %v4174_v11 = vpop.f32.mrf.mxu1 }
 0x4b9   : >> { %v4177_v37 = vadd.f32 %v4174_v11, %v4141_v39  ;;  %v4209_v12 = vpop.f32.mrf.mxu2  ;;  %v4924_v39 = vld [vmem:[%s9379_s7 + $0x168] sm:$0xff] (%p3965_p13)  ;;  %v4923_v11 = vld [vmem:[%s9379_s7 + $0x160] sm:$0xff] (%p3965_p13) }
 0x4ba   : > { %4967 = vmatpush.msra.mxu1 (%p3965_p13), %v4924_v39  ;;  %4947 = vmatpush.msra.mxu0 (%p3965_p13), %v4923_v11  ;;  %v5081_v11 = vld [vmem:[%s9379_s7 + $0x350] sm:$0xff] (%p3965_p13) }
 0x4bb   : >> { %v4212_v46 = vadd.f32 %v4209_v12, %v4177_v37  ;;  %v4917_v37 = vld [vmem:[%s9379_s7 + $0x130] sm:$0xff] (%p3965_p13)  ;;  %v4918_v12 = vld [vmem:[%s9379_s7 + $0x138] sm:$0xff] (%p3965_p13) }
 0x4bc   : >> { %v4244_v48 = vpop.f32.mrf.mxu3  ;;  %4989 = vmatpush.msra.mxu2 (%p3965_p13), %v4917_v37  ;;  %5009 = vmatpush.msra.mxu3 (%p3965_p13), %v4918_v12  ;;  %v5082_v37 = vld [vmem:[%s9379_s7 + $0x358] sm:$0xff] (%p3965_p13) }
 0x4bd   : >> { %v4247_v50 = vadd.f32 %v4244_v48, %v4212_v46  ;;  %v4920_v46 = vld [vmem:[%s9379_s7 + $0x148] sm:$0xff] (%p3965_p13)  ;;  %v4919_v48 = vld [vmem:[%s9379_s7 + $0x140] sm:$0xff] (%p3965_p13) }
 0x4be   : > { %4968 = vmatpush.msra.mxu1 (%p3965_p13), %v4920_v46  ;;  %4948 = vmatpush.msra.mxu0 (%p3965_p13), %v4919_v48  ;;  %v5088_v46 = vld [vmem:[%s9379_s7 + $0x388] sm:$0xff] (%p3965_p13)  ;;  %v5087_v48 = vld [vmem:[%s9379_s7 + $0x380] sm:$0xff] (%p3965_p13) }
 0x4c1   : >> { %v4279_v25 = vpop.f32.mrf.mxu0 }
 0x4c2   : >> { %v4282_v55 = vadd.f32 %v4279_v25, %v4247_v50  ;;  %v4913_v50 = vld [vmem:[%s9379_s7 + $0x110] sm:$0xff] (%p3965_p13)  ;;  %v4914_v25 = vld [vmem:[%s9379_s7 + $0x118] sm:$0xff] (%p3965_p13) }
 0x4c3   : > { %4990 = vmatpush.msra.mxu2 (%p3965_p13), %v4913_v50  ;;  %5010 = vmatpush.msra.mxu3 (%p3965_p13), %v4914_v25  ;;  %v5077_v50 = vld [vmem:[%s9379_s7 + $0x330] sm:$0xff] (%p3965_p13)  ;;  %v5078_v25 = vld [vmem:[%s9379_s7 + $0x338] sm:$0xff] (%p3965_p13) }
 0x4c4   : >> { %v4314_v26 = vpop.f32.mrf.mxu1 }
 0x4c5   : >> { %v4317_v57 = vadd.f32 %v4314_v26, %v4282_v55  ;;  %v4916_v55 = vld [vmem:[%s9379_s7 + $0x128] sm:$0xff] (%p3965_p13)  ;;  %v4915_v26 = vld [vmem:[%s9379_s7 + $0x120] sm:$0xff] (%p3965_p13) }
 0x4c6   : > { %4969 = vmatpush.msra.mxu1 (%p3965_p13), %v4916_v55  ;;  %4949 = vmatpush.msra.mxu0 (%p3965_p13), %v4915_v26  ;;  %v5084_v26 = vld [vmem:[%s9379_s7 + $0x368] sm:$0xff] (%p3965_p13) }
 0x4c7   : >> { %v4350_v41 = vpop.f32.mrf.mxu2 }
 0x4c8   : >> { %v4353_v51 = vadd.f32 %v4350_v41, %v4317_v57  ;;  %v4909_v41 = vld [vmem:[%s9379_s7 + $0xf0] sm:$0xff] (%p3965_p13)  ;;  %v4910_v57 = vld [vmem:[%s9379_s7 + $0xf8] sm:$0xff] (%p3965_p13) }
 0x4c9   : > { %4991 = vmatpush.msra.mxu2 (%p3965_p13), %v4909_v41  ;;  %5011 = vmatpush.msra.mxu3 (%p3965_p13), %v4910_v57  ;;  %v5083_v41 = vld [vmem:[%s9379_s7 + $0x360] sm:$0xff] (%p3965_p13)  ;;  %v5073_v57 = vld [vmem:[%s9379_s7 + $0x310] sm:$0xff] (%p3965_p13) }
 0x4ca   : >> { %v4385_v58 = vpop.f32.mrf.mxu3 }
 0x4cb   : >> { %v4388_v42 = vadd.f32 %v4385_v58, %v4353_v51  ;;  %v4912_v51 = vld [vmem:[%s9379_s7 + $0x108] sm:$0xff] (%p3965_p13)  ;;  %v4911_v58 = vld [vmem:[%s9379_s7 + $0x100] sm:$0xff] (%p3965_p13) }
 0x4cc   : > { %4970 = vmatpush.msra.mxu1 (%p3965_p13), %v4912_v51  ;;  %4950 = vmatpush.msra.mxu0 (%p3965_p13), %v4911_v58  ;;  %v5074_v51 = vld [vmem:[%s9379_s7 + $0x318] sm:$0xff] (%p3965_p13)  ;;  %v5080_v58 = vld [vmem:[%s9379_s7 + $0x348] sm:$0xff] (%p3965_p13) }
 0x4d3   : >> { %v4420_v40 = vpop.f32.mrf.mxu0 }
 0x4d4   : >> { %v4423_v52 = vadd.f32 %v4420_v40, %v4388_v42  ;;  %v4905_v40 = vld [vmem:[%s9379_s7 + $0xd0] sm:$0xff] (%p3965_p13)  ;;  %v4906_v42 = vld [vmem:[%s9379_s7 + $0xd8] sm:$0xff] (%p3965_p13) }
 0x4d5   : > { %4992 = vmatpush.msra.mxu2 (%p3965_p13), %v4905_v40  ;;  %5012 = vmatpush.msra.mxu3 (%p3965_p13), %v4906_v42  ;;  %v5079_v40 = vld [vmem:[%s9379_s7 + $0x340] sm:$0xff] (%p3965_p13)  ;;  %v5069_v42 = vld [vmem:[%s9379_s7 + $0x2f0] sm:$0xff] (%p3965_p13) }
 0x4d6   : >> { %v4455_v27 = vpop.f32.mrf.mxu1 }
 0x4d7   : >> { %v4458_v53 = vadd.f32 %v4455_v27, %v4423_v52  ;;  %v4908_v52 = vld [vmem:[%s9379_s7 + $0xe8] sm:$0xff] (%p3965_p13)  ;;  %v4907_v27 = vld [vmem:[%s9379_s7 + $0xe0] sm:$0xff] (%p3965_p13) }
 0x4d8   : > { %4971 = vmatpush.msra.mxu1 (%p3965_p13), %v4908_v52  ;;  %4951 = vmatpush.msra.mxu0 (%p3965_p13), %v4907_v27  ;;  %v5070_v52 = vld [vmem:[%s9379_s7 + $0x2f8] sm:$0xff] (%p3965_p13)  ;;  %v5076_v27 = vld [vmem:[%s9379_s7 + $0x328] sm:$0xff] (%p3965_p13) }
 0x4d9   : >> { %v4490_v59 = vpop.f32.mrf.mxu2 }
 0x4da   : >> { %v4493_v54 = vadd.f32 %v4490_v59, %v4458_v53  ;;  %v4901_v59 = vld [vmem:[%s9379_s7 + $0xb0] sm:$0xff] (%p3965_p13)  ;;  %v4902_v53 = vld [vmem:[%s9379_s7 + $0xb8] sm:$0xff] (%p3965_p13) }
 0x4db   : > { %4993 = vmatpush.msra.mxu2 (%p3965_p13), %v4901_v59  ;;  %5013 = vmatpush.msra.mxu3 (%p3965_p13), %v4902_v53  ;;  %v5075_v59 = vld [vmem:[%s9379_s7 + $0x320] sm:$0xff] (%p3965_p13)  ;;  %v5065_v53 = vld [vmem:[%s9379_s7 + $0x2d0] sm:$0xff] (%p3965_p13) }
 0x4dc   : >> { %v4526_v62 = vpop.f32.mrf.mxu3 }
 0x4dd   : >> { %v4529_v44 = vadd.f32 %v4526_v62, %v4493_v54  ;;  %v4904_v54 = vld [vmem:[%s9379_s7 + $0xc8] sm:$0xff] (%p3965_p13)  ;;  %v4903_v62 = vld [vmem:[%s9379_s7 + $0xc0] sm:$0xff] (%p3965_p13) }
 0x4de   : > { %4972 = vmatpush.msra.mxu1 (%p3965_p13), %v4904_v54  ;;  %4952 = vmatpush.msra.mxu0 (%p3965_p13), %v4903_v62  ;;  %v5066_v54 = vld [vmem:[%s9379_s7 + $0x2d8] sm:$0xff] (%p3965_p13)  ;;  %v5072_v62 = vld [vmem:[%s9379_s7 + $0x308] sm:$0xff] (%p3965_p13) }
 0x4e5   : >> { %v4561_v28 = vpop.f32.mrf.mxu0 }
 0x4e6   : >> { %v4564_v61 = vadd.f32 %v4561_v28, %v4529_v44  ;;  %v4897_v28 = vld [vmem:[%s9379_s7 + $0x90] sm:$0xff] (%p3965_p13)  ;;  %v4898_v44 = vld [vmem:[%s9379_s7 + $0x98] sm:$0xff] (%p3965_p13) }
 0x4e7   : > { %4994 = vmatpush.msra.mxu2 (%p3965_p13), %v4897_v28  ;;  %5014 = vmatpush.msra.mxu3 (%p3965_p13), %v4898_v44  ;;  %v5071_v28 = vld [vmem:[%s9379_s7 + $0x300] sm:$0xff] (%p3965_p13)  ;;  %v5061_v44 = vld [vmem:[%s9379_s7 + $0x2b0] sm:$0xff] (%p3965_p13) }
 0x4e8   : >> { %v4596_v47 = vpop.f32.mrf.mxu1 }
 0x4e9   : >> { %v4599_v45 = vadd.f32 %v4596_v47, %v4564_v61  ;;  %v4900_v61 = vld [vmem:[%s9379_s7 + $0xa8] sm:$0xff] (%p3965_p13)  ;;  %v4899_v47 = vld [vmem:[%s9379_s7 + $0xa0] sm:$0xff] (%p3965_p13) }
 0x4ea   : > { %4973 = vmatpush.msra.mxu1 (%p3965_p13), %v4900_v61  ;;  %4953 = vmatpush.msra.mxu0 (%p3965_p13), %v4899_v47  ;;  %v5062_v61 = vld [vmem:[%s9379_s7 + $0x2b8] sm:$0xff] (%p3965_p13)  ;;  %v5068_v47 = vld [vmem:[%s9379_s7 + $0x2e8] sm:$0xff] (%p3965_p13) }
 0x4eb   : >> { %v4631_v3 = vpop.f32.mrf.mxu2 }
 0x4ec   : >> { %v4634_v4 = vadd.f32 %v4631_v3, %v4599_v45  ;;  %v4893_v3 = vld [vmem:[%s9379_s7 + $0x70] sm:$0xff] (%p3965_p13)  ;;  %v4894_v45 = vld [vmem:[%s9379_s7 + $0x78] sm:$0xff] (%p3965_p13) }
 0x4ed   : > { %4995 = vmatpush.msra.mxu2 (%p3965_p13), %v4893_v3  ;;  %5015 = vmatpush.msra.mxu3 (%p3965_p13), %v4894_v45  ;;  %v5067_v3 = vld [vmem:[%s9379_s7 + $0x2e0] sm:$0xff] (%p3965_p13)  ;;  %v5057_v45 = vld [vmem:[%s9379_s7 + $0x290] sm:$0xff] (%p3965_p13) }
 0x4ee   : >> { %v4666_v6 = vpop.f32.mrf.mxu3 }
 0x4ef   : >> { %v4669_v38 = vadd.f32 %v4666_v6, %v4634_v4  ;;  %v4896_v4 = vld [vmem:[%s9379_s7 + $0x88] sm:$0xff] (%p3965_p13)  ;;  %v4895_v6 = vld [vmem:[%s9379_s7 + $0x80] sm:$0xff] (%p3965_p13) }
 0x4f0   : > { %4974 = vmatpush.msra.mxu1 (%p3965_p13), %v4896_v4  ;;  %4954 = vmatpush.msra.mxu0 (%p3965_p13), %v4895_v6  ;;  %v5058_v4 = vld [vmem:[%s9379_s7 + $0x298] sm:$0xff] (%p3965_p13)  ;;  %v5064_v6 = vld [vmem:[%s9379_s7 + $0x2c8] sm:$0xff] (%p3965_p13) }
 0x4f7   : >> { %v4702_v2 = vpop.f32.mrf.mxu0 }
 0x4f8   : >> { %v4705_v63 = vadd.f32 %v4702_v2, %v4669_v38  ;;  %v4889_v2 = vld [vmem:[%s9379_s7 + $0x50] sm:$0xff] (%p3965_p13)  ;;  %v4890_v38 = vld [vmem:[%s9379_s7 + $0x58] sm:$0xff] (%p3965_p13) }
 0x4f9   : >> { %v4737_v7 = vpop.f32.mrf.mxu1  ;;  %4996 = vmatpush.msra.mxu2 (%p3965_p13), %v4889_v2  ;;  %5016 = vmatpush.msra.mxu3 (%p3965_p13), %v4890_v38  ;;  %v5053_v38 = vld [vmem:[%s9379_s7 + $0x270] sm:$0xff] (%p3965_p13) }
 0x4fa   : >> { %v4740_v56 = vadd.f32 %v4737_v7, %v4705_v63  ;;  %v4892_v63 = vld [vmem:[%s9379_s7 + $0x68] sm:$0xff] (%p3965_p13)  ;;  %v4891_v7 = vld [vmem:[%s9379_s7 + $0x60] sm:$0xff] (%p3965_p13) }
 0x4fb   : > { %4975 = vmatpush.msra.mxu1 (%p3965_p13), %v4892_v63  ;;  %4955 = vmatpush.msra.mxu0 (%p3965_p13), %v4891_v7  ;;  %v5054_v63 = vld [vmem:[%s9379_s7 + $0x278] sm:$0xff] (%p3965_p13)  ;;  %v5063_v7 = vld [vmem:[%s9379_s7 + $0x2c0] sm:$0xff] (%p3965_p13) }
 0x4fd   : >> { %v4772_v8 = vpop.f32.mrf.mxu2 }
 0x4fe   : >> { %v4775_v9 = vadd.f32 %v4772_v8, %v4740_v56  ;;  %v4885_v8 = vld [vmem:[%s9379_s7 + $0x30] sm:$0xff] (%p3965_p13)  ;;  %v4886_v56 = vld [vmem:[%s9379_s7 + $0x38] sm:$0xff] (%p3965_p13) }
 0x4ff   : > { %4997 = vmatpush.msra.mxu2 (%p3965_p13), %v4885_v8  ;;  %5017 = vmatpush.msra.mxu3 (%p3965_p13), %v4886_v56  ;;  %v5060_v8 = vld [vmem:[%s9379_s7 + $0x2a8] sm:$0xff] (%p3965_p13)  ;;  %v5049_v56 = vld [vmem:[%s9379_s7 + $0x250] sm:$0xff] (%p3965_p13) }
 0x500   : >> { %v4807_v5 = vpop.f32.mrf.mxu3 }
 0x501   : >> { %v4810_v10 = vadd.f32 %v4807_v5, %v4775_v9  ;;  %v4888_v9 = vld [vmem:[%s9379_s7 + $0x48] sm:$0xff] (%p3965_p13)  ;;  %v4887_v5 = vld [vmem:[%s9379_s7 + $0x40] sm:$0xff] (%p3965_p13) }
 0x502   : > { %4976 = vmatpush.msra.mxu1 (%p3965_p13), %v4888_v9  ;;  %4956 = vmatpush.msra.mxu0 (%p3965_p13), %v4887_v5  ;;  %v5050_v9 = vld [vmem:[%s9379_s7 + $0x258] sm:$0xff] (%p3965_p13)  ;;  %v5059_v5 = vld [vmem:[%s9379_s7 + $0x2a0] sm:$0xff] (%p3965_p13) }
 0x507   : >> { %v4842_v14 = vpop.f32.mrf.mxu0 }
 0x508   : >> { %v4845_v1 = vadd.f32 %v4842_v14, %v4810_v10  ;;  %v4881_v10 = vld [vmem:[%s9379_s7 + $0x10] sm:$0xff] (%p3965_p13) }
 0x509   : > { %v5101_v14 = vld [vmem:[%s9379_s7 + $0x3f0] sm:$0xff] (%p3965_p13)  ;;  %4998 = vmatpush.msra.mxu2 (%p3965_p13), %v4881_v10  ;;  %v5056_v10 = vld [vmem:[%s9379_s7 + $0x288] sm:$0xff] (%p3965_p13) }
 0x50a   : >> { %v4850_v60 = vadd.f32 %v4848_v49, %v4845_v1  ;;  %3967 = sbr.rel (!%p3965_p13) target bundleno = 1039 (0x40f), region = 573  ;;  %v4882_v49 = vld [vmem:[%s9379_s7 + $0x18] sm:$0xff] (%p3965_p13) }
 0x50b   : > { %v5102_v1 = vld [vmem:[%s9379_s7 + $0x3f8] sm:$0xff] (%p3965_p13)  ;;  %5018 = vmatpush.msra.mxu3 (%p3965_p13), %v4882_v49  ;;  %5143 = vmatpush.msrb.mxu2 (%p3965_p13), %v5101_v14  ;;  %v5045_v49 = vld [vmem:[%s9379_s7 + $0x230] sm:$0xff] (%p3965_p13) }
 0x50c   : >> { %v4851_v15 = vmax.f32 %v4850_v60, 0.0  ;;  %v4884_v60 = vld [vmem:[%s9379_s7 + $0x28] sm:$0xff] (%p3965_p13)  ;;  %v5046_v14 = vld [vmem:[%s9379_s7 + $0x238] sm:$0xff] (%p3965_p13) }
 0x50d   : > { %5163 = vmatpush.msrb.mxu3 (%p3965_p13), %v5102_v1  ;;  %4977 = vmatpush.msra.mxu1 (%p3965_p13), %v4884_v60  ;;  %v5055_v1 = vld [vmem:[%s9379_s7 + $0x280] sm:$0xff] (%p3965_p13)  ;;  %v5052_v60 = vld [vmem:[%s9379_s7 + $0x268] sm:$0xff] (%p3965_p13) }
 0x50e   : >> { %4853 = vst [vmem:[%s4852_s0] sm:$0x1f] %v4851_v15  ;;  %v4883_v15 = vld [vmem:[%s9379_s7 + $0x20] sm:$0xff] (%p3965_p13)  ;;  %5144 = vmatpush.msrb.mxu2 (%p3965_p13), %v5097_v16  ;;  %v5042_v16 = vld [vmem:[%s9379_s7 + $0x218] sm:$0xff] (%p3965_p13)  ;;  %s5701_s0 = sshll.u32 (%p3965_p13), %s6666_s24, 4  ;;  %s5702_s0 = int_to_ptr.vmem [resolvable:$true] %s5701_s0 }
 0x50f   : > { %4957 = vmatpush.msra.mxu0 %v4883_v15  ;;  %5164 = vmatpush.msrb.mxu3 %v5098_v17  ;;  %v5041_v15 = vld [vmem:[%s9379_s7 + $0x210] sm:$0xff] }
 0x510   : > { %4978 = vmatpush.msra.mxu1 %v4880_v18  ;;  %5145 = vmatpush.msrb.mxu2 %v5093_v35  ;;  %v5258_v17 = vld [vmem:[%s9379_s7 + $0x5f0] sm:$0xff]  ;;  %v5259_v18 = vld [vmem:[%s9379_s7 + $0x5f8] sm:$0xff]  ;;  %v5048_v35 = vld [vmem:[%s9379_s7 + $0x248] sm:$0xff] }
 0x511   : > { %4958 = vmatpush.msra.mxu0 %v4879_v13  ;;  %5165 = vmatpush.msrb.mxu3 %v5094_v19  ;;  %v5051_v13 = vld [vmem:[%s9379_s7 + $0x260] sm:$0xff] }
 0x512   : > { %5123 = vmatpush.msrb.mxu1 %v5100_v20  ;;  %5146 = vmatpush.msrb.mxu2 %v5089_v22 }
 0x513   : > { %5103 = vmatpush.msrb.mxu0 %v5099_v23  ;;  %5166 = vmatpush.msrb.mxu3 %v5090_v24  ;;  %v5254_v23 = vld [vmem:[%s9379_s7 + $0x5d0] sm:$0xff] }
 0x514   : > { %5124 = vmatpush.msrb.mxu1 %v5096_v31  ;;  %5147 = vmatpush.msrb.mxu2 %v5085_v21  ;;  %v5255_v31 = vld [vmem:[%s9379_s7 + $0x5d8] sm:$0xff]  ;;  %v5047_v21 = vld [vmem:[%s9379_s7 + $0x240] sm:$0xff] }
 0x515   : > { %v4854_v34 = vld [vmem:[#allocation6] ss:$2 sm:$0x3]  ;;  %v4856_v30 = vld [vmem:[#allocation6 + $0x1] ss:$2 sm:$0x3]  ;;  %5104 = vmatpush.msrb.mxu0 %v5095_v29  ;;  %5167 = vmatpush.msrb.mxu3 %v5086_v0 }
 0x516   : > { %v4858_v32 = vld [vmem:[#allocation6 + $0x8] ss:$2 sm:$0x3]  ;;  %v4860_v33 = vld [vmem:[#allocation6 + $0x9] ss:$2 sm:$0x3]  ;;  %v4861_v39 = vmax.f32 %v4854_v34, %v4856_v30  ;;  %5125 = vmatpush.msrb.mxu1 %v5092_v43  ;;  %5148 = vmatpush.msrb.mxu2 %v5081_v11 }
 0x517   : > { %v4862_v12 = vmax.f32 %v4858_v32, %v4860_v33  ;;  %5105 = vmatpush.msrb.mxu0 %v5091_v36  ;;  %5168 = vmatpush.msrb.mxu3 %v5082_v37  ;;  %v4866_v19 = vld [vmem:[#allocation6 + $0x10] ss:$2 sm:$0x3]  ;;  %v4868_v20 = vld [vmem:[#allocation6 + $0x11] ss:$2 sm:$0x3] }
 0x518   : > { %5126 = vmatpush.msrb.mxu1 %v5088_v46  ;;  %5149 = vmatpush.msrb.mxu2 %v5077_v50  ;;  %v4870_v24 = vld [vmem:[#allocation6 + $0x18] ss:$2 sm:$0x3]  ;;  %v4873_v0 = vmax.f32 %v4866_v19, %v4868_v20  ;;  %v5044_v29 = vld [vmem:[%s9379_s7 + $0x228] sm:$0xff]  ;;  %v5251_v32 = vld [vmem:[%s9379_s7 + $0x5b8] sm:$0xff] }
 0x519   : > { %v4863_v55 = vmax.f32 %v4861_v39, %v4862_v12  ;;  %5106 = vmatpush.msrb.mxu0 %v5087_v48  ;;  %5169 = vmatpush.msrb.mxu3 %v5078_v25  ;;  %v5250_v34 = vld [vmem:[%s9379_s7 + $0x5b0] sm:$0xff]  ;;  %v5043_v43 = vld [vmem:[%s9379_s7 + $0x220] sm:$0xff]  ;;  %v5040_v33 = vld [vmem:[%s9379_s7 + $0x208] sm:$0xff] }
 0x51a   : > { %5127 = vmatpush.msrb.mxu1 %v5084_v26  ;;  %5150 = vmatpush.msrb.mxu2 %v5073_v57  ;;  %v4872_v30 = vld [vmem:[#allocation6 + $0x19] ss:$2 sm:$0x3]  ;;  %v5257_v11 = vld [vmem:[%s9379_s7 + $0x5e8] sm:$0xff]  ;;  %v5247_v37 = vld [vmem:[%s9379_s7 + $0x598] sm:$0xff] }
 0x51b   : > { %4864 = vst [vmem:[#allocation7] sm:$0x3] %v4863_v55  ;;  %5107 = vmatpush.msrb.mxu0 %v5083_v41  ;;  %5170 = vmatpush.msrb.mxu3 %v5074_v51  ;;  %v4874_v36 = vmax.f32 %v4870_v24, %v4872_v30  ;;  %v5246_v39 = vld [vmem:[%s9379_s7 + $0x590] sm:$0xff]  ;;  %v5039_v46 = vld [vmem:[%s9379_s7 + $0x200] sm:$0xff]  ;;  %v5253_v50 = vld [vmem:[%s9379_s7 + $0x5c8] sm:$0xff] }
 0x51c   : > { %5128 = vmatpush.msrb.mxu1 %v5080_v58  ;;  %5151 = vmatpush.msrb.mxu2 %v5069_v42  ;;  %v5256_v48 = vld [vmem:[%s9379_s7 + $0x5e0] sm:$0xff]  ;;  %v5242_v25 = vld [vmem:[%s9379_s7 + $0x570] sm:$0xff]  ;;  %v5243_v55 = vld [vmem:[%s9379_s7 + $0x578] sm:$0xff] }
 0x51d   : > { %5108 = vmatpush.msrb.mxu0 %v5079_v40  ;;  %5171 = vmatpush.msrb.mxu3 %v5070_v52  ;;  %v4875_v12 = vmax.f32 %v4873_v0, %v4874_v36  ;;  %v5249_v26 = vld [vmem:[%s9379_s7 + $0x5a8] sm:$0xff]  ;;  %v5252_v41 = vld [vmem:[%s9379_s7 + $0x5c0] sm:$0xff]  ;;  %v5238_v57 = vld [vmem:[%s9379_s7 + $0x550] sm:$0xff] }
 0x51e   : > { %5129 = vmatpush.msrb.mxu1 %v5076_v27  ;;  %5152 = vmatpush.msrb.mxu2 %v5065_v53  ;;  %v5239_v51 = vld [vmem:[%s9379_s7 + $0x558] sm:$0xff]  ;;  %v5245_v58 = vld [vmem:[%s9379_s7 + $0x588] sm:$0xff]  ;;  %v5248_v40 = vld [vmem:[%s9379_s7 + $0x5a0] sm:$0xff] }
 0x51f   : > { %5109 = vmatpush.msrb.mxu0 %v5075_v59  ;;  %5172 = vmatpush.msrb.mxu3 %v5066_v54  ;;  %4876 = vst [vmem:[#allocation7 + $0x2] sm:$0x3] %v4875_v12  ;;  %v5234_v42 = vld [vmem:[%s9379_s7 + $0x530] sm:$0xff]  ;;  %v5235_v52 = vld [vmem:[%s9379_s7 + $0x538] sm:$0xff]  ;;  %v5241_v27 = vld [vmem:[%s9379_s7 + $0x568] sm:$0xff] }
 0x520   : > { %5130 = vmatpush.msrb.mxu1 %v5072_v62  ;;  %5153 = vmatpush.msrb.mxu2 %v5061_v44  ;;  %v5244_v59 = vld [vmem:[%s9379_s7 + $0x580] sm:$0xff]  ;;  %v5230_v53 = vld [vmem:[%s9379_s7 + $0x510] sm:$0xff]  ;;  %v5231_v54 = vld [vmem:[%s9379_s7 + $0x518] sm:$0xff] }
 0x521   : > { %5110 = vmatpush.msrb.mxu0 %v5071_v28  ;;  %5173 = vmatpush.msrb.mxu3 %v5062_v61  ;;  %v5237_v62 = vld [vmem:[%s9379_s7 + $0x548] sm:$0xff]  ;;  %v5240_v28 = vld [vmem:[%s9379_s7 + $0x560] sm:$0xff]  ;;  %v5226_v44 = vld [vmem:[%s9379_s7 + $0x4f0] sm:$0xff] }
 0x522   : > { %v4878_v2 = vld [vmem:[#allocation7] sm:$0x1]  ;;  %5131 = vmatpush.msrb.mxu1 %v5068_v47  ;;  %5154 = vmatpush.msrb.mxu2 %v5057_v45  ;;  %v5038_v22 = vld [vmem:[#allocation7 + $0x1] sm:$0x1]  ;;  %v5227_v61 = vld [vmem:[%s9379_s7 + $0x4f8] sm:$0xff] }
 0x523   : > { %5111 = vmatpush.msrb.mxu0 %v5067_v3  ;;  %5174 = vmatpush.msrb.mxu3 %v5058_v4  ;;  %v5233_v47 = vld [vmem:[%s9379_s7 + $0x528] sm:$0xff]  ;;  %v5236_v3 = vld [vmem:[%s9379_s7 + $0x540] sm:$0xff]  ;;  %v5222_v45 = vld [vmem:[%s9379_s7 + $0x4d0] sm:$0xff] }
 0x524   : > { %5132 = vmatpush.msrb.mxu1 %v5064_v6  ;;  %4999 = vmatmul.f32.vlgmr.msra.gmra.mxu2 %v4878_v2  ;;  %v5223_v4 = vld [vmem:[%s9379_s7 + $0x4d8] sm:$0xff]  ;;  %v5229_v6 = vld [vmem:[%s9379_s7 + $0x508] sm:$0xff]  ;;  %v5212_v20 = vld [vmem:[%s9379_s7 + $0x480] sm:$0xff] }
 0x525   : > { %5155 = vmatpush.msrb.mxu2 %v5053_v38  ;;  %5175 = vmatpush.msrb.mxu3 %v5054_v63  ;;  %v5218_v38 = vld [vmem:[%s9379_s7 + $0x4b0] sm:$0xff]  ;;  %v5219_v63 = vld [vmem:[%s9379_s7 + $0x4b8] sm:$0xff]  ;;  %v5209_v19 = vld [vmem:[%s9379_s7 + $0x468] sm:$0xff] }
 0x526   : > { %5019 = vmatmul.f32.vlgmr.msra.gmra.mxu3 %v4878_v2  ;;  %5112 = vmatpush.msrb.mxu0 %v5063_v7  ;;  %v5225_v7 = vld [vmem:[%s9379_s7 + $0x4e8] sm:$0xff]  ;;  %v5195_v24 = vld [vmem:[#allocation7 + $0x2] sm:$0x1]  ;;  %v5412_v30 = vld [vmem:[%s9379_s7 + $0x7d8] sm:$0xff] }
 0x527   : > { %5133 = vmatpush.msrb.mxu1 %v5060_v8  ;;  %5156 = vmatpush.msrb.mxu2 %v5049_v56  ;;  %v5228_v8 = vld [vmem:[%s9379_s7 + $0x500] sm:$0xff]  ;;  %v5214_v56 = vld [vmem:[%s9379_s7 + $0x490] sm:$0xff]  ;;  %v5404_v12 = vld [vmem:[%s9379_s7 + $0x798] sm:$0xff] }
 0x528   : > { %5176 = vmatpush.msrb.mxu3 %v5050_v9  ;;  %5113 = vmatpush.msrb.mxu0 %v5059_v5  ;;  %v5215_v9 = vld [vmem:[%s9379_s7 + $0x498] sm:$0xff]  ;;  %v5221_v5 = vld [vmem:[%s9379_s7 + $0x4c8] sm:$0xff]  ;;  %v5208_v0 = vld [vmem:[%s9379_s7 + $0x460] sm:$0xff] }
 0x529   : > { %5134 = vmatpush.msrb.mxu1 %v5056_v10  ;;  %5157 = vmatpush.msrb.mxu2 %v5045_v49  ;;  %v5224_v10 = vld [vmem:[%s9379_s7 + $0x4e0] sm:$0xff]  ;;  %v5210_v49 = vld [vmem:[%s9379_s7 + $0x470] sm:$0xff] }
 0x52a   : > { %5177 = vmatpush.msrb.mxu3 %v5046_v14  ;;  %5114 = vmatpush.msrb.mxu0 %v5055_v1  ;;  %v5211_v14 = vld [vmem:[%s9379_s7 + $0x478] sm:$0xff]  ;;  %v5217_v1 = vld [vmem:[%s9379_s7 + $0x4a8] sm:$0xff]  ;;  %v5407_v36 = vld [vmem:[%s9379_s7 + $0x7b0] sm:$0xff] }
 0x52b   : > { %5135 = vmatpush.msrb.mxu1 %v5052_v60  ;;  %5158 = vmatpush.msrb.mxu2 %v5041_v15  ;;  %v5220_v60 = vld [vmem:[%s9379_s7 + $0x4c0] sm:$0xff]  ;;  %v5206_v15 = vld [vmem:[%s9379_s7 + $0x450] sm:$0xff] }
 0x52c   : > { %5178 = vmatpush.msrb.mxu3 %v5042_v16  ;;  %4979 = vmatmul.f32.vlgmr.msra.gmra.mxu1 %v4878_v2  ;;  %v5207_v16 = vld [vmem:[%s9379_s7 + $0x458] sm:$0xff] }
 0x52d   : > { %5300 = vmatpush.msra.mxu2 %v5258_v17  ;;  %5115 = vmatpush.msrb.mxu0 %v5051_v13  ;;  %v5213_v17 = vld [vmem:[%s9379_s7 + $0x488] sm:$0xff]  ;;  %v5202_v13 = vld [vmem:[%s9379_s7 + $0x430] sm:$0xff] }
 0x52e   : > { %5320 = vmatpush.msra.mxu3 %v5259_v18  ;;  %5136 = vmatpush.msrb.mxu1 %v5048_v35  ;;  %v5216_v18 = vld [vmem:[%s9379_s7 + $0x4a0] sm:$0xff]  ;;  %v5203_v35 = vld [vmem:[%s9379_s7 + $0x438] sm:$0xff] }
 0x52f   : > { %4959 = vmatmul.f32.vlgmr.msra.gmra.mxu0 %v4878_v2  ;;  %5159 = vmatmul.f32.vlgmr.msrb.gmra.mxu2 %v5038_v22  ;;  %v5232_v2 = vld [vmem:[%s9379_s7 + $0x520] sm:$0xff] }
 0x530   : > { %5179 = vmatmul.f32.vlgmr.msrb.gmra.mxu3 %v5038_v22  ;;  %5301 = vmatpush.msra.mxu2 %v5254_v23  ;;  %v5199_v23 = vld [vmem:[%s9379_s7 + $0x418] sm:$0xff] }
 0x531   : > { %5321 = vmatpush.msra.mxu3 %v5255_v31  ;;  %5116 = vmatpush.msrb.mxu0 %v5047_v21  ;;  %v5415_v31 = vld [vmem:[%s9379_s7 + $0x7f0] sm:$0xff]  ;;  %v5416_v21 = vld [vmem:[%s9379_s7 + $0x7f8] sm:$0xff] }
 0x532   : > { %5137 = vmatpush.msrb.mxu1 %v5044_v29  ;;  %5302 = vmatpush.msra.mxu2 %v5250_v34  ;;  %v5205_v29 = vld [vmem:[%s9379_s7 + $0x448] sm:$0xff]  ;;  %v5411_v34 = vld [vmem:[%s9379_s7 + $0x7d0] sm:$0xff] }
 0x533   : > { %5322 = vmatpush.msra.mxu3 %v5251_v32  ;;  %5117 = vmatpush.msrb.mxu0 %v5043_v43  ;;  %v5204_v32 = vld [vmem:[%s9379_s7 + $0x440] sm:$0xff]  ;;  %v5201_v43 = vld [vmem:[%s9379_s7 + $0x428] sm:$0xff] }
 0x534   : > { %5138 = vmatpush.msrb.mxu1 %v5040_v33  ;;  %5303 = vmatpush.msra.mxu2 %v5246_v39  ;;  %v5408_v33 = vld [vmem:[%s9379_s7 + $0x7b8] sm:$0xff]  ;;  %v5200_v39 = vld [vmem:[%s9379_s7 + $0x420] sm:$0xff] }
 0x535   : > { %5323 = vmatpush.msra.mxu3 %v5247_v37  ;;  %5118 = vmatpush.msrb.mxu0 %v5039_v46  ;;  %v5403_v37 = vld [vmem:[%s9379_s7 + $0x790] sm:$0xff]  ;;  %v5414_v46 = vld [vmem:[%s9379_s7 + $0x7e8] sm:$0xff] }
 0x536   : > { %5280 = vmatpush.msra.mxu1 %v5257_v11  ;;  %5304 = vmatpush.msra.mxu2 %v5242_v25  ;;  %v5197_v11 = vld [vmem:[%s9379_s7 + $0x408] sm:$0xff]  ;;  %v5413_v25 = vld [vmem:[%s9379_s7 + $0x7e0] sm:$0xff] }
 0x537   : > { %5139 = vmatmul.f32.vlgmr.msrb.gmra.mxu1 %v5038_v22  ;;  %5260 = vmatpush.msra.mxu0 %v5256_v48  ;;  %v5196_v48 = vld [vmem:[%s9379_s7 + $0x400] sm:$0xff] }
 0x538   : > { %5281 = vmatpush.msra.mxu1 %v5253_v50  ;;  %5324 = vmatpush.msra.mxu3 %v5243_v55  ;;  %v5399_v50 = vld [vmem:[%s9379_s7 + $0x770] sm:$0xff]  ;;  %v5410_v55 = vld [vmem:[%s9379_s7 + $0x7c8] sm:$0xff] }
 0x539   : > { %5119 = vmatmul.f32.vlgmr.msrb.gmra.mxu0 %v5038_v22  ;;  %5305 = vmatpush.msra.mxu2 %v5238_v57  ;;  %v5198_v22 = vld [vmem:[%s9379_s7 + $0x410] sm:$0xff]  ;;  %v5409_v57 = vld [vmem:[%s9379_s7 + $0x7c0] sm:$0xff] }
 0x53a   : > { %5282 = vmatpush.msra.mxu1 %v5249_v26  ;;  %5261 = vmatpush.msra.mxu0 %v5252_v41  ;;  %v5400_v26 = vld [vmem:[%s9379_s7 + $0x778] sm:$0xff]  ;;  %v5395_v41 = vld [vmem:[%s9379_s7 + $0x750] sm:$0xff] }
 0x53b   : > { %5325 = vmatpush.msra.mxu3 %v5239_v51  ;;  %5306 = vmatpush.msra.mxu2 %v5234_v42  ;;  %v5406_v51 = vld [vmem:[%s9379_s7 + $0x7a8] sm:$0xff]  ;;  %v5405_v42 = vld [vmem:[%s9379_s7 + $0x7a0] sm:$0xff] }
 0x53c   : > { %5283 = vmatpush.msra.mxu1 %v5245_v58  ;;  %5262 = vmatpush.msra.mxu0 %v5248_v40  ;;  %v5396_v58 = vld [vmem:[%s9379_s7 + $0x758] sm:$0xff]  ;;  %v5391_v40 = vld [vmem:[%s9379_s7 + $0x730] sm:$0xff] }
 0x53d   : > { %5326 = vmatpush.msra.mxu3 %v5235_v52  ;;  %5307 = vmatpush.msra.mxu2 %v5230_v53  ;;  %v5402_v52 = vld [vmem:[%s9379_s7 + $0x788] sm:$0xff]  ;;  %v5401_v53 = vld [vmem:[%s9379_s7 + $0x780] sm:$0xff] }
 0x53e   : > { %5284 = vmatpush.msra.mxu1 %v5241_v27  ;;  %5263 = vmatpush.msra.mxu0 %v5244_v59  ;;  %v5392_v27 = vld [vmem:[%s9379_s7 + $0x738] sm:$0xff]  ;;  %v5387_v59 = vld [vmem:[%s9379_s7 + $0x710] sm:$0xff] }
 0x53f   : > { %5327 = vmatpush.msra.mxu3 %v5231_v54  ;;  %5308 = vmatpush.msra.mxu2 %v5226_v44  ;;  %v5398_v54 = vld [vmem:[%s9379_s7 + $0x768] sm:$0xff]  ;;  %v5397_v44 = vld [vmem:[%s9379_s7 + $0x760] sm:$0xff] }
 0x540   : > { %5285 = vmatpush.msra.mxu1 %v5237_v62  ;;  %5264 = vmatpush.msra.mxu0 %v5240_v28  ;;  %v5388_v62 = vld [vmem:[%s9379_s7 + $0x718] sm:$0xff]  ;;  %v5383_v28 = vld [vmem:[%s9379_s7 + $0x6f0] sm:$0xff] }
 0x541   : > { %5328 = vmatpush.msra.mxu3 %v5227_v61  ;;  %5309 = vmatpush.msra.mxu2 %v5222_v45  ;;  %v5394_v61 = vld [vmem:[%s9379_s7 + $0x748] sm:$0xff]  ;;  %v5393_v45 = vld [vmem:[%s9379_s7 + $0x740] sm:$0xff] }
 0x542   : > { %5286 = vmatpush.msra.mxu1 %v5233_v47  ;;  %5265 = vmatpush.msra.mxu0 %v5236_v3  ;;  %v5384_v47 = vld [vmem:[%s9379_s7 + $0x6f8] sm:$0xff]  ;;  %v5379_v3 = vld [vmem:[%s9379_s7 + $0x6d0] sm:$0xff] }
 0x543   : > { %5329 = vmatpush.msra.mxu3 %v5223_v4  ;;  %5310 = vmatpush.msra.mxu2 %v5218_v38  ;;  %v5390_v4 = vld [vmem:[%s9379_s7 + $0x728] sm:$0xff]  ;;  %v5389_v38 = vld [vmem:[%s9379_s7 + $0x720] sm:$0xff] }
 0x544   : > { %5287 = vmatpush.msra.mxu1 %v5229_v6  ;;  %5266 = vmatpush.msra.mxu0 %v5232_v2  ;;  %v5380_v6 = vld [vmem:[%s9379_s7 + $0x6d8] sm:$0xff]  ;;  %v5375_v2 = vld [vmem:[%s9379_s7 + $0x6b0] sm:$0xff] }
 0x545   : > { %5330 = vmatpush.msra.mxu3 %v5219_v63  ;;  %5311 = vmatpush.msra.mxu2 %v5214_v56  ;;  %v5386_v63 = vld [vmem:[%s9379_s7 + $0x708] sm:$0xff]  ;;  %v5385_v56 = vld [vmem:[%s9379_s7 + $0x700] sm:$0xff] }
 0x546   : > { %5288 = vmatpush.msra.mxu1 %v5225_v7  ;;  %5267 = vmatpush.msra.mxu0 %v5228_v8  ;;  %v5376_v7 = vld [vmem:[%s9379_s7 + $0x6b8] sm:$0xff]  ;;  %v5371_v8 = vld [vmem:[%s9379_s7 + $0x690] sm:$0xff] }
 0x547   : > { %5331 = vmatpush.msra.mxu3 %v5215_v9  ;;  %5312 = vmatpush.msra.mxu2 %v5210_v49  ;;  %v5382_v9 = vld [vmem:[%s9379_s7 + $0x6e8] sm:$0xff]  ;;  %v5381_v49 = vld [vmem:[%s9379_s7 + $0x6e0] sm:$0xff] }
 0x548   : > { %5289 = vmatpush.msra.mxu1 %v5221_v5  ;;  %5268 = vmatpush.msra.mxu0 %v5224_v10  ;;  %v5372_v5 = vld [vmem:[%s9379_s7 + $0x698] sm:$0xff]  ;;  %v5367_v10 = vld [vmem:[%s9379_s7 + $0x670] sm:$0xff] }
 0x549   : > { %5332 = vmatpush.msra.mxu3 %v5211_v14  ;;  %5313 = vmatpush.msra.mxu2 %v5206_v15  ;;  %v5378_v14 = vld [vmem:[%s9379_s7 + $0x6c8] sm:$0xff]  ;;  %v5377_v15 = vld [vmem:[%s9379_s7 + $0x6c0] sm:$0xff] }
 0x54a   : > { %5290 = vmatpush.msra.mxu1 %v5217_v1  ;;  %5269 = vmatpush.msra.mxu0 %v5220_v60  ;;  %v5368_v1 = vld [vmem:[%s9379_s7 + $0x678] sm:$0xff]  ;;  %v5363_v60 = vld [vmem:[%s9379_s7 + $0x650] sm:$0xff] }
 0x54b   : > { %5333 = vmatpush.msra.mxu3 %v5207_v16  ;;  %5314 = vmatpush.msra.mxu2 %v5202_v13  ;;  %v5374_v16 = vld [vmem:[%s9379_s7 + $0x6a8] sm:$0xff]  ;;  %v5373_v13 = vld [vmem:[%s9379_s7 + $0x6a0] sm:$0xff] }
 0x54c   : > { %5291 = vmatpush.msra.mxu1 %v5213_v17  ;;  %5270 = vmatpush.msra.mxu0 %v5216_v18  ;;  %v5364_v17 = vld [vmem:[%s9379_s7 + $0x658] sm:$0xff]  ;;  %v5359_v18 = vld [vmem:[%s9379_s7 + $0x630] sm:$0xff] }
 0x54d   : > { %5334 = vmatpush.msra.mxu3 %v5203_v35  ;;  %5315 = vmatpush.msra.mxu2 %v5198_v22  ;;  %v5370_v35 = vld [vmem:[%s9379_s7 + $0x688] sm:$0xff]  ;;  %v5369_v22 = vld [vmem:[%s9379_s7 + $0x680] sm:$0xff] }
 0x54e   : > { %5292 = vmatpush.msra.mxu1 %v5209_v19  ;;  %5271 = vmatpush.msra.mxu0 %v5212_v20  ;;  %v5360_v19 = vld [vmem:[%s9379_s7 + $0x638] sm:$0xff]  ;;  %v5355_v20 = vld [vmem:[%s9379_s7 + $0x610] sm:$0xff] }
 0x54f   : > { %5335 = vmatpush.msra.mxu3 %v5199_v23  ;;  %5316 = vmatmul.f32.vlgmr.msra.gmra.mxu2 %v5195_v24  ;;  %v5366_v23 = vld [vmem:[%s9379_s7 + $0x668] sm:$0xff] }
 0x550   : > { %5336 = vmatmul.f32.vlgmr.msra.gmra.mxu3 %v5195_v24  ;;  %5457 = vmatpush.msrb.mxu2 %v5415_v31  ;;  %v5352_v31 = vld [vmem:[#allocation7 + $0x3] sm:$0x1] }
 0x551   : > { %5477 = vmatpush.msrb.mxu3 %v5416_v21  ;;  %5272 = vmatpush.msra.mxu0 %v5208_v0  ;;  %v5365_v21 = vld [vmem:[%s9379_s7 + $0x660] sm:$0xff]  ;;  %v5362_v0 = vld [vmem:[%s9379_s7 + $0x648] sm:$0xff] }
 0x552   : > { %5293 = vmatpush.msra.mxu1 %v5205_v29  ;;  %5458 = vmatpush.msrb.mxu2 %v5411_v34  ;;  %v5361_v29 = vld [vmem:[%s9379_s7 + $0x640] sm:$0xff]  ;;  %v5358_v34 = vld [vmem:[%s9379_s7 + $0x628] sm:$0xff] }
 0x553   : > { %5478 = vmatpush.msrb.mxu3 %v5412_v30  ;;  %5273 = vmatpush.msra.mxu0 %v5204_v32  ;;  %v5357_v30 = vld [vmem:[%s9379_s7 + $0x620] sm:$0xff]  ;;  %v5354_v32 = vld [vmem:[%s9379_s7 + $0x608] sm:$0xff] }
 0x554   : > { %5294 = vmatpush.msra.mxu1 %v5201_v43  ;;  %5459 = vmatpush.msrb.mxu2 %v5407_v36  ;;  %v5353_v43 = vld [vmem:[%s9379_s7 + $0x600] sm:$0xff]  ;;  %v5525_v36 = vld [vmem:[%s9381_s9 + $0x78] sm:$0xff] }
 0x555   : > { %5479 = vmatpush.msrb.mxu3 %v5408_v33  ;;  %5274 = vmatpush.msra.mxu0 %v5200_v39  ;;  %v5541_v33 = vld [vmem:[%s9381_s9 + $0xf8] sm:$0xff] }
 0x556   : > { %5295 = vmatpush.msra.mxu1 %v5197_v11  ;;  %5460 = vmatpush.msrb.mxu2 %v5403_v37  ;;  %v5557_v39 = vld [vmem:[%s9381_s9 + $0x178] sm:$0xff]  ;;  %v5524_v37 = vld [vmem:[%s9381_s9 + $0x70] sm:$0xff] }
 0x557   : > { %5296 = vmatmul.f32.vlgmr.msra.gmra.mxu1 %v5195_v24  ;;  %5480 = vmatpush.msrb.mxu3 %v5404_v12  ;;  %v5573_v11 = vld [vmem:[%s9381_s9 + $0x1f8] sm:$0xff]  ;;  %v5540_v12 = vld [vmem:[%s9381_s9 + $0xf0] sm:$0xff] }
 0x558   : > { %5437 = vmatpush.msrb.mxu1 %v5414_v46  ;;  %5275 = vmatpush.msra.mxu0 %v5196_v48  ;;  %v5556_v46 = vld [vmem:[%s9381_s9 + $0x170] sm:$0xff] }
 0x559   : > { %5276 = vmatmul.f32.vlgmr.msra.gmra.mxu0 %v5195_v24  ;;  %5461 = vmatpush.msrb.mxu2 %v5399_v50  ;;  %v5356_v24 = vld [vmem:[%s9379_s7 + $0x618] sm:$0xff]  ;;  %v5572_v48 = vld [vmem:[%s9381_s9 + $0x1f0] sm:$0xff]  ;;  %v5523_v50 = vld [vmem:[%s9381_s9 + $0x68] sm:$0xff] }
 0x55a   : > { %5417 = vmatpush.msrb.mxu0 %v5413_v25  ;;  %5438 = vmatpush.msrb.mxu1 %v5410_v55  ;;  %v5539_v25 = vld [vmem:[%s9381_s9 + $0xe8] sm:$0xff] }
 0x55b   : > { %5481 = vmatpush.msrb.mxu3 %v5400_v26  ;;  %5462 = vmatpush.msrb.mxu2 %v5395_v41  ;;  %v5555_v55 = vld [vmem:[%s9381_s9 + $0x168] sm:$0xff]  ;;  %v5522_v41 = vld [vmem:[%s9381_s9 + $0x60] sm:$0xff] }
 0x55c   : > { %5418 = vmatpush.msrb.mxu0 %v5409_v57  ;;  %5439 = vmatpush.msrb.mxu1 %v5406_v51  ;;  %v5571_v26 = vld [vmem:[%s9381_s9 + $0x1e8] sm:$0xff]  ;;  %v5538_v57 = vld [vmem:[%s9381_s9 + $0xe0] sm:$0xff] }
 0x55d   : > { %5482 = vmatpush.msrb.mxu3 %v5396_v58  ;;  %5463 = vmatpush.msrb.mxu2 %v5391_v40  ;;  %v5554_v51 = vld [vmem:[%s9381_s9 + $0x160] sm:$0xff]  ;;  %v5521_v40 = vld [vmem:[%s9381_s9 + $0x58] sm:$0xff] }
 0x55e   : > { %5419 = vmatpush.msrb.mxu0 %v5405_v42  ;;  %5440 = vmatpush.msrb.mxu1 %v5402_v52  ;;  %v5570_v58 = vld [vmem:[%s9381_s9 + $0x1e0] sm:$0xff]  ;;  %v5537_v42 = vld [vmem:[%s9381_s9 + $0xd8] sm:$0xff] }
 0x55f   : > { %5483 = vmatpush.msrb.mxu3 %v5392_v27  ;;  %5464 = vmatpush.msrb.mxu2 %v5387_v59  ;;  %v5553_v52 = vld [vmem:[%s9381_s9 + $0x158] sm:$0xff]  ;;  %v5520_v59 = vld [vmem:[%s9381_s9 + $0x50] sm:$0xff] }
 0x560   : > { %5420 = vmatpush.msrb.mxu0 %v5401_v53  ;;  %5441 = vmatpush.msrb.mxu1 %v5398_v54  ;;  %v5569_v27 = vld [vmem:[%s9381_s9 + $0x1d8] sm:$0xff]  ;;  %v5536_v53 = vld [vmem:[%s9381_s9 + $0xd0] sm:$0xff] }
 0x561   : > { %5484 = vmatpush.msrb.mxu3 %v5388_v62  ;;  %5465 = vmatpush.msrb.mxu2 %v5383_v28  ;;  %v5552_v54 = vld [vmem:[%s9381_s9 + $0x150] sm:$0xff]  ;;  %v5519_v28 = vld [vmem:[%s9381_s9 + $0x48] sm:$0xff] }
 0x562   : > { %5421 = vmatpush.msrb.mxu0 %v5397_v44  ;;  %5442 = vmatpush.msrb.mxu1 %v5394_v61  ;;  %v5568_v62 = vld [vmem:[%s9381_s9 + $0x1d0] sm:$0xff]  ;;  %v5535_v44 = vld [vmem:[%s9381_s9 + $0xc8] sm:$0xff] }
 0x563   : > { %5485 = vmatpush.msrb.mxu3 %v5384_v47  ;;  %5466 = vmatpush.msrb.mxu2 %v5379_v3  ;;  %v5551_v61 = vld [vmem:[%s9381_s9 + $0x148] sm:$0xff]  ;;  %v5518_v3 = vld [vmem:[%s9381_s9 + $0x40] sm:$0xff] }
 0x564   : > { %5422 = vmatpush.msrb.mxu0 %v5393_v45  ;;  %5443 = vmatpush.msrb.mxu1 %v5390_v4  ;;  %v5567_v47 = vld [vmem:[%s9381_s9 + $0x1c8] sm:$0xff]  ;;  %v5534_v45 = vld [vmem:[%s9381_s9 + $0xc0] sm:$0xff] }
 0x565   : > { %5486 = vmatpush.msrb.mxu3 %v5380_v6  ;;  %5467 = vmatpush.msrb.mxu2 %v5375_v2  ;;  %v5550_v4 = vld [vmem:[%s9381_s9 + $0x140] sm:$0xff]  ;;  %v5517_v2 = vld [vmem:[%s9381_s9 + $0x38] sm:$0xff] }
 0x566   : > { %5423 = vmatpush.msrb.mxu0 %v5389_v38  ;;  %5444 = vmatpush.msrb.mxu1 %v5386_v63  ;;  %v5566_v6 = vld [vmem:[%s9381_s9 + $0x1c0] sm:$0xff]  ;;  %v5533_v38 = vld [vmem:[%s9381_s9 + $0xb8] sm:$0xff] }
 0x567   : > { %5487 = vmatpush.msrb.mxu3 %v5376_v7  ;;  %5468 = vmatpush.msrb.mxu2 %v5371_v8  ;;  %v5549_v63 = vld [vmem:[%s9381_s9 + $0x138] sm:$0xff]  ;;  %v5516_v8 = vld [vmem:[%s9381_s9 + $0x30] sm:$0xff] }
 0x568   : > { %5424 = vmatpush.msrb.mxu0 %v5385_v56  ;;  %5445 = vmatpush.msrb.mxu1 %v5382_v9  ;;  %v5565_v7 = vld [vmem:[%s9381_s9 + $0x1b8] sm:$0xff]  ;;  %v5532_v56 = vld [vmem:[%s9381_s9 + $0xb0] sm:$0xff] }
 0x569   : > { %5488 = vmatpush.msrb.mxu3 %v5372_v5  ;;  %5469 = vmatpush.msrb.mxu2 %v5367_v10  ;;  %v5548_v9 = vld [vmem:[%s9381_s9 + $0x130] sm:$0xff]  ;;  %v5515_v10 = vld [vmem:[%s9381_s9 + $0x28] sm:$0xff] }
 0x56a   : > { %5425 = vmatpush.msrb.mxu0 %v5381_v49  ;;  %5446 = vmatpush.msrb.mxu1 %v5378_v14  ;;  %v5564_v5 = vld [vmem:[%s9381_s9 + $0x1b0] sm:$0xff]  ;;  %v5531_v49 = vld [vmem:[%s9381_s9 + $0xa8] sm:$0xff] }
 0x56b   : > { %5489 = vmatpush.msrb.mxu3 %v5368_v1  ;;  %5470 = vmatpush.msrb.mxu2 %v5363_v60  ;;  %v5547_v14 = vld [vmem:[%s9381_s9 + $0x128] sm:$0xff]  ;;  %v5514_v60 = vld [vmem:[%s9381_s9 + $0x20] sm:$0xff] }
 0x56c   : > { %5426 = vmatpush.msrb.mxu0 %v5377_v15  ;;  %5447 = vmatpush.msrb.mxu1 %v5374_v16  ;;  %v5563_v1 = vld [vmem:[%s9381_s9 + $0x1a8] sm:$0xff]  ;;  %v5530_v15 = vld [vmem:[%s9381_s9 + $0xa0] sm:$0xff] }
 0x56d   : > { %5490 = vmatpush.msrb.mxu3 %v5364_v17  ;;  %5471 = vmatpush.msrb.mxu2 %v5359_v18  ;;  %v5546_v16 = vld [vmem:[%s9381_s9 + $0x120] sm:$0xff] }
 0x56e   : > { %5427 = vmatpush.msrb.mxu0 %v5373_v13  ;;  %5448 = vmatpush.msrb.mxu1 %v5370_v35  ;;  %v5562_v17 = vld [vmem:[%s9381_s9 + $0x1a0] sm:$0xff]  ;;  %v5513_v13 = vld [vmem:[%s9381_s9 + $0x18] sm:$0xff] }
 0x56f   : > { %5491 = vmatpush.msrb.mxu3 %v5360_v19  ;;  %5472 = vmatpush.msrb.mxu2 %v5355_v20  ;;  %v5529_v35 = vld [vmem:[%s9381_s9 + $0x98] sm:$0xff] }
 0x570   : > { %5428 = vmatpush.msrb.mxu0 %v5369_v22  ;;  %5449 = vmatpush.msrb.mxu1 %v5366_v23  ;;  %v5545_v19 = vld [vmem:[%s9381_s9 + $0x118] sm:$0xff] }
 0x571   : > { %5492 = vmatpush.msrb.mxu3 %v5356_v24  ;;  %5473 = vmatmul.f32.vlgmr.msrb.gmra.mxu2 %v5352_v31  ;;  %v5561_v23 = vld [vmem:[%s9381_s9 + $0x198] sm:$0xff]  ;;  %v5512_v24 = vld [vmem:[%s9381_s9 + $0x10] sm:$0xff] }
 0x572   : > { %5493 = vmatmul.f32.vlgmr.msrb.gmra.mxu3 %v5352_v31  ;;  %5429 = vmatpush.msrb.mxu0 %v5365_v21  ;;  %v5544_v21 = vld [vmem:[%s9381_s9 + $0x110] sm:$0xff] }
 0x573   : > { %5450 = vmatpush.msrb.mxu1 %v5362_v0  ;;  %5624 = vmatpush.msra.mxu2 %v5557_v39  ;;  %v5560_v0 = vld [vmem:[%s9381_s9 + $0x190] sm:$0xff]  ;;  %v5542_v39 = vld [vmem:[%s9381_s9 + $0x100] sm:$0xff] }
 0x574   : > { %5430 = vmatpush.msrb.mxu0 %v5361_v29  ;;  %5644 = vmatpush.msra.mxu3 %v5573_v11  ;;  %v5558_v11 = vld [vmem:[%s9381_s9 + $0x180] sm:$0xff] }
 0x575   : > { %5451 = vmatpush.msrb.mxu1 %v5358_v34  ;;  %5625 = vmatpush.msra.mxu2 %v5556_v46  ;;  %v5511_v34 = vld [vmem:[%s9381_s9 + $0x8] sm:$0xff] }
 0x576   : > { %5431 = vmatpush.msrb.mxu0 %v5357_v30  ;;  %5645 = vmatpush.msra.mxu3 %v5572_v48  ;;  %v5527_v30 = vld [vmem:[%s9381_s9 + $0x88] sm:$0xff] }
 0x577   : > { %5452 = vmatpush.msrb.mxu1 %v5354_v32  ;;  %5626 = vmatpush.msra.mxu2 %v5555_v55  ;;  %v5543_v32 = vld [vmem:[%s9381_s9 + $0x108] sm:$0xff] }
 0x578   : > { %5453 = vmatmul.f32.vlgmr.msrb.gmra.mxu1 %v5352_v31  ;;  %5432 = vmatpush.msrb.mxu0 %v5353_v43  ;;  %v5559_v43 = vld [vmem:[%s9381_s9 + $0x188] sm:$0xff] }
 0x579   : > { %5433 = vmatmul.f32.vlgmr.msrb.gmra.mxu0 %v5352_v31  ;;  %5604 = vmatpush.msra.mxu1 %v5541_v33  ;;  %v5528_v31 = vld [vmem:[%s9381_s9 + $0x90] sm:$0xff]  ;;  %v5526_v33 = vld [vmem:[%s9381_s9 + $0x80] sm:$0xff] }
 0x57a   : > { %5584 = vmatpush.msra.mxu0 %v5525_v36  ;;  %5646 = vmatpush.msra.mxu3 %v5571_v26  ;;  %v5510_v36 = vld [vmem:[%s9381_s9] sm:$0xff] }
 0x57b   : > { %5605 = vmatpush.msra.mxu1 %v5540_v12  ;;  %5627 = vmatpush.msra.mxu2 %v5554_v51 }
 0x57c   : > { %5585 = vmatpush.msra.mxu0 %v5524_v37  ;;  %5647 = vmatpush.msra.mxu3 %v5570_v58 }
 0x57d   : > { %5606 = vmatpush.msra.mxu1 %v5539_v25  ;;  %5628 = vmatpush.msra.mxu2 %v5553_v52 }
 0x57e   : > { %5586 = vmatpush.msra.mxu0 %v5523_v50  ;;  %5648 = vmatpush.msra.mxu3 %v5569_v27 }
 0x57f   : > { %5607 = vmatpush.msra.mxu1 %v5538_v57  ;;  %5629 = vmatpush.msra.mxu2 %v5552_v54 }
 0x580   : > { %5587 = vmatpush.msra.mxu0 %v5522_v41  ;;  %5649 = vmatpush.msra.mxu3 %v5568_v62  ;;  %v4877_v62 = vld [vmem:[%s9380_s8] sm:$0xf] }
 0x581   : > { %5608 = vmatpush.msra.mxu1 %v5537_v42  ;;  %5630 = vmatpush.msra.mxu2 %v5551_v61 }
 0x582   : > { %5588 = vmatpush.msra.mxu0 %v5521_v40  ;;  %5650 = vmatpush.msra.mxu3 %v5567_v47 }
 0x583   : > { %5609 = vmatpush.msra.mxu1 %v5536_v53  ;;  %5631 = vmatpush.msra.mxu2 %v5550_v4 }
 0x584   : > { %5589 = vmatpush.msra.mxu0 %v5520_v59  ;;  %5651 = vmatpush.msra.mxu3 %v5566_v6 }
 0x585   : > { %5610 = vmatpush.msra.mxu1 %v5535_v44  ;;  %5632 = vmatpush.msra.mxu2 %v5549_v63 }
 0x586   : > { %5590 = vmatpush.msra.mxu0 %v5519_v28  ;;  %5652 = vmatpush.msra.mxu3 %v5565_v7 }
 0x587   : > { %5611 = vmatpush.msra.mxu1 %v5534_v45  ;;  %5633 = vmatpush.msra.mxu2 %v5548_v9 }
 0x588   : > { %5591 = vmatpush.msra.mxu0 %v5518_v3  ;;  %5653 = vmatpush.msra.mxu3 %v5564_v5 }
 0x589   : > { %5612 = vmatpush.msra.mxu1 %v5533_v38  ;;  %5634 = vmatpush.msra.mxu2 %v5547_v14 }
 0x58a   : > { %5592 = vmatpush.msra.mxu0 %v5517_v2  ;;  %5654 = vmatpush.msra.mxu3 %v5563_v1 }
 0x58b   : > { %5613 = vmatpush.msra.mxu1 %v5532_v56  ;;  %5635 = vmatpush.msra.mxu2 %v5546_v16 }
 0x58c   : > { %5593 = vmatpush.msra.mxu0 %v5516_v8  ;;  %5655 = vmatpush.msra.mxu3 %v5562_v17 }
 0x58d   : > { %5614 = vmatpush.msra.mxu1 %v5531_v49  ;;  %5636 = vmatpush.msra.mxu2 %v5545_v19 }
 0x58e   : > { %5594 = vmatpush.msra.mxu0 %v5515_v10  ;;  %5656 = vmatpush.msra.mxu3 %v5561_v23 }
 0x58f   : > { %5615 = vmatpush.msra.mxu1 %v5530_v15  ;;  %5637 = vmatpush.msra.mxu2 %v5544_v21 }
 0x590   : > { %5595 = vmatpush.msra.mxu0 %v5514_v60  ;;  %5657 = vmatpush.msra.mxu3 %v5560_v0 }
 0x591   : > { %5616 = vmatpush.msra.mxu1 %v5529_v35  ;;  %5638 = vmatpush.msra.mxu2 %v5543_v32  ;;  %v5574_v35 = vld [vmem:[%s9382_s10] sm:$0x1] }
 0x592   : > { %5596 = vmatpush.msra.mxu0 %v5513_v13  ;;  %5658 = vmatpush.msra.mxu3 %v5559_v43 }
 0x593   : > { %5617 = vmatpush.msra.mxu1 %v5528_v31  ;;  %5639 = vmatpush.msra.mxu2 %v5542_v39 }
 0x594   : > { %5597 = vmatpush.msra.mxu0 %v5512_v24  ;;  %5659 = vmatpush.msra.mxu3 %v5558_v11 }
 0x595   : > { %5618 = vmatpush.msra.mxu1 %v5527_v30 }
 0x596   : > { %5598 = vmatpush.msra.mxu0 %v5511_v34 }
 0x597   : > { %5619 = vmatpush.msra.mxu1 %v5526_v33 }
 0x598   : > { %5599 = vmatpush.msra.mxu0 %v5510_v36 }
 0x5a7   : > { %v5000_v18 = vpop.f32.mrf.mxu2 }
 0x5a8   : > { %v5028_v50 = vrot.slane %v5000_v18, 6 }
 0x5a9   : > { %v4980_v20 = vpop.f32.mrf.mxu1  ;;  %v5020_v22 = vpop.f32.mrf.mxu3 }
 0x5aa   : > { %v5029_v25 = vrot.slane %v5020_v22, 5  ;;  %v5027_v55 = vrot.slane %v4980_v20, 7 }
 0x5ac   : > { %v4960_v29 = vpop.f32.mrf.mxu0  ;;  %v5033_v41 = vsel %vm5032_vm6, %v5028_v50, %v5029_v25 }
 0x5ad   : > { %v5031_v58 = vsel %vm5030_vm7, %v4960_v29, %v5027_v55 }
 0x5ae   : > { %v5035_v28 = vsel %vm5034_vm8, %v5031_v58, %v5033_v41 }
 0x5af   : > { %v5037_v47 = vadd.f32 %v5035_v28, %v4877_v62 }
 0x5b2   : > { %v5160_v37 = vpop.f32.mrf.mxu2 }
 0x5b3   : > { %v5180_v46 = vpop.f32.mrf.mxu3  ;;  %v5188_v42 = vrot.slane %v5160_v37, 6 }
 0x5b4   : > { %v5140_v12 = vpop.f32.mrf.mxu1  ;;  %v5189_v52 = vrot.slane %v5180_v46, 5 }
 0x5b5   : > { %v5187_v40 = vrot.slane %v5140_v12, 7 }
 0x5b6   : > { %v5120_v48 = vpop.f32.mrf.mxu0  ;;  %v5191_v44 = vsel %vm5032_vm6, %v5188_v42, %v5189_v52 }
 0x5b7   : > { %v5190_v61 = vsel %vm5030_vm7, %v5120_v48, %v5187_v40 }
 0x5b8   : > { %v5192_v4 = vsel %vm5034_vm8, %v5190_v61, %v5191_v44 }
 0x5b9   : > { %v5194_v8 = vadd.f32 %v5192_v4, %v5037_v47 }
 0x5d2   : > { %v5317_v26 = vpop.f32.mrf.mxu2 }
 0x5d3   : > { %v5337_v51 = vpop.f32.mrf.mxu3  ;;  %v5345_v59 = vrot.slane %v5317_v26, 6 }
 0x5d4   : > { %v5297_v57 = vpop.f32.mrf.mxu1  ;;  %v5346_v53 = vrot.slane %v5337_v51, 5 }
 0x5d5   : > { %v5344_v27 = vrot.slane %v5297_v57, 7 }
 0x5d6   : > { %v5277_v54 = vpop.f32.mrf.mxu0  ;;  %v5348_v3 = vsel %vm5032_vm6, %v5345_v59, %v5346_v53 }
 0x5d7   : > { %v5347_v45 = vsel %vm5030_vm7, %v5277_v54, %v5344_v27 }
 0x5d8   : > { %v5349_v2 = vsel %vm5034_vm8, %v5347_v45, %v5348_v3 }
 0x5d9   : > { %v5351_v10 = vadd.f32 %v5349_v2, %v5194_v8 }
 0x5f4   : > { %v5474_v6 = vpop.f32.mrf.mxu2 }
 0x5f5   : > { %v5454_v38 = vpop.f32.mrf.mxu1  ;;  %v5502_v63 = vrot.slane %v5474_v6, 6  ;;  %v5494_v7 = vpop.f32.mrf.mxu3 }
 0x5f6   : > { %v5501_v56 = vrot.slane %v5454_v38, 7  ;;  %v5503_v9 = vrot.slane %v5494_v7, 5  ;;  %v5434_v5 = vpop.f32.mrf.mxu0 }
 0x5f8   : > { %v5505_v49 = vsel %vm5032_vm6, %v5502_v63, %v5503_v9  ;;  %v5504_v14 = vsel %vm5030_vm7, %v5434_v5, %v5501_v56 }
 0x5f9   : > { %v5506_v1 = vsel %vm5034_vm8, %v5504_v14, %v5505_v49 }
 0x5fa   : > { %v5508_v60 = vadd.f32 %v5506_v1, %v5351_v10 }
 0x5fc   : > { %v5509_v15 = vmax.f32 %v5508_v60, 0.0 }
 0x5fe   : > { %v5576_v16 = vperm.slane %v5509_v15, 0  ;;  %v5577_v17 = vperm.slane %v5509_v15, 1  ;;  %v5578_v18 = vperm.slane %v5509_v15, 2  ;;  %v5579_v13 = vperm.slane %v5509_v15, 3 }
 0x600   : > { %5600 = vmatmul.f32.vlgmr.msra.gmra.mxu0 %v5576_v16  ;;  %5620 = vmatmul.f32.vlgmr.msra.gmra.mxu1 %v5577_v17 }
 0x601   : > { %5640 = vmatmul.f32.vlgmr.msra.gmra.mxu2 %v5578_v18  ;;  %5660 = vmatmul.f32.vlgmr.msra.gmra.mxu3 %v5579_v13 }
 0x67d   : > { %v5601_v19 = vpop.f32.mrf.mxu0  ;;  %v5621_v22 = vpop.f32.mrf.mxu1 }
 0x67e   : > { %v5602_v20 = vadd.f32 %v5601_v19, %v5574_v35 }
 0x680   : > { %v5622_v23 = vadd.f32 %v5621_v22, %v5602_v20 }
 0x684   : > { %v5641_v24 = vpop.f32.mrf.mxu2  ;;  %v5661_v21 = vpop.f32.mrf.mxu3 }
 0x685   : > { %v5642_v31 = vadd.f32 %v5641_v24, %v5622_v23 }
 0x687   : > { %v5662_v0 = vadd.f32 %v5661_v21, %v5642_v31 }
 0x689   : > { %v5665_v29 = vsel %vm5664_vm9, %v5662_v0, -inf }
 0x68a   : > { %5666 = vmax.xlane.f32.xlu0 %v5665_v29 }
 0x6fd   : > { %v5667_v34 = vpop.xlane.xlu0 %5666 }
 0x6fe   : > { %v5668_v30 = vsub.f32 %v5662_v0, %v5667_v34 }
 0x700   : > { %v5669_v32 = vmul.f32 1.442695, %v5668_v30 }
 0x702   : > { %6450 = vpow2.f32 %v5669_v32 }
 0x708   : > { %v6451_v43 = vpop.eup %6450 }
 0x709   : > { %v5671_v36 = vsel %vm5664_vm9, %v6451_v43, 0.0 }
 0x70a   : > { %5672 = vadd.xlane.f32.xlu0 %v5671_v36 }
 0x77d   : > { %v5673_v33 = vpop.xlane.xlu0 %5672 }
 0x77e   : > { %6452 = vrcp.f32 %v5673_v33  ;;  %v5685_v12 = vand.u32 2147483648, %v5673_v33  ;;  %v5683_v48 = vand.u32 2147483647, %v5673_v33  ;;  %vm5679_vm11 = vweird.f32 %v5673_v33 }
 0x780   : > { %v5686_v25 = vor.u32 1.1754944e-38, %v5685_v12  ;;  %vm5684_vm13 = vcmp.eq.f32.partialorder %v5683_v48, 8.507059e+37 }
 0x784   : > { %v6453_v39 = vpop.eup %6452 }
 0x785   : > { %v5675_v11 = vmul.f32 %v6453_v39, %v5673_v33  ;;  %vm5680_vm10 = vweird.f32 %v6453_v39 }
 0x786   : > { %vm5681_vm12 = vmor %vm5679_vm11, %vm5680_vm10 }
 0x787   : > { %v5676_v37 = vsub.f32 1.0, %v5675_v11 }
 0x789   : > { %v5677_v46 = vmul.f32 %v6453_v39, %v5676_v37 }
 0x78b   : > { %v5678_v50 = vadd.f32 %v6453_v39, %v5677_v46 }
 0x78d   : > { %v5682_v55 = vsel %vm5681_vm12, %v6453_v39, %v5678_v50 }
 0x78e   : > { %v5687_v26 = vsel %vm5684_vm13, %v5686_v25, %v5682_v55 }
 0x78f   : > { %v5688_v41 = vmul.f32 %v6451_v43, %v5687_v26 }
 0x791   : > { %5689 = vst.msk [vmem:[%s6666_s24] sm:$0x1] %vm5664_vm9, %v5688_v41 }
 0x792   : > { %6481 = shalt.err (!%p6478_p8)
}
 0x793   : > { %6358 = dma.vmem_to_hbm [thread:$0]  (%p6641_p5), %s5702_s0, 16, %s5704_s22, %s5691_s2  }
 0x794 PF: > { %p6364_p9 = scmp.ge.s32.totalorder %s6528_s20, 2  ;;  %s5715_s24 = sand.u32 1, %s6516_s17  }
 0x795   : > { %s5716_s12 = scalar_lea.sflag [#allocation9], %s5715_s24 }
 0x796   : > { %p6361_p10 = pnand %p6364_p9, %p6645_p6 }
 0x798   : > { %p6362_p11 = pneg %p6361_p10 }
 0x79a   : > { %6511 = dma.done.wait (%p6362_p11), %s5716_s12, 16  }
 0x79b   : > { %6513 = vsyncadd (%p6362_p11), %s5716_s12, 4294967280  ;;  %p21_p12 = scmp.ge.s32.totalorder %s6628_s23, 4   ;;  %s9394_s17 = smov %s6520_s18 }
 0x79c   : > { %s9395_s18 = smov %s6524_s19  ;;  %s9396_s19 = smov %s6639_s26 }
 0x79d   : > { %s9397_s20 = smov %s6628_s23  ;;  %23 = sbr.rel (!%p21_p12) target bundleno = 7 (0x7), region = 584 }
 0x7a2   :  { %5721 = vsyncpa [#allocation9], 1 }
 0x7a3   :  { %5723 = vsyncpa [#allocation9 + $0x1], 1 }

</bundles_post_ra>
